<compile_context>
chip_gen: v7x
topology: tpu7x:2x2x1
jax: 0.10.0
libtpu: 0.0.40
codegen_flags: <defaults>
</compile_context>

<pallas_src>
import functools

import numpy as np
import jax
import jax.numpy as jnp
from jax.experimental import pallas as pl
from jax.experimental.pallas import tpu as pltpu

HIDDEN = 32  # hidden width of the synthetic regularizer MLP


def _centered_dft_matrix(n: int, inverse: bool) -> np.ndarray:
    """Matrix A (complex64) such that A @ x == fftshift(op(ifftshift(x))) along axis 0,
    with op = (i)fft, norm='ortho' (fastMRI fft2c / ifft2c, one 1-D factor)."""
    eye = np.eye(n)
    shifted = np.fft.ifftshift(eye, axes=0)
    if inverse:
        f = np.fft.ifft(shifted, axis=0, norm="ortho")
    else:
        f = np.fft.fft(shifted, axis=0, norm="ortho")
    return np.fft.fftshift(f, axes=0).astype(np.complex64)


def _pack_gauss(mat: np.ndarray) -> jnp.ndarray:
    """complex (N,N) -> (3,N,N) bf16 stack [real, imag, real+imag] for Gauss matmul."""
    r = np.asarray(mat.real, np.float32)
    i = np.asarray(mat.imag, np.float32)
    return jnp.asarray(np.stack([r, i, r + i], axis=0), jnp.bfloat16)


def _mamba_varnet_block_kernel(
    mask_ref,                          # (1, W)      sampling mask
    ckr_ref, cki_ref,                  # (Nc*H, W)   current k-space (re / im)
    rkr_ref, rki_ref,                  # (Nc*H, W)   reference (undersampled) k-space
    sr_ref, si_ref,                    # (Nc*H, W)   coil sensitivities
    fh_ref, fw_ref,                    # (3,H,H),(3,W,W)  fft2c matrices, bf16, [re,im,re+im]
    ih_ref, iw_ref,                    # (3,H,H),(3,W,W)  ifft2c matrices (W right mats pre-T)
    w1_ref, b1_ref, w2_ref, b2_ref,    # regularizer MLP params (SMEM)
    dcw_ref,                           # (1,)        dc_weight (SMEM)
    outr_ref, outi_ref,                # (Nc*H, W)   outputs
    *, nc, h,
):
    f32 = jnp.float32
    bf16 = jnp.bfloat16
    w = ckr_ref.shape[-1]

    ckr = ckr_ref[...]
    cki = cki_ref[...]
    sr = sr_ref[...]
    si = si_ref[...]
    dcw = dcw_ref[0]

    # ---- soft data-consistency term --------------------------------------
    mvec = (mask_ref[...] != 0.0).astype(f32)             # (1, W), broadcasts over rows
    sdc_r = (ckr - rkr_ref[...]) * mvec * dcw
    sdc_i = (cki - rki_ref[...]) * mvec * dcw

    # ---- complex matmul: 3-multiply (Gauss) form, bf16 in / f32 accumulate
    def gauss_mm(ar, ai, asum, br, bi, bsum):
        p1 = jnp.dot(ar, br, preferred_element_type=f32)
        p2 = jnp.dot(ai, bi, preferred_element_type=f32)
        p3 = jnp.dot(asum, bsum, preferred_element_type=f32)
        return p1 - p2, p3 - p1 - p2

    def triplet(xr, xi):
        return xr.astype(bf16), xi.astype(bf16), (xr + xi).astype(bf16)

    iwr, iwi, iws = iw_ref[0], iw_ref[1], iw_ref[2]
    ihr, ihi, ihs = ih_ref[0], ih_ref[1], ih_ref[2]
    fwr, fwi, fws = fw_ref[0], fw_ref[1], fw_ref[2]
    fhr, fhi, fhs = fh_ref[0], fh_ref[1], fh_ref[2]

    # ---- sens_reduce: sum_coils( ifft2c(cur_k) * conj(sens) ) -------------
    # W-axis transform: one tall coil-fused matmul (M = Nc*H, lane-dense).
    ar, ai, asum = triplet(ckr, cki)
    tr, ti = gauss_mm(ar, ai, asum, iwr, iwi, iws)        # (Nc*H, W) f32
    trb, tib, tsb = triplet(tr, ti)

    img_r = jnp.zeros((h, w), f32)
    img_i = jnp.zeros((h, w), f32)
    for n in range(nc):                                    # static unroll over coils
        rs = slice(n * h, (n + 1) * h)
        # H-axis transform per coil: (H,H) @ (H,W) on the MXU, no broadcasting.
        yr, yi = gauss_mm(ihr, ihi, ihs, trb[rs, :], tib[rs, :], tsb[rs, :])
        s_r = sr[rs, :]
        s_i = si[rs, :]
        img_r = img_r + (yr * s_r + yi * s_i)
        img_i = img_i + (yi * s_r - yr * s_i)

    # ---- regularizer -------------------------------------------------------
    # TODO(synk): the injected `regularizer` (MambaRecon) architecture is not
    # given here; it is replaced by a deterministic per-pixel 2->HIDDEN->2
    # tanh-GELU MLP.  Weights sit in SMEM; compute is lane-dense (W on lanes)
    # with no cross-lane reductions or (H,W,HIDDEN) intermediates.
    hidden = w1_ref.shape[1]
    reg_r = jnp.zeros((h, w), f32) + b2_ref[0, 0]
    reg_i = jnp.zeros((h, w), f32) + b2_ref[0, 1]
    for j in range(hidden):                                # static unroll over hidden
        pre = img_r * w1_ref[0, j] + img_i * w1_ref[1, j] + b1_ref[0, j]
        g = jax.nn.gelu(pre, approximate=True)
        reg_r = reg_r + g * w2_ref[j, 0]
        reg_i = reg_i + g * w2_ref[j, 1]

    # ---- sens_expand: fft2c(reg * sens) ------------------------------------
    # Stage P = reg * sens per coil into the output refs (reused as scratch),
    # so the W-axis fft also runs as one coil-fused tall matmul.
    for n in range(nc):
        rs = slice(n * h, (n + 1) * h)
        s_r = sr[rs, :]
        s_i = si[rs, :]
        outr_ref[rs, :] = reg_r * s_r - reg_i * s_i
        outi_ref[rs, :] = reg_r * s_i + reg_i * s_r

    pr = outr_ref[...]
    pi = outi_ref[...]
    ar, ai, asum = triplet(pr, pi)
    tr, ti = gauss_mm(ar, ai, asum, fwr, fwi, fws)        # (Nc*H, W) f32
    trb, tib, tsb = triplet(tr, ti)

    # ---- final combination: out = cur_k - soft_dc - model_term --------------
    for n in range(nc):
        rs = slice(n * h, (n + 1) * h)
        mr, mi = gauss_mm(fhr, fhi, fhs, trb[rs, :], tib[rs, :], tsb[rs, :])
        outr_ref[rs, :] = ckr[rs, :] - sdc_r[rs, :] - mr
        outi_ref[rs, :] = cki[rs, :] - sdc_i[rs, :] - mi


def mamba_varnet_block(cur_k, ref_k, mask, sens, dc_weight, w1, b1, w2, b2):
    """cur_k/ref_k/sens: (B, Nc, H, W, 2); mask: (B, 1, 1, W, 1)."""
    B, Nc, H, W, _ = cur_k.shape
    f32 = jnp.float32

    # Centered DFT matrices, packed as [real, imag, real+imag] in bf16.
    fh = _pack_gauss(_centered_dft_matrix(H, inverse=False))      # fft2c, H axis (left)
    fw = _pack_gauss(_centered_dft_matrix(W, inverse=False).T)    # fft2c, W axis (right, pre-T)
    ih = _pack_gauss(_centered_dft_matrix(H, inverse=True))       # ifft2c, H axis
    iw = _pack_gauss(_centered_dft_matrix(W, inverse=True).T)     # ifft2c, W axis

    mask2 = mask[:, 0, 0, :, 0].reshape(B, 1, W).astype(f32)
    ckr = cur_k[..., 0].reshape(B, Nc * H, W)
    cki = cur_k[..., 1].reshape(B, Nc * H, W)
    rkr = ref_k[..., 0].reshape(B, Nc * H, W)
    rki = ref_k[..., 1].reshape(B, Nc * H, W)
    sr = sens[..., 0].reshape(B, Nc * H, W)
    si = sens[..., 1].reshape(B, Nc * H, W)

    vol_spec = pl.BlockSpec((None, Nc * H, W), lambda b: (b, 0, 0))
    mat_h = pl.BlockSpec((3, H, H), lambda b: (0, 0, 0))
    mat_w = pl.BlockSpec((3, W, W), lambda b: (0, 0, 0))
    smem = pl.BlockSpec(memory_space=pltpu.MemorySpace.SMEM)

    in_specs = [
        pl.BlockSpec((None, 1, W), lambda b: (b, 0, 0)),   # mask
        vol_spec, vol_spec,                                # cur_k r/i
        vol_spec, vol_spec,                                # ref_k r/i
        vol_spec, vol_spec,                                # sens r/i
        mat_h, mat_w, mat_h, mat_w,                        # fft2c / ifft2c matrices
        smem, smem, smem, smem,                            # w1, b1, w2, b2
        smem,                                              # dc_weight scalar
    ]
    out_specs = (vol_spec, vol_spec)
    out_shape = (jax.ShapeDtypeStruct((B, Nc * H, W), f32),
                 jax.ShapeDtypeStruct((B, Nc * H, W), f32))

    kernel = functools.partial(_mamba_varnet_block_kernel, nc=Nc, h=H)

    # TODO(synk): at real fastMRI scale (Nc~15, H=W~320-384) add coil tiling /
    # streaming (grid over coils or emit_pipeline from HBM) so the working set
    # fits v7x's 64 MiB VMEM; the toy shapes here fit comfortably.
    out_r, out_i = pl.pallas_call(
        kernel,
        grid=(B,),
        in_specs=in_specs,
        out_specs=out_specs,
        out_shape=out_shape,
        compiler_params=pltpu.CompilerParams(
            dimension_semantics=("parallel",),
            vmem_limit_bytes=64 * 1024 * 1024),
    )(mask2, ckr, cki, rkr, rki, sr, si,
      fh, fw, ih, iw, w1, b1, w2, b2, dc_weight)

    out = jnp.stack([out_r, out_i], axis=-1)               # (B, Nc*H, W, 2)
    return out.reshape(B, Nc, H, W, 2)


def _reference_forward(cur_k, ref_k, mask, sens, dc_weight, w1, b1, w2, b2):
    """Pure-numpy reference of the PyTorch forward semantics."""
    cur = np.asarray(cur_k, np.float64)
    refk = np.asarray(ref_k, np.float64)
    s = np.asarray(sens, np.float64)
    m = np.asarray(mask, np.float64)
    w1 = np.asarray(w1, np.float64); b1 = np.asarray(b1, np.float64)
    w2 = np.asarray(w2, np.float64); b2 = np.asarray(b2, np.float64)

    cur_c = cur[..., 0] + 1j * cur[..., 1]
    ref_c = refk[..., 0] + 1j * refk[..., 1]
    sens_c = s[..., 0] + 1j * s[..., 1]

    def fft2c(x):
        return np.fft.fftshift(np.fft.fft2(np.fft.ifftshift(x, axes=(-2, -1)),
                                           axes=(-2, -1), norm="ortho"),
                               axes=(-2, -1))

    def ifft2c(x):
        return np.fft.fftshift(np.fft.ifft2(np.fft.ifftshift(x, axes=(-2, -1)),
                                            axes=(-2, -1), norm="ortho"),
                               axes=(-2, -1))

    img = np.sum(ifft2c(cur_c) * np.conj(sens_c), axis=1)          # (B,H,W)
    feat = np.stack([img.real, img.imag], axis=-1)                  # (B,H,W,2)
    pre = feat @ w1 + b1[0]
    g = 0.5 * pre * (1.0 + np.tanh(np.sqrt(2.0 / np.pi)
                                   * (pre + 0.044715 * pre ** 3)))  # tanh-GELU
    out_feat = g @ w2 + b2[0]
    reg_c = out_feat[..., 0] + 1j * out_feat[..., 1]
    model_term = fft2c(reg_c[:, None, :, :] * sens_c)               # (B,Nc,H,W)

    soft_dc = np.where(m[..., 0] != 0, cur_c - ref_c, 0.0) * float(dc_weight[0])
    res = cur_c - soft_dc - model_term
    return np.stack([res.real, res.imag], axis=-1)


if __name__ == "__main__":
    B, Nc, H, W = 2, 4, 16, 16
    key = jax.random.PRNGKey(0)
    k1, k2, k3, k4, k5, k6, k7, k8 = jax.random.split(key, 8)

    cur_k = jax.random.normal(k1, (B, Nc, H, W, 2), jnp.float32)
    ref_k = jax.random.normal(k2, (B, Nc, H, W, 2), jnp.float32)
    sens = jax.random.normal(k3, (B, Nc, H, W, 2), jnp.float32) * 0.3
    mask = (jax.random.uniform(k4, (B, 1, 1, W, 1)) > 0.5).astype(jnp.float32)

    # deterministic synthetic regularizer params + dc_weight (torch.ones(1))
    w1 = jax.random.normal(k5, (2, HIDDEN), jnp.float32) * 0.2
    b1 = jax.random.normal(k6, (1, HIDDEN), jnp.float32) * 0.1
    w2 = jax.random.normal(k7, (HIDDEN, 2), jnp.float32) * 0.2
    b2 = jax.random.normal(k8, (1, 2), jnp.float32) * 0.1
    dc_weight = jnp.ones((1,), jnp.float32)

    out = mamba_varnet_block(cur_k, ref_k, mask, sens, dc_weight, w1, b1, w2, b2)
    out = jax.block_until_ready(out)

    ref = _reference_forward(cur_k, ref_k, mask, sens, dc_weight, w1, b1, w2, b2)
    out_np = np.asarray(out)
    assert out_np.shape == (B, Nc, H, W, 2)
    assert np.all(np.isfinite(out_np))
    err = np.max(np.abs(out_np - ref))
    scale = np.max(np.abs(ref)) + 1e-6
    assert err <= 5e-2 * scale, f"mismatch: max err {err}, scale {scale}"

    print("KERNEL_OK")
</pallas_src>

<mosaic_0001>
module attributes {stable_mosaic.version = 11 : i64} {
  func.func @_mamba_varnet_block_kernel(%arg0: i32, %arg1: memref<1x1x16xf32, #tpu.memory_space<vmem>>, %arg2: memref<1x64x16xf32, #tpu.memory_space<vmem>>, %arg3: memref<1x64x16xf32, #tpu.memory_space<vmem>>, %arg4: memref<1x64x16xf32, #tpu.memory_space<vmem>>, %arg5: memref<1x64x16xf32, #tpu.memory_space<vmem>>, %arg6: memref<1x64x16xf32, #tpu.memory_space<vmem>>, %arg7: memref<1x64x16xf32, #tpu.memory_space<vmem>>, %arg8: memref<3x16x16xbf16, #tpu.memory_space<vmem>>, %arg9: memref<3x16x16xbf16, #tpu.memory_space<vmem>>, %arg10: memref<3x16x16xbf16, #tpu.memory_space<vmem>>, %arg11: memref<3x16x16xbf16, #tpu.memory_space<vmem>>, %arg12: memref<2x32xf32, #tpu.memory_space<smem>>, %arg13: memref<1x32xf32, #tpu.memory_space<smem>>, %arg14: memref<32x2xf32, #tpu.memory_space<smem>>, %arg15: memref<1x2xf32, #tpu.memory_space<smem>>, %arg16: memref<1xf32, #tpu.memory_space<smem>>, %arg17: memref<1x64x16xf32, #tpu.memory_space<vmem>>, %arg18: memref<1x64x16xf32, #tpu.memory_space<vmem>>) attributes {dimension_semantics = [#tpu.dimension_semantics<parallel>], iteration_bounds = array<i64: 2>, scalar_prefetch = 0 : i64, scratch_operands = 0 : i64, tpu.core_type = #tpu.core_type<tc>, window_params = [{transform_indices = @transform_0, window_bounds = array<i64: 1, 1, 16>}, {transform_indices = @transform_1, window_bounds = array<i64: 1, 64, 16>}, {transform_indices = @transform_2, window_bounds = array<i64: 1, 64, 16>}, {transform_indices = @transform_3, window_bounds = array<i64: 1, 64, 16>}, {transform_indices = @transform_4, window_bounds = array<i64: 1, 64, 16>}, {transform_indices = @transform_5, window_bounds = array<i64: 1, 64, 16>}, {transform_indices = @transform_6, window_bounds = array<i64: 1, 64, 16>}, {pipeline_mode = #tpu.pipeline_mode<synchronous>, transform_indices = @transform_7, window_bounds = array<i64: 3, 16, 16>}, {pipeline_mode = #tpu.pipeline_mode<synchronous>, transform_indices = @transform_8, window_bounds = array<i64: 3, 16, 16>}, {pipeline_mode = #tpu.pipeline_mode<synchronous>, transform_indices = @transform_9, window_bounds = array<i64: 3, 16, 16>}, {pipeline_mode = #tpu.pipeline_mode<synchronous>, transform_indices = @transform_10, window_bounds = array<i64: 3, 16, 16>}, {transform_indices = @transform_11, window_bounds = array<i64: 2, 32>}, {transform_indices = @transform_12, window_bounds = array<i64: 1, 32>}, {transform_indices = @transform_13, window_bounds = array<i64: 32, 2>}, {transform_indices = @transform_14, window_bounds = array<i64: 1, 2>}, {transform_indices = @transform_15, window_bounds = array<i64: 1>}, {transform_indices = @transform_16, window_bounds = array<i64: 1, 64, 16>}, {transform_indices = @transform_17, window_bounds = array<i64: 1, 64, 16>}]} {
    %c0 = arith.constant 0 : index
    %c0_0 = arith.constant 0 : index
    %c0_1 = arith.constant 0 : index
    %0 = vector.load %arg2[%c0, %c0_0, %c0_1] : memref<1x64x16xf32, #tpu.memory_space<vmem>>, vector<1x64x16xf32>
    %1 = vector.shape_cast %0 : vector<1x64x16xf32> to vector<64x16xf32>
    %c0_2 = arith.constant 0 : index
    %c0_3 = arith.constant 0 : index
    %c0_4 = arith.constant 0 : index
    %2 = vector.load %arg3[%c0_2, %c0_3, %c0_4] : memref<1x64x16xf32, #tpu.memory_space<vmem>>, vector<1x64x16xf32>
    %3 = vector.shape_cast %2 : vector<1x64x16xf32> to vector<64x16xf32>
    %c0_5 = arith.constant 0 : index
    %c0_6 = arith.constant 0 : index
    %c0_7 = arith.constant 0 : index
    %4 = vector.load %arg6[%c0_5, %c0_6, %c0_7] : memref<1x64x16xf32, #tpu.memory_space<vmem>>, vector<1x64x16xf32>
    %5 = vector.shape_cast %4 : vector<1x64x16xf32> to vector<64x16xf32>
    %c0_8 = arith.constant 0 : index
    %c0_9 = arith.constant 0 : index
    %c0_10 = arith.constant 0 : index
    %6 = vector.load %arg7[%c0_8, %c0_9, %c0_10] : memref<1x64x16xf32, #tpu.memory_space<vmem>>, vector<1x64x16xf32>
    %7 = vector.shape_cast %6 : vector<1x64x16xf32> to vector<64x16xf32>
    %c0_11 = arith.constant 0 : index
    %8 = memref.load %arg16[%c0_11] : memref<1xf32, #tpu.memory_space<smem>>
    %c0_12 = arith.constant 0 : index
    %c0_13 = arith.constant 0 : index
    %c0_14 = arith.constant 0 : index
    %9 = vector.load %arg1[%c0_12, %c0_13, %c0_14] : memref<1x1x16xf32, #tpu.memory_space<vmem>>, vector<1x1x16xf32>
    %10 = vector.shape_cast %9 : vector<1x1x16xf32> to vector<1x16xf32>
    %cst = arith.constant 0.000000e+00 : f32
    %11 = vector.broadcast %cst : f32 to vector<1x16xf32>
    %12 = arith.cmpf one, %10, %11 : vector<1x16xf32>
    %13 = arith.extui %12 : vector<1x16xi1> to vector<1x16xi32>
    %14 = arith.sitofp %13 : vector<1x16xi32> to vector<1x16xf32>
    %c0_15 = arith.constant 0 : index
    %c0_16 = arith.constant 0 : index
    %c0_17 = arith.constant 0 : index
    %15 = vector.load %arg4[%c0_15, %c0_16, %c0_17] : memref<1x64x16xf32, #tpu.memory_space<vmem>>, vector<1x64x16xf32>
    %16 = vector.shape_cast %15 : vector<1x64x16xf32> to vector<64x16xf32>
    %17 = arith.subf %1, %16 : vector<64x16xf32>
    %18 = vector.broadcast %14 : vector<1x16xf32> to vector<64x16xf32>
    %19 = arith.mulf %17, %18 : vector<64x16xf32>
    %20 = vector.broadcast %8 : f32 to vector<64x16xf32>
    %21 = arith.mulf %19, %20 : vector<64x16xf32>
    %c0_18 = arith.constant 0 : index
    %c0_19 = arith.constant 0 : index
    %c0_20 = arith.constant 0 : index
    %22 = vector.load %arg5[%c0_18, %c0_19, %c0_20] : memref<1x64x16xf32, #tpu.memory_space<vmem>>, vector<1x64x16xf32>
    %23 = vector.shape_cast %22 : vector<1x64x16xf32> to vector<64x16xf32>
    %24 = arith.subf %3, %23 : vector<64x16xf32>
    %25 = vector.broadcast %14 : vector<1x16xf32> to vector<64x16xf32>
    %26 = arith.mulf %24, %25 : vector<64x16xf32>
    %27 = vector.broadcast %8 : f32 to vector<64x16xf32>
    %28 = arith.mulf %26, %27 : vector<64x16xf32>
    %c0_21 = arith.constant 0 : index
    %c0_22 = arith.constant 0 : index
    %c0_23 = arith.constant 0 : index
    %29 = vector.load %arg11[%c0_21, %c0_22, %c0_23] : memref<3x16x16xbf16, #tpu.memory_space<vmem>>, vector<1x16x16xbf16>
    %30 = vector.shape_cast %29 : vector<1x16x16xbf16> to vector<16x16xbf16>
    %c1 = arith.constant 1 : index
    %c0_24 = arith.constant 0 : index
    %c0_25 = arith.constant 0 : index
    %31 = vector.load %arg11[%c1, %c0_24, %c0_25] : memref<3x16x16xbf16, #tpu.memory_space<vmem>>, vector<1x16x16xbf16>
    %32 = vector.shape_cast %31 : vector<1x16x16xbf16> to vector<16x16xbf16>
    %c2 = arith.constant 2 : index
    %c0_26 = arith.constant 0 : index
    %c0_27 = arith.constant 0 : index
    %33 = vector.load %arg11[%c2, %c0_26, %c0_27] : memref<3x16x16xbf16, #tpu.memory_space<vmem>>, vector<1x16x16xbf16>
    %34 = vector.shape_cast %33 : vector<1x16x16xbf16> to vector<16x16xbf16>
    %c0_28 = arith.constant 0 : index
    %c0_29 = arith.constant 0 : index
    %c0_30 = arith.constant 0 : index
    %35 = vector.load %arg10[%c0_28, %c0_29, %c0_30] : memref<3x16x16xbf16, #tpu.memory_space<vmem>>, vector<1x16x16xbf16>
    %36 = vector.shape_cast %35 : vector<1x16x16xbf16> to vector<16x16xbf16>
    %c1_31 = arith.constant 1 : index
    %c0_32 = arith.constant 0 : index
    %c0_33 = arith.constant 0 : index
    %37 = vector.load %arg10[%c1_31, %c0_32, %c0_33] : memref<3x16x16xbf16, #tpu.memory_space<vmem>>, vector<1x16x16xbf16>
    %38 = vector.shape_cast %37 : vector<1x16x16xbf16> to vector<16x16xbf16>
    %c2_34 = arith.constant 2 : index
    %c0_35 = arith.constant 0 : index
    %c0_36 = arith.constant 0 : index
    %39 = vector.load %arg10[%c2_34, %c0_35, %c0_36] : memref<3x16x16xbf16, #tpu.memory_space<vmem>>, vector<1x16x16xbf16>
    %40 = vector.shape_cast %39 : vector<1x16x16xbf16> to vector<16x16xbf16>
    %c0_37 = arith.constant 0 : index
    %c0_38 = arith.constant 0 : index
    %c0_39 = arith.constant 0 : index
    %41 = vector.load %arg9[%c0_37, %c0_38, %c0_39] : memref<3x16x16xbf16, #tpu.memory_space<vmem>>, vector<1x16x16xbf16>
    %42 = vector.shape_cast %41 : vector<1x16x16xbf16> to vector<16x16xbf16>
    %c1_40 = arith.constant 1 : index
    %c0_41 = arith.constant 0 : index
    %c0_42 = arith.constant 0 : index
    %43 = vector.load %arg9[%c1_40, %c0_41, %c0_42] : memref<3x16x16xbf16, #tpu.memory_space<vmem>>, vector<1x16x16xbf16>
    %44 = vector.shape_cast %43 : vector<1x16x16xbf16> to vector<16x16xbf16>
    %c2_43 = arith.constant 2 : index
    %c0_44 = arith.constant 0 : index
    %c0_45 = arith.constant 0 : index
    %45 = vector.load %arg9[%c2_43, %c0_44, %c0_45] : memref<3x16x16xbf16, #tpu.memory_space<vmem>>, vector<1x16x16xbf16>
    %46 = vector.shape_cast %45 : vector<1x16x16xbf16> to vector<16x16xbf16>
    %c0_46 = arith.constant 0 : index
    %c0_47 = arith.constant 0 : index
    %c0_48 = arith.constant 0 : index
    %47 = vector.load %arg8[%c0_46, %c0_47, %c0_48] : memref<3x16x16xbf16, #tpu.memory_space<vmem>>, vector<1x16x16xbf16>
    %48 = vector.shape_cast %47 : vector<1x16x16xbf16> to vector<16x16xbf16>
    %c1_49 = arith.constant 1 : index
    %c0_50 = arith.constant 0 : index
    %c0_51 = arith.constant 0 : index
    %49 = vector.load %arg8[%c1_49, %c0_50, %c0_51] : memref<3x16x16xbf16, #tpu.memory_space<vmem>>, vector<1x16x16xbf16>
    %50 = vector.shape_cast %49 : vector<1x16x16xbf16> to vector<16x16xbf16>
    %c2_52 = arith.constant 2 : index
    %c0_53 = arith.constant 0 : index
    %c0_54 = arith.constant 0 : index
    %51 = vector.load %arg8[%c2_52, %c0_53, %c0_54] : memref<3x16x16xbf16, #tpu.memory_space<vmem>>, vector<1x16x16xbf16>
    %52 = vector.shape_cast %51 : vector<1x16x16xbf16> to vector<16x16xbf16>
    %53 = arith.truncf %1 : vector<64x16xf32> to vector<64x16xbf16>
    %54 = arith.truncf %3 : vector<64x16xf32> to vector<64x16xbf16>
    %55 = arith.addf %1, %3 : vector<64x16xf32>
    %56 = arith.truncf %55 : vector<64x16xf32> to vector<64x16xbf16>
    %cst_55 = arith.constant dense<0.000000e+00> : vector<64x16xf32>
    %57 = tpu.matmul %53, %30, %cst_55 {dimension_numbers = #tpu.dot_dimension_numbers<[1], [0], [0], [1], [0, 0, 1, 1], [], []>} : vector<64x16xbf16>, vector<16x16xbf16>, vector<64x16xf32> -> vector<64x16xf32>
    %cst_56 = arith.constant dense<0.000000e+00> : vector<64x16xf32>
    %58 = tpu.matmul %54, %32, %cst_56 {dimension_numbers = #tpu.dot_dimension_numbers<[1], [0], [0], [1], [0, 0, 1, 1], [], []>} : vector<64x16xbf16>, vector<16x16xbf16>, vector<64x16xf32> -> vector<64x16xf32>
    %cst_57 = arith.constant dense<0.000000e+00> : vector<64x16xf32>
    %59 = tpu.matmul %56, %34, %cst_57 {dimension_numbers = #tpu.dot_dimension_numbers<[1], [0], [0], [1], [0, 0, 1, 1], [], []>} : vector<64x16xbf16>, vector<16x16xbf16>, vector<64x16xf32> -> vector<64x16xf32>
    %60 = arith.subf %57, %58 : vector<64x16xf32>
    %61 = arith.subf %59, %57 : vector<64x16xf32>
    %62 = arith.subf %61, %58 : vector<64x16xf32>
    %63 = arith.truncf %60 : vector<64x16xf32> to vector<64x16xbf16>
    %64 = arith.truncf %62 : vector<64x16xf32> to vector<64x16xbf16>
    %65 = arith.addf %60, %62 : vector<64x16xf32>
    %66 = arith.truncf %65 : vector<64x16xf32> to vector<64x16xbf16>
    %cst_58 = arith.constant 0.000000e+00 : f32
    %67 = vector.broadcast %cst_58 : f32 to vector<16x16xf32>
    %cst_59 = arith.constant 0.000000e+00 : f32
    %68 = vector.broadcast %cst_59 : f32 to vector<16x16xf32>
    %69 = vector.extract_strided_slice %63 {offsets = [0, 0], sizes = [16, 16], strides = [1, 1]} : vector<64x16xbf16> to vector<16x16xbf16>
    %70 = vector.extract_strided_slice %64 {offsets = [0, 0], sizes = [16, 16], strides = [1, 1]} : vector<64x16xbf16> to vector<16x16xbf16>
    %71 = vector.extract_strided_slice %66 {offsets = [0, 0], sizes = [16, 16], strides = [1, 1]} : vector<64x16xbf16> to vector<16x16xbf16>
    %cst_60 = arith.constant dense<0.000000e+00> : vector<16x16xf32>
    %72 = tpu.matmul %36, %69, %cst_60 {dimension_numbers = #tpu.dot_dimension_numbers<[1], [0], [0], [1], [0, 0, 1, 1], [], []>} : vector<16x16xbf16>, vector<16x16xbf16>, vector<16x16xf32> -> vector<16x16xf32>
    %cst_61 = arith.constant dense<0.000000e+00> : vector<16x16xf32>
    %73 = tpu.matmul %38, %70, %cst_61 {dimension_numbers = #tpu.dot_dimension_numbers<[1], [0], [0], [1], [0, 0, 1, 1], [], []>} : vector<16x16xbf16>, vector<16x16xbf16>, vector<16x16xf32> -> vector<16x16xf32>
    %cst_62 = arith.constant dense<0.000000e+00> : vector<16x16xf32>
    %74 = tpu.matmul %40, %71, %cst_62 {dimension_numbers = #tpu.dot_dimension_numbers<[1], [0], [0], [1], [0, 0, 1, 1], [], []>} : vector<16x16xbf16>, vector<16x16xbf16>, vector<16x16xf32> -> vector<16x16xf32>
    %75 = arith.subf %72, %73 : vector<16x16xf32>
    %76 = arith.subf %74, %72 : vector<16x16xf32>
    %77 = arith.subf %76, %73 : vector<16x16xf32>
    %78 = vector.extract_strided_slice %5 {offsets = [0, 0], sizes = [16, 16], strides = [1, 1]} : vector<64x16xf32> to vector<16x16xf32>
    %79 = vector.extract_strided_slice %7 {offsets = [0, 0], sizes = [16, 16], strides = [1, 1]} : vector<64x16xf32> to vector<16x16xf32>
    %80 = arith.mulf %75, %78 : vector<16x16xf32>
    %81 = arith.mulf %77, %79 : vector<16x16xf32>
    %82 = arith.addf %80, %81 : vector<16x16xf32>
    %83 = arith.addf %67, %82 : vector<16x16xf32>
    %84 = arith.mulf %77, %78 : vector<16x16xf32>
    %85 = arith.mulf %75, %79 : vector<16x16xf32>
    %86 = arith.subf %84, %85 : vector<16x16xf32>
    %87 = arith.addf %68, %86 : vector<16x16xf32>
    %88 = vector.extract_strided_slice %63 {offsets = [16, 0], sizes = [16, 16], strides = [1, 1]} : vector<64x16xbf16> to vector<16x16xbf16>
    %89 = vector.extract_strided_slice %64 {offsets = [16, 0], sizes = [16, 16], strides = [1, 1]} : vector<64x16xbf16> to vector<16x16xbf16>
    %90 = vector.extract_strided_slice %66 {offsets = [16, 0], sizes = [16, 16], strides = [1, 1]} : vector<64x16xbf16> to vector<16x16xbf16>
    %cst_63 = arith.constant dense<0.000000e+00> : vector<16x16xf32>
    %91 = tpu.matmul %36, %88, %cst_63 {dimension_numbers = #tpu.dot_dimension_numbers<[1], [0], [0], [1], [0, 0, 1, 1], [], []>} : vector<16x16xbf16>, vector<16x16xbf16>, vector<16x16xf32> -> vector<16x16xf32>
    %cst_64 = arith.constant dense<0.000000e+00> : vector<16x16xf32>
    %92 = tpu.matmul %38, %89, %cst_64 {dimension_numbers = #tpu.dot_dimension_numbers<[1], [0], [0], [1], [0, 0, 1, 1], [], []>} : vector<16x16xbf16>, vector<16x16xbf16>, vector<16x16xf32> -> vector<16x16xf32>
    %cst_65 = arith.constant dense<0.000000e+00> : vector<16x16xf32>
    %93 = tpu.matmul %40, %90, %cst_65 {dimension_numbers = #tpu.dot_dimension_numbers<[1], [0], [0], [1], [0, 0, 1, 1], [], []>} : vector<16x16xbf16>, vector<16x16xbf16>, vector<16x16xf32> -> vector<16x16xf32>
    %94 = arith.subf %91, %92 : vector<16x16xf32>
    %95 = arith.subf %93, %91 : vector<16x16xf32>
    %96 = arith.subf %95, %92 : vector<16x16xf32>
    %97 = vector.extract_strided_slice %5 {offsets = [16, 0], sizes = [16, 16], strides = [1, 1]} : vector<64x16xf32> to vector<16x16xf32>
    %98 = vector.extract_strided_slice %7 {offsets = [16, 0], sizes = [16, 16], strides = [1, 1]} : vector<64x16xf32> to vector<16x16xf32>
    %99 = arith.mulf %94, %97 : vector<16x16xf32>
    %100 = arith.mulf %96, %98 : vector<16x16xf32>
    %101 = arith.addf %99, %100 : vector<16x16xf32>
    %102 = arith.addf %83, %101 : vector<16x16xf32>
    %103 = arith.mulf %96, %97 : vector<16x16xf32>
    %104 = arith.mulf %94, %98 : vector<16x16xf32>
    %105 = arith.subf %103, %104 : vector<16x16xf32>
    %106 = arith.addf %87, %105 : vector<16x16xf32>
    %107 = vector.extract_strided_slice %63 {offsets = [32, 0], sizes = [16, 16], strides = [1, 1]} : vector<64x16xbf16> to vector<16x16xbf16>
    %108 = vector.extract_strided_slice %64 {offsets = [32, 0], sizes = [16, 16], strides = [1, 1]} : vector<64x16xbf16> to vector<16x16xbf16>
    %109 = vector.extract_strided_slice %66 {offsets = [32, 0], sizes = [16, 16], strides = [1, 1]} : vector<64x16xbf16> to vector<16x16xbf16>
    %cst_66 = arith.constant dense<0.000000e+00> : vector<16x16xf32>
    %110 = tpu.matmul %36, %107, %cst_66 {dimension_numbers = #tpu.dot_dimension_numbers<[1], [0], [0], [1], [0, 0, 1, 1], [], []>} : vector<16x16xbf16>, vector<16x16xbf16>, vector<16x16xf32> -> vector<16x16xf32>
    %cst_67 = arith.constant dense<0.000000e+00> : vector<16x16xf32>
    %111 = tpu.matmul %38, %108, %cst_67 {dimension_numbers = #tpu.dot_dimension_numbers<[1], [0], [0], [1], [0, 0, 1, 1], [], []>} : vector<16x16xbf16>, vector<16x16xbf16>, vector<16x16xf32> -> vector<16x16xf32>
    %cst_68 = arith.constant dense<0.000000e+00> : vector<16x16xf32>
    %112 = tpu.matmul %40, %109, %cst_68 {dimension_numbers = #tpu.dot_dimension_numbers<[1], [0], [0], [1], [0, 0, 1, 1], [], []>} : vector<16x16xbf16>, vector<16x16xbf16>, vector<16x16xf32> -> vector<16x16xf32>
    %113 = arith.subf %110, %111 : vector<16x16xf32>
    %114 = arith.subf %112, %110 : vector<16x16xf32>
    %115 = arith.subf %114, %111 : vector<16x16xf32>
    %116 = vector.extract_strided_slice %5 {offsets = [32, 0], sizes = [16, 16], strides = [1, 1]} : vector<64x16xf32> to vector<16x16xf32>
    %117 = vector.extract_strided_slice %7 {offsets = [32, 0], sizes = [16, 16], strides = [1, 1]} : vector<64x16xf32> to vector<16x16xf32>
    %118 = arith.mulf %113, %116 : vector<16x16xf32>
    %119 = arith.mulf %115, %117 : vector<16x16xf32>
    %120 = arith.addf %118, %119 : vector<16x16xf32>
    %121 = arith.addf %102, %120 : vector<16x16xf32>
    %122 = arith.mulf %115, %116 : vector<16x16xf32>
    %123 = arith.mulf %113, %117 : vector<16x16xf32>
    %124 = arith.subf %122, %123 : vector<16x16xf32>
    %125 = arith.addf %106, %124 : vector<16x16xf32>
    %126 = vector.extract_strided_slice %63 {offsets = [48, 0], sizes = [16, 16], strides = [1, 1]} : vector<64x16xbf16> to vector<16x16xbf16>
    %127 = vector.extract_strided_slice %64 {offsets = [48, 0], sizes = [16, 16], strides = [1, 1]} : vector<64x16xbf16> to vector<16x16xbf16>
    %128 = vector.extract_strided_slice %66 {offsets = [48, 0], sizes = [16, 16], strides = [1, 1]} : vector<64x16xbf16> to vector<16x16xbf16>
    %cst_69 = arith.constant dense<0.000000e+00> : vector<16x16xf32>
    %129 = tpu.matmul %36, %126, %cst_69 {dimension_numbers = #tpu.dot_dimension_numbers<[1], [0], [0], [1], [0, 0, 1, 1], [], []>} : vector<16x16xbf16>, vector<16x16xbf16>, vector<16x16xf32> -> vector<16x16xf32>
    %cst_70 = arith.constant dense<0.000000e+00> : vector<16x16xf32>
    %130 = tpu.matmul %38, %127, %cst_70 {dimension_numbers = #tpu.dot_dimension_numbers<[1], [0], [0], [1], [0, 0, 1, 1], [], []>} : vector<16x16xbf16>, vector<16x16xbf16>, vector<16x16xf32> -> vector<16x16xf32>
    %cst_71 = arith.constant dense<0.000000e+00> : vector<16x16xf32>
    %131 = tpu.matmul %40, %128, %cst_71 {dimension_numbers = #tpu.dot_dimension_numbers<[1], [0], [0], [1], [0, 0, 1, 1], [], []>} : vector<16x16xbf16>, vector<16x16xbf16>, vector<16x16xf32> -> vector<16x16xf32>
    %132 = arith.subf %129, %130 : vector<16x16xf32>
    %133 = arith.subf %131, %129 : vector<16x16xf32>
    %134 = arith.subf %133, %130 : vector<16x16xf32>
    %135 = vector.extract_strided_slice %5 {offsets = [48, 0], sizes = [16, 16], strides = [1, 1]} : vector<64x16xf32> to vector<16x16xf32>
    %136 = vector.extract_strided_slice %7 {offsets = [48, 0], sizes = [16, 16], strides = [1, 1]} : vector<64x16xf32> to vector<16x16xf32>
    %137 = arith.mulf %132, %135 : vector<16x16xf32>
    %138 = arith.mulf %134, %136 : vector<16x16xf32>
    %139 = arith.addf %137, %138 : vector<16x16xf32>
    %140 = arith.addf %121, %139 : vector<16x16xf32>
    %141 = arith.mulf %134, %135 : vector<16x16xf32>
    %142 = arith.mulf %132, %136 : vector<16x16xf32>
    %143 = arith.subf %141, %142 : vector<16x16xf32>
    %144 = arith.addf %125, %143 : vector<16x16xf32>
    %cst_72 = arith.constant 0.000000e+00 : f32
    %145 = vector.broadcast %cst_72 : f32 to vector<16x16xf32>
    %c0_73 = arith.constant 0 : index
    %c0_74 = arith.constant 0 : index
    %146 = memref.load %arg15[%c0_73, %c0_74] : memref<1x2xf32, #tpu.memory_space<smem>>
    %147 = vector.broadcast %146 : f32 to vector<16x16xf32>
    %148 = arith.addf %145, %147 : vector<16x16xf32>
    %cst_75 = arith.constant 0.000000e+00 : f32
    %149 = vector.broadcast %cst_75 : f32 to vector<16x16xf32>
    %c0_76 = arith.constant 0 : index
    %c1_77 = arith.constant 1 : index
    %150 = memref.load %arg15[%c0_76, %c1_77] : memref<1x2xf32, #tpu.memory_space<smem>>
    %151 = vector.broadcast %150 : f32 to vector<16x16xf32>
    %152 = arith.addf %149, %151 : vector<16x16xf32>
    %c0_78 = arith.constant 0 : index
    %c0_79 = arith.constant 0 : index
    %153 = memref.load %arg12[%c0_78, %c0_79] : memref<2x32xf32, #tpu.memory_space<smem>>
    %154 = vector.broadcast %153 : f32 to vector<16x16xf32>
    %155 = arith.mulf %140, %154 : vector<16x16xf32>
    %c1_80 = arith.constant 1 : index
    %c0_81 = arith.constant 0 : index
    %156 = memref.load %arg12[%c1_80, %c0_81] : memref<2x32xf32, #tpu.memory_space<smem>>
    %157 = vector.broadcast %156 : f32 to vector<16x16xf32>
    %158 = arith.mulf %144, %157 : vector<16x16xf32>
    %159 = arith.addf %155, %158 : vector<16x16xf32>
    %c0_82 = arith.constant 0 : index
    %c0_83 = arith.constant 0 : index
    %160 = memref.load %arg13[%c0_82, %c0_83] : memref<1x32xf32, #tpu.memory_space<smem>>
    %161 = vector.broadcast %160 : f32 to vector<16x16xf32>
    %162 = arith.addf %159, %161 : vector<16x16xf32>
    %163 = arith.mulf %162, %162 : vector<16x16xf32>
    %164 = arith.mulf %162, %163 : vector<16x16xf32>
    %cst_84 = arith.constant 4.471500e-02 : f32
    %165 = vector.broadcast %cst_84 : f32 to vector<16x16xf32>
    %166 = arith.mulf %165, %164 : vector<16x16xf32>
    %167 = arith.addf %162, %166 : vector<16x16xf32>
    %cst_85 = arith.constant 0.797884583 : f32
    %168 = vector.broadcast %cst_85 : f32 to vector<16x16xf32>
    %169 = arith.mulf %168, %167 : vector<16x16xf32>
    %170 = math.tanh %169 : vector<16x16xf32>
    %cst_86 = arith.constant 1.000000e+00 : f32
    %171 = vector.broadcast %cst_86 : f32 to vector<16x16xf32>
    %172 = arith.addf %171, %170 : vector<16x16xf32>
    %cst_87 = arith.constant 5.000000e-01 : f32
    %173 = vector.broadcast %cst_87 : f32 to vector<16x16xf32>
    %174 = arith.mulf %173, %172 : vector<16x16xf32>
    %175 = arith.mulf %162, %174 : vector<16x16xf32>
    %c0_88 = arith.constant 0 : index
    %c0_89 = arith.constant 0 : index
    %176 = memref.load %arg14[%c0_88, %c0_89] : memref<32x2xf32, #tpu.memory_space<smem>>
    %177 = vector.broadcast %176 : f32 to vector<16x16xf32>
    %178 = arith.mulf %175, %177 : vector<16x16xf32>
    %179 = arith.addf %148, %178 : vector<16x16xf32>
    %c0_90 = arith.constant 0 : index
    %c1_91 = arith.constant 1 : index
    %180 = memref.load %arg14[%c0_90, %c1_91] : memref<32x2xf32, #tpu.memory_space<smem>>
    %181 = vector.broadcast %180 : f32 to vector<16x16xf32>
    %182 = arith.mulf %175, %181 : vector<16x16xf32>
    %183 = arith.addf %152, %182 : vector<16x16xf32>
    %c0_92 = arith.constant 0 : index
    %c1_93 = arith.constant 1 : index
    %184 = memref.load %arg12[%c0_92, %c1_93] : memref<2x32xf32, #tpu.memory_space<smem>>
    %185 = vector.broadcast %184 : f32 to vector<16x16xf32>
    %186 = arith.mulf %140, %185 : vector<16x16xf32>
    %c1_94 = arith.constant 1 : index
    %c1_95 = arith.constant 1 : index
    %187 = memref.load %arg12[%c1_94, %c1_95] : memref<2x32xf32, #tpu.memory_space<smem>>
    %188 = vector.broadcast %187 : f32 to vector<16x16xf32>
    %189 = arith.mulf %144, %188 : vector<16x16xf32>
    %190 = arith.addf %186, %189 : vector<16x16xf32>
    %c0_96 = arith.constant 0 : index
    %c1_97 = arith.constant 1 : index
    %191 = memref.load %arg13[%c0_96, %c1_97] : memref<1x32xf32, #tpu.memory_space<smem>>
    %192 = vector.broadcast %191 : f32 to vector<16x16xf32>
    %193 = arith.addf %190, %192 : vector<16x16xf32>
    %194 = arith.mulf %193, %193 : vector<16x16xf32>
    %195 = arith.mulf %193, %194 : vector<16x16xf32>
    %cst_98 = arith.constant 4.471500e-02 : f32
    %196 = vector.broadcast %cst_98 : f32 to vector<16x16xf32>
    %197 = arith.mulf %196, %195 : vector<16x16xf32>
    %198 = arith.addf %193, %197 : vector<16x16xf32>
    %cst_99 = arith.constant 0.797884583 : f32
    %199 = vector.broadcast %cst_99 : f32 to vector<16x16xf32>
    %200 = arith.mulf %199, %198 : vector<16x16xf32>
    %201 = math.tanh %200 : vector<16x16xf32>
    %cst_100 = arith.constant 1.000000e+00 : f32
    %202 = vector.broadcast %cst_100 : f32 to vector<16x16xf32>
    %203 = arith.addf %202, %201 : vector<16x16xf32>
    %cst_101 = arith.constant 5.000000e-01 : f32
    %204 = vector.broadcast %cst_101 : f32 to vector<16x16xf32>
    %205 = arith.mulf %204, %203 : vector<16x16xf32>
    %206 = arith.mulf %193, %205 : vector<16x16xf32>
    %c1_102 = arith.constant 1 : index
    %c0_103 = arith.constant 0 : index
    %207 = memref.load %arg14[%c1_102, %c0_103] : memref<32x2xf32, #tpu.memory_space<smem>>
    %208 = vector.broadcast %207 : f32 to vector<16x16xf32>
    %209 = arith.mulf %206, %208 : vector<16x16xf32>
    %210 = arith.addf %179, %209 : vector<16x16xf32>
    %c1_104 = arith.constant 1 : index
    %c1_105 = arith.constant 1 : index
    %211 = memref.load %arg14[%c1_104, %c1_105] : memref<32x2xf32, #tpu.memory_space<smem>>
    %212 = vector.broadcast %211 : f32 to vector<16x16xf32>
    %213 = arith.mulf %206, %212 : vector<16x16xf32>
    %214 = arith.addf %183, %213 : vector<16x16xf32>
    %c0_106 = arith.constant 0 : index
    %c2_107 = arith.constant 2 : index
    %215 = memref.load %arg12[%c0_106, %c2_107] : memref<2x32xf32, #tpu.memory_space<smem>>
    %216 = vector.broadcast %215 : f32 to vector<16x16xf32>
    %217 = arith.mulf %140, %216 : vector<16x16xf32>
    %c1_108 = arith.constant 1 : index
    %c2_109 = arith.constant 2 : index
    %218 = memref.load %arg12[%c1_108, %c2_109] : memref<2x32xf32, #tpu.memory_space<smem>>
    %219 = vector.broadcast %218 : f32 to vector<16x16xf32>
    %220 = arith.mulf %144, %219 : vector<16x16xf32>
    %221 = arith.addf %217, %220 : vector<16x16xf32>
    %c0_110 = arith.constant 0 : index
    %c2_111 = arith.constant 2 : index
    %222 = memref.load %arg13[%c0_110, %c2_111] : memref<1x32xf32, #tpu.memory_space<smem>>
    %223 = vector.broadcast %222 : f32 to vector<16x16xf32>
    %224 = arith.addf %221, %223 : vector<16x16xf32>
    %225 = arith.mulf %224, %224 : vector<16x16xf32>
    %226 = arith.mulf %224, %225 : vector<16x16xf32>
    %cst_112 = arith.constant 4.471500e-02 : f32
    %227 = vector.broadcast %cst_112 : f32 to vector<16x16xf32>
    %228 = arith.mulf %227, %226 : vector<16x16xf32>
    %229 = arith.addf %224, %228 : vector<16x16xf32>
    %cst_113 = arith.constant 0.797884583 : f32
    %230 = vector.broadcast %cst_113 : f32 to vector<16x16xf32>
    %231 = arith.mulf %230, %229 : vector<16x16xf32>
    %232 = math.tanh %231 : vector<16x16xf32>
    %cst_114 = arith.constant 1.000000e+00 : f32
    %233 = vector.broadcast %cst_114 : f32 to vector<16x16xf32>
    %234 = arith.addf %233, %232 : vector<16x16xf32>
    %cst_115 = arith.constant 5.000000e-01 : f32
    %235 = vector.broadcast %cst_115 : f32 to vector<16x16xf32>
    %236 = arith.mulf %235, %234 : vector<16x16xf32>
    %237 = arith.mulf %224, %236 : vector<16x16xf32>
    %c2_116 = arith.constant 2 : index
    %c0_117 = arith.constant 0 : index
    %238 = memref.load %arg14[%c2_116, %c0_117] : memref<32x2xf32, #tpu.memory_space<smem>>
    %239 = vector.broadcast %238 : f32 to vector<16x16xf32>
    %240 = arith.mulf %237, %239 : vector<16x16xf32>
    %241 = arith.addf %210, %240 : vector<16x16xf32>
    %c2_118 = arith.constant 2 : index
    %c1_119 = arith.constant 1 : index
    %242 = memref.load %arg14[%c2_118, %c1_119] : memref<32x2xf32, #tpu.memory_space<smem>>
    %243 = vector.broadcast %242 : f32 to vector<16x16xf32>
    %244 = arith.mulf %237, %243 : vector<16x16xf32>
    %245 = arith.addf %214, %244 : vector<16x16xf32>
    %c0_120 = arith.constant 0 : index
    %c3 = arith.constant 3 : index
    %246 = memref.load %arg12[%c0_120, %c3] : memref<2x32xf32, #tpu.memory_space<smem>>
    %247 = vector.broadcast %246 : f32 to vector<16x16xf32>
    %248 = arith.mulf %140, %247 : vector<16x16xf32>
    %c1_121 = arith.constant 1 : index
    %c3_122 = arith.constant 3 : index
    %249 = memref.load %arg12[%c1_121, %c3_122] : memref<2x32xf32, #tpu.memory_space<smem>>
    %250 = vector.broadcast %249 : f32 to vector<16x16xf32>
    %251 = arith.mulf %144, %250 : vector<16x16xf32>
    %252 = arith.addf %248, %251 : vector<16x16xf32>
    %c0_123 = arith.constant 0 : index
    %c3_124 = arith.constant 3 : index
    %253 = memref.load %arg13[%c0_123, %c3_124] : memref<1x32xf32, #tpu.memory_space<smem>>
    %254 = vector.broadcast %253 : f32 to vector<16x16xf32>
    %255 = arith.addf %252, %254 : vector<16x16xf32>
    %256 = arith.mulf %255, %255 : vector<16x16xf32>
    %257 = arith.mulf %255, %256 : vector<16x16xf32>
    %cst_125 = arith.constant 4.471500e-02 : f32
    %258 = vector.broadcast %cst_125 : f32 to vector<16x16xf32>
    %259 = arith.mulf %258, %257 : vector<16x16xf32>
    %260 = arith.addf %255, %259 : vector<16x16xf32>
    %cst_126 = arith.constant 0.797884583 : f32
    %261 = vector.broadcast %cst_126 : f32 to vector<16x16xf32>
    %262 = arith.mulf %261, %260 : vector<16x16xf32>
    %263 = math.tanh %262 : vector<16x16xf32>
    %cst_127 = arith.constant 1.000000e+00 : f32
    %264 = vector.broadcast %cst_127 : f32 to vector<16x16xf32>
    %265 = arith.addf %264, %263 : vector<16x16xf32>
    %cst_128 = arith.constant 5.000000e-01 : f32
    %266 = vector.broadcast %cst_128 : f32 to vector<16x16xf32>
    %267 = arith.mulf %266, %265 : vector<16x16xf32>
    %268 = arith.mulf %255, %267 : vector<16x16xf32>
    %c3_129 = arith.constant 3 : index
    %c0_130 = arith.constant 0 : index
    %269 = memref.load %arg14[%c3_129, %c0_130] : memref<32x2xf32, #tpu.memory_space<smem>>
    %270 = vector.broadcast %269 : f32 to vector<16x16xf32>
    %271 = arith.mulf %268, %270 : vector<16x16xf32>
    %272 = arith.addf %241, %271 : vector<16x16xf32>
    %c3_131 = arith.constant 3 : index
    %c1_132 = arith.constant 1 : index
    %273 = memref.load %arg14[%c3_131, %c1_132] : memref<32x2xf32, #tpu.memory_space<smem>>
    %274 = vector.broadcast %273 : f32 to vector<16x16xf32>
    %275 = arith.mulf %268, %274 : vector<16x16xf32>
    %276 = arith.addf %245, %275 : vector<16x16xf32>
    %c0_133 = arith.constant 0 : index
    %c4 = arith.constant 4 : index
    %277 = memref.load %arg12[%c0_133, %c4] : memref<2x32xf32, #tpu.memory_space<smem>>
    %278 = vector.broadcast %277 : f32 to vector<16x16xf32>
    %279 = arith.mulf %140, %278 : vector<16x16xf32>
    %c1_134 = arith.constant 1 : index
    %c4_135 = arith.constant 4 : index
    %280 = memref.load %arg12[%c1_134, %c4_135] : memref<2x32xf32, #tpu.memory_space<smem>>
    %281 = vector.broadcast %280 : f32 to vector<16x16xf32>
    %282 = arith.mulf %144, %281 : vector<16x16xf32>
    %283 = arith.addf %279, %282 : vector<16x16xf32>
    %c0_136 = arith.constant 0 : index
    %c4_137 = arith.constant 4 : index
    %284 = memref.load %arg13[%c0_136, %c4_137] : memref<1x32xf32, #tpu.memory_space<smem>>
    %285 = vector.broadcast %284 : f32 to vector<16x16xf32>
    %286 = arith.addf %283, %285 : vector<16x16xf32>
    %287 = arith.mulf %286, %286 : vector<16x16xf32>
    %288 = arith.mulf %286, %287 : vector<16x16xf32>
    %cst_138 = arith.constant 4.471500e-02 : f32
    %289 = vector.broadcast %cst_138 : f32 to vector<16x16xf32>
    %290 = arith.mulf %289, %288 : vector<16x16xf32>
    %291 = arith.addf %286, %290 : vector<16x16xf32>
    %cst_139 = arith.constant 0.797884583 : f32
    %292 = vector.broadcast %cst_139 : f32 to vector<16x16xf32>
    %293 = arith.mulf %292, %291 : vector<16x16xf32>
    %294 = math.tanh %293 : vector<16x16xf32>
    %cst_140 = arith.constant 1.000000e+00 : f32
    %295 = vector.broadcast %cst_140 : f32 to vector<16x16xf32>
    %296 = arith.addf %295, %294 : vector<16x16xf32>
    %cst_141 = arith.constant 5.000000e-01 : f32
    %297 = vector.broadcast %cst_141 : f32 to vector<16x16xf32>
    %298 = arith.mulf %297, %296 : vector<16x16xf32>
    %299 = arith.mulf %286, %298 : vector<16x16xf32>
    %c4_142 = arith.constant 4 : index
    %c0_143 = arith.constant 0 : index
    %300 = memref.load %arg14[%c4_142, %c0_143] : memref<32x2xf32, #tpu.memory_space<smem>>
    %301 = vector.broadcast %300 : f32 to vector<16x16xf32>
    %302 = arith.mulf %299, %301 : vector<16x16xf32>
    %303 = arith.addf %272, %302 : vector<16x16xf32>
    %c4_144 = arith.constant 4 : index
    %c1_145 = arith.constant 1 : index
    %304 = memref.load %arg14[%c4_144, %c1_145] : memref<32x2xf32, #tpu.memory_space<smem>>
    %305 = vector.broadcast %304 : f32 to vector<16x16xf32>
    %306 = arith.mulf %299, %305 : vector<16x16xf32>
    %307 = arith.addf %276, %306 : vector<16x16xf32>
    %c0_146 = arith.constant 0 : index
    %c5 = arith.constant 5 : index
    %308 = memref.load %arg12[%c0_146, %c5] : memref<2x32xf32, #tpu.memory_space<smem>>
    %309 = vector.broadcast %308 : f32 to vector<16x16xf32>
    %310 = arith.mulf %140, %309 : vector<16x16xf32>
    %c1_147 = arith.constant 1 : index
    %c5_148 = arith.constant 5 : index
    %311 = memref.load %arg12[%c1_147, %c5_148] : memref<2x32xf32, #tpu.memory_space<smem>>
    %312 = vector.broadcast %311 : f32 to vector<16x16xf32>
    %313 = arith.mulf %144, %312 : vector<16x16xf32>
    %314 = arith.addf %310, %313 : vector<16x16xf32>
    %c0_149 = arith.constant 0 : index
    %c5_150 = arith.constant 5 : index
    %315 = memref.load %arg13[%c0_149, %c5_150] : memref<1x32xf32, #tpu.memory_space<smem>>
    %316 = vector.broadcast %315 : f32 to vector<16x16xf32>
    %317 = arith.addf %314, %316 : vector<16x16xf32>
    %318 = arith.mulf %317, %317 : vector<16x16xf32>
    %319 = arith.mulf %317, %318 : vector<16x16xf32>
    %cst_151 = arith.constant 4.471500e-02 : f32
    %320 = vector.broadcast %cst_151 : f32 to vector<16x16xf32>
    %321 = arith.mulf %320, %319 : vector<16x16xf32>
    %322 = arith.addf %317, %321 : vector<16x16xf32>
    %cst_152 = arith.constant 0.797884583 : f32
    %323 = vector.broadcast %cst_152 : f32 to vector<16x16xf32>
    %324 = arith.mulf %323, %322 : vector<16x16xf32>
    %325 = math.tanh %324 : vector<16x16xf32>
    %cst_153 = arith.constant 1.000000e+00 : f32
    %326 = vector.broadcast %cst_153 : f32 to vector<16x16xf32>
    %327 = arith.addf %326, %325 : vector<16x16xf32>
    %cst_154 = arith.constant 5.000000e-01 : f32
    %328 = vector.broadcast %cst_154 : f32 to vector<16x16xf32>
    %329 = arith.mulf %328, %327 : vector<16x16xf32>
    %330 = arith.mulf %317, %329 : vector<16x16xf32>
    %c5_155 = arith.constant 5 : index
    %c0_156 = arith.constant 0 : index
    %331 = memref.load %arg14[%c5_155, %c0_156] : memref<32x2xf32, #tpu.memory_space<smem>>
    %332 = vector.broadcast %331 : f32 to vector<16x16xf32>
    %333 = arith.mulf %330, %332 : vector<16x16xf32>
    %334 = arith.addf %303, %333 : vector<16x16xf32>
    %c5_157 = arith.constant 5 : index
    %c1_158 = arith.constant 1 : index
    %335 = memref.load %arg14[%c5_157, %c1_158] : memref<32x2xf32, #tpu.memory_space<smem>>
    %336 = vector.broadcast %335 : f32 to vector<16x16xf32>
    %337 = arith.mulf %330, %336 : vector<16x16xf32>
    %338 = arith.addf %307, %337 : vector<16x16xf32>
    %c0_159 = arith.constant 0 : index
    %c6 = arith.constant 6 : index
    %339 = memref.load %arg12[%c0_159, %c6] : memref<2x32xf32, #tpu.memory_space<smem>>
    %340 = vector.broadcast %339 : f32 to vector<16x16xf32>
    %341 = arith.mulf %140, %340 : vector<16x16xf32>
    %c1_160 = arith.constant 1 : index
    %c6_161 = arith.constant 6 : index
    %342 = memref.load %arg12[%c1_160, %c6_161] : memref<2x32xf32, #tpu.memory_space<smem>>
    %343 = vector.broadcast %342 : f32 to vector<16x16xf32>
    %344 = arith.mulf %144, %343 : vector<16x16xf32>
    %345 = arith.addf %341, %344 : vector<16x16xf32>
    %c0_162 = arith.constant 0 : index
    %c6_163 = arith.constant 6 : index
    %346 = memref.load %arg13[%c0_162, %c6_163] : memref<1x32xf32, #tpu.memory_space<smem>>
    %347 = vector.broadcast %346 : f32 to vector<16x16xf32>
    %348 = arith.addf %345, %347 : vector<16x16xf32>
    %349 = arith.mulf %348, %348 : vector<16x16xf32>
    %350 = arith.mulf %348, %349 : vector<16x16xf32>
    %cst_164 = arith.constant 4.471500e-02 : f32
    %351 = vector.broadcast %cst_164 : f32 to vector<16x16xf32>
    %352 = arith.mulf %351, %350 : vector<16x16xf32>
    %353 = arith.addf %348, %352 : vector<16x16xf32>
    %cst_165 = arith.constant 0.797884583 : f32
    %354 = vector.broadcast %cst_165 : f32 to vector<16x16xf32>
    %355 = arith.mulf %354, %353 : vector<16x16xf32>
    %356 = math.tanh %355 : vector<16x16xf32>
    %cst_166 = arith.constant 1.000000e+00 : f32
    %357 = vector.broadcast %cst_166 : f32 to vector<16x16xf32>
    %358 = arith.addf %357, %356 : vector<16x16xf32>
    %cst_167 = arith.constant 5.000000e-01 : f32
    %359 = vector.broadcast %cst_167 : f32 to vector<16x16xf32>
    %360 = arith.mulf %359, %358 : vector<16x16xf32>
    %361 = arith.mulf %348, %360 : vector<16x16xf32>
    %c6_168 = arith.constant 6 : index
    %c0_169 = arith.constant 0 : index
    %362 = memref.load %arg14[%c6_168, %c0_169] : memref<32x2xf32, #tpu.memory_space<smem>>
    %363 = vector.broadcast %362 : f32 to vector<16x16xf32>
    %364 = arith.mulf %361, %363 : vector<16x16xf32>
    %365 = arith.addf %334, %364 : vector<16x16xf32>
    %c6_170 = arith.constant 6 : index
    %c1_171 = arith.constant 1 : index
    %366 = memref.load %arg14[%c6_170, %c1_171] : memref<32x2xf32, #tpu.memory_space<smem>>
    %367 = vector.broadcast %366 : f32 to vector<16x16xf32>
    %368 = arith.mulf %361, %367 : vector<16x16xf32>
    %369 = arith.addf %338, %368 : vector<16x16xf32>
    %c0_172 = arith.constant 0 : index
    %c7 = arith.constant 7 : index
    %370 = memref.load %arg12[%c0_172, %c7] : memref<2x32xf32, #tpu.memory_space<smem>>
    %371 = vector.broadcast %370 : f32 to vector<16x16xf32>
    %372 = arith.mulf %140, %371 : vector<16x16xf32>
    %c1_173 = arith.constant 1 : index
    %c7_174 = arith.constant 7 : index
    %373 = memref.load %arg12[%c1_173, %c7_174] : memref<2x32xf32, #tpu.memory_space<smem>>
    %374 = vector.broadcast %373 : f32 to vector<16x16xf32>
    %375 = arith.mulf %144, %374 : vector<16x16xf32>
    %376 = arith.addf %372, %375 : vector<16x16xf32>
    %c0_175 = arith.constant 0 : index
    %c7_176 = arith.constant 7 : index
    %377 = memref.load %arg13[%c0_175, %c7_176] : memref<1x32xf32, #tpu.memory_space<smem>>
    %378 = vector.broadcast %377 : f32 to vector<16x16xf32>
    %379 = arith.addf %376, %378 : vector<16x16xf32>
    %380 = arith.mulf %379, %379 : vector<16x16xf32>
    %381 = arith.mulf %379, %380 : vector<16x16xf32>
    %cst_177 = arith.constant 4.471500e-02 : f32
    %382 = vector.broadcast %cst_177 : f32 to vector<16x16xf32>
    %383 = arith.mulf %382, %381 : vector<16x16xf32>
    %384 = arith.addf %379, %383 : vector<16x16xf32>
    %cst_178 = arith.constant 0.797884583 : f32
    %385 = vector.broadcast %cst_178 : f32 to vector<16x16xf32>
    %386 = arith.mulf %385, %384 : vector<16x16xf32>
    %387 = math.tanh %386 : vector<16x16xf32>
    %cst_179 = arith.constant 1.000000e+00 : f32
    %388 = vector.broadcast %cst_179 : f32 to vector<16x16xf32>
    %389 = arith.addf %388, %387 : vector<16x16xf32>
    %cst_180 = arith.constant 5.000000e-01 : f32
    %390 = vector.broadcast %cst_180 : f32 to vector<16x16xf32>
    %391 = arith.mulf %390, %389 : vector<16x16xf32>
    %392 = arith.mulf %379, %391 : vector<16x16xf32>
    %c7_181 = arith.constant 7 : index
    %c0_182 = arith.constant 0 : index
    %393 = memref.load %arg14[%c7_181, %c0_182] : memref<32x2xf32, #tpu.memory_space<smem>>
    %394 = vector.broadcast %393 : f32 to vector<16x16xf32>
    %395 = arith.mulf %392, %394 : vector<16x16xf32>
    %396 = arith.addf %365, %395 : vector<16x16xf32>
    %c7_183 = arith.constant 7 : index
    %c1_184 = arith.constant 1 : index
    %397 = memref.load %arg14[%c7_183, %c1_184] : memref<32x2xf32, #tpu.memory_space<smem>>
    %398 = vector.broadcast %397 : f32 to vector<16x16xf32>
    %399 = arith.mulf %392, %398 : vector<16x16xf32>
    %400 = arith.addf %369, %399 : vector<16x16xf32>
    %c0_185 = arith.constant 0 : index
    %c8 = arith.constant 8 : index
    %401 = memref.load %arg12[%c0_185, %c8] : memref<2x32xf32, #tpu.memory_space<smem>>
    %402 = vector.broadcast %401 : f32 to vector<16x16xf32>
    %403 = arith.mulf %140, %402 : vector<16x16xf32>
    %c1_186 = arith.constant 1 : index
    %c8_187 = arith.constant 8 : index
    %404 = memref.load %arg12[%c1_186, %c8_187] : memref<2x32xf32, #tpu.memory_space<smem>>
    %405 = vector.broadcast %404 : f32 to vector<16x16xf32>
    %406 = arith.mulf %144, %405 : vector<16x16xf32>
    %407 = arith.addf %403, %406 : vector<16x16xf32>
    %c0_188 = arith.constant 0 : index
    %c8_189 = arith.constant 8 : index
    %408 = memref.load %arg13[%c0_188, %c8_189] : memref<1x32xf32, #tpu.memory_space<smem>>
    %409 = vector.broadcast %408 : f32 to vector<16x16xf32>
    %410 = arith.addf %407, %409 : vector<16x16xf32>
    %411 = arith.mulf %410, %410 : vector<16x16xf32>
    %412 = arith.mulf %410, %411 : vector<16x16xf32>
    %cst_190 = arith.constant 4.471500e-02 : f32
    %413 = vector.broadcast %cst_190 : f32 to vector<16x16xf32>
    %414 = arith.mulf %413, %412 : vector<16x16xf32>
    %415 = arith.addf %410, %414 : vector<16x16xf32>
    %cst_191 = arith.constant 0.797884583 : f32
    %416 = vector.broadcast %cst_191 : f32 to vector<16x16xf32>
    %417 = arith.mulf %416, %415 : vector<16x16xf32>
    %418 = math.tanh %417 : vector<16x16xf32>
    %cst_192 = arith.constant 1.000000e+00 : f32
    %419 = vector.broadcast %cst_192 : f32 to vector<16x16xf32>
    %420 = arith.addf %419, %418 : vector<16x16xf32>
    %cst_193 = arith.constant 5.000000e-01 : f32
    %421 = vector.broadcast %cst_193 : f32 to vector<16x16xf32>
    %422 = arith.mulf %421, %420 : vector<16x16xf32>
    %423 = arith.mulf %410, %422 : vector<16x16xf32>
    %c8_194 = arith.constant 8 : index
    %c0_195 = arith.constant 0 : index
    %424 = memref.load %arg14[%c8_194, %c0_195] : memref<32x2xf32, #tpu.memory_space<smem>>
    %425 = vector.broadcast %424 : f32 to vector<16x16xf32>
    %426 = arith.mulf %423, %425 : vector<16x16xf32>
    %427 = arith.addf %396, %426 : vector<16x16xf32>
    %c8_196 = arith.constant 8 : index
    %c1_197 = arith.constant 1 : index
    %428 = memref.load %arg14[%c8_196, %c1_197] : memref<32x2xf32, #tpu.memory_space<smem>>
    %429 = vector.broadcast %428 : f32 to vector<16x16xf32>
    %430 = arith.mulf %423, %429 : vector<16x16xf32>
    %431 = arith.addf %400, %430 : vector<16x16xf32>
    %c0_198 = arith.constant 0 : index
    %c9 = arith.constant 9 : index
    %432 = memref.load %arg12[%c0_198, %c9] : memref<2x32xf32, #tpu.memory_space<smem>>
    %433 = vector.broadcast %432 : f32 to vector<16x16xf32>
    %434 = arith.mulf %140, %433 : vector<16x16xf32>
    %c1_199 = arith.constant 1 : index
    %c9_200 = arith.constant 9 : index
    %435 = memref.load %arg12[%c1_199, %c9_200] : memref<2x32xf32, #tpu.memory_space<smem>>
    %436 = vector.broadcast %435 : f32 to vector<16x16xf32>
    %437 = arith.mulf %144, %436 : vector<16x16xf32>
    %438 = arith.addf %434, %437 : vector<16x16xf32>
    %c0_201 = arith.constant 0 : index
    %c9_202 = arith.constant 9 : index
    %439 = memref.load %arg13[%c0_201, %c9_202] : memref<1x32xf32, #tpu.memory_space<smem>>
    %440 = vector.broadcast %439 : f32 to vector<16x16xf32>
    %441 = arith.addf %438, %440 : vector<16x16xf32>
    %442 = arith.mulf %441, %441 : vector<16x16xf32>
    %443 = arith.mulf %441, %442 : vector<16x16xf32>
    %cst_203 = arith.constant 4.471500e-02 : f32
    %444 = vector.broadcast %cst_203 : f32 to vector<16x16xf32>
    %445 = arith.mulf %444, %443 : vector<16x16xf32>
    %446 = arith.addf %441, %445 : vector<16x16xf32>
    %cst_204 = arith.constant 0.797884583 : f32
    %447 = vector.broadcast %cst_204 : f32 to vector<16x16xf32>
    %448 = arith.mulf %447, %446 : vector<16x16xf32>
    %449 = math.tanh %448 : vector<16x16xf32>
    %cst_205 = arith.constant 1.000000e+00 : f32
    %450 = vector.broadcast %cst_205 : f32 to vector<16x16xf32>
    %451 = arith.addf %450, %449 : vector<16x16xf32>
    %cst_206 = arith.constant 5.000000e-01 : f32
    %452 = vector.broadcast %cst_206 : f32 to vector<16x16xf32>
    %453 = arith.mulf %452, %451 : vector<16x16xf32>
    %454 = arith.mulf %441, %453 : vector<16x16xf32>
    %c9_207 = arith.constant 9 : index
    %c0_208 = arith.constant 0 : index
    %455 = memref.load %arg14[%c9_207, %c0_208] : memref<32x2xf32, #tpu.memory_space<smem>>
    %456 = vector.broadcast %455 : f32 to vector<16x16xf32>
    %457 = arith.mulf %454, %456 : vector<16x16xf32>
    %458 = arith.addf %427, %457 : vector<16x16xf32>
    %c9_209 = arith.constant 9 : index
    %c1_210 = arith.constant 1 : index
    %459 = memref.load %arg14[%c9_209, %c1_210] : memref<32x2xf32, #tpu.memory_space<smem>>
    %460 = vector.broadcast %459 : f32 to vector<16x16xf32>
    %461 = arith.mulf %454, %460 : vector<16x16xf32>
    %462 = arith.addf %431, %461 : vector<16x16xf32>
    %c0_211 = arith.constant 0 : index
    %c10 = arith.constant 10 : index
    %463 = memref.load %arg12[%c0_211, %c10] : memref<2x32xf32, #tpu.memory_space<smem>>
    %464 = vector.broadcast %463 : f32 to vector<16x16xf32>
    %465 = arith.mulf %140, %464 : vector<16x16xf32>
    %c1_212 = arith.constant 1 : index
    %c10_213 = arith.constant 10 : index
    %466 = memref.load %arg12[%c1_212, %c10_213] : memref<2x32xf32, #tpu.memory_space<smem>>
    %467 = vector.broadcast %466 : f32 to vector<16x16xf32>
    %468 = arith.mulf %144, %467 : vector<16x16xf32>
    %469 = arith.addf %465, %468 : vector<16x16xf32>
    %c0_214 = arith.constant 0 : index
    %c10_215 = arith.constant 10 : index
    %470 = memref.load %arg13[%c0_214, %c10_215] : memref<1x32xf32, #tpu.memory_space<smem>>
    %471 = vector.broadcast %470 : f32 to vector<16x16xf32>
    %472 = arith.addf %469, %471 : vector<16x16xf32>
    %473 = arith.mulf %472, %472 : vector<16x16xf32>
    %474 = arith.mulf %472, %473 : vector<16x16xf32>
    %cst_216 = arith.constant 4.471500e-02 : f32
    %475 = vector.broadcast %cst_216 : f32 to vector<16x16xf32>
    %476 = arith.mulf %475, %474 : vector<16x16xf32>
    %477 = arith.addf %472, %476 : vector<16x16xf32>
    %cst_217 = arith.constant 0.797884583 : f32
    %478 = vector.broadcast %cst_217 : f32 to vector<16x16xf32>
    %479 = arith.mulf %478, %477 : vector<16x16xf32>
    %480 = math.tanh %479 : vector<16x16xf32>
    %cst_218 = arith.constant 1.000000e+00 : f32
    %481 = vector.broadcast %cst_218 : f32 to vector<16x16xf32>
    %482 = arith.addf %481, %480 : vector<16x16xf32>
    %cst_219 = arith.constant 5.000000e-01 : f32
    %483 = vector.broadcast %cst_219 : f32 to vector<16x16xf32>
    %484 = arith.mulf %483, %482 : vector<16x16xf32>
    %485 = arith.mulf %472, %484 : vector<16x16xf32>
    %c10_220 = arith.constant 10 : index
    %c0_221 = arith.constant 0 : index
    %486 = memref.load %arg14[%c10_220, %c0_221] : memref<32x2xf32, #tpu.memory_space<smem>>
    %487 = vector.broadcast %486 : f32 to vector<16x16xf32>
    %488 = arith.mulf %485, %487 : vector<16x16xf32>
    %489 = arith.addf %458, %488 : vector<16x16xf32>
    %c10_222 = arith.constant 10 : index
    %c1_223 = arith.constant 1 : index
    %490 = memref.load %arg14[%c10_222, %c1_223] : memref<32x2xf32, #tpu.memory_space<smem>>
    %491 = vector.broadcast %490 : f32 to vector<16x16xf32>
    %492 = arith.mulf %485, %491 : vector<16x16xf32>
    %493 = arith.addf %462, %492 : vector<16x16xf32>
    %c0_224 = arith.constant 0 : index
    %c11 = arith.constant 11 : index
    %494 = memref.load %arg12[%c0_224, %c11] : memref<2x32xf32, #tpu.memory_space<smem>>
    %495 = vector.broadcast %494 : f32 to vector<16x16xf32>
    %496 = arith.mulf %140, %495 : vector<16x16xf32>
    %c1_225 = arith.constant 1 : index
    %c11_226 = arith.constant 11 : index
    %497 = memref.load %arg12[%c1_225, %c11_226] : memref<2x32xf32, #tpu.memory_space<smem>>
    %498 = vector.broadcast %497 : f32 to vector<16x16xf32>
    %499 = arith.mulf %144, %498 : vector<16x16xf32>
    %500 = arith.addf %496, %499 : vector<16x16xf32>
    %c0_227 = arith.constant 0 : index
    %c11_228 = arith.constant 11 : index
    %501 = memref.load %arg13[%c0_227, %c11_228] : memref<1x32xf32, #tpu.memory_space<smem>>
    %502 = vector.broadcast %501 : f32 to vector<16x16xf32>
    %503 = arith.addf %500, %502 : vector<16x16xf32>
    %504 = arith.mulf %503, %503 : vector<16x16xf32>
    %505 = arith.mulf %503, %504 : vector<16x16xf32>
    %cst_229 = arith.constant 4.471500e-02 : f32
    %506 = vector.broadcast %cst_229 : f32 to vector<16x16xf32>
    %507 = arith.mulf %506, %505 : vector<16x16xf32>
    %508 = arith.addf %503, %507 : vector<16x16xf32>
    %cst_230 = arith.constant 0.797884583 : f32
    %509 = vector.broadcast %cst_230 : f32 to vector<16x16xf32>
    %510 = arith.mulf %509, %508 : vector<16x16xf32>
    %511 = math.tanh %510 : vector<16x16xf32>
    %cst_231 = arith.constant 1.000000e+00 : f32
    %512 = vector.broadcast %cst_231 : f32 to vector<16x16xf32>
    %513 = arith.addf %512, %511 : vector<16x16xf32>
    %cst_232 = arith.constant 5.000000e-01 : f32
    %514 = vector.broadcast %cst_232 : f32 to vector<16x16xf32>
    %515 = arith.mulf %514, %513 : vector<16x16xf32>
    %516 = arith.mulf %503, %515 : vector<16x16xf32>
    %c11_233 = arith.constant 11 : index
    %c0_234 = arith.constant 0 : index
    %517 = memref.load %arg14[%c11_233, %c0_234] : memref<32x2xf32, #tpu.memory_space<smem>>
    %518 = vector.broadcast %517 : f32 to vector<16x16xf32>
    %519 = arith.mulf %516, %518 : vector<16x16xf32>
    %520 = arith.addf %489, %519 : vector<16x16xf32>
    %c11_235 = arith.constant 11 : index
    %c1_236 = arith.constant 1 : index
    %521 = memref.load %arg14[%c11_235, %c1_236] : memref<32x2xf32, #tpu.memory_space<smem>>
    %522 = vector.broadcast %521 : f32 to vector<16x16xf32>
    %523 = arith.mulf %516, %522 : vector<16x16xf32>
    %524 = arith.addf %493, %523 : vector<16x16xf32>
    %c0_237 = arith.constant 0 : index
    %c12 = arith.constant 12 : index
    %525 = memref.load %arg12[%c0_237, %c12] : memref<2x32xf32, #tpu.memory_space<smem>>
    %526 = vector.broadcast %525 : f32 to vector<16x16xf32>
    %527 = arith.mulf %140, %526 : vector<16x16xf32>
    %c1_238 = arith.constant 1 : index
    %c12_239 = arith.constant 12 : index
    %528 = memref.load %arg12[%c1_238, %c12_239] : memref<2x32xf32, #tpu.memory_space<smem>>
    %529 = vector.broadcast %528 : f32 to vector<16x16xf32>
    %530 = arith.mulf %144, %529 : vector<16x16xf32>
    %531 = arith.addf %527, %530 : vector<16x16xf32>
    %c0_240 = arith.constant 0 : index
    %c12_241 = arith.constant 12 : index
    %532 = memref.load %arg13[%c0_240, %c12_241] : memref<1x32xf32, #tpu.memory_space<smem>>
    %533 = vector.broadcast %532 : f32 to vector<16x16xf32>
    %534 = arith.addf %531, %533 : vector<16x16xf32>
    %535 = arith.mulf %534, %534 : vector<16x16xf32>
    %536 = arith.mulf %534, %535 : vector<16x16xf32>
    %cst_242 = arith.constant 4.471500e-02 : f32
    %537 = vector.broadcast %cst_242 : f32 to vector<16x16xf32>
    %538 = arith.mulf %537, %536 : vector<16x16xf32>
    %539 = arith.addf %534, %538 : vector<16x16xf32>
    %cst_243 = arith.constant 0.797884583 : f32
    %540 = vector.broadcast %cst_243 : f32 to vector<16x16xf32>
    %541 = arith.mulf %540, %539 : vector<16x16xf32>
    %542 = math.tanh %541 : vector<16x16xf32>
    %cst_244 = arith.constant 1.000000e+00 : f32
    %543 = vector.broadcast %cst_244 : f32 to vector<16x16xf32>
    %544 = arith.addf %543, %542 : vector<16x16xf32>
    %cst_245 = arith.constant 5.000000e-01 : f32
    %545 = vector.broadcast %cst_245 : f32 to vector<16x16xf32>
    %546 = arith.mulf %545, %544 : vector<16x16xf32>
    %547 = arith.mulf %534, %546 : vector<16x16xf32>
    %c12_246 = arith.constant 12 : index
    %c0_247 = arith.constant 0 : index
    %548 = memref.load %arg14[%c12_246, %c0_247] : memref<32x2xf32, #tpu.memory_space<smem>>
    %549 = vector.broadcast %548 : f32 to vector<16x16xf32>
    %550 = arith.mulf %547, %549 : vector<16x16xf32>
    %551 = arith.addf %520, %550 : vector<16x16xf32>
    %c12_248 = arith.constant 12 : index
    %c1_249 = arith.constant 1 : index
    %552 = memref.load %arg14[%c12_248, %c1_249] : memref<32x2xf32, #tpu.memory_space<smem>>
    %553 = vector.broadcast %552 : f32 to vector<16x16xf32>
    %554 = arith.mulf %547, %553 : vector<16x16xf32>
    %555 = arith.addf %524, %554 : vector<16x16xf32>
    %c0_250 = arith.constant 0 : index
    %c13 = arith.constant 13 : index
    %556 = memref.load %arg12[%c0_250, %c13] : memref<2x32xf32, #tpu.memory_space<smem>>
    %557 = vector.broadcast %556 : f32 to vector<16x16xf32>
    %558 = arith.mulf %140, %557 : vector<16x16xf32>
    %c1_251 = arith.constant 1 : index
    %c13_252 = arith.constant 13 : index
    %559 = memref.load %arg12[%c1_251, %c13_252] : memref<2x32xf32, #tpu.memory_space<smem>>
    %560 = vector.broadcast %559 : f32 to vector<16x16xf32>
    %561 = arith.mulf %144, %560 : vector<16x16xf32>
    %562 = arith.addf %558, %561 : vector<16x16xf32>
    %c0_253 = arith.constant 0 : index
    %c13_254 = arith.constant 13 : index
    %563 = memref.load %arg13[%c0_253, %c13_254] : memref<1x32xf32, #tpu.memory_space<smem>>
    %564 = vector.broadcast %563 : f32 to vector<16x16xf32>
    %565 = arith.addf %562, %564 : vector<16x16xf32>
    %566 = arith.mulf %565, %565 : vector<16x16xf32>
    %567 = arith.mulf %565, %566 : vector<16x16xf32>
    %cst_255 = arith.constant 4.471500e-02 : f32
    %568 = vector.broadcast %cst_255 : f32 to vector<16x16xf32>
    %569 = arith.mulf %568, %567 : vector<16x16xf32>
    %570 = arith.addf %565, %569 : vector<16x16xf32>
    %cst_256 = arith.constant 0.797884583 : f32
    %571 = vector.broadcast %cst_256 : f32 to vector<16x16xf32>
    %572 = arith.mulf %571, %570 : vector<16x16xf32>
    %573 = math.tanh %572 : vector<16x16xf32>
    %cst_257 = arith.constant 1.000000e+00 : f32
    %574 = vector.broadcast %cst_257 : f32 to vector<16x16xf32>
    %575 = arith.addf %574, %573 : vector<16x16xf32>
    %cst_258 = arith.constant 5.000000e-01 : f32
    %576 = vector.broadcast %cst_258 : f32 to vector<16x16xf32>
    %577 = arith.mulf %576, %575 : vector<16x16xf32>
    %578 = arith.mulf %565, %577 : vector<16x16xf32>
    %c13_259 = arith.constant 13 : index
    %c0_260 = arith.constant 0 : index
    %579 = memref.load %arg14[%c13_259, %c0_260] : memref<32x2xf32, #tpu.memory_space<smem>>
    %580 = vector.broadcast %579 : f32 to vector<16x16xf32>
    %581 = arith.mulf %578, %580 : vector<16x16xf32>
    %582 = arith.addf %551, %581 : vector<16x16xf32>
    %c13_261 = arith.constant 13 : index
    %c1_262 = arith.constant 1 : index
    %583 = memref.load %arg14[%c13_261, %c1_262] : memref<32x2xf32, #tpu.memory_space<smem>>
    %584 = vector.broadcast %583 : f32 to vector<16x16xf32>
    %585 = arith.mulf %578, %584 : vector<16x16xf32>
    %586 = arith.addf %555, %585 : vector<16x16xf32>
    %c0_263 = arith.constant 0 : index
    %c14 = arith.constant 14 : index
    %587 = memref.load %arg12[%c0_263, %c14] : memref<2x32xf32, #tpu.memory_space<smem>>
    %588 = vector.broadcast %587 : f32 to vector<16x16xf32>
    %589 = arith.mulf %140, %588 : vector<16x16xf32>
    %c1_264 = arith.constant 1 : index
    %c14_265 = arith.constant 14 : index
    %590 = memref.load %arg12[%c1_264, %c14_265] : memref<2x32xf32, #tpu.memory_space<smem>>
    %591 = vector.broadcast %590 : f32 to vector<16x16xf32>
    %592 = arith.mulf %144, %591 : vector<16x16xf32>
    %593 = arith.addf %589, %592 : vector<16x16xf32>
    %c0_266 = arith.constant 0 : index
    %c14_267 = arith.constant 14 : index
    %594 = memref.load %arg13[%c0_266, %c14_267] : memref<1x32xf32, #tpu.memory_space<smem>>
    %595 = vector.broadcast %594 : f32 to vector<16x16xf32>
    %596 = arith.addf %593, %595 : vector<16x16xf32>
    %597 = arith.mulf %596, %596 : vector<16x16xf32>
    %598 = arith.mulf %596, %597 : vector<16x16xf32>
    %cst_268 = arith.constant 4.471500e-02 : f32
    %599 = vector.broadcast %cst_268 : f32 to vector<16x16xf32>
    %600 = arith.mulf %599, %598 : vector<16x16xf32>
    %601 = arith.addf %596, %600 : vector<16x16xf32>
    %cst_269 = arith.constant 0.797884583 : f32
    %602 = vector.broadcast %cst_269 : f32 to vector<16x16xf32>
    %603 = arith.mulf %602, %601 : vector<16x16xf32>
    %604 = math.tanh %603 : vector<16x16xf32>
    %cst_270 = arith.constant 1.000000e+00 : f32
    %605 = vector.broadcast %cst_270 : f32 to vector<16x16xf32>
    %606 = arith.addf %605, %604 : vector<16x16xf32>
    %cst_271 = arith.constant 5.000000e-01 : f32
    %607 = vector.broadcast %cst_271 : f32 to vector<16x16xf32>
    %608 = arith.mulf %607, %606 : vector<16x16xf32>
    %609 = arith.mulf %596, %608 : vector<16x16xf32>
    %c14_272 = arith.constant 14 : index
    %c0_273 = arith.constant 0 : index
    %610 = memref.load %arg14[%c14_272, %c0_273] : memref<32x2xf32, #tpu.memory_space<smem>>
    %611 = vector.broadcast %610 : f32 to vector<16x16xf32>
    %612 = arith.mulf %609, %611 : vector<16x16xf32>
    %613 = arith.addf %582, %612 : vector<16x16xf32>
    %c14_274 = arith.constant 14 : index
    %c1_275 = arith.constant 1 : index
    %614 = memref.load %arg14[%c14_274, %c1_275] : memref<32x2xf32, #tpu.memory_space<smem>>
    %615 = vector.broadcast %614 : f32 to vector<16x16xf32>
    %616 = arith.mulf %609, %615 : vector<16x16xf32>
    %617 = arith.addf %586, %616 : vector<16x16xf32>
    %c0_276 = arith.constant 0 : index
    %c15 = arith.constant 15 : index
    %618 = memref.load %arg12[%c0_276, %c15] : memref<2x32xf32, #tpu.memory_space<smem>>
    %619 = vector.broadcast %618 : f32 to vector<16x16xf32>
    %620 = arith.mulf %140, %619 : vector<16x16xf32>
    %c1_277 = arith.constant 1 : index
    %c15_278 = arith.constant 15 : index
    %621 = memref.load %arg12[%c1_277, %c15_278] : memref<2x32xf32, #tpu.memory_space<smem>>
    %622 = vector.broadcast %621 : f32 to vector<16x16xf32>
    %623 = arith.mulf %144, %622 : vector<16x16xf32>
    %624 = arith.addf %620, %623 : vector<16x16xf32>
    %c0_279 = arith.constant 0 : index
    %c15_280 = arith.constant 15 : index
    %625 = memref.load %arg13[%c0_279, %c15_280] : memref<1x32xf32, #tpu.memory_space<smem>>
    %626 = vector.broadcast %625 : f32 to vector<16x16xf32>
    %627 = arith.addf %624, %626 : vector<16x16xf32>
    %628 = arith.mulf %627, %627 : vector<16x16xf32>
    %629 = arith.mulf %627, %628 : vector<16x16xf32>
    %cst_281 = arith.constant 4.471500e-02 : f32
    %630 = vector.broadcast %cst_281 : f32 to vector<16x16xf32>
    %631 = arith.mulf %630, %629 : vector<16x16xf32>
    %632 = arith.addf %627, %631 : vector<16x16xf32>
    %cst_282 = arith.constant 0.797884583 : f32
    %633 = vector.broadcast %cst_282 : f32 to vector<16x16xf32>
    %634 = arith.mulf %633, %632 : vector<16x16xf32>
    %635 = math.tanh %634 : vector<16x16xf32>
    %cst_283 = arith.constant 1.000000e+00 : f32
    %636 = vector.broadcast %cst_283 : f32 to vector<16x16xf32>
    %637 = arith.addf %636, %635 : vector<16x16xf32>
    %cst_284 = arith.constant 5.000000e-01 : f32
    %638 = vector.broadcast %cst_284 : f32 to vector<16x16xf32>
    %639 = arith.mulf %638, %637 : vector<16x16xf32>
    %640 = arith.mulf %627, %639 : vector<16x16xf32>
    %c15_285 = arith.constant 15 : index
    %c0_286 = arith.constant 0 : index
    %641 = memref.load %arg14[%c15_285, %c0_286] : memref<32x2xf32, #tpu.memory_space<smem>>
    %642 = vector.broadcast %641 : f32 to vector<16x16xf32>
    %643 = arith.mulf %640, %642 : vector<16x16xf32>
    %644 = arith.addf %613, %643 : vector<16x16xf32>
    %c15_287 = arith.constant 15 : index
    %c1_288 = arith.constant 1 : index
    %645 = memref.load %arg14[%c15_287, %c1_288] : memref<32x2xf32, #tpu.memory_space<smem>>
    %646 = vector.broadcast %645 : f32 to vector<16x16xf32>
    %647 = arith.mulf %640, %646 : vector<16x16xf32>
    %648 = arith.addf %617, %647 : vector<16x16xf32>
    %c0_289 = arith.constant 0 : index
    %c16 = arith.constant 16 : index
    %649 = memref.load %arg12[%c0_289, %c16] : memref<2x32xf32, #tpu.memory_space<smem>>
    %650 = vector.broadcast %649 : f32 to vector<16x16xf32>
    %651 = arith.mulf %140, %650 : vector<16x16xf32>
    %c1_290 = arith.constant 1 : index
    %c16_291 = arith.constant 16 : index
    %652 = memref.load %arg12[%c1_290, %c16_291] : memref<2x32xf32, #tpu.memory_space<smem>>
    %653 = vector.broadcast %652 : f32 to vector<16x16xf32>
    %654 = arith.mulf %144, %653 : vector<16x16xf32>
    %655 = arith.addf %651, %654 : vector<16x16xf32>
    %c0_292 = arith.constant 0 : index
    %c16_293 = arith.constant 16 : index
    %656 = memref.load %arg13[%c0_292, %c16_293] : memref<1x32xf32, #tpu.memory_space<smem>>
    %657 = vector.broadcast %656 : f32 to vector<16x16xf32>
    %658 = arith.addf %655, %657 : vector<16x16xf32>
    %659 = arith.mulf %658, %658 : vector<16x16xf32>
    %660 = arith.mulf %658, %659 : vector<16x16xf32>
    %cst_294 = arith.constant 4.471500e-02 : f32
    %661 = vector.broadcast %cst_294 : f32 to vector<16x16xf32>
    %662 = arith.mulf %661, %660 : vector<16x16xf32>
    %663 = arith.addf %658, %662 : vector<16x16xf32>
    %cst_295 = arith.constant 0.797884583 : f32
    %664 = vector.broadcast %cst_295 : f32 to vector<16x16xf32>
    %665 = arith.mulf %664, %663 : vector<16x16xf32>
    %666 = math.tanh %665 : vector<16x16xf32>
    %cst_296 = arith.constant 1.000000e+00 : f32
    %667 = vector.broadcast %cst_296 : f32 to vector<16x16xf32>
    %668 = arith.addf %667, %666 : vector<16x16xf32>
    %cst_297 = arith.constant 5.000000e-01 : f32
    %669 = vector.broadcast %cst_297 : f32 to vector<16x16xf32>
    %670 = arith.mulf %669, %668 : vector<16x16xf32>
    %671 = arith.mulf %658, %670 : vector<16x16xf32>
    %c16_298 = arith.constant 16 : index
    %c0_299 = arith.constant 0 : index
    %672 = memref.load %arg14[%c16_298, %c0_299] : memref<32x2xf32, #tpu.memory_space<smem>>
    %673 = vector.broadcast %672 : f32 to vector<16x16xf32>
    %674 = arith.mulf %671, %673 : vector<16x16xf32>
    %675 = arith.addf %644, %674 : vector<16x16xf32>
    %c16_300 = arith.constant 16 : index
    %c1_301 = arith.constant 1 : index
    %676 = memref.load %arg14[%c16_300, %c1_301] : memref<32x2xf32, #tpu.memory_space<smem>>
    %677 = vector.broadcast %676 : f32 to vector<16x16xf32>
    %678 = arith.mulf %671, %677 : vector<16x16xf32>
    %679 = arith.addf %648, %678 : vector<16x16xf32>
    %c0_302 = arith.constant 0 : index
    %c17 = arith.constant 17 : index
    %680 = memref.load %arg12[%c0_302, %c17] : memref<2x32xf32, #tpu.memory_space<smem>>
    %681 = vector.broadcast %680 : f32 to vector<16x16xf32>
    %682 = arith.mulf %140, %681 : vector<16x16xf32>
    %c1_303 = arith.constant 1 : index
    %c17_304 = arith.constant 17 : index
    %683 = memref.load %arg12[%c1_303, %c17_304] : memref<2x32xf32, #tpu.memory_space<smem>>
    %684 = vector.broadcast %683 : f32 to vector<16x16xf32>
    %685 = arith.mulf %144, %684 : vector<16x16xf32>
    %686 = arith.addf %682, %685 : vector<16x16xf32>
    %c0_305 = arith.constant 0 : index
    %c17_306 = arith.constant 17 : index
    %687 = memref.load %arg13[%c0_305, %c17_306] : memref<1x32xf32, #tpu.memory_space<smem>>
    %688 = vector.broadcast %687 : f32 to vector<16x16xf32>
    %689 = arith.addf %686, %688 : vector<16x16xf32>
    %690 = arith.mulf %689, %689 : vector<16x16xf32>
    %691 = arith.mulf %689, %690 : vector<16x16xf32>
    %cst_307 = arith.constant 4.471500e-02 : f32
    %692 = vector.broadcast %cst_307 : f32 to vector<16x16xf32>
    %693 = arith.mulf %692, %691 : vector<16x16xf32>
    %694 = arith.addf %689, %693 : vector<16x16xf32>
    %cst_308 = arith.constant 0.797884583 : f32
    %695 = vector.broadcast %cst_308 : f32 to vector<16x16xf32>
    %696 = arith.mulf %695, %694 : vector<16x16xf32>
    %697 = math.tanh %696 : vector<16x16xf32>
    %cst_309 = arith.constant 1.000000e+00 : f32
    %698 = vector.broadcast %cst_309 : f32 to vector<16x16xf32>
    %699 = arith.addf %698, %697 : vector<16x16xf32>
    %cst_310 = arith.constant 5.000000e-01 : f32
    %700 = vector.broadcast %cst_310 : f32 to vector<16x16xf32>
    %701 = arith.mulf %700, %699 : vector<16x16xf32>
    %702 = arith.mulf %689, %701 : vector<16x16xf32>
    %c17_311 = arith.constant 17 : index
    %c0_312 = arith.constant 0 : index
    %703 = memref.load %arg14[%c17_311, %c0_312] : memref<32x2xf32, #tpu.memory_space<smem>>
    %704 = vector.broadcast %703 : f32 to vector<16x16xf32>
    %705 = arith.mulf %702, %704 : vector<16x16xf32>
    %706 = arith.addf %675, %705 : vector<16x16xf32>
    %c17_313 = arith.constant 17 : index
    %c1_314 = arith.constant 1 : index
    %707 = memref.load %arg14[%c17_313, %c1_314] : memref<32x2xf32, #tpu.memory_space<smem>>
    %708 = vector.broadcast %707 : f32 to vector<16x16xf32>
    %709 = arith.mulf %702, %708 : vector<16x16xf32>
    %710 = arith.addf %679, %709 : vector<16x16xf32>
    %c0_315 = arith.constant 0 : index
    %c18 = arith.constant 18 : index
    %711 = memref.load %arg12[%c0_315, %c18] : memref<2x32xf32, #tpu.memory_space<smem>>
    %712 = vector.broadcast %711 : f32 to vector<16x16xf32>
    %713 = arith.mulf %140, %712 : vector<16x16xf32>
    %c1_316 = arith.constant 1 : index
    %c18_317 = arith.constant 18 : index
    %714 = memref.load %arg12[%c1_316, %c18_317] : memref<2x32xf32, #tpu.memory_space<smem>>
    %715 = vector.broadcast %714 : f32 to vector<16x16xf32>
    %716 = arith.mulf %144, %715 : vector<16x16xf32>
    %717 = arith.addf %713, %716 : vector<16x16xf32>
    %c0_318 = arith.constant 0 : index
    %c18_319 = arith.constant 18 : index
    %718 = memref.load %arg13[%c0_318, %c18_319] : memref<1x32xf32, #tpu.memory_space<smem>>
    %719 = vector.broadcast %718 : f32 to vector<16x16xf32>
    %720 = arith.addf %717, %719 : vector<16x16xf32>
    %721 = arith.mulf %720, %720 : vector<16x16xf32>
    %722 = arith.mulf %720, %721 : vector<16x16xf32>
    %cst_320 = arith.constant 4.471500e-02 : f32
    %723 = vector.broadcast %cst_320 : f32 to vector<16x16xf32>
    %724 = arith.mulf %723, %722 : vector<16x16xf32>
    %725 = arith.addf %720, %724 : vector<16x16xf32>
    %cst_321 = arith.constant 0.797884583 : f32
    %726 = vector.broadcast %cst_321 : f32 to vector<16x16xf32>
    %727 = arith.mulf %726, %725 : vector<16x16xf32>
    %728 = math.tanh %727 : vector<16x16xf32>
    %cst_322 = arith.constant 1.000000e+00 : f32
    %729 = vector.broadcast %cst_322 : f32 to vector<16x16xf32>
    %730 = arith.addf %729, %728 : vector<16x16xf32>
    %cst_323 = arith.constant 5.000000e-01 : f32
    %731 = vector.broadcast %cst_323 : f32 to vector<16x16xf32>
    %732 = arith.mulf %731, %730 : vector<16x16xf32>
    %733 = arith.mulf %720, %732 : vector<16x16xf32>
    %c18_324 = arith.constant 18 : index
    %c0_325 = arith.constant 0 : index
    %734 = memref.load %arg14[%c18_324, %c0_325] : memref<32x2xf32, #tpu.memory_space<smem>>
    %735 = vector.broadcast %734 : f32 to vector<16x16xf32>
    %736 = arith.mulf %733, %735 : vector<16x16xf32>
    %737 = arith.addf %706, %736 : vector<16x16xf32>
    %c18_326 = arith.constant 18 : index
    %c1_327 = arith.constant 1 : index
    %738 = memref.load %arg14[%c18_326, %c1_327] : memref<32x2xf32, #tpu.memory_space<smem>>
    %739 = vector.broadcast %738 : f32 to vector<16x16xf32>
    %740 = arith.mulf %733, %739 : vector<16x16xf32>
    %741 = arith.addf %710, %740 : vector<16x16xf32>
    %c0_328 = arith.constant 0 : index
    %c19 = arith.constant 19 : index
    %742 = memref.load %arg12[%c0_328, %c19] : memref<2x32xf32, #tpu.memory_space<smem>>
    %743 = vector.broadcast %742 : f32 to vector<16x16xf32>
    %744 = arith.mulf %140, %743 : vector<16x16xf32>
    %c1_329 = arith.constant 1 : index
    %c19_330 = arith.constant 19 : index
    %745 = memref.load %arg12[%c1_329, %c19_330] : memref<2x32xf32, #tpu.memory_space<smem>>
    %746 = vector.broadcast %745 : f32 to vector<16x16xf32>
    %747 = arith.mulf %144, %746 : vector<16x16xf32>
    %748 = arith.addf %744, %747 : vector<16x16xf32>
    %c0_331 = arith.constant 0 : index
    %c19_332 = arith.constant 19 : index
    %749 = memref.load %arg13[%c0_331, %c19_332] : memref<1x32xf32, #tpu.memory_space<smem>>
    %750 = vector.broadcast %749 : f32 to vector<16x16xf32>
    %751 = arith.addf %748, %750 : vector<16x16xf32>
    %752 = arith.mulf %751, %751 : vector<16x16xf32>
    %753 = arith.mulf %751, %752 : vector<16x16xf32>
    %cst_333 = arith.constant 4.471500e-02 : f32
    %754 = vector.broadcast %cst_333 : f32 to vector<16x16xf32>
    %755 = arith.mulf %754, %753 : vector<16x16xf32>
    %756 = arith.addf %751, %755 : vector<16x16xf32>
    %cst_334 = arith.constant 0.797884583 : f32
    %757 = vector.broadcast %cst_334 : f32 to vector<16x16xf32>
    %758 = arith.mulf %757, %756 : vector<16x16xf32>
    %759 = math.tanh %758 : vector<16x16xf32>
    %cst_335 = arith.constant 1.000000e+00 : f32
    %760 = vector.broadcast %cst_335 : f32 to vector<16x16xf32>
    %761 = arith.addf %760, %759 : vector<16x16xf32>
    %cst_336 = arith.constant 5.000000e-01 : f32
    %762 = vector.broadcast %cst_336 : f32 to vector<16x16xf32>
    %763 = arith.mulf %762, %761 : vector<16x16xf32>
    %764 = arith.mulf %751, %763 : vector<16x16xf32>
    %c19_337 = arith.constant 19 : index
    %c0_338 = arith.constant 0 : index
    %765 = memref.load %arg14[%c19_337, %c0_338] : memref<32x2xf32, #tpu.memory_space<smem>>
    %766 = vector.broadcast %765 : f32 to vector<16x16xf32>
    %767 = arith.mulf %764, %766 : vector<16x16xf32>
    %768 = arith.addf %737, %767 : vector<16x16xf32>
    %c19_339 = arith.constant 19 : index
    %c1_340 = arith.constant 1 : index
    %769 = memref.load %arg14[%c19_339, %c1_340] : memref<32x2xf32, #tpu.memory_space<smem>>
    %770 = vector.broadcast %769 : f32 to vector<16x16xf32>
    %771 = arith.mulf %764, %770 : vector<16x16xf32>
    %772 = arith.addf %741, %771 : vector<16x16xf32>
    %c0_341 = arith.constant 0 : index
    %c20 = arith.constant 20 : index
    %773 = memref.load %arg12[%c0_341, %c20] : memref<2x32xf32, #tpu.memory_space<smem>>
    %774 = vector.broadcast %773 : f32 to vector<16x16xf32>
    %775 = arith.mulf %140, %774 : vector<16x16xf32>
    %c1_342 = arith.constant 1 : index
    %c20_343 = arith.constant 20 : index
    %776 = memref.load %arg12[%c1_342, %c20_343] : memref<2x32xf32, #tpu.memory_space<smem>>
    %777 = vector.broadcast %776 : f32 to vector<16x16xf32>
    %778 = arith.mulf %144, %777 : vector<16x16xf32>
    %779 = arith.addf %775, %778 : vector<16x16xf32>
    %c0_344 = arith.constant 0 : index
    %c20_345 = arith.constant 20 : index
    %780 = memref.load %arg13[%c0_344, %c20_345] : memref<1x32xf32, #tpu.memory_space<smem>>
    %781 = vector.broadcast %780 : f32 to vector<16x16xf32>
    %782 = arith.addf %779, %781 : vector<16x16xf32>
    %783 = arith.mulf %782, %782 : vector<16x16xf32>
    %784 = arith.mulf %782, %783 : vector<16x16xf32>
    %cst_346 = arith.constant 4.471500e-02 : f32
    %785 = vector.broadcast %cst_346 : f32 to vector<16x16xf32>
    %786 = arith.mulf %785, %784 : vector<16x16xf32>
    %787 = arith.addf %782, %786 : vector<16x16xf32>
    %cst_347 = arith.constant 0.797884583 : f32
    %788 = vector.broadcast %cst_347 : f32 to vector<16x16xf32>
    %789 = arith.mulf %788, %787 : vector<16x16xf32>
    %790 = math.tanh %789 : vector<16x16xf32>
    %cst_348 = arith.constant 1.000000e+00 : f32
    %791 = vector.broadcast %cst_348 : f32 to vector<16x16xf32>
    %792 = arith.addf %791, %790 : vector<16x16xf32>
    %cst_349 = arith.constant 5.000000e-01 : f32
    %793 = vector.broadcast %cst_349 : f32 to vector<16x16xf32>
    %794 = arith.mulf %793, %792 : vector<16x16xf32>
    %795 = arith.mulf %782, %794 : vector<16x16xf32>
    %c20_350 = arith.constant 20 : index
    %c0_351 = arith.constant 0 : index
    %796 = memref.load %arg14[%c20_350, %c0_351] : memref<32x2xf32, #tpu.memory_space<smem>>
    %797 = vector.broadcast %796 : f32 to vector<16x16xf32>
    %798 = arith.mulf %795, %797 : vector<16x16xf32>
    %799 = arith.addf %768, %798 : vector<16x16xf32>
    %c20_352 = arith.constant 20 : index
    %c1_353 = arith.constant 1 : index
    %800 = memref.load %arg14[%c20_352, %c1_353] : memref<32x2xf32, #tpu.memory_space<smem>>
    %801 = vector.broadcast %800 : f32 to vector<16x16xf32>
    %802 = arith.mulf %795, %801 : vector<16x16xf32>
    %803 = arith.addf %772, %802 : vector<16x16xf32>
    %c0_354 = arith.constant 0 : index
    %c21 = arith.constant 21 : index
    %804 = memref.load %arg12[%c0_354, %c21] : memref<2x32xf32, #tpu.memory_space<smem>>
    %805 = vector.broadcast %804 : f32 to vector<16x16xf32>
    %806 = arith.mulf %140, %805 : vector<16x16xf32>
    %c1_355 = arith.constant 1 : index
    %c21_356 = arith.constant 21 : index
    %807 = memref.load %arg12[%c1_355, %c21_356] : memref<2x32xf32, #tpu.memory_space<smem>>
    %808 = vector.broadcast %807 : f32 to vector<16x16xf32>
    %809 = arith.mulf %144, %808 : vector<16x16xf32>
    %810 = arith.addf %806, %809 : vector<16x16xf32>
    %c0_357 = arith.constant 0 : index
    %c21_358 = arith.constant 21 : index
    %811 = memref.load %arg13[%c0_357, %c21_358] : memref<1x32xf32, #tpu.memory_space<smem>>
    %812 = vector.broadcast %811 : f32 to vector<16x16xf32>
    %813 = arith.addf %810, %812 : vector<16x16xf32>
    %814 = arith.mulf %813, %813 : vector<16x16xf32>
    %815 = arith.mulf %813, %814 : vector<16x16xf32>
    %cst_359 = arith.constant 4.471500e-02 : f32
    %816 = vector.broadcast %cst_359 : f32 to vector<16x16xf32>
    %817 = arith.mulf %816, %815 : vector<16x16xf32>
    %818 = arith.addf %813, %817 : vector<16x16xf32>
    %cst_360 = arith.constant 0.797884583 : f32
    %819 = vector.broadcast %cst_360 : f32 to vector<16x16xf32>
    %820 = arith.mulf %819, %818 : vector<16x16xf32>
    %821 = math.tanh %820 : vector<16x16xf32>
    %cst_361 = arith.constant 1.000000e+00 : f32
    %822 = vector.broadcast %cst_361 : f32 to vector<16x16xf32>
    %823 = arith.addf %822, %821 : vector<16x16xf32>
    %cst_362 = arith.constant 5.000000e-01 : f32
    %824 = vector.broadcast %cst_362 : f32 to vector<16x16xf32>
    %825 = arith.mulf %824, %823 : vector<16x16xf32>
    %826 = arith.mulf %813, %825 : vector<16x16xf32>
    %c21_363 = arith.constant 21 : index
    %c0_364 = arith.constant 0 : index
    %827 = memref.load %arg14[%c21_363, %c0_364] : memref<32x2xf32, #tpu.memory_space<smem>>
    %828 = vector.broadcast %827 : f32 to vector<16x16xf32>
    %829 = arith.mulf %826, %828 : vector<16x16xf32>
    %830 = arith.addf %799, %829 : vector<16x16xf32>
    %c21_365 = arith.constant 21 : index
    %c1_366 = arith.constant 1 : index
    %831 = memref.load %arg14[%c21_365, %c1_366] : memref<32x2xf32, #tpu.memory_space<smem>>
    %832 = vector.broadcast %831 : f32 to vector<16x16xf32>
    %833 = arith.mulf %826, %832 : vector<16x16xf32>
    %834 = arith.addf %803, %833 : vector<16x16xf32>
    %c0_367 = arith.constant 0 : index
    %c22 = arith.constant 22 : index
    %835 = memref.load %arg12[%c0_367, %c22] : memref<2x32xf32, #tpu.memory_space<smem>>
    %836 = vector.broadcast %835 : f32 to vector<16x16xf32>
    %837 = arith.mulf %140, %836 : vector<16x16xf32>
    %c1_368 = arith.constant 1 : index
    %c22_369 = arith.constant 22 : index
    %838 = memref.load %arg12[%c1_368, %c22_369] : memref<2x32xf32, #tpu.memory_space<smem>>
    %839 = vector.broadcast %838 : f32 to vector<16x16xf32>
    %840 = arith.mulf %144, %839 : vector<16x16xf32>
    %841 = arith.addf %837, %840 : vector<16x16xf32>
    %c0_370 = arith.constant 0 : index
    %c22_371 = arith.constant 22 : index
    %842 = memref.load %arg13[%c0_370, %c22_371] : memref<1x32xf32, #tpu.memory_space<smem>>
    %843 = vector.broadcast %842 : f32 to vector<16x16xf32>
    %844 = arith.addf %841, %843 : vector<16x16xf32>
    %845 = arith.mulf %844, %844 : vector<16x16xf32>
    %846 = arith.mulf %844, %845 : vector<16x16xf32>
    %cst_372 = arith.constant 4.471500e-02 : f32
    %847 = vector.broadcast %cst_372 : f32 to vector<16x16xf32>
    %848 = arith.mulf %847, %846 : vector<16x16xf32>
    %849 = arith.addf %844, %848 : vector<16x16xf32>
    %cst_373 = arith.constant 0.797884583 : f32
    %850 = vector.broadcast %cst_373 : f32 to vector<16x16xf32>
    %851 = arith.mulf %850, %849 : vector<16x16xf32>
    %852 = math.tanh %851 : vector<16x16xf32>
    %cst_374 = arith.constant 1.000000e+00 : f32
    %853 = vector.broadcast %cst_374 : f32 to vector<16x16xf32>
    %854 = arith.addf %853, %852 : vector<16x16xf32>
    %cst_375 = arith.constant 5.000000e-01 : f32
    %855 = vector.broadcast %cst_375 : f32 to vector<16x16xf32>
    %856 = arith.mulf %855, %854 : vector<16x16xf32>
    %857 = arith.mulf %844, %856 : vector<16x16xf32>
    %c22_376 = arith.constant 22 : index
    %c0_377 = arith.constant 0 : index
    %858 = memref.load %arg14[%c22_376, %c0_377] : memref<32x2xf32, #tpu.memory_space<smem>>
    %859 = vector.broadcast %858 : f32 to vector<16x16xf32>
    %860 = arith.mulf %857, %859 : vector<16x16xf32>
    %861 = arith.addf %830, %860 : vector<16x16xf32>
    %c22_378 = arith.constant 22 : index
    %c1_379 = arith.constant 1 : index
    %862 = memref.load %arg14[%c22_378, %c1_379] : memref<32x2xf32, #tpu.memory_space<smem>>
    %863 = vector.broadcast %862 : f32 to vector<16x16xf32>
    %864 = arith.mulf %857, %863 : vector<16x16xf32>
    %865 = arith.addf %834, %864 : vector<16x16xf32>
    %c0_380 = arith.constant 0 : index
    %c23 = arith.constant 23 : index
    %866 = memref.load %arg12[%c0_380, %c23] : memref<2x32xf32, #tpu.memory_space<smem>>
    %867 = vector.broadcast %866 : f32 to vector<16x16xf32>
    %868 = arith.mulf %140, %867 : vector<16x16xf32>
    %c1_381 = arith.constant 1 : index
    %c23_382 = arith.constant 23 : index
    %869 = memref.load %arg12[%c1_381, %c23_382] : memref<2x32xf32, #tpu.memory_space<smem>>
    %870 = vector.broadcast %869 : f32 to vector<16x16xf32>
    %871 = arith.mulf %144, %870 : vector<16x16xf32>
    %872 = arith.addf %868, %871 : vector<16x16xf32>
    %c0_383 = arith.constant 0 : index
    %c23_384 = arith.constant 23 : index
    %873 = memref.load %arg13[%c0_383, %c23_384] : memref<1x32xf32, #tpu.memory_space<smem>>
    %874 = vector.broadcast %873 : f32 to vector<16x16xf32>
    %875 = arith.addf %872, %874 : vector<16x16xf32>
    %876 = arith.mulf %875, %875 : vector<16x16xf32>
    %877 = arith.mulf %875, %876 : vector<16x16xf32>
    %cst_385 = arith.constant 4.471500e-02 : f32
    %878 = vector.broadcast %cst_385 : f32 to vector<16x16xf32>
    %879 = arith.mulf %878, %877 : vector<16x16xf32>
    %880 = arith.addf %875, %879 : vector<16x16xf32>
    %cst_386 = arith.constant 0.797884583 : f32
    %881 = vector.broadcast %cst_386 : f32 to vector<16x16xf32>
    %882 = arith.mulf %881, %880 : vector<16x16xf32>
    %883 = math.tanh %882 : vector<16x16xf32>
    %cst_387 = arith.constant 1.000000e+00 : f32
    %884 = vector.broadcast %cst_387 : f32 to vector<16x16xf32>
    %885 = arith.addf %884, %883 : vector<16x16xf32>
    %cst_388 = arith.constant 5.000000e-01 : f32
    %886 = vector.broadcast %cst_388 : f32 to vector<16x16xf32>
    %887 = arith.mulf %886, %885 : vector<16x16xf32>
    %888 = arith.mulf %875, %887 : vector<16x16xf32>
    %c23_389 = arith.constant 23 : index
    %c0_390 = arith.constant 0 : index
    %889 = memref.load %arg14[%c23_389, %c0_390] : memref<32x2xf32, #tpu.memory_space<smem>>
    %890 = vector.broadcast %889 : f32 to vector<16x16xf32>
    %891 = arith.mulf %888, %890 : vector<16x16xf32>
    %892 = arith.addf %861, %891 : vector<16x16xf32>
    %c23_391 = arith.constant 23 : index
    %c1_392 = arith.constant 1 : index
    %893 = memref.load %arg14[%c23_391, %c1_392] : memref<32x2xf32, #tpu.memory_space<smem>>
    %894 = vector.broadcast %893 : f32 to vector<16x16xf32>
    %895 = arith.mulf %888, %894 : vector<16x16xf32>
    %896 = arith.addf %865, %895 : vector<16x16xf32>
    %c0_393 = arith.constant 0 : index
    %c24 = arith.constant 24 : index
    %897 = memref.load %arg12[%c0_393, %c24] : memref<2x32xf32, #tpu.memory_space<smem>>
    %898 = vector.broadcast %897 : f32 to vector<16x16xf32>
    %899 = arith.mulf %140, %898 : vector<16x16xf32>
    %c1_394 = arith.constant 1 : index
    %c24_395 = arith.constant 24 : index
    %900 = memref.load %arg12[%c1_394, %c24_395] : memref<2x32xf32, #tpu.memory_space<smem>>
    %901 = vector.broadcast %900 : f32 to vector<16x16xf32>
    %902 = arith.mulf %144, %901 : vector<16x16xf32>
    %903 = arith.addf %899, %902 : vector<16x16xf32>
    %c0_396 = arith.constant 0 : index
    %c24_397 = arith.constant 24 : index
    %904 = memref.load %arg13[%c0_396, %c24_397] : memref<1x32xf32, #tpu.memory_space<smem>>
    %905 = vector.broadcast %904 : f32 to vector<16x16xf32>
    %906 = arith.addf %903, %905 : vector<16x16xf32>
    %907 = arith.mulf %906, %906 : vector<16x16xf32>
    %908 = arith.mulf %906, %907 : vector<16x16xf32>
    %cst_398 = arith.constant 4.471500e-02 : f32
    %909 = vector.broadcast %cst_398 : f32 to vector<16x16xf32>
    %910 = arith.mulf %909, %908 : vector<16x16xf32>
    %911 = arith.addf %906, %910 : vector<16x16xf32>
    %cst_399 = arith.constant 0.797884583 : f32
    %912 = vector.broadcast %cst_399 : f32 to vector<16x16xf32>
    %913 = arith.mulf %912, %911 : vector<16x16xf32>
    %914 = math.tanh %913 : vector<16x16xf32>
    %cst_400 = arith.constant 1.000000e+00 : f32
    %915 = vector.broadcast %cst_400 : f32 to vector<16x16xf32>
    %916 = arith.addf %915, %914 : vector<16x16xf32>
    %cst_401 = arith.constant 5.000000e-01 : f32
    %917 = vector.broadcast %cst_401 : f32 to vector<16x16xf32>
    %918 = arith.mulf %917, %916 : vector<16x16xf32>
    %919 = arith.mulf %906, %918 : vector<16x16xf32>
    %c24_402 = arith.constant 24 : index
    %c0_403 = arith.constant 0 : index
    %920 = memref.load %arg14[%c24_402, %c0_403] : memref<32x2xf32, #tpu.memory_space<smem>>
    %921 = vector.broadcast %920 : f32 to vector<16x16xf32>
    %922 = arith.mulf %919, %921 : vector<16x16xf32>
    %923 = arith.addf %892, %922 : vector<16x16xf32>
    %c24_404 = arith.constant 24 : index
    %c1_405 = arith.constant 1 : index
    %924 = memref.load %arg14[%c24_404, %c1_405] : memref<32x2xf32, #tpu.memory_space<smem>>
    %925 = vector.broadcast %924 : f32 to vector<16x16xf32>
    %926 = arith.mulf %919, %925 : vector<16x16xf32>
    %927 = arith.addf %896, %926 : vector<16x16xf32>
    %c0_406 = arith.constant 0 : index
    %c25 = arith.constant 25 : index
    %928 = memref.load %arg12[%c0_406, %c25] : memref<2x32xf32, #tpu.memory_space<smem>>
    %929 = vector.broadcast %928 : f32 to vector<16x16xf32>
    %930 = arith.mulf %140, %929 : vector<16x16xf32>
    %c1_407 = arith.constant 1 : index
    %c25_408 = arith.constant 25 : index
    %931 = memref.load %arg12[%c1_407, %c25_408] : memref<2x32xf32, #tpu.memory_space<smem>>
    %932 = vector.broadcast %931 : f32 to vector<16x16xf32>
    %933 = arith.mulf %144, %932 : vector<16x16xf32>
    %934 = arith.addf %930, %933 : vector<16x16xf32>
    %c0_409 = arith.constant 0 : index
    %c25_410 = arith.constant 25 : index
    %935 = memref.load %arg13[%c0_409, %c25_410] : memref<1x32xf32, #tpu.memory_space<smem>>
    %936 = vector.broadcast %935 : f32 to vector<16x16xf32>
    %937 = arith.addf %934, %936 : vector<16x16xf32>
    %938 = arith.mulf %937, %937 : vector<16x16xf32>
    %939 = arith.mulf %937, %938 : vector<16x16xf32>
    %cst_411 = arith.constant 4.471500e-02 : f32
    %940 = vector.broadcast %cst_411 : f32 to vector<16x16xf32>
    %941 = arith.mulf %940, %939 : vector<16x16xf32>
    %942 = arith.addf %937, %941 : vector<16x16xf32>
    %cst_412 = arith.constant 0.797884583 : f32
    %943 = vector.broadcast %cst_412 : f32 to vector<16x16xf32>
    %944 = arith.mulf %943, %942 : vector<16x16xf32>
    %945 = math.tanh %944 : vector<16x16xf32>
    %cst_413 = arith.constant 1.000000e+00 : f32
    %946 = vector.broadcast %cst_413 : f32 to vector<16x16xf32>
    %947 = arith.addf %946, %945 : vector<16x16xf32>
    %cst_414 = arith.constant 5.000000e-01 : f32
    %948 = vector.broadcast %cst_414 : f32 to vector<16x16xf32>
    %949 = arith.mulf %948, %947 : vector<16x16xf32>
    %950 = arith.mulf %937, %949 : vector<16x16xf32>
    %c25_415 = arith.constant 25 : index
    %c0_416 = arith.constant 0 : index
    %951 = memref.load %arg14[%c25_415, %c0_416] : memref<32x2xf32, #tpu.memory_space<smem>>
    %952 = vector.broadcast %951 : f32 to vector<16x16xf32>
    %953 = arith.mulf %950, %952 : vector<16x16xf32>
    %954 = arith.addf %923, %953 : vector<16x16xf32>
    %c25_417 = arith.constant 25 : index
    %c1_418 = arith.constant 1 : index
    %955 = memref.load %arg14[%c25_417, %c1_418] : memref<32x2xf32, #tpu.memory_space<smem>>
    %956 = vector.broadcast %955 : f32 to vector<16x16xf32>
    %957 = arith.mulf %950, %956 : vector<16x16xf32>
    %958 = arith.addf %927, %957 : vector<16x16xf32>
    %c0_419 = arith.constant 0 : index
    %c26 = arith.constant 26 : index
    %959 = memref.load %arg12[%c0_419, %c26] : memref<2x32xf32, #tpu.memory_space<smem>>
    %960 = vector.broadcast %959 : f32 to vector<16x16xf32>
    %961 = arith.mulf %140, %960 : vector<16x16xf32>
    %c1_420 = arith.constant 1 : index
    %c26_421 = arith.constant 26 : index
    %962 = memref.load %arg12[%c1_420, %c26_421] : memref<2x32xf32, #tpu.memory_space<smem>>
    %963 = vector.broadcast %962 : f32 to vector<16x16xf32>
    %964 = arith.mulf %144, %963 : vector<16x16xf32>
    %965 = arith.addf %961, %964 : vector<16x16xf32>
    %c0_422 = arith.constant 0 : index
    %c26_423 = arith.constant 26 : index
    %966 = memref.load %arg13[%c0_422, %c26_423] : memref<1x32xf32, #tpu.memory_space<smem>>
    %967 = vector.broadcast %966 : f32 to vector<16x16xf32>
    %968 = arith.addf %965, %967 : vector<16x16xf32>
    %969 = arith.mulf %968, %968 : vector<16x16xf32>
    %970 = arith.mulf %968, %969 : vector<16x16xf32>
    %cst_424 = arith.constant 4.471500e-02 : f32
    %971 = vector.broadcast %cst_424 : f32 to vector<16x16xf32>
    %972 = arith.mulf %971, %970 : vector<16x16xf32>
    %973 = arith.addf %968, %972 : vector<16x16xf32>
    %cst_425 = arith.constant 0.797884583 : f32
    %974 = vector.broadcast %cst_425 : f32 to vector<16x16xf32>
    %975 = arith.mulf %974, %973 : vector<16x16xf32>
    %976 = math.tanh %975 : vector<16x16xf32>
    %cst_426 = arith.constant 1.000000e+00 : f32
    %977 = vector.broadcast %cst_426 : f32 to vector<16x16xf32>
    %978 = arith.addf %977, %976 : vector<16x16xf32>
    %cst_427 = arith.constant 5.000000e-01 : f32
    %979 = vector.broadcast %cst_427 : f32 to vector<16x16xf32>
    %980 = arith.mulf %979, %978 : vector<16x16xf32>
    %981 = arith.mulf %968, %980 : vector<16x16xf32>
    %c26_428 = arith.constant 26 : index
    %c0_429 = arith.constant 0 : index
    %982 = memref.load %arg14[%c26_428, %c0_429] : memref<32x2xf32, #tpu.memory_space<smem>>
    %983 = vector.broadcast %982 : f32 to vector<16x16xf32>
    %984 = arith.mulf %981, %983 : vector<16x16xf32>
    %985 = arith.addf %954, %984 : vector<16x16xf32>
    %c26_430 = arith.constant 26 : index
    %c1_431 = arith.constant 1 : index
    %986 = memref.load %arg14[%c26_430, %c1_431] : memref<32x2xf32, #tpu.memory_space<smem>>
    %987 = vector.broadcast %986 : f32 to vector<16x16xf32>
    %988 = arith.mulf %981, %987 : vector<16x16xf32>
    %989 = arith.addf %958, %988 : vector<16x16xf32>
    %c0_432 = arith.constant 0 : index
    %c27 = arith.constant 27 : index
    %990 = memref.load %arg12[%c0_432, %c27] : memref<2x32xf32, #tpu.memory_space<smem>>
    %991 = vector.broadcast %990 : f32 to vector<16x16xf32>
    %992 = arith.mulf %140, %991 : vector<16x16xf32>
    %c1_433 = arith.constant 1 : index
    %c27_434 = arith.constant 27 : index
    %993 = memref.load %arg12[%c1_433, %c27_434] : memref<2x32xf32, #tpu.memory_space<smem>>
    %994 = vector.broadcast %993 : f32 to vector<16x16xf32>
    %995 = arith.mulf %144, %994 : vector<16x16xf32>
    %996 = arith.addf %992, %995 : vector<16x16xf32>
    %c0_435 = arith.constant 0 : index
    %c27_436 = arith.constant 27 : index
    %997 = memref.load %arg13[%c0_435, %c27_436] : memref<1x32xf32, #tpu.memory_space<smem>>
    %998 = vector.broadcast %997 : f32 to vector<16x16xf32>
    %999 = arith.addf %996, %998 : vector<16x16xf32>
    %1000 = arith.mulf %999, %999 : vector<16x16xf32>
    %1001 = arith.mulf %999, %1000 : vector<16x16xf32>
    %cst_437 = arith.constant 4.471500e-02 : f32
    %1002 = vector.broadcast %cst_437 : f32 to vector<16x16xf32>
    %1003 = arith.mulf %1002, %1001 : vector<16x16xf32>
    %1004 = arith.addf %999, %1003 : vector<16x16xf32>
    %cst_438 = arith.constant 0.797884583 : f32
    %1005 = vector.broadcast %cst_438 : f32 to vector<16x16xf32>
    %1006 = arith.mulf %1005, %1004 : vector<16x16xf32>
    %1007 = math.tanh %1006 : vector<16x16xf32>
    %cst_439 = arith.constant 1.000000e+00 : f32
    %1008 = vector.broadcast %cst_439 : f32 to vector<16x16xf32>
    %1009 = arith.addf %1008, %1007 : vector<16x16xf32>
    %cst_440 = arith.constant 5.000000e-01 : f32
    %1010 = vector.broadcast %cst_440 : f32 to vector<16x16xf32>
    %1011 = arith.mulf %1010, %1009 : vector<16x16xf32>
    %1012 = arith.mulf %999, %1011 : vector<16x16xf32>
    %c27_441 = arith.constant 27 : index
    %c0_442 = arith.constant 0 : index
    %1013 = memref.load %arg14[%c27_441, %c0_442] : memref<32x2xf32, #tpu.memory_space<smem>>
    %1014 = vector.broadcast %1013 : f32 to vector<16x16xf32>
    %1015 = arith.mulf %1012, %1014 : vector<16x16xf32>
    %1016 = arith.addf %985, %1015 : vector<16x16xf32>
    %c27_443 = arith.constant 27 : index
    %c1_444 = arith.constant 1 : index
    %1017 = memref.load %arg14[%c27_443, %c1_444] : memref<32x2xf32, #tpu.memory_space<smem>>
    %1018 = vector.broadcast %1017 : f32 to vector<16x16xf32>
    %1019 = arith.mulf %1012, %1018 : vector<16x16xf32>
    %1020 = arith.addf %989, %1019 : vector<16x16xf32>
    %c0_445 = arith.constant 0 : index
    %c28 = arith.constant 28 : index
    %1021 = memref.load %arg12[%c0_445, %c28] : memref<2x32xf32, #tpu.memory_space<smem>>
    %1022 = vector.broadcast %1021 : f32 to vector<16x16xf32>
    %1023 = arith.mulf %140, %1022 : vector<16x16xf32>
    %c1_446 = arith.constant 1 : index
    %c28_447 = arith.constant 28 : index
    %1024 = memref.load %arg12[%c1_446, %c28_447] : memref<2x32xf32, #tpu.memory_space<smem>>
    %1025 = vector.broadcast %1024 : f32 to vector<16x16xf32>
    %1026 = arith.mulf %144, %1025 : vector<16x16xf32>
    %1027 = arith.addf %1023, %1026 : vector<16x16xf32>
    %c0_448 = arith.constant 0 : index
    %c28_449 = arith.constant 28 : index
    %1028 = memref.load %arg13[%c0_448, %c28_449] : memref<1x32xf32, #tpu.memory_space<smem>>
    %1029 = vector.broadcast %1028 : f32 to vector<16x16xf32>
    %1030 = arith.addf %1027, %1029 : vector<16x16xf32>
    %1031 = arith.mulf %1030, %1030 : vector<16x16xf32>
    %1032 = arith.mulf %1030, %1031 : vector<16x16xf32>
    %cst_450 = arith.constant 4.471500e-02 : f32
    %1033 = vector.broadcast %cst_450 : f32 to vector<16x16xf32>
    %1034 = arith.mulf %1033, %1032 : vector<16x16xf32>
    %1035 = arith.addf %1030, %1034 : vector<16x16xf32>
    %cst_451 = arith.constant 0.797884583 : f32
    %1036 = vector.broadcast %cst_451 : f32 to vector<16x16xf32>
    %1037 = arith.mulf %1036, %1035 : vector<16x16xf32>
    %1038 = math.tanh %1037 : vector<16x16xf32>
    %cst_452 = arith.constant 1.000000e+00 : f32
    %1039 = vector.broadcast %cst_452 : f32 to vector<16x16xf32>
    %1040 = arith.addf %1039, %1038 : vector<16x16xf32>
    %cst_453 = arith.constant 5.000000e-01 : f32
    %1041 = vector.broadcast %cst_453 : f32 to vector<16x16xf32>
    %1042 = arith.mulf %1041, %1040 : vector<16x16xf32>
    %1043 = arith.mulf %1030, %1042 : vector<16x16xf32>
    %c28_454 = arith.constant 28 : index
    %c0_455 = arith.constant 0 : index
    %1044 = memref.load %arg14[%c28_454, %c0_455] : memref<32x2xf32, #tpu.memory_space<smem>>
    %1045 = vector.broadcast %1044 : f32 to vector<16x16xf32>
    %1046 = arith.mulf %1043, %1045 : vector<16x16xf32>
    %1047 = arith.addf %1016, %1046 : vector<16x16xf32>
    %c28_456 = arith.constant 28 : index
    %c1_457 = arith.constant 1 : index
    %1048 = memref.load %arg14[%c28_456, %c1_457] : memref<32x2xf32, #tpu.memory_space<smem>>
    %1049 = vector.broadcast %1048 : f32 to vector<16x16xf32>
    %1050 = arith.mulf %1043, %1049 : vector<16x16xf32>
    %1051 = arith.addf %1020, %1050 : vector<16x16xf32>
    %c0_458 = arith.constant 0 : index
    %c29 = arith.constant 29 : index
    %1052 = memref.load %arg12[%c0_458, %c29] : memref<2x32xf32, #tpu.memory_space<smem>>
    %1053 = vector.broadcast %1052 : f32 to vector<16x16xf32>
    %1054 = arith.mulf %140, %1053 : vector<16x16xf32>
    %c1_459 = arith.constant 1 : index
    %c29_460 = arith.constant 29 : index
    %1055 = memref.load %arg12[%c1_459, %c29_460] : memref<2x32xf32, #tpu.memory_space<smem>>
    %1056 = vector.broadcast %1055 : f32 to vector<16x16xf32>
    %1057 = arith.mulf %144, %1056 : vector<16x16xf32>
    %1058 = arith.addf %1054, %1057 : vector<16x16xf32>
    %c0_461 = arith.constant 0 : index
    %c29_462 = arith.constant 29 : index
    %1059 = memref.load %arg13[%c0_461, %c29_462] : memref<1x32xf32, #tpu.memory_space<smem>>
    %1060 = vector.broadcast %1059 : f32 to vector<16x16xf32>
    %1061 = arith.addf %1058, %1060 : vector<16x16xf32>
    %1062 = arith.mulf %1061, %1061 : vector<16x16xf32>
    %1063 = arith.mulf %1061, %1062 : vector<16x16xf32>
    %cst_463 = arith.constant 4.471500e-02 : f32
    %1064 = vector.broadcast %cst_463 : f32 to vector<16x16xf32>
    %1065 = arith.mulf %1064, %1063 : vector<16x16xf32>
    %1066 = arith.addf %1061, %1065 : vector<16x16xf32>
    %cst_464 = arith.constant 0.797884583 : f32
    %1067 = vector.broadcast %cst_464 : f32 to vector<16x16xf32>
    %1068 = arith.mulf %1067, %1066 : vector<16x16xf32>
    %1069 = math.tanh %1068 : vector<16x16xf32>
    %cst_465 = arith.constant 1.000000e+00 : f32
    %1070 = vector.broadcast %cst_465 : f32 to vector<16x16xf32>
    %1071 = arith.addf %1070, %1069 : vector<16x16xf32>
    %cst_466 = arith.constant 5.000000e-01 : f32
    %1072 = vector.broadcast %cst_466 : f32 to vector<16x16xf32>
    %1073 = arith.mulf %1072, %1071 : vector<16x16xf32>
    %1074 = arith.mulf %1061, %1073 : vector<16x16xf32>
    %c29_467 = arith.constant 29 : index
    %c0_468 = arith.constant 0 : index
    %1075 = memref.load %arg14[%c29_467, %c0_468] : memref<32x2xf32, #tpu.memory_space<smem>>
    %1076 = vector.broadcast %1075 : f32 to vector<16x16xf32>
    %1077 = arith.mulf %1074, %1076 : vector<16x16xf32>
    %1078 = arith.addf %1047, %1077 : vector<16x16xf32>
    %c29_469 = arith.constant 29 : index
    %c1_470 = arith.constant 1 : index
    %1079 = memref.load %arg14[%c29_469, %c1_470] : memref<32x2xf32, #tpu.memory_space<smem>>
    %1080 = vector.broadcast %1079 : f32 to vector<16x16xf32>
    %1081 = arith.mulf %1074, %1080 : vector<16x16xf32>
    %1082 = arith.addf %1051, %1081 : vector<16x16xf32>
    %c0_471 = arith.constant 0 : index
    %c30 = arith.constant 30 : index
    %1083 = memref.load %arg12[%c0_471, %c30] : memref<2x32xf32, #tpu.memory_space<smem>>
    %1084 = vector.broadcast %1083 : f32 to vector<16x16xf32>
    %1085 = arith.mulf %140, %1084 : vector<16x16xf32>
    %c1_472 = arith.constant 1 : index
    %c30_473 = arith.constant 30 : index
    %1086 = memref.load %arg12[%c1_472, %c30_473] : memref<2x32xf32, #tpu.memory_space<smem>>
    %1087 = vector.broadcast %1086 : f32 to vector<16x16xf32>
    %1088 = arith.mulf %144, %1087 : vector<16x16xf32>
    %1089 = arith.addf %1085, %1088 : vector<16x16xf32>
    %c0_474 = arith.constant 0 : index
    %c30_475 = arith.constant 30 : index
    %1090 = memref.load %arg13[%c0_474, %c30_475] : memref<1x32xf32, #tpu.memory_space<smem>>
    %1091 = vector.broadcast %1090 : f32 to vector<16x16xf32>
    %1092 = arith.addf %1089, %1091 : vector<16x16xf32>
    %1093 = arith.mulf %1092, %1092 : vector<16x16xf32>
    %1094 = arith.mulf %1092, %1093 : vector<16x16xf32>
    %cst_476 = arith.constant 4.471500e-02 : f32
    %1095 = vector.broadcast %cst_476 : f32 to vector<16x16xf32>
    %1096 = arith.mulf %1095, %1094 : vector<16x16xf32>
    %1097 = arith.addf %1092, %1096 : vector<16x16xf32>
    %cst_477 = arith.constant 0.797884583 : f32
    %1098 = vector.broadcast %cst_477 : f32 to vector<16x16xf32>
    %1099 = arith.mulf %1098, %1097 : vector<16x16xf32>
    %1100 = math.tanh %1099 : vector<16x16xf32>
    %cst_478 = arith.constant 1.000000e+00 : f32
    %1101 = vector.broadcast %cst_478 : f32 to vector<16x16xf32>
    %1102 = arith.addf %1101, %1100 : vector<16x16xf32>
    %cst_479 = arith.constant 5.000000e-01 : f32
    %1103 = vector.broadcast %cst_479 : f32 to vector<16x16xf32>
    %1104 = arith.mulf %1103, %1102 : vector<16x16xf32>
    %1105 = arith.mulf %1092, %1104 : vector<16x16xf32>
    %c30_480 = arith.constant 30 : index
    %c0_481 = arith.constant 0 : index
    %1106 = memref.load %arg14[%c30_480, %c0_481] : memref<32x2xf32, #tpu.memory_space<smem>>
    %1107 = vector.broadcast %1106 : f32 to vector<16x16xf32>
    %1108 = arith.mulf %1105, %1107 : vector<16x16xf32>
    %1109 = arith.addf %1078, %1108 : vector<16x16xf32>
    %c30_482 = arith.constant 30 : index
    %c1_483 = arith.constant 1 : index
    %1110 = memref.load %arg14[%c30_482, %c1_483] : memref<32x2xf32, #tpu.memory_space<smem>>
    %1111 = vector.broadcast %1110 : f32 to vector<16x16xf32>
    %1112 = arith.mulf %1105, %1111 : vector<16x16xf32>
    %1113 = arith.addf %1082, %1112 : vector<16x16xf32>
    %c0_484 = arith.constant 0 : index
    %c31 = arith.constant 31 : index
    %1114 = memref.load %arg12[%c0_484, %c31] : memref<2x32xf32, #tpu.memory_space<smem>>
    %1115 = vector.broadcast %1114 : f32 to vector<16x16xf32>
    %1116 = arith.mulf %140, %1115 : vector<16x16xf32>
    %c1_485 = arith.constant 1 : index
    %c31_486 = arith.constant 31 : index
    %1117 = memref.load %arg12[%c1_485, %c31_486] : memref<2x32xf32, #tpu.memory_space<smem>>
    %1118 = vector.broadcast %1117 : f32 to vector<16x16xf32>
    %1119 = arith.mulf %144, %1118 : vector<16x16xf32>
    %1120 = arith.addf %1116, %1119 : vector<16x16xf32>
    %c0_487 = arith.constant 0 : index
    %c31_488 = arith.constant 31 : index
    %1121 = memref.load %arg13[%c0_487, %c31_488] : memref<1x32xf32, #tpu.memory_space<smem>>
    %1122 = vector.broadcast %1121 : f32 to vector<16x16xf32>
    %1123 = arith.addf %1120, %1122 : vector<16x16xf32>
    %1124 = arith.mulf %1123, %1123 : vector<16x16xf32>
    %1125 = arith.mulf %1123, %1124 : vector<16x16xf32>
    %cst_489 = arith.constant 4.471500e-02 : f32
    %1126 = vector.broadcast %cst_489 : f32 to vector<16x16xf32>
    %1127 = arith.mulf %1126, %1125 : vector<16x16xf32>
    %1128 = arith.addf %1123, %1127 : vector<16x16xf32>
    %cst_490 = arith.constant 0.797884583 : f32
    %1129 = vector.broadcast %cst_490 : f32 to vector<16x16xf32>
    %1130 = arith.mulf %1129, %1128 : vector<16x16xf32>
    %1131 = math.tanh %1130 : vector<16x16xf32>
    %cst_491 = arith.constant 1.000000e+00 : f32
    %1132 = vector.broadcast %cst_491 : f32 to vector<16x16xf32>
    %1133 = arith.addf %1132, %1131 : vector<16x16xf32>
    %cst_492 = arith.constant 5.000000e-01 : f32
    %1134 = vector.broadcast %cst_492 : f32 to vector<16x16xf32>
    %1135 = arith.mulf %1134, %1133 : vector<16x16xf32>
    %1136 = arith.mulf %1123, %1135 : vector<16x16xf32>
    %c31_493 = arith.constant 31 : index
    %c0_494 = arith.constant 0 : index
    %1137 = memref.load %arg14[%c31_493, %c0_494] : memref<32x2xf32, #tpu.memory_space<smem>>
    %1138 = vector.broadcast %1137 : f32 to vector<16x16xf32>
    %1139 = arith.mulf %1136, %1138 : vector<16x16xf32>
    %1140 = arith.addf %1109, %1139 : vector<16x16xf32>
    %c31_495 = arith.constant 31 : index
    %c1_496 = arith.constant 1 : index
    %1141 = memref.load %arg14[%c31_495, %c1_496] : memref<32x2xf32, #tpu.memory_space<smem>>
    %1142 = vector.broadcast %1141 : f32 to vector<16x16xf32>
    %1143 = arith.mulf %1136, %1142 : vector<16x16xf32>
    %1144 = arith.addf %1113, %1143 : vector<16x16xf32>
    %1145 = vector.extract_strided_slice %5 {offsets = [0, 0], sizes = [16, 16], strides = [1, 1]} : vector<64x16xf32> to vector<16x16xf32>
    %1146 = vector.extract_strided_slice %7 {offsets = [0, 0], sizes = [16, 16], strides = [1, 1]} : vector<64x16xf32> to vector<16x16xf32>
    %1147 = arith.mulf %1140, %1145 : vector<16x16xf32>
    %1148 = arith.mulf %1144, %1146 : vector<16x16xf32>
    %1149 = arith.subf %1147, %1148 : vector<16x16xf32>
    %c0_497 = arith.constant 0 : index
    %c0_498 = arith.constant 0 : index
    %c0_499 = arith.constant 0 : index
    %1150 = vector.load %arg17[%c0_497, %c0_498, %c0_499] : memref<1x64x16xf32, #tpu.memory_space<vmem>>, vector<1x16x16xf32>
    %1151 = vector.shape_cast %1150 : vector<1x16x16xf32> to vector<16x16xf32>
    %1152 = vector.shape_cast %1149 : vector<16x16xf32> to vector<1x16x16xf32>
    tpu.vector_store %arg17[%c0_497, %c0_498, %c0_499], %1152 {strides = array<i32>} : memref<1x64x16xf32, #tpu.memory_space<vmem>>, vector<1x16x16xf32>,
    %1153 = arith.mulf %1140, %1146 : vector<16x16xf32>
    %1154 = arith.mulf %1144, %1145 : vector<16x16xf32>
    %1155 = arith.addf %1153, %1154 : vector<16x16xf32>
    %c0_500 = arith.constant 0 : index
    %c0_501 = arith.constant 0 : index
    %c0_502 = arith.constant 0 : index
    %1156 = vector.load %arg18[%c0_500, %c0_501, %c0_502] : memref<1x64x16xf32, #tpu.memory_space<vmem>>, vector<1x16x16xf32>
    %1157 = vector.shape_cast %1156 : vector<1x16x16xf32> to vector<16x16xf32>
    %1158 = vector.shape_cast %1155 : vector<16x16xf32> to vector<1x16x16xf32>
    tpu.vector_store %arg18[%c0_500, %c0_501, %c0_502], %1158 {strides = array<i32>} : memref<1x64x16xf32, #tpu.memory_space<vmem>>, vector<1x16x16xf32>,
    %1159 = vector.extract_strided_slice %5 {offsets = [16, 0], sizes = [16, 16], strides = [1, 1]} : vector<64x16xf32> to vector<16x16xf32>
    %1160 = vector.extract_strided_slice %7 {offsets = [16, 0], sizes = [16, 16], strides = [1, 1]} : vector<64x16xf32> to vector<16x16xf32>
    %1161 = arith.mulf %1140, %1159 : vector<16x16xf32>
    %1162 = arith.mulf %1144, %1160 : vector<16x16xf32>
    %1163 = arith.subf %1161, %1162 : vector<16x16xf32>
    %c0_503 = arith.constant 0 : index
    %c16_504 = arith.constant 16 : index
    %c0_505 = arith.constant 0 : index
    %1164 = vector.load %arg17[%c0_503, %c16_504, %c0_505] : memref<1x64x16xf32, #tpu.memory_space<vmem>>, vector<1x16x16xf32>
    %1165 = vector.shape_cast %1164 : vector<1x16x16xf32> to vector<16x16xf32>
    %1166 = vector.shape_cast %1163 : vector<16x16xf32> to vector<1x16x16xf32>
    tpu.vector_store %arg17[%c0_503, %c16_504, %c0_505], %1166 {strides = array<i32>} : memref<1x64x16xf32, #tpu.memory_space<vmem>>, vector<1x16x16xf32>,
    %1167 = arith.mulf %1140, %1160 : vector<16x16xf32>
    %1168 = arith.mulf %1144, %1159 : vector<16x16xf32>
    %1169 = arith.addf %1167, %1168 : vector<16x16xf32>
    %c0_506 = arith.constant 0 : index
    %c16_507 = arith.constant 16 : index
    %c0_508 = arith.constant 0 : index
    %1170 = vector.load %arg18[%c0_506, %c16_507, %c0_508] : memref<1x64x16xf32, #tpu.memory_space<vmem>>, vector<1x16x16xf32>
    %1171 = vector.shape_cast %1170 : vector<1x16x16xf32> to vector<16x16xf32>
    %1172 = vector.shape_cast %1169 : vector<16x16xf32> to vector<1x16x16xf32>
    tpu.vector_store %arg18[%c0_506, %c16_507, %c0_508], %1172 {strides = array<i32>} : memref<1x64x16xf32, #tpu.memory_space<vmem>>, vector<1x16x16xf32>,
    %1173 = vector.extract_strided_slice %5 {offsets = [32, 0], sizes = [16, 16], strides = [1, 1]} : vector<64x16xf32> to vector<16x16xf32>
    %1174 = vector.extract_strided_slice %7 {offsets = [32, 0], sizes = [16, 16], strides = [1, 1]} : vector<64x16xf32> to vector<16x16xf32>
    %1175 = arith.mulf %1140, %1173 : vector<16x16xf32>
    %1176 = arith.mulf %1144, %1174 : vector<16x16xf32>
    %1177 = arith.subf %1175, %1176 : vector<16x16xf32>
    %c0_509 = arith.constant 0 : index
    %c32 = arith.constant 32 : index
    %c0_510 = arith.constant 0 : index
    %1178 = vector.load %arg17[%c0_509, %c32, %c0_510] : memref<1x64x16xf32, #tpu.memory_space<vmem>>, vector<1x16x16xf32>
    %1179 = vector.shape_cast %1178 : vector<1x16x16xf32> to vector<16x16xf32>
    %1180 = vector.shape_cast %1177 : vector<16x16xf32> to vector<1x16x16xf32>
    tpu.vector_store %arg17[%c0_509, %c32, %c0_510], %1180 {strides = array<i32>} : memref<1x64x16xf32, #tpu.memory_space<vmem>>, vector<1x16x16xf32>,
    %1181 = arith.mulf %1140, %1174 : vector<16x16xf32>
    %1182 = arith.mulf %1144, %1173 : vector<16x16xf32>
    %1183 = arith.addf %1181, %1182 : vector<16x16xf32>
    %c0_511 = arith.constant 0 : index
    %c32_512 = arith.constant 32 : index
    %c0_513 = arith.constant 0 : index
    %1184 = vector.load %arg18[%c0_511, %c32_512, %c0_513] : memref<1x64x16xf32, #tpu.memory_space<vmem>>, vector<1x16x16xf32>
    %1185 = vector.shape_cast %1184 : vector<1x16x16xf32> to vector<16x16xf32>
    %1186 = vector.shape_cast %1183 : vector<16x16xf32> to vector<1x16x16xf32>
    tpu.vector_store %arg18[%c0_511, %c32_512, %c0_513], %1186 {strides = array<i32>} : memref<1x64x16xf32, #tpu.memory_space<vmem>>, vector<1x16x16xf32>,
    %1187 = vector.extract_strided_slice %5 {offsets = [48, 0], sizes = [16, 16], strides = [1, 1]} : vector<64x16xf32> to vector<16x16xf32>
    %1188 = vector.extract_strided_slice %7 {offsets = [48, 0], sizes = [16, 16], strides = [1, 1]} : vector<64x16xf32> to vector<16x16xf32>
    %1189 = arith.mulf %1140, %1187 : vector<16x16xf32>
    %1190 = arith.mulf %1144, %1188 : vector<16x16xf32>
    %1191 = arith.subf %1189, %1190 : vector<16x16xf32>
    %c0_514 = arith.constant 0 : index
    %c48 = arith.constant 48 : index
    %c0_515 = arith.constant 0 : index
    %1192 = vector.load %arg17[%c0_514, %c48, %c0_515] : memref<1x64x16xf32, #tpu.memory_space<vmem>>, vector<1x16x16xf32>
    %1193 = vector.shape_cast %1192 : vector<1x16x16xf32> to vector<16x16xf32>
    %1194 = vector.shape_cast %1191 : vector<16x16xf32> to vector<1x16x16xf32>
    tpu.vector_store %arg17[%c0_514, %c48, %c0_515], %1194 {strides = array<i32>} : memref<1x64x16xf32, #tpu.memory_space<vmem>>, vector<1x16x16xf32>,
    %1195 = arith.mulf %1140, %1188 : vector<16x16xf32>
    %1196 = arith.mulf %1144, %1187 : vector<16x16xf32>
    %1197 = arith.addf %1195, %1196 : vector<16x16xf32>
    %c0_516 = arith.constant 0 : index
    %c48_517 = arith.constant 48 : index
    %c0_518 = arith.constant 0 : index
    %1198 = vector.load %arg18[%c0_516, %c48_517, %c0_518] : memref<1x64x16xf32, #tpu.memory_space<vmem>>, vector<1x16x16xf32>
    %1199 = vector.shape_cast %1198 : vector<1x16x16xf32> to vector<16x16xf32>
    %1200 = vector.shape_cast %1197 : vector<16x16xf32> to vector<1x16x16xf32>
    tpu.vector_store %arg18[%c0_516, %c48_517, %c0_518], %1200 {strides = array<i32>} : memref<1x64x16xf32, #tpu.memory_space<vmem>>, vector<1x16x16xf32>,
    %c0_519 = arith.constant 0 : index
    %c0_520 = arith.constant 0 : index
    %c0_521 = arith.constant 0 : index
    %1201 = vector.load %arg17[%c0_519, %c0_520, %c0_521] : memref<1x64x16xf32, #tpu.memory_space<vmem>>, vector<1x64x16xf32>
    %1202 = vector.shape_cast %1201 : vector<1x64x16xf32> to vector<64x16xf32>
    %c0_522 = arith.constant 0 : index
    %c0_523 = arith.constant 0 : index
    %c0_524 = arith.constant 0 : index
    %1203 = vector.load %arg18[%c0_522, %c0_523, %c0_524] : memref<1x64x16xf32, #tpu.memory_space<vmem>>, vector<1x64x16xf32>
    %1204 = vector.shape_cast %1203 : vector<1x64x16xf32> to vector<64x16xf32>
    %1205 = arith.truncf %1202 : vector<64x16xf32> to vector<64x16xbf16>
    %1206 = arith.truncf %1204 : vector<64x16xf32> to vector<64x16xbf16>
    %1207 = arith.addf %1202, %1204 : vector<64x16xf32>
    %1208 = arith.truncf %1207 : vector<64x16xf32> to vector<64x16xbf16>
    %cst_525 = arith.constant dense<0.000000e+00> : vector<64x16xf32>
    %1209 = tpu.matmul %1205, %42, %cst_525 {dimension_numbers = #tpu.dot_dimension_numbers<[1], [0], [0], [1], [0, 0, 1, 1], [], []>} : vector<64x16xbf16>, vector<16x16xbf16>, vector<64x16xf32> -> vector<64x16xf32>
    %cst_526 = arith.constant dense<0.000000e+00> : vector<64x16xf32>
    %1210 = tpu.matmul %1206, %44, %cst_526 {dimension_numbers = #tpu.dot_dimension_numbers<[1], [0], [0], [1], [0, 0, 1, 1], [], []>} : vector<64x16xbf16>, vector<16x16xbf16>, vector<64x16xf32> -> vector<64x16xf32>
    %cst_527 = arith.constant dense<0.000000e+00> : vector<64x16xf32>
    %1211 = tpu.matmul %1208, %46, %cst_527 {dimension_numbers = #tpu.dot_dimension_numbers<[1], [0], [0], [1], [0, 0, 1, 1], [], []>} : vector<64x16xbf16>, vector<16x16xbf16>, vector<64x16xf32> -> vector<64x16xf32>
    %1212 = arith.subf %1209, %1210 : vector<64x16xf32>
    %1213 = arith.subf %1211, %1209 : vector<64x16xf32>
    %1214 = arith.subf %1213, %1210 : vector<64x16xf32>
    %1215 = arith.truncf %1212 : vector<64x16xf32> to vector<64x16xbf16>
    %1216 = arith.truncf %1214 : vector<64x16xf32> to vector<64x16xbf16>
    %1217 = arith.addf %1212, %1214 : vector<64x16xf32>
    %1218 = arith.truncf %1217 : vector<64x16xf32> to vector<64x16xbf16>
    %1219 = vector.extract_strided_slice %1215 {offsets = [0, 0], sizes = [16, 16], strides = [1, 1]} : vector<64x16xbf16> to vector<16x16xbf16>
    %1220 = vector.extract_strided_slice %1216 {offsets = [0, 0], sizes = [16, 16], strides = [1, 1]} : vector<64x16xbf16> to vector<16x16xbf16>
    %1221 = vector.extract_strided_slice %1218 {offsets = [0, 0], sizes = [16, 16], strides = [1, 1]} : vector<64x16xbf16> to vector<16x16xbf16>
    %cst_528 = arith.constant dense<0.000000e+00> : vector<16x16xf32>
    %1222 = tpu.matmul %48, %1219, %cst_528 {dimension_numbers = #tpu.dot_dimension_numbers<[1], [0], [0], [1], [0, 0, 1, 1], [], []>} : vector<16x16xbf16>, vector<16x16xbf16>, vector<16x16xf32> -> vector<16x16xf32>
    %cst_529 = arith.constant dense<0.000000e+00> : vector<16x16xf32>
    %1223 = tpu.matmul %50, %1220, %cst_529 {dimension_numbers = #tpu.dot_dimension_numbers<[1], [0], [0], [1], [0, 0, 1, 1], [], []>} : vector<16x16xbf16>, vector<16x16xbf16>, vector<16x16xf32> -> vector<16x16xf32>
    %cst_530 = arith.constant dense<0.000000e+00> : vector<16x16xf32>
    %1224 = tpu.matmul %52, %1221, %cst_530 {dimension_numbers = #tpu.dot_dimension_numbers<[1], [0], [0], [1], [0, 0, 1, 1], [], []>} : vector<16x16xbf16>, vector<16x16xbf16>, vector<16x16xf32> -> vector<16x16xf32>
    %1225 = arith.subf %1222, %1223 : vector<16x16xf32>
    %1226 = arith.subf %1224, %1222 : vector<16x16xf32>
    %1227 = arith.subf %1226, %1223 : vector<16x16xf32>
    %1228 = vector.extract_strided_slice %1 {offsets = [0, 0], sizes = [16, 16], strides = [1, 1]} : vector<64x16xf32> to vector<16x16xf32>
    %1229 = vector.extract_strided_slice %21 {offsets = [0, 0], sizes = [16, 16], strides = [1, 1]} : vector<64x16xf32> to vector<16x16xf32>
    %1230 = arith.subf %1228, %1229 : vector<16x16xf32>
    %1231 = arith.subf %1230, %1225 : vector<16x16xf32>
    %c0_531 = arith.constant 0 : index
    %c0_532 = arith.constant 0 : index
    %c0_533 = arith.constant 0 : index
    %1232 = vector.load %arg17[%c0_531, %c0_532, %c0_533] : memref<1x64x16xf32, #tpu.memory_space<vmem>>, vector<1x16x16xf32>
    %1233 = vector.shape_cast %1232 : vector<1x16x16xf32> to vector<16x16xf32>
    %1234 = vector.shape_cast %1231 : vector<16x16xf32> to vector<1x16x16xf32>
    tpu.vector_store %arg17[%c0_531, %c0_532, %c0_533], %1234 {strides = array<i32>} : memref<1x64x16xf32, #tpu.memory_space<vmem>>, vector<1x16x16xf32>,
    %1235 = vector.extract_strided_slice %3 {offsets = [0, 0], sizes = [16, 16], strides = [1, 1]} : vector<64x16xf32> to vector<16x16xf32>
    %1236 = vector.extract_strided_slice %28 {offsets = [0, 0], sizes = [16, 16], strides = [1, 1]} : vector<64x16xf32> to vector<16x16xf32>
    %1237 = arith.subf %1235, %1236 : vector<16x16xf32>
    %1238 = arith.subf %1237, %1227 : vector<16x16xf32>
    %c0_534 = arith.constant 0 : index
    %c0_535 = arith.constant 0 : index
    %c0_536 = arith.constant 0 : index
    %1239 = vector.load %arg18[%c0_534, %c0_535, %c0_536] : memref<1x64x16xf32, #tpu.memory_space<vmem>>, vector<1x16x16xf32>
    %1240 = vector.shape_cast %1239 : vector<1x16x16xf32> to vector<16x16xf32>
    %1241 = vector.shape_cast %1238 : vector<16x16xf32> to vector<1x16x16xf32>
    tpu.vector_store %arg18[%c0_534, %c0_535, %c0_536], %1241 {strides = array<i32>} : memref<1x64x16xf32, #tpu.memory_space<vmem>>, vector<1x16x16xf32>,
    %1242 = vector.extract_strided_slice %1215 {offsets = [16, 0], sizes = [16, 16], strides = [1, 1]} : vector<64x16xbf16> to vector<16x16xbf16>
    %1243 = vector.extract_strided_slice %1216 {offsets = [16, 0], sizes = [16, 16], strides = [1, 1]} : vector<64x16xbf16> to vector<16x16xbf16>
    %1244 = vector.extract_strided_slice %1218 {offsets = [16, 0], sizes = [16, 16], strides = [1, 1]} : vector<64x16xbf16> to vector<16x16xbf16>
    %cst_537 = arith.constant dense<0.000000e+00> : vector<16x16xf32>
    %1245 = tpu.matmul %48, %1242, %cst_537 {dimension_numbers = #tpu.dot_dimension_numbers<[1], [0], [0], [1], [0, 0, 1, 1], [], []>} : vector<16x16xbf16>, vector<16x16xbf16>, vector<16x16xf32> -> vector<16x16xf32>
    %cst_538 = arith.constant dense<0.000000e+00> : vector<16x16xf32>
    %1246 = tpu.matmul %50, %1243, %cst_538 {dimension_numbers = #tpu.dot_dimension_numbers<[1], [0], [0], [1], [0, 0, 1, 1], [], []>} : vector<16x16xbf16>, vector<16x16xbf16>, vector<16x16xf32> -> vector<16x16xf32>
    %cst_539 = arith.constant dense<0.000000e+00> : vector<16x16xf32>
    %1247 = tpu.matmul %52, %1244, %cst_539 {dimension_numbers = #tpu.dot_dimension_numbers<[1], [0], [0], [1], [0, 0, 1, 1], [], []>} : vector<16x16xbf16>, vector<16x16xbf16>, vector<16x16xf32> -> vector<16x16xf32>
    %1248 = arith.subf %1245, %1246 : vector<16x16xf32>
    %1249 = arith.subf %1247, %1245 : vector<16x16xf32>
    %1250 = arith.subf %1249, %1246 : vector<16x16xf32>
    %1251 = vector.extract_strided_slice %1 {offsets = [16, 0], sizes = [16, 16], strides = [1, 1]} : vector<64x16xf32> to vector<16x16xf32>
    %1252 = vector.extract_strided_slice %21 {offsets = [16, 0], sizes = [16, 16], strides = [1, 1]} : vector<64x16xf32> to vector<16x16xf32>
    %1253 = arith.subf %1251, %1252 : vector<16x16xf32>
    %1254 = arith.subf %1253, %1248 : vector<16x16xf32>
    %c0_540 = arith.constant 0 : index
    %c16_541 = arith.constant 16 : index
    %c0_542 = arith.constant 0 : index
    %1255 = vector.load %arg17[%c0_540, %c16_541, %c0_542] : memref<1x64x16xf32, #tpu.memory_space<vmem>>, vector<1x16x16xf32>
    %1256 = vector.shape_cast %1255 : vector<1x16x16xf32> to vector<16x16xf32>
    %1257 = vector.shape_cast %1254 : vector<16x16xf32> to vector<1x16x16xf32>
    tpu.vector_store %arg17[%c0_540, %c16_541, %c0_542], %1257 {strides = array<i32>} : memref<1x64x16xf32, #tpu.memory_space<vmem>>, vector<1x16x16xf32>,
    %1258 = vector.extract_strided_slice %3 {offsets = [16, 0], sizes = [16, 16], strides = [1, 1]} : vector<64x16xf32> to vector<16x16xf32>
    %1259 = vector.extract_strided_slice %28 {offsets = [16, 0], sizes = [16, 16], strides = [1, 1]} : vector<64x16xf32> to vector<16x16xf32>
    %1260 = arith.subf %1258, %1259 : vector<16x16xf32>
    %1261 = arith.subf %1260, %1250 : vector<16x16xf32>
    %c0_543 = arith.constant 0 : index
    %c16_544 = arith.constant 16 : index
    %c0_545 = arith.constant 0 : index
    %1262 = vector.load %arg18[%c0_543, %c16_544, %c0_545] : memref<1x64x16xf32, #tpu.memory_space<vmem>>, vector<1x16x16xf32>
    %1263 = vector.shape_cast %1262 : vector<1x16x16xf32> to vector<16x16xf32>
    %1264 = vector.shape_cast %1261 : vector<16x16xf32> to vector<1x16x16xf32>
    tpu.vector_store %arg18[%c0_543, %c16_544, %c0_545], %1264 {strides = array<i32>} : memref<1x64x16xf32, #tpu.memory_space<vmem>>, vector<1x16x16xf32>,
    %1265 = vector.extract_strided_slice %1215 {offsets = [32, 0], sizes = [16, 16], strides = [1, 1]} : vector<64x16xbf16> to vector<16x16xbf16>
    %1266 = vector.extract_strided_slice %1216 {offsets = [32, 0], sizes = [16, 16], strides = [1, 1]} : vector<64x16xbf16> to vector<16x16xbf16>
    %1267 = vector.extract_strided_slice %1218 {offsets = [32, 0], sizes = [16, 16], strides = [1, 1]} : vector<64x16xbf16> to vector<16x16xbf16>
    %cst_546 = arith.constant dense<0.000000e+00> : vector<16x16xf32>
    %1268 = tpu.matmul %48, %1265, %cst_546 {dimension_numbers = #tpu.dot_dimension_numbers<[1], [0], [0], [1], [0, 0, 1, 1], [], []>} : vector<16x16xbf16>, vector<16x16xbf16>, vector<16x16xf32> -> vector<16x16xf32>
    %cst_547 = arith.constant dense<0.000000e+00> : vector<16x16xf32>
    %1269 = tpu.matmul %50, %1266, %cst_547 {dimension_numbers = #tpu.dot_dimension_numbers<[1], [0], [0], [1], [0, 0, 1, 1], [], []>} : vector<16x16xbf16>, vector<16x16xbf16>, vector<16x16xf32> -> vector<16x16xf32>
    %cst_548 = arith.constant dense<0.000000e+00> : vector<16x16xf32>
    %1270 = tpu.matmul %52, %1267, %cst_548 {dimension_numbers = #tpu.dot_dimension_numbers<[1], [0], [0], [1], [0, 0, 1, 1], [], []>} : vector<16x16xbf16>, vector<16x16xbf16>, vector<16x16xf32> -> vector<16x16xf32>
    %1271 = arith.subf %1268, %1269 : vector<16x16xf32>
    %1272 = arith.subf %1270, %1268 : vector<16x16xf32>
    %1273 = arith.subf %1272, %1269 : vector<16x16xf32>
    %1274 = vector.extract_strided_slice %1 {offsets = [32, 0], sizes = [16, 16], strides = [1, 1]} : vector<64x16xf32> to vector<16x16xf32>
    %1275 = vector.extract_strided_slice %21 {offsets = [32, 0], sizes = [16, 16], strides = [1, 1]} : vector<64x16xf32> to vector<16x16xf32>
    %1276 = arith.subf %1274, %1275 : vector<16x16xf32>
    %1277 = arith.subf %1276, %1271 : vector<16x16xf32>
    %c0_549 = arith.constant 0 : index
    %c32_550 = arith.constant 32 : index
    %c0_551 = arith.constant 0 : index
    %1278 = vector.load %arg17[%c0_549, %c32_550, %c0_551] : memref<1x64x16xf32, #tpu.memory_space<vmem>>, vector<1x16x16xf32>
    %1279 = vector.shape_cast %1278 : vector<1x16x16xf32> to vector<16x16xf32>
    %1280 = vector.shape_cast %1277 : vector<16x16xf32> to vector<1x16x16xf32>
    tpu.vector_store %arg17[%c0_549, %c32_550, %c0_551], %1280 {strides = array<i32>} : memref<1x64x16xf32, #tpu.memory_space<vmem>>, vector<1x16x16xf32>,
    %1281 = vector.extract_strided_slice %3 {offsets = [32, 0], sizes = [16, 16], strides = [1, 1]} : vector<64x16xf32> to vector<16x16xf32>
    %1282 = vector.extract_strided_slice %28 {offsets = [32, 0], sizes = [16, 16], strides = [1, 1]} : vector<64x16xf32> to vector<16x16xf32>
    %1283 = arith.subf %1281, %1282 : vector<16x16xf32>
    %1284 = arith.subf %1283, %1273 : vector<16x16xf32>
    %c0_552 = arith.constant 0 : index
    %c32_553 = arith.constant 32 : index
    %c0_554 = arith.constant 0 : index
    %1285 = vector.load %arg18[%c0_552, %c32_553, %c0_554] : memref<1x64x16xf32, #tpu.memory_space<vmem>>, vector<1x16x16xf32>
    %1286 = vector.shape_cast %1285 : vector<1x16x16xf32> to vector<16x16xf32>
    %1287 = vector.shape_cast %1284 : vector<16x16xf32> to vector<1x16x16xf32>
    tpu.vector_store %arg18[%c0_552, %c32_553, %c0_554], %1287 {strides = array<i32>} : memref<1x64x16xf32, #tpu.memory_space<vmem>>, vector<1x16x16xf32>,
    %1288 = vector.extract_strided_slice %1215 {offsets = [48, 0], sizes = [16, 16], strides = [1, 1]} : vector<64x16xbf16> to vector<16x16xbf16>
    %1289 = vector.extract_strided_slice %1216 {offsets = [48, 0], sizes = [16, 16], strides = [1, 1]} : vector<64x16xbf16> to vector<16x16xbf16>
    %1290 = vector.extract_strided_slice %1218 {offsets = [48, 0], sizes = [16, 16], strides = [1, 1]} : vector<64x16xbf16> to vector<16x16xbf16>
    %cst_555 = arith.constant dense<0.000000e+00> : vector<16x16xf32>
    %1291 = tpu.matmul %48, %1288, %cst_555 {dimension_numbers = #tpu.dot_dimension_numbers<[1], [0], [0], [1], [0, 0, 1, 1], [], []>} : vector<16x16xbf16>, vector<16x16xbf16>, vector<16x16xf32> -> vector<16x16xf32>
    %cst_556 = arith.constant dense<0.000000e+00> : vector<16x16xf32>
    %1292 = tpu.matmul %50, %1289, %cst_556 {dimension_numbers = #tpu.dot_dimension_numbers<[1], [0], [0], [1], [0, 0, 1, 1], [], []>} : vector<16x16xbf16>, vector<16x16xbf16>, vector<16x16xf32> -> vector<16x16xf32>
    %cst_557 = arith.constant dense<0.000000e+00> : vector<16x16xf32>
    %1293 = tpu.matmul %52, %1290, %cst_557 {dimension_numbers = #tpu.dot_dimension_numbers<[1], [0], [0], [1], [0, 0, 1, 1], [], []>} : vector<16x16xbf16>, vector<16x16xbf16>, vector<16x16xf32> -> vector<16x16xf32>
    %1294 = arith.subf %1291, %1292 : vector<16x16xf32>
    %1295 = arith.subf %1293, %1291 : vector<16x16xf32>
    %1296 = arith.subf %1295, %1292 : vector<16x16xf32>
    %1297 = vector.extract_strided_slice %1 {offsets = [48, 0], sizes = [16, 16], strides = [1, 1]} : vector<64x16xf32> to vector<16x16xf32>
    %1298 = vector.extract_strided_slice %21 {offsets = [48, 0], sizes = [16, 16], strides = [1, 1]} : vector<64x16xf32> to vector<16x16xf32>
    %1299 = arith.subf %1297, %1298 : vector<16x16xf32>
    %1300 = arith.subf %1299, %1294 : vector<16x16xf32>
    %c0_558 = arith.constant 0 : index
    %c48_559 = arith.constant 48 : index
    %c0_560 = arith.constant 0 : index
    %1301 = vector.load %arg17[%c0_558, %c48_559, %c0_560] : memref<1x64x16xf32, #tpu.memory_space<vmem>>, vector<1x16x16xf32>
    %1302 = vector.shape_cast %1301 : vector<1x16x16xf32> to vector<16x16xf32>
    %1303 = vector.shape_cast %1300 : vector<16x16xf32> to vector<1x16x16xf32>
    tpu.vector_store %arg17[%c0_558, %c48_559, %c0_560], %1303 {strides = array<i32>} : memref<1x64x16xf32, #tpu.memory_space<vmem>>, vector<1x16x16xf32>,
    %1304 = vector.extract_strided_slice %3 {offsets = [48, 0], sizes = [16, 16], strides = [1, 1]} : vector<64x16xf32> to vector<16x16xf32>
    %1305 = vector.extract_strided_slice %28 {offsets = [48, 0], sizes = [16, 16], strides = [1, 1]} : vector<64x16xf32> to vector<16x16xf32>
    %1306 = arith.subf %1304, %1305 : vector<16x16xf32>
    %1307 = arith.subf %1306, %1296 : vector<16x16xf32>
    %c0_561 = arith.constant 0 : index
    %c48_562 = arith.constant 48 : index
    %c0_563 = arith.constant 0 : index
    %1308 = vector.load %arg18[%c0_561, %c48_562, %c0_563] : memref<1x64x16xf32, #tpu.memory_space<vmem>>, vector<1x16x16xf32>
    %1309 = vector.shape_cast %1308 : vector<1x16x16xf32> to vector<16x16xf32>
    %1310 = vector.shape_cast %1307 : vector<16x16xf32> to vector<1x16x16xf32>
    tpu.vector_store %arg18[%c0_561, %c48_562, %c0_563], %1310 {strides = array<i32>} : memref<1x64x16xf32, #tpu.memory_space<vmem>>, vector<1x16x16xf32>,
    return
  }
  func.func @transform_0(%arg0: i32) -> (i32, i32, i32) {
    %c0_i32 = arith.constant 0 : i32
    %c0_i32_0 = arith.constant 0 : i32
    %c0_i32_1 = arith.constant 0 : i32
    return %arg0, %c0_i32, %c0_i32_0 : i32, i32, i32
  }
  func.func @transform_1(%arg0: i32) -> (i32, i32, i32) {
    %c0_i32 = arith.constant 0 : i32
    %c0_i32_0 = arith.constant 0 : i32
    %c0_i32_1 = arith.constant 0 : i32
    return %arg0, %c0_i32, %c0_i32_0 : i32, i32, i32
  }
  func.func @transform_2(%arg0: i32) -> (i32, i32, i32) {
    %c0_i32 = arith.constant 0 : i32
    %c0_i32_0 = arith.constant 0 : i32
    %c0_i32_1 = arith.constant 0 : i32
    return %arg0, %c0_i32, %c0_i32_0 : i32, i32, i32
  }
  func.func @transform_3(%arg0: i32) -> (i32, i32, i32) {
    %c0_i32 = arith.constant 0 : i32
    %c0_i32_0 = arith.constant 0 : i32
    %c0_i32_1 = arith.constant 0 : i32
    return %arg0, %c0_i32, %c0_i32_0 : i32, i32, i32
  }
  func.func @transform_4(%arg0: i32) -> (i32, i32, i32) {
    %c0_i32 = arith.constant 0 : i32
    %c0_i32_0 = arith.constant 0 : i32
    %c0_i32_1 = arith.constant 0 : i32
    return %arg0, %c0_i32, %c0_i32_0 : i32, i32, i32
  }
  func.func @transform_5(%arg0: i32) -> (i32, i32, i32) {
    %c0_i32 = arith.constant 0 : i32
    %c0_i32_0 = arith.constant 0 : i32
    %c0_i32_1 = arith.constant 0 : i32
    return %arg0, %c0_i32, %c0_i32_0 : i32, i32, i32
  }
  func.func @transform_6(%arg0: i32) -> (i32, i32, i32) {
    %c0_i32 = arith.constant 0 : i32
    %c0_i32_0 = arith.constant 0 : i32
    %c0_i32_1 = arith.constant 0 : i32
    return %arg0, %c0_i32, %c0_i32_0 : i32, i32, i32
  }
  func.func @transform_7(%arg0: i32) -> (i32, i32, i32) {
    %c0_i32 = arith.constant 0 : i32
    %c0_i32_0 = arith.constant 0 : i32
    %c0_i32_1 = arith.constant 0 : i32
    %c0_i32_2 = arith.constant 0 : i32
    return %c0_i32, %c0_i32_0, %c0_i32_1 : i32, i32, i32
  }
  func.func @transform_8(%arg0: i32) -> (i32, i32, i32) {
    %c0_i32 = arith.constant 0 : i32
    %c0_i32_0 = arith.constant 0 : i32
    %c0_i32_1 = arith.constant 0 : i32
    %c0_i32_2 = arith.constant 0 : i32
    return %c0_i32, %c0_i32_0, %c0_i32_1 : i32, i32, i32
  }
  func.func @transform_9(%arg0: i32) -> (i32, i32, i32) {
    %c0_i32 = arith.constant 0 : i32
    %c0_i32_0 = arith.constant 0 : i32
    %c0_i32_1 = arith.constant 0 : i32
    %c0_i32_2 = arith.constant 0 : i32
    return %c0_i32, %c0_i32_0, %c0_i32_1 : i32, i32, i32
  }
  func.func @transform_10(%arg0: i32) -> (i32, i32, i32) {
    %c0_i32 = arith.constant 0 : i32
    %c0_i32_0 = arith.constant 0 : i32
    %c0_i32_1 = arith.constant 0 : i32
    %c0_i32_2 = arith.constant 0 : i32
    return %c0_i32, %c0_i32_0, %c0_i32_1 : i32, i32, i32
  }
  func.func @transform_11(%arg0: i32) -> (i32, i32) {
    %c0_i32 = arith.constant 0 : i32
    %c0_i32_0 = arith.constant 0 : i32
    %c0_i32_1 = arith.constant 0 : i32
    return %c0_i32, %c0_i32_0 : i32, i32
  }
  func.func @transform_12(%arg0: i32) -> (i32, i32) {
    %c0_i32 = arith.constant 0 : i32
    %c0_i32_0 = arith.constant 0 : i32
    %c0_i32_1 = arith.constant 0 : i32
    return %c0_i32, %c0_i32_0 : i32, i32
  }
  func.func @transform_13(%arg0: i32) -> (i32, i32) {
    %c0_i32 = arith.constant 0 : i32
    %c0_i32_0 = arith.constant 0 : i32
    %c0_i32_1 = arith.constant 0 : i32
    return %c0_i32, %c0_i32_0 : i32, i32
  }
  func.func @transform_14(%arg0: i32) -> (i32, i32) {
    %c0_i32 = arith.constant 0 : i32
    %c0_i32_0 = arith.constant 0 : i32
    %c0_i32_1 = arith.constant 0 : i32
    return %c0_i32, %c0_i32_0 : i32, i32
  }
  func.func @transform_15(%arg0: i32) -> i32 {
    %c0_i32 = arith.constant 0 : i32
    %c0_i32_0 = arith.constant 0 : i32
    return %c0_i32 : i32
  }
  func.func @transform_16(%arg0: i32) -> (i32, i32, i32) {
    %c0_i32 = arith.constant 0 : i32
    %c0_i32_0 = arith.constant 0 : i32
    %c0_i32_1 = arith.constant 0 : i32
    return %arg0, %c0_i32, %c0_i32_0 : i32, i32, i32
  }
  func.func @transform_17(%arg0: i32) -> (i32, i32, i32) {
    %c0_i32 = arith.constant 0 : i32
    %c0_i32_0 = arith.constant 0 : i32
    %c0_i32_1 = arith.constant 0 : i32
    return %arg0, %c0_i32, %c0_i32_0 : i32, i32, i32
  }
}

</mosaic_0001>

<bundles_post_ra>
// kernel: tpu_custom_call.1
= control target key start
LH: loop header
LB: loop body
LE: loop exit
PB: predicated region body
PF: predicated region fallthrough
CT: control target
= control target key end

     0   :  { %s9705_s0 = inlined_call_operand.hbm [shape: f32[2,1,16], index: 0, kind: input, shape index: {}]   ;;  %s9706_s1 = inlined_call_operand.hbm [shape: f32[2,64,16], index: 1, kind: input, shape index: {}]   ;;  %s9707_s2 = inlined_call_operand.hbm [shape: f32[2,64,16], index: 2, kind: input, shape index: {}]   ;;  %s9708_s3 = inlined_call_operand.hbm [shape: f32[2,64,16], index: 3, kind: input, shape index: {}]   ;;  %s9709_s4 = inlined_call_operand.hbm [shape: f32[2,64,16], index: 4, kind: input, shape index: {}]   ;;  %s9710_s5 = inlined_call_operand.hbm [shape: f32[2,64,16], index: 5, kind: input, shape index: {}]   ;;  %s9711_s6 = inlined_call_operand.hbm [shape: f32[2,64,16], index: 6, kind: input, shape index: {}]   ;;  %s9712_s7 = inlined_call_operand.hbm [shape: bf16[3,16,16], index: 7, kind: input, shape index: {}]   ;;  %s9713_s8 = inlined_call_operand.hbm [shape: bf16[3,16,16], index: 8, kind: input, shape index: {}]   ;;  %s9714_s9 = inlined_call_operand.hbm [shape: bf16[3,16,16], index: 9, kind: input, shape index: {}]   ;;  %s9715_s10 = inlined_call_operand.hbm [shape: bf16[3,16,16], index: 10, kind: input, shape index: {}]   ;;  %s9716_s11 = inlined_call_operand.hbm [shape: f32[2,32], index: 11, kind: input, shape index: {}]   ;;  %s9717_s12 = inlined_call_operand.hbm [shape: f32[1,32], index: 12, kind: input, shape index: {}]   ;;  %s9718_s13 = inlined_call_operand.hbm [shape: f32[32,2], index: 13, kind: input, shape index: {}]   ;;  %s9719_s14 = inlined_call_operand.hbm [shape: f32[1,2], index: 14, kind: input, shape index: {}]   ;;  %s9720_s15 = inlined_call_operand.<no memory space> [shape: f32[1], index: 15, kind: input, shape index: {}]   ;;  %s9721_s16 = inlined_call_operand.hbm [shape: f32[2,64,16], index: 16, kind: output, shape index: {0}]   ;;  %s9722_s17 = inlined_call_operand.hbm [shape: f32[2,64,16], index: 17, kind: output, shape index: {1}]  }
   0x1   :  { %10131 = sst [smem:[#allocation291_spill]] %s9705_s0 }
   0x2   :  { %10132 = sst [smem:[#allocation292_spill]] %s9706_s1 }
   0x3   :  { %10133 = sst [smem:[#allocation293_spill]] %s9707_s2 }
   0x4   :  { %10134 = sst [smem:[#allocation294_spill]] %s9708_s3 }
   0x5   :  { %10135 = sst [smem:[#allocation295_spill]] %s9709_s4 }
   0x6   :  { %10136 = sst [smem:[#allocation296_spill]] %s9710_s5 }
   0x7   :  { %10137 = sst [smem:[#allocation297_spill]] %s9711_s6 }
   0x8   :  { %10138 = sst [smem:[#allocation298_spill]] %s9712_s7 }
   0x9   :  { %10139 = sst [smem:[#allocation299_spill]] %s9713_s8 }
   0xa   :  { %10140 = sst [smem:[#allocation300_spill]] %s9714_s9 }
   0xb   :  { %10141 = sst [smem:[#allocation301_spill]] %s9715_s10 }
   0xc   :  { %10142 = sst [smem:[#allocation302_spill]] %s9716_s11 }
   0xd   :  { %10143 = sst [smem:[#allocation303_spill]] %s9717_s12 }
   0xe   :  { %10144 = sst [smem:[#allocation304_spill]] %s9718_s13 }
   0xf   :  { %10145 = sst [smem:[#allocation305_spill]] %s9719_s14 }
  0x10   :  { %10146 = sst [smem:[#allocation306_spill]] %s9721_s16 }
  0x11   :  { %10147 = sst [smem:[#allocation307_spill]] %s9722_s17 }
  0x12   :  { %23 = sst [smem:[#allocation2]] %s9720_s15 }
  0x13   :  { %24 = vsyncpa [#allocation4], 0 }
  0x14   :  { %26 = vsyncpa [#allocation4 + $0x1], 0 }
  0x15   :  { %27 = vsyncpa [#allocation8], 0 }
  0x16   :  { %29 = vsyncpa [#allocation8 + $0x1], 0 }
  0x17   :  { %30 = vsyncpa [#allocation11], 0 }
  0x18   :  { %32 = vsyncpa [#allocation11 + $0x1], 0 }
  0x19   :  { %33 = vsyncpa [#allocation14], 0 }
  0x1a   :  { %35 = vsyncpa [#allocation14 + $0x1], 0 }
  0x1b   :  { %36 = vsyncpa [#allocation17], 0 }
  0x1c   :  { %37 = vsyncpa [#allocation20], 0 }
  0x1d   :  { %38 = vsyncpa [#allocation6], 0 }
  0x1e   :  { %39 = vsyncpa [#allocation24], 0 }
  0x1f   :  { %40 = vsyncpa [#allocation27], 0 }
  0x20   :  { %41 = vsyncpa [#allocation5], 0 }
  0x21   :  { %43 = vsyncpa [#allocation5 + $0x1], 0 }
  0x22   :  { %44 = vsyncpa [#allocation30], 0 }
  0x23   :  { %46 = vsyncpa [#allocation30 + $0x1], 0  ;;  %s6237_s26 = smov 0   ;;  %s6239_s15 = smov 0  }
  0x24   :  { %s6241_s27 = smov 0   ;;  %s6243_s28 = smov 0  }
  0x25 LB: > { %10148 = sst [smem:[#allocation42_spill]] %s6105_s26  ;;  %s6119_s29 = smov [#allocation16]   ;;  %s6117_s28 = sphi %s6243_s28, %s11198_s28   ;;  %s6113_s27 = sphi %s6241_s27, %s11201_s27   ;;  %s6109_s15 = sphi %s6239_s15, %s11200_s15   ;;  %s6105_s26 = sphi %s6237_s26, %s11199_s26  }
  0x26   : > { %10149 = sst [smem:[#allocation43_spill]] %s6109_s15  ;;  %s492_s0 = sshll.u32 %s6119_s29, 4  ;;  %s6263_s0 = int_to_ptr.vmem [resolvable:$true] %s492_s0 }
  0x27   : > { %10150 = sst [smem:[#allocation44_spill]] %s6113_s27  ;;  %s6258_s30 = sadd.s32 4294967295, %s6117_s28  }
  0x28   : > { %10151 = sst [smem:[#allocation45_spill]] %s6117_s28  ;;  %p4708_p0 = scmp.ge.s32.totalorder %s6117_s28, 1 }
  0x29   : > { %10152 = sst [smem:[#allocation46_spill]] %s6258_s30  ;;  %p9740_p1 = scmp.eq.s32.totalorder %s6258_s30, 0 }
  0x2a   : > { %p480_p2 = scmp.lt.s32.totalorder %s6117_s28, 3  ;;  %s6120_s19 = smov [#allocation19]  }
  0x2b   : > { %s518_s1 = sshll.u32 %s6120_s19, 4  ;;  %s10156_s7 = sld [smem:[#allocation298_spill]]  ;;  %s6278_s1 = int_to_ptr.vmem [resolvable:$true] %s518_s1 }
  0x2c   : > { %p6265_p3 = pnand %p4708_p0, %p480_p2 }
  0x2e   : > { %s10153_s18 = scalar_select %p6265_p3, 1, 0 }
  0x2f   : > { %p5321_p5 = pneg %p6265_p3 }
  0x30   : > { %10154 = sst [smem:[#allocation47_spill]] %s10153_s18 }
  0x31   : > { %p6274_p6 = pnand %p5321_p5, %p9740_p1  ;;  %s5613_s23 = scalar_lea.hbm %s10156_s7, 384 }
  0x32   : > { %p5614_p7 = scmp.ne.s32.totalorder %s10156_s7, %s5613_s23  ;;  %p5620_p11 = scmp.lt.u32.totalorder %s5613_s23, %s10156_s7 }
  0x33   : > { %s10155_s20 = scalar_select %p6274_p6, 1, 0 }
  0x34   : > { %p6288_p8 = pneg %p6274_p6 }
  0x36   : > { %s10157_s29 = scalar_select %p6288_p8, 1, 0 }
  0x37   : > { %p5616_p9 = pnand %p6288_p8, %p5614_p7 }
  0x39   : > { %p5617_p10 = pneg %p5616_p9 }
  0x3b   : > { %p5622_p12 = pnand %p5620_p11, %p5617_p10 }
  0x3d   : > { %5625 = shalt.err (!%p5622_p12)
}
  0x3e   : > { %s5626_s21 = scalar_lea.vmem %s6263_s0, 384  ;;  %p5634_p5 = scmp.lt.s32.totalorder %s6263_s0, %s6263_s0 }
  0x3f   : > { %p5627_p13 = scmp.ne.s32.totalorder %s6263_s0, %s5626_s21  ;;  %p5635_p4 = scmp.lt.s32.totalorder %s5626_s21, %s5626_s21 }
  0x41   : > { %p5629_p0 = pnand %p5627_p13, %p6288_p8  ;;  %p5636_p7 = por %p5635_p4, %p5634_p5 }
  0x43   : > { %p5630_p2 = pneg %p5629_p0 }
  0x45   : > { %p5637_p9 = pnand %p5636_p7, %p5630_p2 }
  0x47   : > { %5640 = shalt.err (!%p5637_p9)
}
  0x48   : > { %s9731_s22 = smov 64   ;;  %s9733_s17 = smov 4  }
  0x49   : > { %5324 = dma.hbm_to_vmem [thread:$0]  (!%p6274_p6), %s10156_s7, 384, %s6263_s0, [#allocation17], %s9731_s22, %s9731_s22, %s9733_s17  }
  0x4a   : > { %s10158_s9 = sld [smem:[#allocation300_spill]] }
  0x50   : > { %s5641_s21 = scalar_lea.hbm %s10158_s9, 384 }
  0x51   : > { %p5642_p4 = scmp.ne.s32.totalorder %s10158_s9, %s5641_s21  ;;  %p5648_p12 = scmp.lt.u32.totalorder %s5641_s21, %s10158_s9 }
  0x53   : > { %p5644_p10 = pnand %p5642_p4, %p6288_p8 }
  0x55   : > { %p5645_p11 = pneg %p5644_p10 }
  0x57   : > { %p5650_p13 = pnand %p5648_p12, %p5645_p11 }
  0x59   : > { %5653 = shalt.err (!%p5650_p13)
}
  0x5a   : > { %s5654_s0 = scalar_lea.vmem %s6278_s1, 384  ;;  %p5662_p7 = scmp.lt.s32.totalorder %s6278_s1, %s6278_s1 }
  0x5b   : > { %p5655_p0 = scmp.ne.s32.totalorder %s6278_s1, %s5654_s0  ;;  %p5663_p9 = scmp.lt.s32.totalorder %s5654_s0, %s5654_s0 }
  0x5d   : > { %p5657_p2 = pnand %p5655_p0, %p6288_p8  ;;  %p5664_p4 = por %p5663_p9, %p5662_p7 }
  0x5f   : > { %p5658_p5 = pneg %p5657_p2 }
  0x61   : > { %p5665_p10 = pnand %p5664_p4, %p5658_p5 }
  0x63   : > { %5668 = shalt.err (!%p5665_p10)
}
  0x64   : > { %5330 = dma.hbm_to_vmem [thread:$0]  (!%p6274_p6), %s10158_s9, 384, %s6278_s1, [#allocation20], %s9731_s22, %s9731_s22, %s9733_s17  }
  0x65   : > { %s10159_s12 = sld [smem:[#allocation303_spill]] }
  0x6b   : > { %s5669_s23 = scalar_lea.hbm %s10159_s12, 16 }
  0x6c   : > { %p5670_p11 = scmp.ne.s32.totalorder %s10159_s12, %s5669_s23  ;;  %p5676_p0 = scmp.lt.u32.totalorder %s5669_s23, %s10159_s12 }
  0x6e   : > { %p5672_p12 = pnand %p5670_p11, %p6288_p8 }
  0x70   : > { %p5673_p13 = pneg %p5672_p12 }
  0x72   : > { %p5678_p2 = pnand %p5676_p0, %p5673_p13 }
  0x74   : > { %5681 = shalt.err (!%p5678_p2)
}
  0x75   : > { %s6123_s0 = smov [#allocation23]   ;;  %s4707_s6 = sadd.s32 4294967294, %s6117_s28  }
  0x76   : > { %5339 = dma.hbm_to_smem (!%p6274_p6), %s10159_s12, 16, %s6123_s0, [#allocation24]  }
  0x77   : > { %s6356_s16 = sadd.s32 1, %s6117_s28   ;;  %s59_s18 = sadd.s32 1, %s6113_s27 }
  0x78   : > { %10160 = sst [smem:[#allocation48_spill]] %s6356_s16  ;;  %s56_s23 = ssub.s32 %s6117_s28, %s6356_s16 }
  0x79   : > { %p66_p5 = scmp.ne.s32.totalorder %s6113_s27, %s6109_s15  ;;  %p57_p7 = scmp.eq.s32.totalorder %s56_s23, 0 }
  0x7a   : > { %p67_p9 = scmp.eq.s32.totalorder %s6117_s28, 0  ;;  %p72_p4 = scmp.ne.s32.totalorder %s6109_s15, %s6105_s26 }
  0x7b   : > { %p441_p10 = scmp.eq.s32.totalorder %s6258_s30, 1  ;;  %p447_p0 = scmp.eq.s32.totalorder %s4707_s6, 1 }
  0x7c   : > { %s6368_s24 = scalar_select %p57_p7, %s6113_s27, %s59_s18  }
  0x7d   : > { %p68_p11 = por %p67_p9, %p66_p5  ;;  %p6372_p12 = por %p9740_p1, %p72_p4 }
  0x7e   : > { %10161 = sst [smem:[#allocation49_spill]] %s6368_s24  ;;  %p6376_p13 = por %p441_p10, %p66_p5 }
  0x7f   : > { %s10162_s25 = scalar_select %p6372_p12, 1, 0 }
  0x80   : > { %s10164_s19 = scalar_select %p6376_p13, 1, 0 }
  0x81   : > { %10163 = sst [smem:[#allocation50_spill]] %s10162_s25  ;;  %p6380_p2 = por %p447_p0, %p72_p4 }
  0x82   : > { %10165 = sst [smem:[#allocation51_spill]] %s10164_s19  ;;  %p5383_p3 = scmp.lt.s32.totalorder %s6117_s28, 2 }
  0x83   : > { %s10166_s21 = scalar_select %p6380_p2, 1, 0 }
  0x84   : > { %s6386_s0 = sand.u32 1, %s6113_s27   ;;  %s6389_s1 = sand.u32 1, %s6117_s28  }
  0x85   : > { %10167 = sst [smem:[#allocation52_spill]] %s10166_s21  ;;  %p6391_p7 = pnand %p5383_p3, %p68_p11 }
  0x86   : > { %s6396_s18 = sshll.u32 %s6386_s0, 6  ;;  %s6399_s6 = sshll.u32 %s6117_s28, 10 }
  0x87   : > { %s10168_s4 = scalar_select %p6391_p7, 1, 0 }
  0x88   : > { %s10169_s17 = sld [smem:[#allocation292_spill]]  ;;  %s607_s9 = scalar_lea.vmem [#allocation7], %s6396_s18 }
  0x89   : > { %s614_s12 = sshll.u32 %s607_s9, 4  ;;  %p6415_p5 = pneg %p6391_p7  ;;  %s6408_s12 = int_to_ptr.vmem [resolvable:$true] %s614_s12 }
  0x8b   : > { %s10170_s16 = scalar_select %p6415_p5, 1, 0 }
  0x8e   : > { %s6405_s7 = scalar_lea.hbm %s10169_s17, %s6399_s6  ;;  %s5687_s21 = scalar_lea.hbm %s10169_s17, 2048 }
  0x8f   : > { %s5682_s27 = scalar_lea.hbm %s6405_s7, 1024  ;;  %p5688_p10 = scmp.lt.u32.totalorder %s6405_s7, %s10169_s17 }
  0x90   : > { %p5683_p3 = scmp.ne.s32.totalorder %s6405_s7, %s5682_s27  ;;  %p5689_p11 = scmp.lt.u32.totalorder %s5687_s21, %s5682_s27 }
  0x91   : > { %p5691_p1 = scmp.lt.u32.totalorder %s5682_s27, %s6405_s7 }
  0x92   : > { %p5685_p9 = pnand %p6415_p5, %p5683_p3  ;;  %p5690_p0 = por %p5689_p11, %p5688_p10 }
  0x94   : > { %p5686_p4 = pneg %p5685_p9  ;;  %p5692_p2 = por %p5691_p1, %p5690_p0 }
  0x96   : > { %p5693_p13 = pnand %p5692_p2, %p5686_p4 }
  0x98   : > { %5696 = shalt.err (!%p5693_p13)
}
  0x99   : > { %s5697_s24 = scalar_lea.vmem %s6408_s12, 1024  ;;  %s6124_s22 = smov [#allocation7]  }
  0x9a   : > { %p5698_p3 = scmp.ne.s32.totalorder %s6408_s12, %s5697_s24  ;;  %s5702_s23 = sshll.u32 %s6124_s22, 4  ;;  %s5703_s23 = int_to_ptr.vmem [resolvable:$false] %s5702_s23 }
  0x9b   : > { %s5704_s26 = scalar_lea.vmem %s5703_s23, 2048  ;;  %p5705_p6 = scmp.lt.s32.totalorder %s6408_s12, %s5703_s23 }
  0x9c   : > { %p5700_p9 = pnand %p5698_p3, %p6415_p5  ;;  %p5706_p8 = scmp.lt.s32.totalorder %s5704_s26, %s5697_s24 }
  0x9e   : > { %p5701_p12 = pneg %p5700_p9  ;;  %p5707_p10 = por %p5706_p8, %p5705_p6 }
  0xa0   : > { %p5708_p11 = pnand %p5707_p10, %p5701_p12 }
  0xa2   : > { %5711 = shalt.err (!%p5708_p11)
}
  0xa3   : > { %s6125_s27 = smov 128   ;;  %s6126_s21 = smov 8  }
  0xa4   : > { %s10171_s9 = scalar_lea.sflag [#allocation8], %s6389_s1  ;;  %s10172_s3 = sld [smem:[#allocation294_spill]] }
  0xa5   : > { %5352 = dma.hbm_to_vmem [thread:$0]  (!%p6391_p7), %s6405_s7, 1024, %s6408_s12, %s10171_s9, %s6125_s27, %s6125_s27, %s6126_s21  }
  0xa6   : > { %s649_s26 = scalar_lea.vmem [#allocation10], %s6396_s18  ;;  %s9752_s19 = scalar_lea.sflag [#allocation11], %s6389_s1 }
  0xa7   : > { %s656_s17 = sshll.u32 %s649_s26, 4  ;;  %s6450_s17 = int_to_ptr.vmem [resolvable:$true] %s656_s17 }
  0xaa   : > { %s6447_s23 = scalar_lea.hbm %s10172_s3, %s6399_s6  ;;  %s5717_s9 = scalar_lea.hbm %s10172_s3, 2048 }
  0xab   : > { %s5712_s30 = scalar_lea.hbm %s6447_s23, 1024  ;;  %p5718_p12 = scmp.lt.u32.totalorder %s6447_s23, %s10172_s3 }
  0xac   : > { %p5713_p1 = scmp.ne.s32.totalorder %s6447_s23, %s5712_s30  ;;  %p5719_p13 = scmp.lt.u32.totalorder %s5717_s9, %s5712_s30 }
  0xad   : > { %p5721_p4 = scmp.lt.u32.totalorder %s5712_s30, %s6447_s23 }
  0xae   : > { %p5715_p6 = pnand %p5713_p1, %p6415_p5  ;;  %p5720_p2 = por %p5719_p13, %p5718_p12 }
  0xb0   : > { %p5716_p8 = pneg %p5715_p6  ;;  %p5722_p0 = por %p5721_p4, %p5720_p2 }
  0xb2   : > { %p5723_p3 = pnand %p5722_p0, %p5716_p8 }
  0xb4   : > { %5726 = shalt.err (!%p5723_p3)
}
  0xb5   : > { %s5727_s26 = scalar_lea.vmem %s6450_s17, 1024  ;;  %s6127_s7 = smov [#allocation10]  }
  0xb6   : > { %p5728_p9 = scmp.ne.s32.totalorder %s6450_s17, %s5727_s26  ;;  %s5732_s12 = sshll.u32 %s6127_s7, 4  ;;  %s5733_s12 = int_to_ptr.vmem [resolvable:$false] %s5732_s12 }
  0xb7   : > { %s5734_s24 = scalar_lea.vmem %s5733_s12, 2048  ;;  %p5735_p1 = scmp.lt.s32.totalorder %s6450_s17, %s5733_s12 }
  0xb8   : > { %p5730_p10 = pnand %p5728_p9, %p6415_p5  ;;  %p5736_p6 = scmp.lt.s32.totalorder %s5734_s24, %s5727_s26 }
  0xba   : > { %p5731_p11 = pneg %p5730_p10  ;;  %p5737_p12 = por %p5736_p6, %p5735_p1 }
  0xbc   : > { %p5738_p13 = pnand %p5737_p12, %p5731_p11 }
  0xbe   : > { %5741 = shalt.err (!%p5738_p13)
}
  0xbf   : > { %5358 = dma.hbm_to_vmem [thread:$0]  (!%p6391_p7), %s6447_s23, 1024, %s6450_s17, %s9752_s19, %s6125_s27, %s6125_s27, %s6126_s21  }
  0xc0   : > { %s10173_s5 = sld [smem:[#allocation296_spill]]  ;;  %s691_s26 = scalar_lea.vmem [#allocation13], %s6396_s18 }
  0xc1   : > { %s698_s7 = sshll.u32 %s691_s26, 4  ;;  %s9760_s12 = scalar_lea.sflag [#allocation14], %s6389_s1  ;;  %s6486_s7 = int_to_ptr.vmem [resolvable:$true] %s698_s7 }
  0xc6   : > { %s6483_s22 = scalar_lea.hbm %s10173_s5, %s6399_s6  ;;  %s5747_s30 = scalar_lea.hbm %s10173_s5, 2048 }
  0xc7   : > { %s5742_s24 = scalar_lea.hbm %s6483_s22, 1024  ;;  %p5748_p0 = scmp.lt.u32.totalorder %s6483_s22, %s10173_s5 }
  0xc8   : > { %p5743_p8 = scmp.ne.s32.totalorder %s6483_s22, %s5742_s24  ;;  %p5749_p3 = scmp.lt.u32.totalorder %s5747_s30, %s5742_s24 }
  0xc9   : > { %p5751_p10 = scmp.lt.u32.totalorder %s5742_s24, %s6483_s22 }
  0xca   : > { %p5745_p2 = pnand %p5743_p8, %p6415_p5  ;;  %p5750_p9 = por %p5749_p3, %p5748_p0 }
  0xcc   : > { %p5746_p4 = pneg %p5745_p2  ;;  %p5752_p11 = por %p5751_p10, %p5750_p9 }
  0xce   : > { %p5753_p1 = pnand %p5752_p11, %p5746_p4 }
  0xd0   : > { %5756 = shalt.err (!%p5753_p1)
}
  0xd1   : > { %s5757_s26 = scalar_lea.vmem %s6486_s7, 1024  ;;  %s6128_s17 = smov [#allocation13]  }
  0xd2   : > { %p5758_p6 = scmp.ne.s32.totalorder %s6486_s7, %s5757_s26  ;;  %s5762_s23 = sshll.u32 %s6128_s17, 4  ;;  %s5763_s23 = int_to_ptr.vmem [resolvable:$false] %s5762_s23 }
  0xd3   : > { %s5764_s19 = scalar_lea.vmem %s5763_s23, 2048  ;;  %p5765_p8 = scmp.lt.s32.totalorder %s6486_s7, %s5763_s23 }
  0xd4   : > { %p5760_p12 = pnand %p5758_p6, %p6415_p5  ;;  %p5766_p2 = scmp.lt.s32.totalorder %s5764_s19, %s5757_s26 }
  0xd6   : > { %p5761_p13 = pneg %p5760_p12  ;;  %p5767_p0 = por %p5766_p2, %p5765_p8 }
  0xd8   : > { %p5768_p3 = pnand %p5767_p0, %p5761_p13 }
  0xda   : > { %5771 = shalt.err (!%p5768_p3)
}
  0xdb   : > { %5364 = dma.hbm_to_vmem [thread:$0]  (!%p6391_p7), %s6483_s22, 1024, %s6486_s7, %s9760_s12, %s6125_s27, %s6125_s27, %s6126_s21  }
  0xdc   : > { %s6129_s24 = smov [#allocation18]   ;;  %s6130_s9 = smov [#allocation21]  }
  0xdd   : > { %s505_s30 = sshll.u32 %s6129_s24, 4  ;;  %s531_s17 = sshll.u32 %s6130_s9, 4  ;;  %s506_s30 = int_to_ptr.vmem [resolvable:$true] %s505_s30  ;;  %s532_s17 = int_to_ptr.vmem [resolvable:$true] %s531_s17 }
  0xde   : > { %s10174_s8 = sld [smem:[#allocation299_spill]]  ;;  %p10175_p9 = scmp.ne.s32.totalorder %s10157_s29, 0 }
  0xe4   : > { %s5772_s19 = scalar_lea.hbm %s10174_s8, 384 }
  0xe5   : > { %p5773_p4 = scmp.ne.s32.totalorder %s10174_s8, %s5772_s19  ;;  %p5779_p1 = scmp.lt.u32.totalorder %s5772_s19, %s10174_s8 }
  0xe7   : > { %p5775_p10 = pnand %p5773_p4, %p10175_p9 }
  0xe9   : > { %p5776_p11 = pneg %p5775_p10 }
  0xeb   : > { %p5781_p6 = pnand %p5779_p1, %p5776_p11 }
  0xed   : > { %5784 = shalt.err (!%p5781_p6)
}
  0xee   : > { %s5785_s22 = scalar_lea.vmem %s506_s30, 384  ;;  %p5793_p2 = scmp.lt.s32.totalorder %s506_s30, %s506_s30 }
  0xef   : > { %p5786_p12 = scmp.ne.s32.totalorder %s506_s30, %s5785_s22  ;;  %p5794_p0 = scmp.lt.s32.totalorder %s5785_s22, %s5785_s22 }
  0xf1   : > { %p5788_p13 = pnand %p5786_p12, %p10175_p9  ;;  %p5795_p3 = por %p5794_p0, %p5793_p2 }
  0xf3   : > { %p5789_p8 = pneg %p5788_p13 }
  0xf5   : > { %p5796_p7 = pnand %p5795_p3, %p5789_p8 }
  0xf7   : > { %5799 = shalt.err (!%p5796_p7)
}
  0xf8   : > { %p10176_p4 = scmp.ne.s32.totalorder %s10155_s20, 0  ;;  %s10177_s3 = smov 4  }
  0xf9   : > { %s10178_s5 = smov 64   ;;  %s10179_s10 = sld [smem:[#allocation301_spill]] }
  0xfa   : > { %5327 = dma.hbm_to_vmem [thread:$0]  (!%p10176_p4), %s10174_s8, 384, %s506_s30, [#allocation17], %s10178_s5, %s10178_s5, %s10177_s3  }
  0xff   : > { %s5800_s9 = scalar_lea.hbm %s10179_s10, 384 }
 0x100   : > { %p5801_p10 = scmp.ne.s32.totalorder %s10179_s10, %s5800_s9  ;;  %p5807_p1 = scmp.lt.u32.totalorder %s5800_s9, %s10179_s10 }
 0x102   : > { %p5803_p7 = pnand %p5801_p10, %p10175_p9 }
 0x104   : > { %p5804_p11 = pneg %p5803_p7 }
 0x106   : > { %p5809_p6 = pnand %p5807_p1, %p5804_p11 }
 0x108   : > { %5812 = shalt.err (!%p5809_p6)
}
 0x109   : > { %s5813_s15 = scalar_lea.vmem %s532_s17, 384  ;;  %p5821_p2 = scmp.lt.s32.totalorder %s532_s17, %s532_s17 }
 0x10a   : > { %p5814_p12 = scmp.ne.s32.totalorder %s532_s17, %s5813_s15  ;;  %p5822_p0 = scmp.lt.s32.totalorder %s5813_s15, %s5813_s15 }
 0x10c   : > { %p5816_p13 = pnand %p5814_p12, %p10175_p9  ;;  %p5823_p3 = por %p5822_p0, %p5821_p2 }
 0x10e   : > { %p5817_p8 = pneg %p5816_p13 }
 0x110   : > { %p5824_p5 = pnand %p5823_p3, %p5817_p8 }
 0x112   : > { %5827 = shalt.err (!%p5824_p5)
}
 0x113   : > { %5333 = dma.hbm_to_vmem [thread:$0]  (!%p10176_p4), %s10179_s10, 384, %s532_s17, [#allocation20], %s10178_s5, %s10178_s5, %s10177_s3  }
 0x114   : > { %s10180_s11 = sld [smem:[#allocation302_spill]] }
 0x11a   : > { %s5828_s9 = scalar_lea.hbm %s10180_s11, 32 }
 0x11b   : > { %p5829_p10 = scmp.ne.s32.totalorder %s10180_s11, %s5828_s9  ;;  %p5835_p11 = scmp.lt.u32.totalorder %s5828_s9, %s10180_s11 }
 0x11d   : > { %p5831_p5 = pnand %p5829_p10, %p10175_p9 }
 0x11f   : > { %p5832_p7 = pneg %p5831_p5 }
 0x121   : > { %p5837_p1 = pnand %p5835_p11, %p5832_p7 }
 0x123   : > { %5840 = shalt.err (!%p5837_p1)
}
 0x124   : > { %s6131_s15 = smov [#allocation22]   ;;  %s10181_s13 = sld [smem:[#allocation304_spill]] }
 0x125   : > { %5336 = dma.hbm_to_smem (!%p10176_p4), %s10180_s11, 32, %s6131_s15, [#allocation6]  }
 0x12a   : > { %s5841_s25 = scalar_lea.hbm %s10181_s13, 512 }
 0x12b   : > { %p5842_p6 = scmp.ne.s32.totalorder %s10181_s13, %s5841_s25  ;;  %p5848_p8 = scmp.lt.u32.totalorder %s5841_s25, %s10181_s13 }
 0x12d   : > { %p5844_p12 = pnand %p5842_p6, %p10175_p9 }
 0x12f   : > { %p5845_p13 = pneg %p5844_p12 }
 0x131   : > { %p5850_p2 = pnand %p5848_p8, %p5845_p13 }
 0x133   : > { %5853 = shalt.err (!%p5850_p2)
}
 0x134   : > { %s6132_s23 = smov [#allocation25]   ;;  %s10182_s14 = sld [smem:[#allocation305_spill]] }
 0x135   : > { %5342 = dma.hbm_to_smem (!%p10176_p4), %s10181_s13, 512, %s6132_s23, [#allocation24], %s6125_s27, %s6125_s27, %s6126_s21  }
 0x13a   : > { %s5854_s3 = scalar_lea.hbm %s10182_s14, 16 }
 0x13b   : > { %p5855_p0 = scmp.ne.s32.totalorder %s10182_s14, %s5854_s3  ;;  %p5861_p5 = scmp.lt.u32.totalorder %s5854_s3, %s10182_s14 }
 0x13d   : > { %p5857_p3 = pnand %p5855_p0, %p10175_p9 }
 0x13f   : > { %p5858_p10 = pneg %p5857_p3 }
 0x141   : > { %p5863_p7 = pnand %p5861_p5, %p5858_p10 }
 0x143   : > { %5866 = shalt.err (!%p5863_p7)
}
 0x144   : > { %s6133_s24 = smov [#allocation26]   ;;  %s4718_s29 = sshll.u32 %s6117_s28, 4 }
 0x145   : > { %5345 = dma.hbm_to_smem (!%p10176_p4), %s10182_s14, 16, %s6133_s24, [#allocation27]  }
 0x146   : > { %s589_s23 = scalar_lea.vmem [#allocation3], %s6386_s0  ;;  %s10183_s17 = sld [smem:[#allocation291_spill]] }
 0x147   : > { %s596_s19 = sshll.u32 %s589_s23, 4  ;;  %s587_s20 = scalar_lea.sflag [#allocation4], %s6386_s0  ;;  %s597_s19 = int_to_ptr.vmem [resolvable:$true] %s596_s19 }
 0x148   : > { %p10184_p11 = scmp.ne.s32.totalorder %s10170_s16, 0 }
 0x14c   : > { %s6613_s3 = scalar_lea.hbm %s10183_s17, %s4718_s29  ;;  %s5872_s7 = scalar_lea.hbm %s10183_s17, 32 }
 0x14d   : > { %s5867_s5 = scalar_lea.hbm %s6613_s3, 16  ;;  %p5873_p4 = scmp.lt.u32.totalorder %s6613_s3, %s10183_s17 }
 0x14e   : > { %p5868_p9 = scmp.ne.s32.totalorder %s6613_s3, %s5867_s5  ;;  %p5874_p12 = scmp.lt.u32.totalorder %s5872_s7, %s5867_s5 }
 0x14f   : > { %p5876_p8 = scmp.lt.u32.totalorder %s5867_s5, %s6613_s3 }
 0x150   : > { %p5870_p1 = pnand %p5868_p9, %p10184_p11  ;;  %p5875_p13 = por %p5874_p12, %p5873_p4 }
 0x152   : > { %p5871_p6 = pneg %p5870_p1  ;;  %p5877_p2 = por %p5876_p8, %p5875_p13 }
 0x154   : > { %p5878_p0 = pnand %p5877_p2, %p5871_p6 }
 0x156   : > { %5881 = shalt.err (!%p5878_p0)
}
 0x157   : > { %s5882_s0 = scalar_lea.vmem %s597_s19, 16  ;;  %s6134_s26 = smov [#allocation3]  }
 0x158   : > { %p5883_p3 = scmp.ne.s32.totalorder %s597_s19, %s5882_s0  ;;  %s5887_s29 = sshll.u32 %s6134_s26, 4  ;;  %s5888_s29 = int_to_ptr.vmem [resolvable:$false] %s5887_s29 }
 0x159   : > { %s5889_s23 = scalar_lea.vmem %s5888_s29, 32  ;;  %p5890_p7 = scmp.lt.s32.totalorder %s597_s19, %s5888_s29 }
 0x15a   : > { %p5885_p10 = pnand %p5883_p3, %p10184_p11  ;;  %p5891_p9 = scmp.lt.s32.totalorder %s5889_s23, %s5882_s0 }
 0x15c   : > { %p5886_p5 = pneg %p5885_p10  ;;  %p5892_p1 = por %p5891_p9, %p5890_p7 }
 0x15e   : > { %p5893_p4 = pnand %p5892_p1, %p5886_p5 }
 0x160   : > { %5896 = shalt.err (!%p5893_p4)
}
 0x161   : > { %p10185_p12 = scmp.ne.s32.totalorder %s10168_s4, 0  ;;  %s10186_s2 = sld [smem:[#allocation293_spill]] }
 0x162   : > { %s628_s30 = scalar_lea.vmem [#allocation9], %s6396_s18  ;;  %s10187_s9 = sld [smem:[#allocation295_spill]] }
 0x163   : > { %5349 = dma.hbm_to_vmem [thread:$0]  (!%p10185_p12), %s6613_s3, 16, %s597_s19, %s587_s20  }
 0x164   : > { %s635_s25 = sshll.u32 %s628_s30, 4  ;;  %s6640_s25 = int_to_ptr.vmem [resolvable:$true] %s635_s25 }
 0x167   : > { %s6637_s5 = scalar_lea.hbm %s10186_s2, %s6399_s6  ;;  %s5902_s20 = scalar_lea.hbm %s10186_s2, 2048 }
 0x168   : > { %s6646_s0 = scalar_lea.hbm %s10187_s9, %s6399_s6  ;;  %s5897_s26 = scalar_lea.hbm %s6637_s5, 1024 }
 0x169   : > { %p5898_p6 = scmp.ne.s32.totalorder %s6637_s5, %s5897_s26  ;;  %p5903_p2 = scmp.lt.u32.totalorder %s6637_s5, %s10186_s2 }
 0x16a   : > { %p5904_p0 = scmp.lt.u32.totalorder %s5902_s20, %s5897_s26  ;;  %p5906_p10 = scmp.lt.u32.totalorder %s5897_s26, %s6637_s5 }
 0x16b   : > { %p5900_p13 = pnand %p5898_p6, %p10184_p11 }
 0x16c   : > { %p5905_p3 = por %p5904_p0, %p5903_p2 }
 0x16d   : > { %p5901_p8 = pneg %p5900_p13 }
 0x16e   : > { %p5907_p5 = por %p5906_p10, %p5905_p3 }
 0x170   : > { %p5908_p7 = pnand %p5907_p5, %p5901_p8 }
 0x172   : > { %5911 = shalt.err (!%p5908_p7)
}
 0x173   : > { %s5912_s22 = scalar_lea.vmem %s6640_s25, 1024  ;;  %s6135_s15 = smov [#allocation9]  }
 0x174   : > { %p5913_p9 = scmp.ne.s32.totalorder %s6640_s25, %s5912_s22  ;;  %s5917_s30 = sshll.u32 %s6135_s15, 4  ;;  %s5918_s30 = int_to_ptr.vmem [resolvable:$false] %s5917_s30 }
 0x175   : > { %s5919_s7 = scalar_lea.vmem %s5918_s30, 2048  ;;  %p5920_p6 = scmp.lt.s32.totalorder %s6640_s25, %s5918_s30 }
 0x176   : > { %p5915_p1 = pnand %p5913_p9, %p10184_p11  ;;  %p5921_p13 = scmp.lt.s32.totalorder %s5919_s7, %s5912_s22 }
 0x178   : > { %p5916_p4 = pneg %p5915_p1  ;;  %p5922_p2 = por %p5921_p13, %p5920_p6 }
 0x17a   : > { %p5923_p0 = pnand %p5922_p2, %p5916_p4 }
 0x17c   : > { %5926 = shalt.err (!%p5923_p0)
}
 0x17d   : > { %s10188_s24 = scalar_lea.sflag [#allocation8], %s6389_s1  ;;  %s670_s26 = scalar_lea.vmem [#allocation12], %s6396_s18 }
 0x17e   : > { %5355 = dma.hbm_to_vmem [thread:$0]  (!%p10185_p12), %s6637_s5, 1024, %s6640_s25, %s10188_s24, %s6125_s27, %s6125_s27, %s6126_s21  }
 0x17f   : > { %s677_s19 = sshll.u32 %s670_s26, 4  ;;  %s10189_s29 = sld [smem:[#allocation297_spill]]  ;;  %s6675_s19 = int_to_ptr.vmem [resolvable:$true] %s677_s19 }
 0x180   : > { %s5927_s22 = scalar_lea.hbm %s6646_s0, 1024  ;;  %s5932_s7 = scalar_lea.hbm %s10187_s9, 2048 }
 0x181   : > { %p5928_p8 = scmp.ne.s32.totalorder %s6646_s0, %s5927_s22  ;;  %p5933_p5 = scmp.lt.u32.totalorder %s6646_s0, %s10187_s9 }
 0x182   : > { %p5934_p7 = scmp.lt.u32.totalorder %s5932_s7, %s5927_s22  ;;  %p5936_p1 = scmp.lt.u32.totalorder %s5927_s22, %s6646_s0 }
 0x183   : > { %p5930_p3 = pnand %p5928_p8, %p10184_p11 }
 0x184   : > { %p5935_p9 = por %p5934_p7, %p5933_p5 }
 0x185   : > { %s6681_s23 = scalar_lea.hbm %s10189_s29, %s6399_s6  ;;  %p5931_p10 = pneg %p5930_p3 }
 0x186   : > { %p5937_p4 = por %p5936_p1, %p5935_p9 }
 0x188   : > { %p5938_p6 = pnand %p5937_p4, %p5931_p10 }
 0x18a   : > { %5941 = shalt.err (!%p5938_p6)
}
 0x18b   : > { %s5942_s6 = scalar_lea.vmem %s6675_s19, 1024  ;;  %s6136_s25 = smov [#allocation12]  }
 0x18c   : > { %p5943_p13 = scmp.ne.s32.totalorder %s6675_s19, %s5942_s6  ;;  %s5947_s24 = sshll.u32 %s6136_s25, 4  ;;  %s5948_s24 = int_to_ptr.vmem [resolvable:$false] %s5947_s24 }
 0x18d   : > { %s5949_s12 = scalar_lea.vmem %s5948_s24, 2048  ;;  %p5950_p8 = scmp.lt.s32.totalorder %s6675_s19, %s5948_s24 }
 0x18e   : > { %p5945_p2 = pnand %p5943_p13, %p10184_p11  ;;  %p5951_p3 = scmp.lt.s32.totalorder %s5949_s12, %s5942_s6 }
 0x190   : > { %p5946_p0 = pneg %p5945_p2  ;;  %p5952_p5 = por %p5951_p3, %p5950_p8 }
 0x192   : > { %p5953_p7 = pnand %p5952_p5, %p5946_p0 }
 0x194   : > { %5956 = shalt.err (!%p5953_p7)
}
 0x195   : > { %s10190_s26 = scalar_lea.sflag [#allocation11], %s6389_s1  ;;  %s712_s3 = scalar_lea.vmem [#allocation15], %s6396_s18 }
 0x196   : > { %5361 = dma.hbm_to_vmem [thread:$0]  (!%p10185_p12), %s6646_s0, 1024, %s6675_s19, %s10190_s26, %s6125_s27, %s6125_s27, %s6126_s21  }
 0x197   : > { %s719_s20 = sshll.u32 %s712_s3, 4  ;;  %s5957_s22 = scalar_lea.hbm %s6681_s23, 1024  ;;  %s6710_s20 = int_to_ptr.vmem [resolvable:$true] %s719_s20 }
 0x198   : > { %p5958_p10 = scmp.ne.s32.totalorder %s6681_s23, %s5957_s22  ;;  %s5962_s7 = scalar_lea.hbm %s10189_s29, 2048 }
 0x199   : > { %p5963_p4 = scmp.lt.u32.totalorder %s6681_s23, %s10189_s29  ;;  %p5964_p6 = scmp.lt.u32.totalorder %s5962_s7, %s5957_s22 }
 0x19a   : > { %p5960_p9 = pnand %p5958_p10, %p10184_p11  ;;  %p5966_p2 = scmp.lt.u32.totalorder %s5957_s22, %s6681_s23 }
 0x19b   : > { %p5965_p13 = por %p5964_p6, %p5963_p4 }
 0x19c   : > { %p5961_p1 = pneg %p5960_p9 }
 0x19d   : > { %p5967_p0 = por %p5966_p2, %p5965_p13 }
 0x19f   : > { %p5968_p8 = pnand %p5967_p0, %p5961_p1 }
 0x1a1   : > { %5971 = shalt.err (!%p5968_p8)
}
 0x1a2   : > { %s5972_s18 = scalar_lea.vmem %s6710_s20, 1024  ;;  %s6137_s0 = smov [#allocation15]  }
 0x1a3   : > { %p5973_p3 = scmp.ne.s32.totalorder %s6710_s20, %s5972_s18  ;;  %s5977_s19 = sshll.u32 %s6137_s0, 4  ;;  %s5978_s19 = int_to_ptr.vmem [resolvable:$false] %s5977_s19 }
 0x1a4   : > { %s5979_s25 = scalar_lea.vmem %s5978_s19, 2048  ;;  %p5980_p10 = scmp.lt.s32.totalorder %s6710_s20, %s5978_s19 }
 0x1a5   : > { %p5975_p5 = pnand %p5973_p3, %p10184_p11  ;;  %p5981_p9 = scmp.lt.s32.totalorder %s5979_s25, %s5972_s18 }
 0x1a7   : > { %p5976_p7 = pneg %p5975_p5  ;;  %p5982_p4 = por %p5981_p9, %p5980_p10 }
 0x1a9   : > { %p5983_p6 = pnand %p5982_p4, %p5976_p7 }
 0x1ab   : > { %5986 = shalt.err (!%p5983_p6)
}
 0x1ac   : > { %s10191_s24 = scalar_lea.sflag [#allocation14], %s6389_s1  ;;  %s10192_s16 = sld [smem:[#allocation47_spill]] }
 0x1ad   : > { %5367 = dma.hbm_to_vmem [thread:$0]  (!%p10185_p12), %s6681_s23, 1024, %s6710_s20, %s10191_s24, %s6125_s27, %s6125_s27, %s6126_s21  }
 0x1b2   : > { %p10193_p11 = scmp.ne.s32.totalorder %s10192_s16, 0 }
 0x1b4   : > { %731 = sbr.rel (%p10193_p11) target bundleno = 1912 (0x778), region = 84 }
 0x1bb   : > { %s10194_s12 = sld [smem:[#allocation43_spill]] }
 0x1bc   : > { %s10195_s26 = sld [smem:[#allocation50_spill]] }
 0x1c1   : > { %s6741_s3 = sand.u32 1, %s10194_s12  }
 0x1c2   : > { %10196 = sst [smem:[#allocation53_spill]] %s6741_s3  ;;  %s734_s22 = scalar_lea.sflag [#allocation4], %s6741_s3 }
 0x1c3   : > { %p10197_p1 = scmp.ne.s32.totalorder %s10195_s26, 0 }
 0x1c5   : > { %6060 = dma.done.wait (%p10197_p1), %s734_s22, 16  }
 0x1c6   : > { %6062 = vsyncadd (%p10197_p1), %s734_s22, 4294967280  ;;  %s10198_s1 = sld [smem:[#allocation46_spill]]  ;;  %s6751_s27 = sshll.u32 %s6741_s3, 6 }
 0x1c7   : > { %10199 = sst [smem:[#allocation54_spill]] %s6751_s27  ;;  %s6754_s23 = scalar_lea.vmem [#allocation7], %s6751_s27 }
 0x1c8   : > { %10200 = sst [smem:[#allocation55_spill]] %s6754_s23 }
 0x1cc   : > { %s741_s4 = sand.u32 1, %s10198_s1  }
 0x1cd   : > { %s742_s21 = scalar_lea.sflag [#allocation8], %s741_s4 }
 0x1ce   : > { %6064 = dma.done.wait (%p10197_p1), %s742_s21, 2048  }
 0x1cf   : > { %6066 = vsyncadd (%p10197_p1), %s742_s21, 4294965248  ;;  %s6761_s20 = scalar_lea.vmem [#allocation9], %s6751_s27  ;;  %s760_s30 = scalar_lea.sflag [#allocation11], %s741_s4 }
 0x1d0   : > { %10201 = sst [smem:[#allocation56_spill]] %s6761_s20  ;;  %s6764_s7 = scalar_lea.vmem [#allocation10], %s6751_s27 }
 0x1d1   : > { %10202 = sst [smem:[#allocation57_spill]] %s6764_s7 }
 0x1d2   : > { %6068 = dma.done.wait (%p10197_p1), %s760_s30, 2048  }
 0x1d3   : > { %6070 = vsyncadd (%p10197_p1), %s760_s30, 4294965248  ;;  %s6771_s5 = scalar_lea.vmem [#allocation12], %s6751_s27  ;;  %s778_s6 = scalar_lea.sflag [#allocation14], %s741_s4 }
 0x1d4   : > { %10203 = sst [smem:[#allocation58_spill]] %s6771_s5  ;;  %s6774_s18 = scalar_lea.vmem [#allocation13], %s6751_s27 }
 0x1d5   : > { %10204 = sst [smem:[#allocation59_spill]] %s6774_s18 }
 0x1d6   : > { %6072 = dma.done.wait (%p10197_p1), %s778_s6, 2048  }
 0x1d7   : > { %6074 = vsyncadd (%p10197_p1), %s778_s6, 4294965248  ;;  %s6781_s0 = scalar_lea.vmem [#allocation15], %s6751_s27  ;;  %p10206_p12 = scmp.eq.s32.totalorder %s10198_s1, 0 }
 0x1d8   : > { %10205 = sst [smem:[#allocation60_spill]] %s6781_s0 }
 0x1d9   : > { %6076 = dma.done.wait (%p10206_p12), [#allocation17], 768   ;;  %p10207_p13 = pmov %p10206_p12 }
 0x1da   : > { %p10208_p2 = pmov %p10206_p12 }
 0x1db   : > { %6078 = vsyncadd (%p10207_p13), [#allocation17], 4294966528 }
 0x1dc   : > { %6080 = dma.done.wait (%p10208_p2), [#allocation20], 768   ;;  %p10209_p0 = pmov %p10208_p2 }
 0x1de   : > { %6082 = vsyncadd (%p10209_p0), [#allocation20], 4294966528  ;;  %p10210_p8 = pmov %p10209_p0 }
 0x1df   : > { %p10211_p3 = pmov %p10209_p0 }
 0x1e0   : > { %6084 = dma.done.wait (%p10210_p8), [#allocation6], 32  }
 0x1e1   : > { %6086 = vsyncadd (%p10211_p3), [#allocation6], 4294967264  ;;  %p10212_p5 = pmov %p10209_p0 }
 0x1e2   : > { %p10213_p7 = pmov %p10209_p0 }
 0x1e3   : > { %6088 = dma.done.wait (%p10212_p5), [#allocation24], 528  }
 0x1e4   : > { %6090 = vsyncadd (%p10213_p7), [#allocation24], 4294966768  ;;  %p10214_p10 = pmov %p10209_p0 }
 0x1e5   : > { %p10215_p9 = pmov %p10209_p0 }
 0x1e6   : > { %6092 = dma.done.wait (%p10214_p10), [#allocation27], 16  }
 0x1e7   : > { %6094 = vsyncadd (%p10215_p9), [#allocation27], 4294967280 }
 0x1e8   : > { %827 = sfence }
 0x1e9   : > { %v5441_v0 = vld [vmem:[#allocation21] sm:$0xff]   ;;  %v5442_v1 = vld [vmem:[#allocation21 + $0x8] sm:$0xff]   ;;  %v909_v2 = vld [vmem:[%s6754_s23] sm:$0xff]  ;;  %vm1075_vm0 = vcmask 130048   ;;  %v9859_v39 = vmov 0.0   ;;  %vm6139_vm1 = vmmov 0  }
 0x1ea   : > { %5067 = vmatprep.subr.bf16.mxu0 %v5441_v0  ;;  %v910_v3 = vld [vmem:[%s6754_s23 + $0x8] sm:$0xff]  ;;  %5077 = vmatprep.subr.bf16.mxu1 %v5442_v1  ;;  %v917_v5 = vld [vmem:[%s6761_s20] sm:$0xff]  ;;  %v911_v8 = vld [vmem:[%s6754_s23 + $0x10] sm:$0xff]  ;;  %s6912_s19 = sld [smem:[#allocation26]]  ;;  %s6914_s25 = sld [smem:[#allocation26 + $0x1]] }
 0x1eb   : > { %5068 = vmatpush3.bf16.msra.mxu0 %v5441_v0  ;;  %v1049_v4 = vpack.c.bf16 %v910_v3, %v909_v2  ;;  %v918_v6 = vld [vmem:[%s6761_s20 + $0x8] sm:$0xff]  ;;  %5078 = vmatpush3.bf16.msra.mxu1 %v5442_v1  ;;  %v912_v9 = vld [vmem:[%s6754_s23 + $0x18] sm:$0xff]  ;;  %v919_v10 = vld [vmem:[%s6761_s20 + $0x10] sm:$0xff]  ;;  %v1057_v25 = vadd.f32 %v917_v5, %v909_v2  ;;  %s6916_s24 = sld [smem:[#allocation22]]  ;;  %s6924_s22 = sld [smem:[#allocation25 + $0x1]] }
 0x1ec   : > { %v1053_v7 = vpack.c.bf16 %v918_v6, %v917_v5  ;;  %v920_v11 = vld [vmem:[%s6761_s20 + $0x18] sm:$0xff]  ;;  %v1050_v12 = vpack.c.bf16 %v912_v9, %v911_v8  ;;  %v913_v15 = vld [vmem:[%s6754_s23 + $0x20] sm:$0xff]  ;;  %v914_v16 = vld [vmem:[%s6754_s23 + $0x28] sm:$0xff]  ;;  %v1058_v26 = vadd.f32 %v918_v6, %v910_v3  ;;  %v1059_v30 = vadd.f32 %v919_v10, %v911_v8  ;;  %5097 = vmatprep.subr.bf16.mxu1 %v9859_v39  ;;  %s6918_s16 = sld [smem:[#allocation22 + $0x80]]  ;;  %s6926_s4 = sld [smem:[#allocation22 + $0x1]] }
 0x1ed   : > { %5069 = vmatprep.mubr.msk.bf16.mxu0 %vm1075_vm0, %v1049_v4  ;;  %v1054_v13 = vpack.c.bf16 %v920_v11, %v919_v10  ;;  %v5443_v14 = vld [vmem:[#allocation21 + $0x10] sm:$0xff]   ;;  %v921_v17 = vld [vmem:[%s6761_s20 + $0x20] sm:$0xff]  ;;  %v1051_v18 = vpack.c.bf16 %v914_v16, %v913_v15  ;;  %v922_v19 = vld [vmem:[%s6761_s20 + $0x28] sm:$0xff]  ;;  %v1060_v31 = vadd.f32 %v920_v11, %v912_v9  ;;  %s6920_s12 = sld [smem:[#allocation23]]  ;;  %s6928_s21 = sld [smem:[#allocation22 + $0x81]] }
 0x1ee   : > { %5079 = vmatprep.mubr.msk.bf16.mxu1 %vm1075_vm0, %v1053_v7  ;;  %5070 = vmatmul.mubr.msk.bf16.vlgmr.msra.gmra.mrb[0].mxu0 %vm1075_vm0, %v1050_v12  ;;  %v915_v20 = vld [vmem:[%s6754_s23 + $0x30] sm:$0xff]  ;;  %v916_v21 = vld [vmem:[%s6754_s23 + $0x38] sm:$0xff]  ;;  %v1055_v22 = vpack.c.bf16 %v922_v19, %v921_v17  ;;  %v1065_v29 = vpack.c.bf16 %v1058_v26, %v1057_v25  ;;  %v1061_v32 = vadd.f32 %v921_v17, %v913_v15  ;;  %s6922_s26 = sld [smem:[#allocation25]]  ;;  %s6930_s30 = sld [smem:[#allocation23 + $0x1]] }
 0x1ef   : > { %5080 = vmatmul.mubr.msk.bf16.vlgmr.msra.gmra.mrb[0].mxu1 %vm1075_vm0, %v1054_v13  ;;  %5087 = vmatprep.subr.bf16.mxu0 %v5443_v14  ;;  %v923_v23 = vld [vmem:[%s6761_s20 + $0x30] sm:$0xff]  ;;  %v924_v24 = vld [vmem:[%s6761_s20 + $0x38] sm:$0xff]  ;;  %v1052_v27 = vpack.c.bf16 %v916_v21, %v915_v20  ;;  %v1062_v33 = vadd.f32 %v922_v19, %v914_v16  ;;  %v1066_v34 = vpack.c.bf16 %v1060_v31, %v1059_v30  ;;  %s6932_s6 = sld [smem:[#allocation25 + $0x80]]  ;;  %s6934_s15 = sld [smem:[#allocation25 + $0x81]] }
 0x1f0   : > { %5088 = vmatpush3.bf16.msra.mxu0 %v5443_v14  ;;  %5073 = vmatprep.mubr.msk.bf16.mxu0 %vm1075_vm0, %v1051_v18  ;;  %v1056_v28 = vpack.c.bf16 %v924_v24, %v923_v23  ;;  %v1063_v36 = vadd.f32 %v923_v23, %v915_v20  ;;  %v1064_v37 = vadd.f32 %v924_v24, %v916_v21  ;;  %v6843_v54 = vld [vmem:[#allocation19] sm:$0xff]   ;;  %10216 = sst [smem:[#allocation61_spill]] %s6912_s19  ;;  %s6936_s2 = sld [smem:[#allocation22 + $0x2]] }
 0x1f1   : > { %5083 = vmatprep.mubr.msk.bf16.mxu1 %vm1075_vm0, %v1055_v22  ;;  %v1067_v35 = vpack.c.bf16 %v1062_v33, %v1061_v32  ;;  %5109 = vmatprep.subr.bf16.mxu0 %v9859_v39  ;;  %10217 = sst [smem:[#allocation62_spill]] %s6914_s25  ;;  %s6938_s8 = sld [smem:[#allocation22 + $0x82]] }
 0x1f2   : > { %v1068_v38 = vpack.c.bf16 %v1064_v37, %v1063_v36  ;;  %10218 = sst [smem:[#allocation63_spill]] %s6916_s24  ;;  %s6940_s9 = sld [smem:[#allocation23 + $0x2]] }
 0x1f3   : > { %10219 = sst [smem:[#allocation64_spill]] %s6918_s16  ;;  %s6942_s10 = sld [smem:[#allocation25 + $0x100]] }
 0x1f4   : > { %10220 = sst [smem:[#allocation65_spill]] %s6920_s12  ;;  %s6944_s11 = sld [smem:[#allocation25 + $0x101]] }
 0x1f5   : > { %10221 = sst [smem:[#allocation66_spill]] %s6922_s26  ;;  %s6946_s13 = sld [smem:[#allocation22 + $0x3]] }
 0x1f6   : > { %5074 = vmatmul.mubr.msk.bf16.gmra.mrb[4].mxu0 %vm1075_vm0, %v1052_v27  ;;  %v5445_v27 = vld [vmem:[#allocation19 + $0x8] sm:$0xff]   ;;  %10222 = sst [smem:[#allocation67_spill]] %s6924_s22  ;;  %s6948_s14 = sld [smem:[#allocation22 + $0x83]] }
 0x1f7   : > { %5084 = vmatmul.mubr.msk.bf16.gmra.mrb[4].mxu1 %vm1075_vm0, %v1056_v28  ;;  %5089 = vmatprep.mubr.msk.bf16.mxu0 %vm1075_vm0, %v1065_v29  ;;  %10223 = sst [smem:[#allocation68_spill]] %s6926_s4  ;;  %s6950_s17 = sld [smem:[#allocation23 + $0x3]] }
 0x1f8   : > { %5099 = vmatprep.mubr.msk.bf16.mxu1 %vm6139_vm1, %v9859_v39  ;;  %10224 = sst [smem:[#allocation69_spill]] %s6928_s21  ;;  %s6952_s29 = sld [smem:[#allocation25 + $0x180]] }
 0x1f9   : > { %10225 = sst [smem:[#allocation70_spill]] %s6930_s30  ;;  %s6954_s28 = sld [smem:[#allocation25 + $0x181]] }
 0x1fa   : > { %10226 = sst [smem:[#allocation71_spill]] %s6932_s6  ;;  %s6956_s1 = sld [smem:[#allocation22 + $0x4]] }
 0x1fb   : > { %10227 = sst [smem:[#allocation72_spill]] %s6934_s15  ;;  %s6958_s20 = sld [smem:[#allocation22 + $0x84]] }
 0x1fc   : > { %10228 = sst [smem:[#allocation73_spill]] %s6936_s2  ;;  %s6960_s5 = sld [smem:[#allocation23 + $0x4]] }
 0x1fd   : > { %10229 = sst [smem:[#allocation74_spill]] %s6938_s8  ;;  %s6964_s7 = sld [smem:[#allocation25 + $0x201]] }
 0x1fe   : > { %5090 = vmatmul.mubr.msk.bf16.vlgmr.msra.gmra.mrb[8].mxu0 %vm1075_vm0, %v1066_v34  ;;  %v5446_v34 = vld [vmem:[#allocation19 + $0x10] sm:$0xff]   ;;  %10230 = sst [smem:[#allocation75_spill]] %s6940_s9  ;;  %s6962_s23 = sld [smem:[#allocation25 + $0x200]] }
 0x1ff   : > { %5093 = vmatprep.mubr.msk.bf16.mxu0 %vm1075_vm0, %v1067_v35  ;;  %10231 = sst [smem:[#allocation76_spill]] %s6942_s10  ;;  %s6966_s3 = sld [smem:[#allocation22 + $0x5]] }
 0x200   : > { %10232 = sst [smem:[#allocation77_spill]] %s6944_s11  ;;  %s6968_s27 = sld [smem:[#allocation22 + $0x85]] }
 0x201   : > { %10233 = sst [smem:[#allocation78_spill]] %s6946_s13  ;;  %s6970_s0 = sld [smem:[#allocation23 + $0x5]] }
 0x202   : > { %10234 = sst [smem:[#allocation79_spill]] %s6948_s14  ;;  %s6972_s18 = sld [smem:[#allocation25 + $0x280]] }
 0x203   : > { %10235 = sst [smem:[#allocation80_spill]] %s6950_s17  ;;  %s7042_s25 = sld [smem:[#allocation23 + $0xb]] }
 0x204   : > { %10236 = sst [smem:[#allocation81_spill]] %s6952_s29  ;;  %s6974_s29 = sld [smem:[#allocation25 + $0x281]] }
 0x205   : > { %10237 = sst [smem:[#allocation82_spill]] %s6954_s28  ;;  %s6976_s28 = sld [smem:[#allocation22 + $0x6]] }
 0x206   : > { %5094 = vmatmul.mubr.msk.bf16.gmra.mrb[12].mxu0 %vm1075_vm0, %v1068_v38  ;;  %10238 = sst [smem:[#allocation83_spill]] %s6956_s1  ;;  %s6978_s1 = sld [smem:[#allocation22 + $0x86]] }
 0x207   : > { %5111 = vmatprep.mubr.msk.bf16.mxu0 %vm6139_vm1, %v9859_v39  ;;  %10239 = sst [smem:[#allocation84_spill]] %s6958_s20  ;;  %s6980_s20 = sld [smem:[#allocation23 + $0x6]] }
 0x208   : > { %10240 = sst [smem:[#allocation85_spill]] %s6960_s5  ;;  %s6982_s5 = sld [smem:[#allocation25 + $0x300]] }
 0x209   : > { %10241 = sst [smem:[#allocation86_spill]] %s6962_s23  ;;  %s6984_s23 = sld [smem:[#allocation25 + $0x301]] }
 0x20a   : > { %10242 = sst [smem:[#allocation87_spill]] %s6964_s7  ;;  %s6986_s7 = sld [smem:[#allocation22 + $0x7]] }
 0x20b   : > { %10243 = sst [smem:[#allocation88_spill]] %s6966_s3  ;;  %s10279_s12 = sld [smem:[#allocation83_spill]] }
 0x20c   : > { %10244 = sst [smem:[#allocation89_spill]] %s6968_s27  ;;  %s7050_s26 = sld [smem:[#allocation25 + $0x581]] }
 0x20d   : > { %10245 = sst [smem:[#allocation90_spill]] %s6970_s0  ;;  %s6990_s27 = sld [smem:[#allocation22 + $0x87]] }
 0x20e   : > { %10246 = sst [smem:[#allocation91_spill]] %s6972_s18  ;;  %s6992_s0 = sld [smem:[#allocation23 + $0x7]] }
 0x20f   : > { %10247 = sst [smem:[#allocation92_spill]] %s6974_s29  ;;  %s6994_s29 = sld [smem:[#allocation25 + $0x380]] }
 0x210   : > { %10248 = sst [smem:[#allocation93_spill]] %s6976_s28  ;;  %s6996_s28 = sld [smem:[#allocation25 + $0x381]] }
 0x211   : > { %10249 = sst [smem:[#allocation94_spill]] %s6978_s1  ;;  %s7020_s1 = sld [smem:[#allocation22 + $0xa]] }
 0x212   : > { %10250 = sst [smem:[#allocation95_spill]] %s6980_s20  ;;  %s7000_s20 = sld [smem:[#allocation22 + $0x8]] }
 0x213   : > { %10251 = sst [smem:[#allocation96_spill]] %s6982_s5  ;;  %s7018_s5 = sld [smem:[#allocation25 + $0x481]] }
 0x214   : > { %10252 = sst [smem:[#allocation97_spill]] %s6984_s23  ;;  %s7002_s23 = sld [smem:[#allocation22 + $0x88]] }
 0x215   : > { %10253 = sst [smem:[#allocation98_spill]] %s6986_s7  ;;  %s10281_s22 = sld [smem:[#allocation84_spill]] }
 0x216   : > { %10254 = sst [smem:[#allocation99_spill]] %s6990_s27  ;;  %s7004_s7 = sld [smem:[#allocation23 + $0x8]] }
 0x217   : > { %10255 = sst [smem:[#allocation100_spill]] %s6992_s0  ;;  %s7006_s27 = sld [smem:[#allocation25 + $0x400]] }
 0x218   : > { %10256 = sst [smem:[#allocation101_spill]] %s6994_s29  ;;  %s7008_s0 = sld [smem:[#allocation25 + $0x401]] }
 0x219   : > { %10257 = sst [smem:[#allocation102_spill]] %s6996_s28  ;;  %s7010_s29 = sld [smem:[#allocation22 + $0x9]] }
 0x21a   : > { %10258 = sst [smem:[#allocation103_spill]] %s7000_s20  ;;  %s7012_s28 = sld [smem:[#allocation22 + $0x89]] }
 0x21b   : > { %10259 = sst [smem:[#allocation104_spill]] %s7002_s23  ;;  %s7014_s20 = sld [smem:[#allocation23 + $0x9]] }
 0x21c   : > { %10260 = sst [smem:[#allocation105_spill]] %s7004_s7  ;;  %s7016_s23 = sld [smem:[#allocation25 + $0x480]] }
 0x21d   : > { %10261 = sst [smem:[#allocation106_spill]] %s7006_s27  ;;  %s7022_s27 = sld [smem:[#allocation22 + $0x8a]] }
 0x21e   : > { %10262 = sst [smem:[#allocation107_spill]] %s7008_s0  ;;  %s7024_s0 = sld [smem:[#allocation23 + $0xa]] }
 0x21f   : > { %10263 = sst [smem:[#allocation108_spill]] %s7010_s29  ;;  %s7026_s29 = sld [smem:[#allocation25 + $0x500]] }
 0x220   : > { %10264 = sst [smem:[#allocation109_spill]] %s7012_s28  ;;  %s7058_s30 = sld [smem:[#allocation22 + $0x8c]] }
 0x221   : > { %10265 = sst [smem:[#allocation110_spill]] %s7014_s20  ;;  %s10287_s15 = sld [smem:[#allocation89_spill]] }
 0x222   : > { %10266 = sst [smem:[#allocation111_spill]] %s7016_s23  ;;  %s7032_s23 = sld [smem:[#allocation25 + $0x501]] }
 0x223   : > { %10267 = sst [smem:[#allocation112_spill]] %s7018_s5  ;;  %s10292_s10 = sld [smem:[#allocation93_spill]] }
 0x224   : > { %10268 = sst [smem:[#allocation113_spill]] %s7020_s1  ;;  %s7034_s1 = sld [smem:[#allocation22 + $0xb]] }
 0x225   : > { %10269 = sst [smem:[#allocation114_spill]] %s7022_s27  ;;  %s7082_s19 = sld [smem:[#allocation23 + $0xd]] }
 0x226   : > { %10270 = sst [smem:[#allocation115_spill]] %s7024_s0  ;;  %s10313_s18 = sld [smem:[#allocation104_spill]] }
 0x227   : > { %10271 = sst [smem:[#allocation116_spill]] %s7026_s29  ;;  %s7040_s29 = sld [smem:[#allocation22 + $0x8b]] }
 0x228   : > { %10272 = sst [smem:[#allocation117_spill]] %s7032_s23  ;;  %s7113_s11 = sld [smem:[#allocation25 + $0x701]] }
 0x229   : > { %10275 = sst [smem:[#allocation120_spill]] %s7042_s25  ;;  %s7056_s25 = sld [smem:[#allocation22 + $0xc]] }
 0x22a   : > { %10273 = sst [smem:[#allocation118_spill]] %s7034_s1  ;;  %s7115_s17 = sld [smem:[#allocation22 + $0xf]] }
 0x22b   : > { %10280 = sst [smem:[#allocation122_spill]] %s7050_s26  ;;  %s7064_s26 = sld [smem:[#allocation23 + $0xc]] }
 0x22c   : > { %10286 = sst [smem:[#allocation124_spill]] %s7058_s30  ;;  %s7072_s30 = sld [smem:[#allocation25 + $0x601]] }
 0x22d   : > { %10274 = sst [smem:[#allocation119_spill]] %s7040_s29  ;;  %s10323_s29 = sld [smem:[#allocation113_spill]] }
 0x22e   : > { %10301 = sst [smem:[#allocation130_spill]] %s7082_s19  ;;  %s7098_s19 = sld [smem:[#allocation22 + $0x8e]] }
 0x22f   : > { %10284 = sst [smem:[#allocation123_spill]] %s7056_s25  ;;  %s7139_s9 = sld [smem:[#allocation22 + $0x10]] }
 0x230   : > { %10319 = sst [smem:[#allocation137_spill]] %s7113_s11  ;;  %s7141_s7 = sld [smem:[#allocation22 + $0x90]] }
 0x231   : > { %10289 = sst [smem:[#allocation125_spill]] %s7064_s26  ;;  %s7080_s26 = sld [smem:[#allocation22 + $0x8d]] }
 0x232   : > { %10294 = sst [smem:[#allocation127_spill]] %s7072_s30  ;;  %s7088_s30 = sld [smem:[#allocation25 + $0x680]] }
 0x233   : > { %10320 = sst [smem:[#allocation138_spill]] %s7115_s17  ;;  %s7154_s5 = sld [smem:[#allocation25 + $0x801]] }
 0x234   : > { %10311 = sst [smem:[#allocation134_spill]] %s7098_s19  ;;  %s7156_s20 = sld [smem:[#allocation22 + $0x11]] }
 0x235   : > { %10328 = sst [smem:[#allocation143_spill]] %s7139_s9  ;;  %s7160_s0 = sld [smem:[#allocation22 + $0x91]] }
 0x236   : > { %10329 = sst [smem:[#allocation144_spill]] %s7141_s7  ;;  %s10339_s23 = sld [smem:[#allocation124_spill]] }
 0x237   : > { %10299 = sst [smem:[#allocation129_spill]] %s7080_s26  ;;  %s7168_s6 = sld [smem:[#allocation25 + $0x880]] }
 0x238   : > { %10305 = sst [smem:[#allocation131_spill]] %s7088_s30  ;;  %s7238_s30 = sld [smem:[#allocation22 + $0x94]] }
 0x239   : > { %10334 = sst [smem:[#allocation147_spill]] %s7154_s5 }
 0x23a   : > { %10335 = sst [smem:[#allocation148_spill]] %s7156_s20  ;;  %s7199_s5 = sld [smem:[#allocation25 + $0x901]] }
 0x23b   : > { %10336 = sst [smem:[#allocation149_spill]] %s7160_s0  ;;  %s7176_s0 = sld [smem:[#allocation22 + $0x12]] }
 0x23c   : > { %s7178_s20 = sld [smem:[#allocation22 + $0x92]]  ;;  %s7253_s11 = sld [smem:[#allocation25 + $0xa01]] }
 0x23d   : > { %10340 = sst [smem:[#allocation151_spill]] %s7168_s6  ;;  %s7244_s6 = sld [smem:[#allocation23 + $0x14]] }
 0x23e   : > { %10358 = sst [smem:[#allocation164_spill]] %s7238_s30  ;;  %s7365_s30 = sld [smem:[#allocation25 + $0xc81]] }
 0x240   : > { %10351 = sst [smem:[#allocation157_spill]] %s7199_s5  ;;  %s7318_s5 = sld [smem:[#allocation22 + $0x18]] }
 0x241   : > { %10343 = sst [smem:[#allocation153_spill]] %s7176_s0  ;;  %s7190_s0 = sld [smem:[#allocation23 + $0x12]] }
 0x242   : > { %10344 = sst [smem:[#allocation154_spill]] %s7178_s20 }
 0x243   : > { %s7192_s20 = sld [smem:[#allocation25 + $0x900]]  ;;  %10360 = sst [smem:[#allocation165_spill]] %s7244_s6 }
 0x244   : > { %10365 = sst [smem:[#allocation167_spill]] %s7253_s11  ;;  %s7363_s6 = sld [smem:[#allocation25 + $0xc80]] }
 0x245   : > { %10394 = sst [smem:[#allocation192_spill]] %s7365_s30  ;;  %s7378_s11 = sld [smem:[#allocation23 + $0x1a]] }
 0x246   : > { %10385 = sst [smem:[#allocation183_spill]] %s7318_s5  ;;  %s7448_s5 = sld [smem:[#allocation25 + $0xe81]] }
 0x247   : > { %10348 = sst [smem:[#allocation155_spill]] %s7190_s0  ;;  %s7306_s0 = sld [smem:[#allocation23 + $0x17]] }
 0x248   : > { %s7462_s30 = sld [smem:[#allocation23 + $0x1e]] }
 0x249   : > { %10349 = sst [smem:[#allocation156_spill]] %s7192_s20  ;;  %s7304_s20 = sld [smem:[#allocation22 + $0x97]] }
 0x24a   : > { %10393 = sst [smem:[#allocation191_spill]] %s7363_s6  ;;  %s7464_s6 = sld [smem:[#allocation22 + $0x1f]] }
 0x24b   : > { %10397 = sst [smem:[#allocation195_spill]] %s7378_s11 }
 0x24c   : > { %10416 = sst [smem:[#allocation214_spill]] %s7448_s5 }
 0x24d   : > { %10382 = sst [smem:[#allocation180_spill]] %s7306_s0  ;;  %s7423_s0 = sld [smem:[#allocation22 + $0x1d]] }
 0x24e   : > { %10420 = sst [smem:[#allocation217_spill]] %s7462_s30 }
 0x24f   : > { %10381 = sst [smem:[#allocation179_spill]] %s7304_s20 }
 0x250   : > { %10421 = sst [smem:[#allocation218_spill]] %s7464_s6 }
 0x253   : > { %10410 = sst [smem:[#allocation208_spill]] %s7423_s0  ;;  %s10466_s0 = sld [smem:[#allocation153_spill]] }
 0x254   : > { %s10487_s30 = sld [smem:[#allocation208_spill]] }
 0x2c1   : > { %v5071_v40 = vpop.f32.mrb[0].mxu0 }
 0x2c2   : > { %v5081_v41 = vpop.f32.mrb[0].mxu1  ;;  %v1122_v43 = vpop.f32.mrb[1].mxu0 }
 0x2c3   : > { %v6837_v42 = vsub.f32 %v5071_v40, %v5081_v41  ;;  %v1205_v44 = vpop.f32.mrb[1].mxu1  ;;  %v5072_v46 = vpop.f32.mrb[2].mxu0 }
 0x2c4   : > { %v1319_v45 = vsub.f32 %v1122_v43, %v1205_v44  ;;  %v5082_v47 = vpop.f32.mrb[2].mxu1  ;;  %v1125_v49 = vpop.f32.mrb[3].mxu0 }
 0x2c5   : > { %v6839_v48 = vsub.f32 %v5072_v46, %v5082_v47  ;;  %v1208_v50 = vpop.f32.mrb[3].mxu1 }
 0x2c6   : > { %v1320_v51 = vsub.f32 %v1125_v49, %v1208_v50 }
 0x2c7   : > { %v1344_v52 = vpack.c.bf16 %v6839_v48, %v6837_v42 }
 0x2c8   : > { %v1343_v53 = vpack.c.bf16 %v1320_v51, %v1319_v45 }
 0x2c9   : > { %v5075_v55 = vpop.f32.mrb[4].mxu0 }
 0x2ca   : > { %v5085_v56 = vpop.f32.mrb[4].mxu1  ;;  %5098 = vmatpush3.bf16.msra.mxu1 %v1343_v53  ;;  %v1138_v58 = vpop.f32.mrb[5].mxu0  ;;  %v10051_v53 = vstv %s7080_s26  ;;  %s7255_s26 = sld [smem:[#allocation22 + $0x15]] }
 0x2cb   : > { %v6845_v57 = vsub.f32 %v5075_v55, %v5085_v56  ;;  %v1221_v59 = vpop.f32.mrb[5].mxu1  ;;  %5103 = vmatprep.subr.bf16.mxu1 %v9859_v39  ;;  %v5076_v61 = vpop.f32.mrb[6].mxu0 }
 0x2cc   : > { %v6848_v60 = vsub.f32 %v1138_v58, %v1221_v59  ;;  %v5086_v62 = vpop.f32.mrb[6].mxu1  ;;  %v1141_v0 = vpop.f32.mrb[7].mxu0 }
 0x2cd   : > { %v6850_v63 = vsub.f32 %v5076_v61, %v5086_v62  ;;  %v1224_v1 = vpop.f32.mrb[7].mxu1  ;;  %5100 = vmatmul.mubr.msk.bf16.vlgmr.msra.gmra.mrb[8].mxu1 %vm1075_vm0, %v6843_v54 }
 0x2ce   : > { %v6854_v2 = vsub.f32 %v1141_v0, %v1224_v1  ;;  %5105 = vmatprep.mubr.msk.bf16.mxu1 %vm6139_vm1, %v9859_v39 }
 0x2cf   : > { %v1346_v3 = vpack.c.bf16 %v6850_v63, %v6845_v57 }
 0x2d0   : > { %v1345_v4 = vpack.c.bf16 %v6854_v2, %v6848_v60  ;;  %10367 = sst [smem:[#allocation168_spill]] %s7255_s26  ;;  %s7408_s26 = sld [smem:[#allocation23 + $0x1c]] }
 0x2d1   : > { %v5091_v5 = vpop.f32.mrb[8].mxu0 }
 0x2d2   : > { %v1329_v6 = vsub.f32 %v5091_v5, %v5071_v40  ;;  %v1288_v7 = vpop.f32.mrb[9].mxu0  ;;  %v10030_v5 = vstv %s6946_s13  ;;  %s7074_s13 = sld [smem:[#allocation22 + $0xd]] }
 0x2d3   : > { %v1327_v8 = vsub.f32 %v1288_v7, %v1122_v43  ;;  %v5092_v9 = vpop.f32.mrb[10].mxu0 }
 0x2d4   : > { %v1337_v10 = vsub.f32 %v1329_v6, %v5081_v41  ;;  %v1330_v11 = vsub.f32 %v5092_v9, %v5072_v46  ;;  %v1291_v12 = vpop.f32.mrb[11].mxu0  ;;  %v10031_v6 = vstv %s6948_s14  ;;  %s10318_s14 = sld [smem:[#allocation108_spill]]  ;;  %v10049_v9 = vstv %s10339_s23  ;;  %s7224_s23 = sld [smem:[#allocation25 + $0x980]] }
 0x2d5   : > { %v1335_v13 = vsub.f32 %v1327_v8, %v1205_v44  ;;  %v1328_v14 = vsub.f32 %v1291_v12, %v1125_v49 }
 0x2d6   : > { %v1353_v15 = vadd.f32 %v1337_v10, %v6837_v42  ;;  %v1338_v16 = vsub.f32 %v1330_v11, %v5082_v47  ;;  %v10033_v11 = vstv %s10281_s22  ;;  %s7274_s22 = sld [smem:[#allocation25 + $0xa81]]  ;;  %10407 = sst [smem:[#allocation205_spill]] %s7408_s26 }
 0x2d7   : > { %v1351_v17 = vadd.f32 %v1335_v13, %v1319_v45  ;;  %v1336_v18 = vsub.f32 %v1328_v14, %v1208_v50  ;;  %s10457_s26 = sld [smem:[#allocation129_spill]] }
 0x2d8   : > { %v1348_v19 = vpack.c.bf16 %v1338_v16, %v1337_v10  ;;  %v1354_v20 = vadd.f32 %v1338_v16, %v6839_v48  ;;  %v10032_v10 = vstv %s10279_s12  ;;  %10296 = sst [smem:[#allocation128_spill]] %s7074_s13  ;;  %v10035_v16 = vstv %s10287_s15  ;;  %s10304_s12 = sld [smem:[#allocation59_spill]] }
 0x2d9   : > { %v1347_v21 = vpack.c.bf16 %v1336_v18, %v1335_v13  ;;  %v1352_v22 = vadd.f32 %v1336_v18, %v1320_v51  ;;  %v5095_v23 = vpop.f32.mrb[12].mxu0  ;;  %s7090_s13 = sld [smem:[#allocation25 + $0x681]]  ;;  %s10312_s15 = sld [smem:[#allocation60_spill]]  ;;  %v10048_v13 = vstv %s7056_s25 }
 0x2da   : > { %v1360_v24 = vpack.c.bf16 %v1354_v20, %v1353_v15  ;;  %v1333_v25 = vsub.f32 %v5095_v23, %v5075_v55  ;;  %v1304_v26 = vpop.f32.mrb[13].mxu0  ;;  %v10063_v55 = vstv %s6918_s16  ;;  %v10034_v15 = vstv %s6966_s3  ;;  %s10302_s16 = sld [smem:[#allocation99_spill]]  ;;  %s7096_s3 = sld [smem:[#allocation22 + $0xe]] }
 0x2db   : > { %v1359_v28 = vpack.c.bf16 %v1352_v22, %v1351_v17  ;;  %v1331_v29 = vsub.f32 %v1304_v26, %v1138_v58  ;;  %v5096_v30 = vpop.f32.mrb[14].mxu0  ;;  %5104 = vmatpush3.bf16.msra.mxu1 %v1347_v21  ;;  %v10036_v20 = vstv %s10292_s10  ;;  %s7104_s10 = sld [smem:[#allocation23 + $0xe]]  ;;  %10355 = sst [smem:[#allocation161_spill]] %s7224_s23 }
 0x2dc   : > { %v1341_v31 = vsub.f32 %v1333_v25, %v5085_v56  ;;  %v1334_v32 = vsub.f32 %v5096_v30, %v5076_v61  ;;  %v1307_v33 = vpop.f32.mrb[15].mxu0  ;;  %5115 = vmatprep.subr.bf16.mxu1 %v9859_v39  ;;  %10374 = sst [smem:[#allocation172_spill]] %s7274_s22  ;;  %s7340_s23 = sld [smem:[#allocation22 + $0x19]] }
 0x2dd   : > { %v1339_v35 = vsub.f32 %v1331_v29, %v1221_v59  ;;  %v1332_v36 = vsub.f32 %v1307_v33, %v1141_v0  ;;  %5110 = vmatpush3.bf16.msra.mxu0 %v1359_v28  ;;  %v10061_v59 = vstv %s6926_s4  ;;  %v10056_v0 = vstv %s6936_s2  ;;  %s10293_s2 = sld [smem:[#allocation94_spill]]  ;;  %s10309_s4 = sld [smem:[#allocation103_spill]] }
 0x2de   : > { %v1357_v37 = vadd.f32 %v1341_v31, %v6845_v57  ;;  %v1342_v38 = vsub.f32 %v1334_v32, %v5086_v62  ;;  %5106 = vmatmul.mubr.msk.bf16.vlgmr.msra.gmra.mrb[12].mxu1 %vm1075_vm0, %v5445_v27  ;;  %5121 = vmatprep.subr.bf16.mxu0 %v9859_v39  ;;  %v925_v29 = vld [vmem:[%s10304_s12] sm:$0xff]  ;;  %v928_v62 = vld [vmem:[%s10304_s12 + $0x18] sm:$0xff]  ;;  %s7371_s25 = sld [smem:[#allocation22 + $0x9a]]  ;;  %s7388_s22 = sld [smem:[#allocation22 + $0x9b]] }
 0x2df   : > { %v1355_v40 = vadd.f32 %v1339_v35, %v6848_v60  ;;  %v1340_v41 = vsub.f32 %v1332_v36, %v1224_v1  ;;  %5116 = vmatpush3.bf16.msra.mxu1 %v1344_v52  ;;  %5117 = vmatprep.mubr.msk.bf16.mxu1 %vm6139_vm1, %v9859_v39  ;;  %v10058_v60 = vstv %s6928_s21  ;;  %v10054_v1 = vstv %s6938_s8  ;;  %s7066_s8 = sld [smem:[#allocation25 + $0x600]]  ;;  %10306 = sst [smem:[#allocation132_spill]] %s7090_s13  ;;  %v936_v58 = vld [vmem:[%s10312_s15 + $0x18] sm:$0xff] }
 0x2e0   : > { %v1350_v42 = vpack.c.bf16 %v1342_v38, %v1341_v31  ;;  %v1358_v43 = vadd.f32 %v1342_v38, %v6850_v63  ;;  %5112 = vmatmul.mubr.msk.bf16.vlgmr.msra.gmra.mrb[16].mxu0 %vm1075_vm0, %v5446_v34  ;;  %5127 = vmatprep.subr.bf16.mxu1 %v9859_v39  ;;  %10310 = sst [smem:[#allocation133_spill]] %s7096_s3  ;;  %v10041_v36 = vstv %s10313_s18  ;;  %s7128_s21 = sld [smem:[#allocation25 + $0x780]]  ;;  %v10044_v38 = vstv %s10323_s29 }
 0x2e1   : > { %v1349_v44 = vpack.c.bf16 %v1340_v41, %v1339_v35  ;;  %v1356_v45 = vadd.f32 %v1340_v41, %v6854_v2  ;;  %5122 = vmatpush3.bf16.msra.mxu0 %v1348_v19  ;;  %5123 = vmatprep.mubr.msk.bf16.mxu0 %vm6139_vm1, %v9859_v39  ;;  %10316 = sst [smem:[#allocation135_spill]] %s7104_s10  ;;  %v933_v35 = vld [vmem:[%s10312_s15] sm:$0xff]  ;;  %s7130_s18 = sld [smem:[#allocation25 + $0x781]]  ;;  %v10045_v31 = vstv %s7022_s27  ;;  %v10046_v19 = vstv %s7034_s1 }
 0x2e2   : > { %v1362_v46 = vpack.c.bf16 %v1358_v43, %v1357_v37  ;;  %5133 = vmatprep.subr.bf16.mxu0 %v9859_v39  ;;  %v10042_v43 = vstv %s10318_s14  ;;  %s7147_s14 = sld [smem:[#allocation25 + $0x800]]  ;;  %s7162_s27 = sld [smem:[#allocation23 + $0x11]]  ;;  %v10052_v52 = vstv %s7096_s3  ;;  %v10053_v63 = vstv %s7098_s19 }
 0x2e3   : > { %v1361_v47 = vpack.c.bf16 %v1356_v45, %v1355_v40  ;;  %v10037_v21 = vstv %s10293_s2  ;;  %s7106_s2 = sld [smem:[#allocation25 + $0x700]]  ;;  %v10040_v33 = vstv %s10309_s4  ;;  %v926_v45 = vld [vmem:[%s10304_s12 + $0x8] sm:$0xff]  ;;  %s10332_s4 = sld [smem:[#allocation119_spill]] }
 0x2e4   : > { %s7170_s1 = sld [smem:[#allocation25 + $0x881]]  ;;  %s7201_s29 = sld [smem:[#allocation22 + $0x13]] }
 0x2e5   : > { %10290 = sst [smem:[#allocation126_spill]] %s7066_s8  ;;  %s10300_s8 = sld [smem:[#allocation98_spill]] }
 0x2e6   : > { %5118 = vmatmul.mubr.msk.bf16.vlgmr.msra.gmra.mrb[16].mxu1 %vm1075_vm0, %v6843_v54  ;;  %10325 = sst [smem:[#allocation141_spill]] %s7128_s21  ;;  %s7236_s13 = sld [smem:[#allocation22 + $0x14]] }
 0x2e7   : > { %5128 = vmatpush3.bf16.msra.mxu1 %v1360_v24  ;;  %5129 = vmatprep.mubr.msk.bf16.mxu1 %vm6139_vm1, %v9859_v39  ;;  %10326 = sst [smem:[#allocation142_spill]] %s7130_s18  ;;  %s7246_s3 = sld [smem:[#allocation25 + $0xa00]] }
 0x2e8   : > { %5124 = vmatmul.mubr.msk.bf16.vlgmr.msra.gmra.mrb[20].mxu0 %vm1075_vm0, %v5445_v27  ;;  %5139 = vmatprep.subr.bf16.mxu1 %v9859_v39  ;;  %10331 = sst [smem:[#allocation146_spill]] %s7147_s14  ;;  %s7263_s18 = sld [smem:[#allocation23 + $0x15]] }
 0x2e9   : > { %5134 = vmatpush3.bf16.msra.mxu0 %v1345_v4  ;;  %5135 = vmatprep.mubr.msk.bf16.mxu0 %vm6139_vm1, %v9859_v39  ;;  %10317 = sst [smem:[#allocation136_spill]] %s7106_s2  ;;  %s10362_s2 = sld [smem:[#allocation148_spill]] }
 0x2ea   : > { %5145 = vmatprep.subr.bf16.mxu0 %v9859_v39  ;;  %10337 = sst [smem:[#allocation150_spill]] %s7162_s27  ;;  %s7217_s27 = sld [smem:[#allocation23 + $0x13]]  ;;  %v10065_v12 = vstv %s7201_s29 }
 0x2eb   : > { %v10038_v26 = vstv %s10300_s8  ;;  %s7124_s8 = sld [smem:[#allocation23 + $0xf]]  ;;  %10341 = sst [smem:[#allocation152_spill]] %s7170_s1 }
 0x2ec   : > { %s10347_s1 = sld [smem:[#allocation128_spill]]  ;;  %10352 = sst [smem:[#allocation158_spill]] %s7201_s29 }
 0x2ed   : > { %10357 = sst [smem:[#allocation163_spill]] %s7236_s13  ;;  %s7272_s14 = sld [smem:[#allocation25 + $0xa80]] }
 0x2ee   : > { %5130 = vmatmul.mubr.msk.bf16.vlgmr.msra.gmra.mrb[20].mxu1 %vm1075_vm0, %v5446_v34  ;;  %10361 = sst [smem:[#allocation166_spill]] %s7246_s3  ;;  %s7291_s19 = sld [smem:[#allocation25 + $0xb00]] }
 0x2ef   : > { %5140 = vmatpush3.bf16.msra.mxu1 %v1349_v44  ;;  %5141 = vmatprep.mubr.msk.bf16.mxu1 %vm6139_vm1, %v9859_v39  ;;  %v10043_v44 = vstv %s7012_s28  ;;  %s7145_s28 = sld [smem:[#allocation23 + $0x10]]  ;;  %v10062_v17 = vstv %s10362_s2  ;;  %s7312_s10 = sld [smem:[#allocation25 + $0xb81]] }
 0x2f0   : > { %5136 = vmatmul.mubr.msk.bf16.vlgmr.msra.gmra.mrb[24].mxu0 %vm1075_vm0, %v6843_v54  ;;  %5151 = vmatprep.subr.bf16.mxu1 %v9859_v39  ;;  %10354 = sst [smem:[#allocation160_spill]] %s7217_s27  ;;  %s7310_s21 = sld [smem:[#allocation25 + $0xb80]] }
 0x2f1   : > { %5146 = vmatpush3.bf16.msra.mxu0 %v1361_v47  ;;  %5147 = vmatprep.mubr.msk.bf16.mxu0 %vm6139_vm1, %v9859_v39  ;;  %10324 = sst [smem:[#allocation140_spill]] %s7124_s8  ;;  %s7296_s8 = sld [smem:[#allocation25 + $0xb01]] }
 0x2f2   : > { %5157 = vmatprep.subr.bf16.mxu0 %v9859_v39  ;;  %10371 = sst [smem:[#allocation170_spill]] %s7263_s18  ;;  %s7344_s27 = sld [smem:[#allocation22 + $0x99]] }
 0x2f3   : > { %10373 = sst [smem:[#allocation171_spill]] %s7272_s14  ;;  %s7320_s29 = sld [smem:[#allocation22 + $0x98]] }
 0x2f4   : > { %10378 = sst [smem:[#allocation176_spill]] %s7291_s19  ;;  %s7322_s2 = sld [smem:[#allocation23 + $0x18]] }
 0x2f5   : > { %10330 = sst [smem:[#allocation145_spill]] %s7145_s28  ;;  %s7280_s28 = sld [smem:[#allocation22 + $0x16]] }
 0x2f6   : > { %5142 = vmatmul.mubr.msk.bf16.vlgmr.msra.gmra.mrb[24].mxu1 %vm1075_vm0, %v5445_v27  ;;  %10383 = sst [smem:[#allocation181_spill]] %s7310_s21  ;;  %s7369_s13 = sld [smem:[#allocation22 + $0x1a]] }
 0x2f7   : > { %5152 = vmatpush3.bf16.msra.mxu1 %v1346_v3  ;;  %5153 = vmatprep.mubr.msk.bf16.mxu1 %vm6139_vm1, %v9859_v39  ;;  %v10050_v3 = vstv %s10347_s1  ;;  %s7261_s1 = sld [smem:[#allocation22 + $0x95]]  ;;  %10379 = sst [smem:[#allocation177_spill]] %s7296_s8 }
 0x2f8   : > { %5148 = vmatmul.mubr.msk.bf16.vlgmr.msra.gmra.mrb[28].mxu0 %vm1075_vm0, %v5446_v34  ;;  %5163 = vmatprep.subr.bf16.mxu1 %v9859_v39  ;;  %10384 = sst [smem:[#allocation182_spill]] %s7312_s10  ;;  %s7380_s3 = sld [smem:[#allocation25 + $0xd00]] }
 0x2f9   : > { %5158 = vmatpush3.bf16.msra.mxu0 %v1350_v42  ;;  %5159 = vmatprep.mubr.msk.bf16.mxu0 %vm6139_vm1, %v9859_v39  ;;  %10386 = sst [smem:[#allocation184_spill]] %s7320_s29  ;;  %s7382_s14 = sld [smem:[#allocation25 + $0xd01]] }
 0x2fa   : > { %10387 = sst [smem:[#allocation185_spill]] %s7322_s2  ;;  %s7384_s18 = sld [smem:[#allocation22 + $0x1b]] }
 0x2fb   : > { %10375 = sst [smem:[#allocation173_spill]] %s7280_s28  ;;  %s7394_s28 = sld [smem:[#allocation25 + $0xd80]] }
 0x2fc   : > { %10390 = sst [smem:[#allocation188_spill]] %s7340_s23  ;;  %s7402_s19 = sld [smem:[#allocation22 + $0x1c]] }
 0x2fd   : > { %10370 = sst [smem:[#allocation169_spill]] %s7261_s1  ;;  %s7396_s1 = sld [smem:[#allocation25 + $0xd81]] }
 0x2fe   : > { %5154 = vmatmul.mubr.msk.bf16.vlgmr.msra.gmra.mrb[28].mxu1 %vm1075_vm0, %v6843_v54  ;;  %v10064_v54 = vstv %s6916_s24  ;;  %s7048_s24 = sld [smem:[#allocation25 + $0x580]]  ;;  %10391 = sst [smem:[#allocation189_spill]] %s7344_s27 }
 0x2ff   : > { %5164 = vmatpush3.bf16.msra.mxu1 %v1362_v46  ;;  %5165 = vmatprep.mubr.msk.bf16.mxu1 %vm6139_vm1, %v9859_v39  ;;  %10395 = sst [smem:[#allocation193_spill]] %s7369_s13  ;;  %s7421_s8 = sld [smem:[#allocation25 + $0xe01]] }
 0x300   : > { %5160 = vmatmul.mubr.msk.bf16.vlgmr.msra.gmra.mrb[32].mxu0 %vm1075_vm0, %v5445_v27  ;;  %v10039_v27 = vstv %s10302_s16  ;;  %s7122_s16 = sld [smem:[#allocation22 + $0x8f]]  ;;  %10396 = sst [smem:[#allocation194_spill]] %s7371_s25 }
 0x301   : > { %10398 = sst [smem:[#allocation196_spill]] %s7380_s3  ;;  %s7438_s10 = sld [smem:[#allocation22 + $0x9d]] }
 0x302   : > { %10399 = sst [smem:[#allocation197_spill]] %s7382_s14  ;;  %s7440_s21 = sld [smem:[#allocation23 + $0x1d]] }
 0x303   : > { %10400 = sst [smem:[#allocation198_spill]] %s7384_s18  ;;  %s7446_s29 = sld [smem:[#allocation25 + $0xe80]] }
 0x304   : > { %10278 = sst [smem:[#allocation121_spill]] %s7048_s24  ;;  %s7215_s24 = sld [smem:[#allocation22 + $0x93]] }
 0x305   : > { %10401 = sst [smem:[#allocation199_spill]] %s7388_s22  ;;  %s7457_s2 = sld [smem:[#allocation22 + $0x9e]] }
 0x306   : > { %5166 = vmatmul.mubr.msk.bf16.vlgmr.msra.gmra.mrb[32].mxu1 %vm1075_vm0, %v5446_v34  ;;  %10322 = sst [smem:[#allocation139_spill]] %s7122_s16  ;;  %v10057_v57 = vstv %s7122_s16  ;;  %s7298_s16 = sld [smem:[#allocation22 + $0x17]] }
 0x307   : > { %10403 = sst [smem:[#allocation201_spill]] %s7394_s28  ;;  %s10461_s5 = sld [smem:[#allocation139_spill]] }
 0x308   : > { %10404 = sst [smem:[#allocation202_spill]] %s7396_s1  ;;  %s7472_s14 = sld [smem:[#allocation22 + $0x9f]] }
 0x309   : > { %10405 = sst [smem:[#allocation203_spill]] %s7402_s19  ;;  %s7410_s1 = sld [smem:[#allocation25 + $0xe00]] }
 0x30a   : > { %10353 = sst [smem:[#allocation159_spill]] %s7215_s24  ;;  %s7346_s24 = sld [smem:[#allocation23 + $0x19]] }
 0x30b   : > { %10409 = sst [smem:[#allocation207_spill]] %s7421_s8  ;;  %s7474_s3 = sld [smem:[#allocation23 + $0x1f]] }
 0x30c   : > { %10380 = sst [smem:[#allocation178_spill]] %s7298_s16  ;;  %s10472_s8 = sld [smem:[#allocation168_spill]] }
 0x30d   : > { %10413 = sst [smem:[#allocation211_spill]] %s7438_s10  ;;  %s10465_s10 = sld [smem:[#allocation149_spill]] }
 0x30e   : > { %10414 = sst [smem:[#allocation212_spill]] %s7440_s21  ;;  %s10456_s21 = sld [smem:[#allocation128_spill]] }
 0x30f   : > { %10408 = sst [smem:[#allocation206_spill]] %s7410_s1  ;;  %s10473_s1 = sld [smem:[#allocation169_spill]] }
 0x310   : > { %10392 = sst [smem:[#allocation190_spill]] %s7346_s24  ;;  %s10462_s24 = sld [smem:[#allocation143_spill]] }
 0x311   : > { %10415 = sst [smem:[#allocation213_spill]] %s7446_s29  ;;  %s10460_s29 = sld [smem:[#allocation138_spill]] }
 0x312   : > { %10419 = sst [smem:[#allocation216_spill]] %s7457_s2  ;;  %s10463_s2 = sld [smem:[#allocation144_spill]] }
 0x313   : > { %10422 = sst [smem:[#allocation219_spill]] %s7472_s14  ;;  %s10477_s11 = sld [smem:[#allocation184_spill]] }
 0x314   : > { %10423 = sst [smem:[#allocation220_spill]] %s7474_s3  ;;  %s10470_s3 = sld [smem:[#allocation163_spill]] }
 0x3a0   : > { %v6988_v48 = vpop.f32.mrb[8].mxu1 }
 0x3a1   : > { %v5101_v49 = vpop.f32.mrb[9].mxu1 }
 0x3a2   : > { %v6998_v50 = vpop.f32.mrb[10].mxu1 }
 0x3a3   : > { %v5102_v51 = vpop.f32.mrb[11].mxu1 }
 0x3b1   : > { %v1454_v24 = vpop.f32.mrb[12].mxu1 }
 0x3b2   : > { %v1510_v30 = vsub.f32 %v6988_v48, %v1454_v24  ;;  %v5107_v34 = vpop.f32.mrb[13].mxu1 }
 0x3b3   : > { %v1457_v41 = vpop.f32.mrb[14].mxu1  ;;  %v1503_v42 = vpop.f32.mrb[16].mxu0 }
 0x3b4   : > { %v1511_v46 = vsub.f32 %v6998_v50, %v1457_v41  ;;  %v1512_v47 = vsub.f32 %v1503_v42, %v6988_v48  ;;  %v5108_v49 = vpop.f32.mrb[15].mxu1  ;;  %v5113_v51 = vpop.f32.mrb[17].mxu0  ;;  %v934_v48 = vld [vmem:[%s10312_s15 + $0x8] sm:$0xff]  ;;  %v1516_v40 = vmul.f32 %v1510_v30, %v925_v29  ;;  %v7158_v18 = vmul.f32 %v1510_v30, %v933_v35 }
 0x3b5   : > { %v1506_v32 = vpop.f32.mrb[18].mxu0 }
 0x3b6   : > { %v1514_v42 = vsub.f32 %v1512_v47, %v1454_v24  ;;  %v1513_v49 = vsub.f32 %v1506_v32, %v6998_v50  ;;  %v5114_v51 = vpop.f32.mrb[19].mxu0  ;;  %v10047_v32 = vstv %s10332_s4  ;;  %v1517_v30 = vmul.f32 %v1511_v46, %v926_v45  ;;  %s7226_s4 = sld [smem:[#allocation25 + $0x981]] }
 0x3b7   : > { %v7172_v51 = vmul.f32 %v1511_v46, %v934_v48  ;;  %v10060_v47 = vstv %s7141_s7  ;;  %s7282_s7 = sld [smem:[#allocation22 + $0x96]] }
 0x3b8   : > { %v1518_v14 = vmul.f32 %v1514_v42, %v933_v35  ;;  %v7164_v24 = vmul.f32 %v1514_v42, %v925_v29  ;;  %v1515_v50 = vsub.f32 %v1513_v49, %v1457_v41 }
 0x3b9   : > { %v7174_v23 = vpop.f32.mrb[16].mxu1 }
 0x3ba   : > { %v7180_v29 = vadd.f32 %v1518_v14, %v1516_v40  ;;  %v1528_v35 = vsub.f32 %v7164_v24, %v7158_v18  ;;  %v1519_v41 = vmul.f32 %v1515_v50, %v934_v48  ;;  %v7184_v42 = vmul.f32 %v1515_v50, %v926_v45  ;;  %v5119_v49 = vpop.f32.mrb[17].mxu1 }
 0x3bb   : > { %v7194_v14 = vpop.f32.mrb[18].mxu1  ;;  %v7196_v40 = vpop.f32.mrb[20].mxu0  ;;  %v10059_v45 = vstv %s7139_s9  ;;  %s7324_s9 = sld [smem:[#allocation25 + $0xc00]] }
 0x3bc   : > { %v7203_v48 = vadd.f32 %v1519_v41, %v1517_v30  ;;  %v1529_v50 = vsub.f32 %v7184_v42, %v7172_v51  ;;  %v7209_v49 = vsub.f32 %v7174_v23, %v7196_v40  ;;  %v5120_v46 = vpop.f32.mrb[19].mxu1  ;;  %v5125_v39 = vpop.f32.mrb[21].mxu0  ;;  %10356 = sst [smem:[#allocation162_spill]] %s7226_s4  ;;  %s7338_s4 = sld [smem:[#allocation25 + $0xc01]] }
 0x3bd   : > { %v7219_v30 = vpop.f32.mrb[22].mxu0  ;;  %v10055_v46 = vstv %s7115_s17  ;;  %v935_v39 = vld [vmem:[%s10312_s15 + $0x10] sm:$0xff]  ;;  %10376 = sst [smem:[#allocation174_spill]] %s7282_s7  ;;  %s7289_s17 = sld [smem:[#allocation23 + $0x16]] }
 0x3be   : > { %v7230_v4 = vsub.f32 %v7194_v14, %v7219_v30  ;;  %v5126_v8 = vpop.f32.mrb[23].mxu0  ;;  %s7390_s7 = sld [smem:[#allocation23 + $0x1b]]  ;;  %s10475_s28 = sld [smem:[#allocation174_spill]] }
 0x3bf   : > { %v927_v8 = vld [vmem:[%s10304_s12 + $0x10] sm:$0xff] }
 0x3c0   : > { %v1661_v2 = vmul.f32 %v7209_v49, %v927_v8  ;;  %v1662_v56 = vmul.f32 %v7230_v4, %v928_v62  ;;  %v1672_v7 = vmul.f32 %v7230_v4, %v936_v58 }
 0x3c1   : > { %v1648_v41 = vpop.f32.mrb[20].mxu1  ;;  %10388 = sst [smem:[#allocation186_spill]] %s7324_s9  ;;  %s7455_s9 = sld [smem:[#allocation22 + $0x1e]] }
 0x3c2   : > { %v1657_v28 = vsub.f32 %v1648_v41, %v7174_v23  ;;  %v5131_v22 = vpop.f32.mrb[21].mxu1  ;;  %10389 = sst [smem:[#allocation187_spill]] %s7338_s4  ;;  %s10474_s4 = sld [smem:[#allocation173_spill]] }
 0x3c3   : > { %v1651_v37 = vpop.f32.mrb[22].mxu1  ;;  %v7276_v34 = vpop.f32.mrb[24].mxu0  ;;  %10377 = sst [smem:[#allocation175_spill]] %s7289_s17  ;;  %s7404_s17 = sld [smem:[#allocation22 + $0x9c]] }
 0x3c4   : > { %v1659_v22 = vsub.f32 %v1657_v28, %v7196_v40  ;;  %v1658_v23 = vsub.f32 %v1651_v37, %v7194_v14  ;;  %v5132_v41 = vpop.f32.mrb[23].mxu1  ;;  %v5137_v25 = vpop.f32.mrb[25].mxu0  ;;  %v1671_v28 = vmul.f32 %v7209_v49, %v935_v39  ;;  %10402 = sst [smem:[#allocation200_spill]] %s7390_s7  ;;  %s10476_s7 = sld [smem:[#allocation183_spill]] }
 0x3c5   : > { %v7294_v61 = vpop.f32.mrb[26].mxu0 }
 0x3c6   : > { %v1663_v37 = vmul.f32 %v1659_v22, %v935_v39  ;;  %v1669_v25 = vmul.f32 %v1659_v22, %v927_v8  ;;  %v1660_v14 = vsub.f32 %v1658_v23, %v7219_v30  ;;  %v5138_v40 = vpop.f32.mrb[27].mxu0 }
 0x3c7   : > { %10418 = sst [smem:[#allocation215_spill]] %s7455_s9  ;;  %s10464_s9 = sld [smem:[#allocation148_spill]] }
 0x3c8   : > { %v1665_v49 = vadd.f32 %v1663_v37, %v1661_v2  ;;  %v1673_v39 = vsub.f32 %v1669_v25, %v1671_v28  ;;  %v1664_v30 = vmul.f32 %v1660_v14, %v936_v58  ;;  %v1670_v8 = vmul.f32 %v1660_v14, %v928_v62  ;;  %v929_v37 = vld [vmem:[%s10304_s12 + $0x20] sm:$0xff] }
 0x3c9   : > { %v1752_v4 = vpop.f32.mrb[24].mxu1  ;;  %10406 = sst [smem:[#allocation204_spill]] %s7404_s17  ;;  %s10467_s17 = sld [smem:[#allocation154_spill]] }
 0x3ca   : > { %v7327_v58 = vadd.f32 %v1665_v49, %v7180_v29  ;;  %v7332_v62 = vadd.f32 %v1673_v39, %v1528_v35  ;;  %v1666_v2 = vadd.f32 %v1664_v30, %v1662_v56  ;;  %v1674_v28 = vsub.f32 %v1670_v8, %v1672_v7  ;;  %v5143_v25 = vpop.f32.mrb[25].mxu1  ;;  %v937_v29 = vld [vmem:[%s10312_s15 + $0x20] sm:$0xff]  ;;  %v930_v49 = vld [vmem:[%s10304_s12 + $0x28] sm:$0xff] }
 0x3cb   : > { %v1800_v18 = vsub.f32 %v7276_v34, %v1752_v4  ;;  %v1755_v24 = vpop.f32.mrb[26].mxu1  ;;  %v1793_v56 = vpop.f32.mrb[28].mxu0 }
 0x3cc   : > { %v7349_v7 = vadd.f32 %v1666_v2, %v7203_v48  ;;  %v7354_v35 = vadd.f32 %v1674_v28, %v1529_v50  ;;  %v1801_v39 = vsub.f32 %v7294_v61, %v1755_v24  ;;  %v1802_v30 = vsub.f32 %v1793_v56, %v7276_v34  ;;  %v5144_v8 = vpop.f32.mrb[27].mxu1  ;;  %v5149_v25 = vpop.f32.mrb[29].mxu0  ;;  %v938_v34 = vld [vmem:[%s10312_s15 + $0x28] sm:$0xff] }
 0x3cd   : > { %v1796_v51 = vpop.f32.mrb[30].mxu0  ;;  %v1806_v42 = vmul.f32 %v1800_v18, %v929_v37  ;;  %v1816_v50 = vmul.f32 %v1800_v18, %v937_v29 }
 0x3ce   : > { %v1804_v28 = vsub.f32 %v1802_v30, %v1752_v4  ;;  %v1803_v56 = vsub.f32 %v1796_v51, %v7294_v61  ;;  %v5150_v8 = vpop.f32.mrb[31].mxu0  ;;  %v1807_v51 = vmul.f32 %v1801_v39, %v930_v49  ;;  %v940_v61 = vld [vmem:[%s10312_s15 + $0x38] sm:$0xff] }
 0x3cf   : > { %v1817_v8 = vmul.f32 %v1801_v39, %v938_v34 }
 0x3d0   : > { %v1808_v2 = vmul.f32 %v1804_v28, %v937_v29  ;;  %v1814_v48 = vmul.f32 %v1804_v28, %v929_v37  ;;  %v1805_v4 = vsub.f32 %v1803_v56, %v1755_v24  ;;  %v932_v56 = vld [vmem:[%s10304_s12 + $0x38] sm:$0xff] }
 0x3d1   : > { %v7392_v25 = vpop.f32.mrb[28].mxu1 }
 0x3d2   : > { %v1810_v37 = vadd.f32 %v1808_v2, %v1806_v42  ;;  %v1818_v29 = vsub.f32 %v1814_v48, %v1816_v50  ;;  %v1809_v18 = vmul.f32 %v1805_v4, %v938_v34  ;;  %v1815_v24 = vmul.f32 %v1805_v4, %v930_v49  ;;  %v5155_v28 = vpop.f32.mrb[29].mxu1 }
 0x3d3   : > { %v7406_v39 = vpop.f32.mrb[30].mxu1  ;;  %v1897_v23 = vpop.f32.mrb[32].mxu0 }
 0x3d4   : > { %v7413_v49 = vadd.f32 %v1810_v37, %v7327_v58  ;;  %v7416_v48 = vadd.f32 %v1818_v29, %v7332_v62  ;;  %v1811_v2 = vadd.f32 %v1809_v18, %v1807_v51  ;;  %v1819_v42 = vsub.f32 %v1815_v24, %v1817_v8  ;;  %v5156_v50 = vpop.f32.mrb[31].mxu1  ;;  %v5161_v34 = vpop.f32.mrb[33].mxu0 }
 0x3d5   : > { %v1945_v58 = vsub.f32 %v7392_v25, %v1897_v23  ;;  %v1900_v62 = vpop.f32.mrb[34].mxu0  ;;  %v939_v50 = vld [vmem:[%s10312_s15 + $0x30] sm:$0xff]  ;;  %s10469_s15 = sld [smem:[#allocation159_spill]]  ;;  %v10490_v51 = vstv %s10475_s28  ;;  %s10536_s28 = sld [smem:[#allocation155_spill]] }
 0x3d6   : > { %v7428_v8 = vadd.f32 %v1811_v2, %v7349_v7  ;;  %v7431_v37 = vadd.f32 %v1819_v42, %v7354_v35  ;;  %v1946_v29 = vsub.f32 %v7406_v39, %v1900_v62  ;;  %v5162_v18 = vpop.f32.mrb[35].mxu0 }
 0x3d7   : > { %v931_v18 = vld [vmem:[%s10304_s12 + $0x30] sm:$0xff]  ;;  %v1961_v30 = vmul.f32 %v1945_v58, %v939_v50  ;;  %s10471_s12 = sld [smem:[#allocation164_spill]] }
 0x3d8   : > { %10411 = vst [vmem:[#allocation209_spill] sm:$0xff] %v7428_v8  ;;  %10412 = vst [vmem:[#allocation210_spill] sm:$0xff] %v7431_v37  ;;  %v1951_v42 = vmul.f32 %v1945_v58, %v931_v18  ;;  %v10500_v37 = vstv %s7371_s25  ;;  %s10524_s25 = sld [smem:[#allocation115_spill]] }
 0x3d9   : > { %v1938_v2 = vpop.f32.mrb[32].mxu1 }
 0x3da   : > { %v1947_v4 = vsub.f32 %v1938_v2, %v7392_v25  ;;  %v5167_v24 = vpop.f32.mrb[33].mxu1 }
 0x3db   : > { %v1941_v40 = vpop.f32.mrb[34].mxu1 }
 0x3dc   : > { %v1949_v25 = vsub.f32 %v1947_v4, %v1897_v23  ;;  %v1948_v24 = vsub.f32 %v1941_v40, %v7406_v39  ;;  %v5168_v2 = vpop.f32.mrb[35].mxu1  ;;  %v1952_v23 = vmul.f32 %v1946_v29, %v932_v56  ;;  %v7486_v40 = vmul.f32 %v1946_v29, %v940_v61 }
 0x3de   : > { %v1953_v41 = vmul.f32 %v1949_v25, %v939_v50  ;;  %v1959_v14 = vmul.f32 %v1949_v25, %v931_v18  ;;  %v1950_v35 = vsub.f32 %v1948_v24, %v1900_v62  ;;  %10424 = vst [vmem:[#allocation221_spill] sm:$0xff] %v7486_v40  ;;  %v10495_v18 = vstv %s10476_s7  ;;  %s10530_s7 = sld [smem:[#allocation140_spill]] }
 0x3df   : > { %v10496_v50 = vstv %s10477_s11  ;;  %s10528_s11 = sld [smem:[#allocation135_spill]] }
 0x3e0   : > { %v1955_v39 = vadd.f32 %v1953_v41, %v1951_v42  ;;  %v1963_v4 = vsub.f32 %v1959_v14, %v1961_v30  ;;  %v1954_v2 = vmul.f32 %v1950_v35, %v940_v61  ;;  %v7488_v7 = vmul.f32 %v1950_v35, %v932_v56 }
 0x3e1   : > { %v10484_v61 = vstv %s10472_s8  ;;  %v10488_v30 = vstv %s10474_s4  ;;  %v10492_v35 = vstv %s7298_s16  ;;  %v10494_v56 = vstv %s7304_s20  ;;  %s10532_s20 = sld [smem:[#allocation145_spill]]  ;;  %s10534_s16 = sld [smem:[#allocation150_spill]] }
 0x3e2   : > { %10428 = vst [vmem:[#allocation222_spill] sm:$0xff] %v7488_v7  ;;  %v7495_v29 = vadd.f32 %v1955_v39, %v7413_v49  ;;  %v7498_v41 = vadd.f32 %v1963_v4, %v7416_v48  ;;  %v7500_v14 = vadd.f32 %v1954_v2, %v1952_v23  ;;  %v10486_v49 = vstv %s10473_s1  ;;  %s10538_s4 = sld [smem:[#allocation160_spill]] }
 0x3e3   : > { %v10499_v7 = vstv %s7369_s13  ;;  %s10525_s13 = sld [smem:[#allocation120_spill]] }
 0x3e4   : > { %10436 = vst [vmem:[#allocation223_spill] sm:$0xff] %v7500_v14  ;;  %v7511_v48 = vmul.f32 %v10064_v54, %v7495_v29  ;;  %v7516_v42 = vmul.f32 %v10063_v55, %v7498_v41  ;;  %v7521_v25 = vmul.f32 %v10061_v59, %v7495_v29  ;;  %v2023_v24 = vmul.f32 %v10058_v60, %v7498_v41 }
 0x3e5   : > { %v2063_v23 = vmul.f32 %v10056_v0, %v7495_v29  ;;  %v2067_v39 = vmul.f32 %v10054_v1, %v7498_v41  ;;  %v2107_v4 = vmul.f32 %v10030_v5, %v7495_v29  ;;  %v2111_v2 = vmul.f32 %v10031_v6, %v7498_v41 }
 0x3e6   : > { %10443 = vst [vmem:[#allocation224_spill] sm:$0xff] %v7511_v48  ;;  %10445 = vst [vmem:[#allocation225_spill] sm:$0xff] %v7516_v42  ;;  %v2151_v62 = vmul.f32 %v10032_v10, %v7495_v29  ;;  %v2155_v58 = vmul.f32 %v10033_v11, %v7498_v41  ;;  %v2195_v34 = vmul.f32 %v10034_v15, %v7495_v29  ;;  %v10478_v1 = vstv %s10465_s10 }
 0x3e7   : > { %10447 = vst [vmem:[#allocation226_spill] sm:$0xff] %v7521_v25  ;;  %v2199_v5 = vmul.f32 %v10035_v16, %v7498_v41  ;;  %v2239_v6 = vmul.f32 %v10036_v20, %v7495_v29  ;;  %v2243_v10 = vmul.f32 %v10037_v21, %v7498_v41  ;;  %v2283_v11 = vmul.f32 %v10038_v26, %v7495_v29 }
 0x3e8   : > { %v2287_v15 = vmul.f32 %v10039_v27, %v7498_v41  ;;  %v2327_v16 = vmul.f32 %v10040_v33, %v7495_v29  ;;  %v2331_v20 = vmul.f32 %v10041_v36, %v7498_v41  ;;  %v2371_v21 = vmul.f32 %v10042_v43, %v7495_v29 }
 0x3e9   : > { %v2375_v26 = vmul.f32 %v10043_v44, %v7498_v41  ;;  %v2415_v27 = vmul.f32 %v10044_v38, %v7495_v29  ;;  %v2419_v33 = vmul.f32 %v10045_v31, %v7498_v41  ;;  %v2459_v36 = vmul.f32 %v10046_v19, %v7495_v29 }
 0x3ea   : > { %v2463_v43 = vmul.f32 %v10047_v32, %v7498_v41  ;;  %v2503_v44 = vmul.f32 %v10048_v13, %v7495_v29  ;;  %v2507_v38 = vmul.f32 %v10049_v9, %v7498_v41  ;;  %v2547_v31 = vmul.f32 %v10050_v3, %v7495_v29 }
 0x3eb   : > { %v2551_v19 = vmul.f32 %v10051_v53, %v7498_v41  ;;  %v2591_v32 = vmul.f32 %v10052_v52, %v7495_v29  ;;  %v2595_v13 = vmul.f32 %v10053_v63, %v7498_v41  ;;  %v2635_v9 = vmul.f32 %v10055_v46, %v7495_v29 }
 0x3ec   : > { %v2639_v3 = vmul.f32 %v10057_v57, %v7498_v41  ;;  %v2679_v53 = vmul.f32 %v10059_v45, %v7495_v29  ;;  %v2683_v52 = vmul.f32 %v10060_v47, %v7498_v41  ;;  %v2723_v63 = vmul.f32 %v10062_v17, %v7495_v29 }
 0x3ed   : > { %v2727_v46 = vmul.f32 %v10478_v1, %v7498_v41  ;;  %v10479_v0 = vstv %s10466_s0  ;;  %v10480_v60 = vstv %s10467_s17  ;;  %v2811_v47 = vmul.f32 %v10065_v12, %v7495_v29  ;;  %s10485_s17 = sld [smem:[#allocation204_spill]] }
 0x3ee   : > { %v2767_v57 = vmul.f32 %v10479_v0, %v7495_v29  ;;  %v2771_v45 = vmul.f32 %v10480_v60, %v7498_v41  ;;  %v10481_v59 = vstv %s10469_s15  ;;  %v10482_v55 = vstv %s10470_s3  ;;  %s10489_s15 = sld [smem:[#allocation211_spill]]  ;;  %s10491_s3 = sld [smem:[#allocation215_spill]] }
 0x3ef   : > { %v2815_v17 = vmul.f32 %v10481_v59, %v7498_v41  ;;  %v2855_v1 = vmul.f32 %v10482_v55, %v7495_v29  ;;  %v10483_v54 = vstv %s10471_s12  ;;  %v2899_v60 = vmul.f32 %v10484_v61, %v7495_v29  ;;  %s10493_s12 = sld [smem:[#allocation216_spill]] }
 0x3f0   : > { %v2859_v0 = vmul.f32 %v10483_v54, %v7498_v41  ;;  %v2903_v12 = vmul.f32 %v10486_v49, %v7498_v41  ;;  %v2943_v59 = vmul.f32 %v10488_v30, %v7495_v29  ;;  %v2947_v55 = vmul.f32 %v10490_v51, %v7498_v41 }
 0x3f1   : > { %v2987_v54 = vmul.f32 %v10492_v35, %v7495_v29  ;;  %v2991_v61 = vmul.f32 %v10494_v56, %v7498_v41  ;;  %v3031_v49 = vmul.f32 %v10495_v18, %v7495_v29  ;;  %v3035_v22 = vmul.f32 %v10496_v50, %v7498_v41 }
 0x3f2   : > { %v10497_v30 = vstv %s7340_s23  ;;  %v10498_v51 = vstv %s7344_s27  ;;  %v3119_v35 = vmul.f32 %v10499_v7, %v7495_v29  ;;  %v3123_v14 = vmul.f32 %v10500_v37, %v7498_v41  ;;  %s10526_s27 = sld [smem:[#allocation125_spill]]  ;;  %s10527_s23 = sld [smem:[#allocation130_spill]] }
 0x3f3   : > { %v3075_v28 = vmul.f32 %v10497_v30, %v7495_v29  ;;  %v3079_v40 = vmul.f32 %v10498_v51, %v7498_v41  ;;  %v10501_v56 = vstv %s7384_s18  ;;  %v10502_v18 = vstv %s7388_s22  ;;  %s10522_s22 = sld [smem:[#allocation105_spill]]  ;;  %s10523_s18 = sld [smem:[#allocation110_spill]] }
 0x3f4   : > { %v3163_v8 = vmul.f32 %v10501_v56, %v7495_v29  ;;  %v3167_v25 = vmul.f32 %v10502_v18, %v7498_v41  ;;  %v10503_v50 = vstv %s7402_s19  ;;  %v10504_v30 = vstv %s10485_s17  ;;  %s10520_s17 = sld [smem:[#allocation95_spill]]  ;;  %s10521_s19 = sld [smem:[#allocation100_spill]] }
 0x3f5   : > { %v3207_v42 = vmul.f32 %v10503_v50, %v7495_v29  ;;  %v3211_v48 = vmul.f32 %v10504_v30, %v7498_v41  ;;  %v10505_v51 = vstv %s10487_s30  ;;  %v10506_v37 = vstv %s10489_s15  ;;  %s10518_s15 = sld [smem:[#allocation85_spill]]  ;;  %s10519_s30 = sld [smem:[#allocation90_spill]] }
 0x3f6   : > { %v3251_v7 = vmul.f32 %v10505_v51, %v7495_v29  ;;  %v3255_v56 = vmul.f32 %v10506_v37, %v7498_v41  ;;  %v10507_v18 = vstv %s10491_s3  ;;  %v10508_v30 = vstv %s10493_s12  ;;  %s10516_s12 = sld [smem:[#allocation75_spill]]  ;;  %s10517_s3 = sld [smem:[#allocation80_spill]] }
 0x3f7   : > { %v3295_v50 = vmul.f32 %v10507_v18, %v7495_v29  ;;  %v3299_v51 = vmul.f32 %v10508_v30, %v7498_v41  ;;  %v10509_v37 = vstv %s7464_s6  ;;  %v10510_v30 = vstv %s7472_s14  ;;  %s10514_s14 = sld [smem:[#allocation65_spill]]  ;;  %s10515_s6 = sld [smem:[#allocation70_spill]] }
 0x3f8   : > { %v3339_v18 = vmul.f32 %v10509_v37, %v7495_v29  ;;  %v3343_v29 = vmul.f32 %v10510_v30, %v7498_v41  ;;  %v10511_v37 = vld [vmem:[#allocation224_spill] sm:$0xff]  ;;  %v10512_v30 = vld [vmem:[#allocation225_spill] sm:$0xff] }
 0x3f9   : > { %v1981_v41 = vadd.f32 %v10512_v30, %v10511_v37  ;;  %v10513_v30 = vld [vmem:[#allocation226_spill] sm:$0xff] }
 0x3fa   : > { %v2025_v37 = vadd.f32 %v2023_v24, %v10513_v30  ;;  %v2069_v24 = vadd.f32 %v2067_v39, %v2063_v23  ;;  %v2113_v30 = vadd.f32 %v2111_v2, %v2107_v4  ;;  %v2157_v23 = vadd.f32 %v2155_v58, %v2151_v62 }
 0x3fb   : > { %v2201_v39 = vadd.f32 %v2199_v5, %v2195_v34  ;;  %v2245_v2 = vadd.f32 %v2243_v10, %v2239_v6  ;;  %v2289_v4 = vadd.f32 %v2287_v15, %v2283_v11  ;;  %v2333_v58 = vadd.f32 %v2331_v20, %v2327_v16 }
 0x3fc   : > { %v2377_v62 = vadd.f32 %v2375_v26, %v2371_v21  ;;  %v2421_v5 = vadd.f32 %v2419_v33, %v2415_v27  ;;  %v2465_v34 = vadd.f32 %v2463_v43, %v2459_v36  ;;  %v2509_v6 = vadd.f32 %v2507_v38, %v2503_v44 }
 0x3fd   : > { %v2553_v10 = vadd.f32 %v2551_v19, %v2547_v31  ;;  %v2597_v11 = vadd.f32 %v2595_v13, %v2591_v32  ;;  %v2641_v15 = vadd.f32 %v2639_v3, %v2635_v9  ;;  %v2685_v16 = vadd.f32 %v2683_v52, %v2679_v53 }
 0x3fe   : > { %v2729_v20 = vadd.f32 %v2727_v46, %v2723_v63  ;;  %v2773_v21 = vadd.f32 %v2771_v45, %v2767_v57  ;;  %v2817_v26 = vadd.f32 %v2815_v17, %v2811_v47  ;;  %v2861_v27 = vadd.f32 %v2859_v0, %v2855_v1 }
 0x3ff   : > { %v2905_v33 = vadd.f32 %v2903_v12, %v2899_v60  ;;  %v2949_v36 = vadd.f32 %v2947_v55, %v2943_v59  ;;  %v2993_v43 = vadd.f32 %v2991_v61, %v2987_v54  ;;  %v3037_v38 = vadd.f32 %v3035_v22, %v3031_v49 }
 0x400   : > { %v3081_v13 = vadd.f32 %v3079_v40, %v3075_v28  ;;  %v3125_v52 = vadd.f32 %v3123_v14, %v3119_v35  ;;  %v3169_v53 = vadd.f32 %v3167_v25, %v3163_v8  ;;  %v3213_v57 = vadd.f32 %v3211_v48, %v3207_v42 }
 0x401   : > { %v3257_v63 = vadd.f32 %v3255_v56, %v3251_v7  ;;  %v3301_v3 = vadd.f32 %v3299_v51, %v3295_v50  ;;  %v3345_v9 = vadd.f32 %v3343_v29, %v3339_v18  ;;  %v10529_v12 = vstv %s10514_s14  ;;  %s10540_s14 = sld [smem:[#allocation165_spill]] }
 0x402   : > { %v7711_v17 = vadd.f32 %v10529_v12, %v1981_v41  ;;  %v10531_v19 = vstv %s10515_s6  ;;  %v10533_v44 = vstv %s10516_s12  ;;  %v10535_v47 = vstv %s10517_s3  ;;  %s10542_s6 = sld [smem:[#allocation170_spill]]  ;;  %s10545_s12 = sld [smem:[#allocation175_spill]] }
 0x403   : > { %v7715_v31 = vadd.f32 %v10531_v19, %v2025_v37  ;;  %v7719_v32 = vadd.f32 %v10533_v44, %v2069_v24  ;;  %v7723_v45 = vadd.f32 %v10535_v47, %v2113_v30  ;;  %v10537_v46 = vstv %s10518_s15  ;;  %s10548_s3 = sld [smem:[#allocation180_spill]]  ;;  %s10551_s15 = sld [smem:[#allocation185_spill]] }
 0x404   : > { %v7727_v22 = vadd.f32 %v10537_v46, %v2157_v23  ;;  %v10539_v28 = vstv %s10519_s30  ;;  %v10541_v40 = vstv %s10520_s17  ;;  %v10544_v48 = vstv %s10521_s19  ;;  %s10554_s30 = sld [smem:[#allocation190_spill]]  ;;  %s10557_s17 = sld [smem:[#allocation195_spill]] }
 0x405   : > { %v7731_v8 = vadd.f32 %v10539_v28, %v2201_v39  ;;  %v7735_v14 = vadd.f32 %v10541_v40, %v2245_v2  ;;  %v7739_v42 = vadd.f32 %v10544_v48, %v2289_v4  ;;  %v10547_v25 = vstv %s10522_s22  ;;  %s10560_s19 = sld [smem:[#allocation200_spill]]  ;;  %s10563_s22 = sld [smem:[#allocation205_spill]]  ;;  %v10611_v28 = vld [vmem:[#allocation209_spill] sm:$0xff]  ;;  %v10614_v48 = vld [vmem:[#allocation210_spill] sm:$0xff] }
 0x406   : > { %v7743_v1 = vadd.f32 %v10547_v25, %v2333_v58  ;;  %v10550_v0 = vstv %s10523_s18  ;;  %v10553_v59 = vstv %s10524_s25  ;;  %v10556_v54 = vstv %s10525_s13  ;;  %s10566_s18 = sld [smem:[#allocation212_spill]]  ;;  %s10569_s25 = sld [smem:[#allocation217_spill]]  ;;  %v10612_v40 = vld [vmem:[#allocation223_spill] sm:$0xff]  ;;  %v10616_v25 = vld [vmem:[#allocation221_spill] sm:$0xff] }
 0x407   : > { %10543 = vst [vmem:[#allocation224_spill] sm:$0xff] %v7735_v14  ;;  %10546 = vst [vmem:[#allocation225_spill] sm:$0xff] %v7739_v42  ;;  %v7747_v60 = vadd.f32 %v10550_v0, %v2377_v62  ;;  %v7751_v55 = vadd.f32 %v10553_v59, %v2421_v5  ;;  %v7755_v61 = vadd.f32 %v10556_v54, %v2465_v34  ;;  %v10559_v49 = vstv %s10526_s27  ;;  %s10572_s13 = sld [smem:[#allocation220_spill]] }
 0x408   : > { %10549 = vst [vmem:[#allocation226_spill] sm:$0xff] %v7743_v1  ;;  %v7759_v35 = vadd.f32 %v10559_v49, %v2509_v6  ;;  %v10562_v7 = vstv %s10527_s23  ;;  %v10565_v50 = vstv %s10528_s11  ;;  %v10568_v18 = vstv %s10530_s7  ;;  %s10630_s7 = sld [smem:[#allocation103_spill]] }
 0x409   : > { %10552 = vst [vmem:[#allocation227_spill] sm:$0xff] %v7747_v60  ;;  %10555 = vst [vmem:[#allocation228_spill] sm:$0xff] %v7751_v55  ;;  %v7763_v56 = vadd.f32 %v10562_v7, %v2553_v10  ;;  %v7767_v51 = vadd.f32 %v10565_v50, %v2597_v11  ;;  %v7771_v29 = vadd.f32 %v10568_v18, %v2641_v15  ;;  %v10571_v41 = vstv %s10532_s20  ;;  %s10627_s20 = sld [smem:[#allocation99_spill]] }
 0x40a   : > { %10558 = vst [vmem:[#allocation229_spill] sm:$0xff] %v7755_v61  ;;  %10561 = vst [vmem:[#allocation230_spill] sm:$0xff] %v7759_v35  ;;  %v7775_v37 = vadd.f32 %v10571_v41, %v2685_v16  ;;  %v10574_v24 = vstv %s10534_s16  ;;  %v10576_v23 = vstv %s10536_s28  ;;  %v10578_v2 = vstv %s10538_s4  ;;  %s10591_s28 = sld [smem:[#allocation63_spill]]  ;;  %s10623_s4 = sld [smem:[#allocation94_spill]] }
 0x40b   : > { %10564 = vst [vmem:[#allocation231_spill] sm:$0xff] %v7763_v56  ;;  %10567 = vst [vmem:[#allocation232_spill] sm:$0xff] %v7767_v51  ;;  %v7779_v30 = vadd.f32 %v10574_v24, %v2729_v20  ;;  %v7783_v39 = vadd.f32 %v10576_v23, %v2773_v21  ;;  %v7787_v4 = vadd.f32 %v10578_v2, %v2817_v26  ;;  %v10580_v58 = vstv %s10540_s14  ;;  %s10594_s14 = sld [smem:[#allocation64_spill]]  ;;  %s10625_s16 = sld [smem:[#allocation98_spill]] }
 0x40c   : > { %10570 = vst [vmem:[#allocation233_spill] sm:$0xff] %v7771_v29  ;;  %10573 = vst [vmem:[#allocation234_spill] sm:$0xff] %v7775_v37  ;;  %v7791_v62 = vadd.f32 %v10580_v58, %v2861_v27  ;;  %v10582_v5 = vstv %s10542_s6  ;;  %v10584_v6 = vstv %s10545_s12  ;;  %v10586_v11 = vstv %s10548_s3  ;;  %s10597_s6 = sld [smem:[#allocation68_spill]]  ;;  %s10600_s12 = sld [smem:[#allocation69_spill]] }
 0x40d   : > { %10575 = vst [vmem:[#allocation235_spill] sm:$0xff] %v7779_v30  ;;  %10577 = vst [vmem:[#allocation236_spill] sm:$0xff] %v7783_v39  ;;  %v7795_v34 = vadd.f32 %v10582_v5, %v2905_v33  ;;  %v7799_v10 = vadd.f32 %v10584_v6, %v2949_v36  ;;  %v7803_v15 = vadd.f32 %v10586_v11, %v2993_v43  ;;  %v10588_v16 = vstv %s10551_s15  ;;  %s10603_s15 = sld [smem:[#allocation73_spill]]  ;;  %s10622_s3 = sld [smem:[#allocation93_spill]] }
 0x40e   : > { %10579 = vst [vmem:[#allocation237_spill] sm:$0xff] %v7787_v4  ;;  %10581 = vst [vmem:[#allocation238_spill] sm:$0xff] %v7791_v62  ;;  %v7807_v20 = vadd.f32 %v10588_v16, %v3037_v38  ;;  %v10590_v21 = vstv %s10554_s30  ;;  %v10593_v26 = vstv %s10557_s17  ;;  %v10596_v19 = vstv %s10560_s19  ;;  %s10606_s30 = sld [smem:[#allocation74_spill]]  ;;  %s10609_s17 = sld [smem:[#allocation78_spill]] }
 0x40f   : > { %10583 = vst [vmem:[#allocation239_spill] sm:$0xff] %v7795_v34  ;;  %10585 = vst [vmem:[#allocation240_spill] sm:$0xff] %v7799_v10  ;;  %v7811_v12 = vadd.f32 %v10590_v21, %v3081_v13  ;;  %v7815_v27 = vadd.f32 %v10593_v26, %v3125_v52  ;;  %v7819_v33 = vadd.f32 %v10596_v19, %v3169_v53  ;;  %v10599_v36 = vstv %s10563_s22  ;;  %s10613_s19 = sld [smem:[#allocation79_spill]]  ;;  %s10621_s22 = sld [smem:[#allocation89_spill]] }
 0x410   : > { %10587 = vst [vmem:[#allocation241_spill] sm:$0xff] %v7803_v15  ;;  %10589 = vst [vmem:[#allocation242_spill] sm:$0xff] %v7807_v20  ;;  %v7823_v44 = vadd.f32 %v10599_v36, %v3213_v57  ;;  %v10602_v43 = vstv %s10566_s18  ;;  %v10605_v47 = vstv %s10569_s25  ;;  %v10608_v46 = vstv %s10572_s13  ;;  %v10615_v57 = vld [vmem:[#allocation222_spill] sm:$0xff]  ;;  %s10618_s18 = sld [smem:[#allocation83_spill]]  ;;  %s10619_s25 = sld [smem:[#allocation84_spill]] }
 0x411   : > { %10592 = vst [vmem:[#allocation243_spill] sm:$0xff] %v7811_v12  ;;  %10595 = vst [vmem:[#allocation244_spill] sm:$0xff] %v7815_v27  ;;  %v7827_v38 = vadd.f32 %v10602_v43, %v3257_v63  ;;  %v7831_v13 = vadd.f32 %v10605_v47, %v3301_v3  ;;  %v7835_v52 = vadd.f32 %v10608_v46, %v3345_v9  ;;  %s10620_s13 = sld [smem:[#allocation88_spill]]  ;;  %v10624_v50 = vstv %s10591_s28 }
 0x412   : > { %10598 = vst [vmem:[#allocation245_spill] sm:$0xff] %v7819_v33  ;;  %10601 = vst [vmem:[#allocation246_spill] sm:$0xff] %v7823_v44  ;;  %v7839_v53 = vadd.f32 %v10612_v40, %v10611_v28  ;;  %v10617_v0 = vsub.f32 %v10615_v57, %v10616_v25  ;;  %v7849_v3 = vmul.f32 %v7711_v17, %v7711_v17  ;;  %v10626_v41 = vstv %s10594_s14  ;;  %s10632_s28 = sld [smem:[#allocation104_spill]]  ;;  %s10635_s14 = sld [smem:[#allocation108_spill]] }
 0x413   : > { %10604 = vst [vmem:[#allocation247_spill] sm:$0xff] %v7827_v38  ;;  %10607 = vst [vmem:[#allocation248_spill] sm:$0xff] %v7831_v13  ;;  %v7853_v9 = vmul.f32 %v7715_v31, %v7715_v31  ;;  %v7857_v59 = vmul.f32 %v7719_v32, %v7719_v32  ;;  %v7861_v54 = vmul.f32 %v7723_v45, %v7723_v45  ;;  %v10628_v23 = vstv %s10597_s6  ;;  %s10724_s6 = sld [smem:[#allocation194_spill]] }
 0x414   : > { %10610 = vst [vmem:[#allocation249_spill] sm:$0xff] %v7835_v52  ;;  %v7845_v63 = vadd.f32 %v10617_v0, %v10614_v48  ;;  %v7865_v49 = vmul.f32 %v7727_v22, %v7727_v22  ;;  %v7869_v7 = vmul.f32 %v7731_v8, %v7731_v8  ;;  %v7874_v18 = vmul.f32 %v10624_v50, %v7839_v53 }
 0x415   : > { %v7884_v2 = vmul.f32 %v10628_v23, %v7839_v53  ;;  %v10629_v58 = vstv %s10600_s12  ;;  %v10631_v6 = vstv %s10603_s15  ;;  %v10633_v16 = vstv %s10606_s30  ;;  %s10637_s12 = sld [smem:[#allocation109_spill]]  ;;  %s10640_s15 = sld [smem:[#allocation113_spill]] }
 0x416   : > { %v7879_v24 = vmul.f32 %v10626_v41, %v7845_v63  ;;  %v7889_v5 = vmul.f32 %v10629_v58, %v7845_v63  ;;  %v7894_v11 = vmul.f32 %v10631_v6, %v7839_v53  ;;  %v7899_v21 = vmul.f32 %v10633_v16, %v7845_v63  ;;  %s10722_s30 = sld [smem:[#allocation193_spill]] }
 0x417   : > { %v10634_v26 = vstv %s10609_s17  ;;  %v10636_v36 = vstv %s10613_s19  ;;  %v10638_v47 = vstv %s10618_s18  ;;  %v10639_v28 = vstv %s10619_s25  ;;  %s10642_s17 = sld [smem:[#allocation114_spill]]  ;;  %s10645_s19 = sld [smem:[#allocation118_spill]] }
 0x418   : > { %v7904_v19 = vmul.f32 %v10634_v26, %v7839_v53  ;;  %v7909_v43 = vmul.f32 %v10636_v36, %v7845_v63  ;;  %v7914_v46 = vmul.f32 %v10638_v47, %v7839_v53  ;;  %v7919_v40 = vmul.f32 %v10639_v28, %v7845_v63  ;;  %s10647_s18 = sld [smem:[#allocation119_spill]]  ;;  %s10678_s25 = sld [smem:[#allocation154_spill]] }
 0x419   : > { %v10641_v48 = vstv %s10620_s13  ;;  %v10643_v25 = vstv %s10621_s22  ;;  %v10644_v50 = vstv %s10622_s3  ;;  %v10646_v23 = vstv %s10623_s4  ;;  %s10649_s13 = sld [smem:[#allocation123_spill]]  ;;  %s10651_s3 = sld [smem:[#allocation124_spill]] }
 0x41a   : > { %v7924_v57 = vmul.f32 %v10641_v48, %v7839_v53  ;;  %v7929_v0 = vmul.f32 %v10643_v25, %v7845_v63  ;;  %v7934_v41 = vmul.f32 %v10644_v50, %v7839_v53  ;;  %v7939_v58 = vmul.f32 %v10646_v23, %v7845_v63  ;;  %s10684_s22 = sld [smem:[#allocation159_spill]]  ;;  %s10690_s4 = sld [smem:[#allocation164_spill]] }
 0x41b   : > { %v7943_v6 = vmul.f32 %v7735_v14, %v7735_v14  ;;  %v10648_v16 = vstv %s10625_s16  ;;  %v10650_v36 = vstv %s10627_s20  ;;  %v7957_v28 = vmul.f32 %v7739_v42, %v7739_v42  ;;  %s10659_s20 = sld [smem:[#allocation133_spill]]  ;;  %s10682_s16 = sld [smem:[#allocation158_spill]] }
 0x41c   : > { %v7948_v26 = vmul.f32 %v10648_v16, %v7839_v53  ;;  %v7953_v47 = vmul.f32 %v10650_v36, %v7845_v63  ;;  %v10654_v48 = vstv %s10630_s7  ;;  %v10655_v50 = vstv %s10632_s28  ;;  %s10661_s7 = sld [smem:[#allocation134_spill]] }
 0x41d   : > { %10653 = vst [vmem:[#allocation223_spill] sm:$0xff] %v7957_v28  ;;  %v7962_v25 = vmul.f32 %v10654_v48, %v7839_v53  ;;  %v7967_v23 = vmul.f32 %v10655_v50, %v7845_v63  ;;  %v7971_v16 = vmul.f32 %v7743_v1, %v7743_v1  ;;  %v10658_v36 = vstv %s10635_s14  ;;  %s10728_s28 = sld [smem:[#allocation198_spill]]  ;;  %s10736_s14 = sld [smem:[#allocation204_spill]] }
 0x41e   : > { %10652 = vst [vmem:[#allocation209_spill] sm:$0xff] %v7953_v47  ;;  %v7976_v47 = vmul.f32 %v10658_v36, %v7839_v53  ;;  %v10660_v28 = vstv %s10637_s12  ;;  %v7985_v48 = vmul.f32 %v7747_v60, %v7747_v60  ;;  %v10664_v50 = vstv %s10640_s15  ;;  %s10740_s12 = sld [smem:[#allocation208_spill]]  ;;  %s10742_s15 = sld [smem:[#allocation211_spill]] }
 0x41f   : > { %10656 = vst [vmem:[#allocation210_spill] sm:$0xff] %v7967_v23  ;;  %10657 = vst [vmem:[#allocation222_spill] sm:$0xff] %v7971_v16  ;;  %v7981_v42 = vmul.f32 %v10660_v28, %v7845_v63  ;;  %v7990_v23 = vmul.f32 %v10664_v50, %v7839_v53  ;;  %v10665_v16 = vstv %s10642_s17  ;;  %v7999_v36 = vmul.f32 %v7751_v55, %v7751_v55  ;;  %s10746_s17 = sld [smem:[#allocation215_spill]] }
 0x420   : > { %10663 = vst [vmem:[#allocation250_spill] sm:$0xff] %v7985_v48  ;;  %v7995_v1 = vmul.f32 %v10665_v16, %v7845_v63  ;;  %v10668_v28 = vstv %s10645_s19  ;;  %v10669_v48 = vstv %s10647_s18  ;;  %v8013_v50 = vmul.f32 %v7755_v61, %v7755_v61  ;;  %s10748_s19 = sld [smem:[#allocation216_spill]]  ;;  %s10752_s18 = sld [smem:[#allocation218_spill]] }
 0x421   : > { %10662 = vst [vmem:[#allocation221_spill] sm:$0xff] %v7981_v42  ;;  %10667 = vst [vmem:[#allocation252_spill] sm:$0xff] %v7999_v36  ;;  %v8004_v42 = vmul.f32 %v10668_v28, %v7839_v53  ;;  %v8009_v60 = vmul.f32 %v10669_v48, %v7845_v63  ;;  %v10672_v16 = vstv %s10649_s13  ;;  %v10673_v36 = vstv %s10651_s3  ;;  %s10755_s13 = sld [smem:[#allocation219_spill]] }
 0x422   : > { %10666 = vst [vmem:[#allocation251_spill] sm:$0xff] %v7995_v1  ;;  %10671 = vst [vmem:[#allocation254_spill] sm:$0xff] %v8013_v50  ;;  %v8018_v1 = vmul.f32 %v10672_v16, %v7839_v53  ;;  %v8023_v55 = vmul.f32 %v10673_v36, %v7845_v63  ;;  %v8027_v28 = vmul.f32 %v7759_v35, %v7759_v35  ;;  %v10676_v48 = vstv %s10456_s21  ;;  %s10718_s21 = sld [smem:[#allocation189_spill]]  ;;  %s10843_s3 = sld [smem:[#allocation65_spill]] }
 0x423   : > { %10670 = vst [vmem:[#allocation253_spill] sm:$0xff] %v8009_v60  ;;  %v8032_v60 = vmul.f32 %v10676_v48, %v7839_v53  ;;  %v10677_v50 = vstv %s10457_s26  ;;  %v8041_v16 = vmul.f32 %v7763_v56, %v7763_v56  ;;  %v10681_v36 = vstv %s10659_s20  ;;  %s10688_s26 = sld [smem:[#allocation163_spill]]  ;;  %s10849_s20 = sld [smem:[#allocation70_spill]] }
 0x424   : > { %10674 = vst [vmem:[#allocation255_spill] sm:$0xff] %v8023_v55  ;;  %10675 = vst [vmem:[#allocation256_spill] sm:$0xff] %v8027_v28  ;;  %v8037_v61 = vmul.f32 %v10677_v50, %v7845_v63  ;;  %v8046_v55 = vmul.f32 %v10681_v36, %v7839_v53  ;;  %v10683_v28 = vstv %s10661_s7  ;;  %v8055_v48 = vmul.f32 %v7767_v51, %v7767_v51  ;;  %s10855_s7 = sld [smem:[#allocation75_spill]] }
 0x425   : > { %10680 = vst [vmem:[#allocation258_spill] sm:$0xff] %v8041_v16  ;;  %v8051_v35 = vmul.f32 %v10683_v28, %v7845_v63  ;;  %v10687_v50 = vstv %s10460_s29  ;;  %v10689_v16 = vstv %s10461_s5  ;;  %v8069_v36 = vmul.f32 %v7771_v29, %v7771_v29  ;;  %s10698_s29 = sld [smem:[#allocation173_spill]]  ;;  %s10700_s5 = sld [smem:[#allocation174_spill]] }
 0x426   : > { %10679 = vst [vmem:[#allocation257_spill] sm:$0xff] %v8037_v61  ;;  %10686 = vst [vmem:[#allocation260_spill] sm:$0xff] %v8055_v48  ;;  %v8060_v61 = vmul.f32 %v10687_v50, %v7839_v53  ;;  %v8065_v56 = vmul.f32 %v10689_v16, %v7845_v63  ;;  %v10693_v28 = vstv %s10462_s24  ;;  %v10694_v48 = vstv %s10463_s2  ;;  %s10704_s2 = sld [smem:[#allocation178_spill]]  ;;  %s10716_s24 = sld [smem:[#allocation188_spill]] }
 0x427   : > { %10685 = vst [vmem:[#allocation259_spill] sm:$0xff] %v8051_v35  ;;  %10692 = vst [vmem:[#allocation262_spill] sm:$0xff] %v8069_v36  ;;  %v8074_v35 = vmul.f32 %v10693_v28, %v7839_v53  ;;  %v8079_v51 = vmul.f32 %v10694_v48, %v7845_v63  ;;  %v8083_v50 = vmul.f32 %v7775_v37, %v7775_v37  ;;  %v10697_v16 = vstv %s10464_s9  ;;  %s10706_s9 = sld [smem:[#allocation179_spill]] }
 0x428   : > { %10691 = vst [vmem:[#allocation261_spill] sm:$0xff] %v8065_v56  ;;  %v8088_v56 = vmul.f32 %v10697_v16, %v7839_v53  ;;  %v10699_v36 = vstv %s10465_s10  ;;  %v8097_v28 = vmul.f32 %v7779_v30, %v7779_v30  ;;  %v10703_v48 = vstv %s10466_s0  ;;  %s10710_s10 = sld [smem:[#allocation183_spill]]  ;;  %s10712_s0 = sld [smem:[#allocation184_spill]] }
 0x429   : > { %10695 = vst [vmem:[#allocation263_spill] sm:$0xff] %v8079_v51  ;;  %10696 = vst [vmem:[#allocation264_spill] sm:$0xff] %v8083_v50  ;;  %v8093_v29 = vmul.f32 %v10699_v36, %v7845_v63  ;;  %v8102_v51 = vmul.f32 %v10703_v48, %v7839_v53  ;;  %v10705_v50 = vstv %s10678_s25  ;;  %v8111_v16 = vmul.f32 %v7783_v39, %v7783_v39  ;;  %s10866_s25 = sld [smem:[#allocation80_spill]] }
 0x42a   : > { %10702 = vst [vmem:[#allocation266_spill] sm:$0xff] %v8097_v28  ;;  %v8107_v37 = vmul.f32 %v10705_v50, %v7845_v63  ;;  %v10709_v36 = vstv %s10682_s16  ;;  %v10711_v28 = vstv %s10684_s22  ;;  %v8125_v48 = vmul.f32 %v7787_v4, %v7787_v4  ;;  %s10882_s16 = sld [smem:[#allocation85_spill]]  ;;  %s10883_s22 = sld [smem:[#allocation90_spill]] }
 0x42b   : > { %10701 = vst [vmem:[#allocation265_spill] sm:$0xff] %v8093_v29  ;;  %10708 = vst [vmem:[#allocation268_spill] sm:$0xff] %v8111_v16  ;;  %v8116_v29 = vmul.f32 %v10709_v36, %v7839_v53  ;;  %v8121_v30 = vmul.f32 %v10711_v28, %v7845_v63  ;;  %v10715_v50 = vstv %s10688_s26  ;;  %v10717_v16 = vstv %s10690_s4  ;;  %s10885_s26 = sld [smem:[#allocation95_spill]]  ;;  %s10887_s4 = sld [smem:[#allocation100_spill]] }
 0x42c   : > { %10707 = vst [vmem:[#allocation267_spill] sm:$0xff] %v8107_v37  ;;  %10714 = vst [vmem:[#allocation270_spill] sm:$0xff] %v8125_v48  ;;  %v8130_v37 = vmul.f32 %v10715_v50, %v7839_v53  ;;  %v8135_v39 = vmul.f32 %v10717_v16, %v7845_v63  ;;  %v8139_v36 = vmul.f32 %v7791_v62, %v7791_v62  ;;  %v10721_v28 = vstv %s10472_s8  ;;  %s10730_s8 = sld [smem:[#allocation199_spill]] }
 0x42d   : > { %10713 = vst [vmem:[#allocation269_spill] sm:$0xff] %v8121_v30  ;;  %v8144_v30 = vmul.f32 %v10721_v28, %v7839_v53  ;;  %v10723_v48 = vstv %s10473_s1  ;;  %v8153_v50 = vmul.f32 %v7795_v34, %v7795_v34  ;;  %v10727_v16 = vstv %s10698_s29  ;;  %s10734_s1 = sld [smem:[#allocation203_spill]]  ;;  %s10891_s29 = sld [smem:[#allocation66_spill]] }
 0x42e   : > { %10719 = vst [vmem:[#allocation271_spill] sm:$0xff] %v8135_v39  ;;  %10720 = vst [vmem:[#allocation272_spill] sm:$0xff] %v8139_v36  ;;  %v8149_v4 = vmul.f32 %v10723_v48, %v7845_v63  ;;  %v8158_v39 = vmul.f32 %v10727_v16, %v7839_v53  ;;  %v10729_v36 = vstv %s10700_s5  ;;  %v8167_v28 = vmul.f32 %v7799_v10, %v7799_v10  ;;  %s10892_s5 = sld [smem:[#allocation67_spill]] }
 0x42f   : > { %10726 = vst [vmem:[#allocation274_spill] sm:$0xff] %v8153_v50  ;;  %v8163_v62 = vmul.f32 %v10729_v36, %v7845_v63  ;;  %v10733_v48 = vstv %s10704_s2  ;;  %v10735_v50 = vstv %s10706_s9  ;;  %v8181_v16 = vmul.f32 %v7803_v15, %v7803_v15  ;;  %s10893_s2 = sld [smem:[#allocation71_spill]]  ;;  %s10894_s9 = sld [smem:[#allocation72_spill]] }
 0x430   : > { %10725 = vst [vmem:[#allocation273_spill] sm:$0xff] %v8149_v4  ;;  %10732 = vst [vmem:[#allocation276_spill] sm:$0xff] %v8167_v28  ;;  %v8172_v4 = vmul.f32 %v10733_v48, %v7839_v53  ;;  %v8177_v34 = vmul.f32 %v10735_v50, %v7845_v63  ;;  %v10739_v36 = vstv %s10710_s10  ;;  %v10741_v28 = vstv %s10712_s0  ;;  %s10896_s10 = sld [smem:[#allocation61_spill]]  ;;  %s10897_s0 = sld [smem:[#allocation62_spill]] }
 0x431   : > { %10731 = vst [vmem:[#allocation275_spill] sm:$0xff] %v8163_v62  ;;  %10738 = vst [vmem:[#allocation278_spill] sm:$0xff] %v8181_v16  ;;  %v8186_v62 = vmul.f32 %v10739_v36, %v7839_v53  ;;  %v8191_v10 = vmul.f32 %v10741_v28, %v7845_v63  ;;  %v8195_v48 = vmul.f32 %v7807_v20, %v7807_v20  ;;  %v10745_v50 = vstv %s10716_s24  ;;  %s10899_s24 = sld [smem:[#allocation76_spill]] }
 0x432   : > { %10737 = vst [vmem:[#allocation277_spill] sm:$0xff] %v8177_v34  ;;  %v8200_v34 = vmul.f32 %v10745_v50, %v7839_v53  ;;  %v10747_v16 = vstv %s10718_s21  ;;  %v8209_v36 = vmul.f32 %v7811_v12, %v7811_v12  ;;  %v10751_v28 = vstv %s10722_s30  ;;  %s10901_s21 = sld [smem:[#allocation77_spill]]  ;;  %s10905_s30 = sld [smem:[#allocation81_spill]] }
 0x433   : > { %10743 = vst [vmem:[#allocation279_spill] sm:$0xff] %v8191_v10  ;;  %10744 = vst [vmem:[#allocation280_spill] sm:$0xff] %v8195_v48  ;;  %v8205_v15 = vmul.f32 %v10747_v16, %v7845_v63  ;;  %v8214_v10 = vmul.f32 %v10751_v28, %v7839_v53  ;;  %v10754_v48 = vstv %s10724_s6  ;;  %v8223_v50 = vmul.f32 %v7815_v27, %v7815_v27  ;;  %s10907_s6 = sld [smem:[#allocation82_spill]] }
 0x434   : > { %10750 = vst [vmem:[#allocation282_spill] sm:$0xff] %v8209_v36  ;;  %v8219_v20 = vmul.f32 %v10754_v48, %v7845_v63  ;;  %v10757_v16 = vstv %s10728_s28  ;;  %v10759_v36 = vstv %s10730_s8  ;;  %v8237_v28 = vmul.f32 %v7819_v33, %v7819_v33  ;;  %s10922_s28 = sld [smem:[#allocation86_spill]]  ;;  %s10923_s8 = sld [smem:[#allocation87_spill]] }
 0x435   : > { %10749 = vst [vmem:[#allocation281_spill] sm:$0xff] %v8205_v15  ;;  %10753 = vst [vmem:[#allocation283_spill] sm:$0xff] %v8214_v10  ;;  %v8228_v15 = vmul.f32 %v10757_v16, %v7839_v53  ;;  %v8233_v12 = vmul.f32 %v10759_v36, %v7845_v63  ;;  %v10761_v10 = vstv %s10734_s1  ;;  %v8251_v16 = vmul.f32 %v7823_v44, %v7823_v44  ;;  %s10924_s1 = sld [smem:[#allocation91_spill]] }
 0x436   : > { %10756 = vst [vmem:[#allocation284_spill] sm:$0xff] %v8219_v20  ;;  %v8242_v48 = vmul.f32 %v10761_v10, %v7839_v53  ;;  %v10763_v20 = vstv %s10736_s14  ;;  %v8265_v10 = vmul.f32 %v7827_v38, %v7827_v38  ;;  %s10925_s14 = sld [smem:[#allocation92_spill]] }
 0x437   : > { %10758 = vst [vmem:[#allocation285_spill] sm:$0xff] %v8228_v15  ;;  %10760 = vst [vmem:[#allocation286_spill] sm:$0xff] %v8233_v12  ;;  %v8247_v27 = vmul.f32 %v10763_v20, %v7845_v63  ;;  %v10765_v15 = vstv %s10740_s12  ;;  %v10767_v12 = vstv %s10742_s15  ;;  %s10926_s12 = sld [smem:[#allocation96_spill]]  ;;  %s10927_s15 = sld [smem:[#allocation97_spill]] }
 0x438   : > { %10762 = vst [vmem:[#allocation287_spill] sm:$0xff] %v8242_v48  ;;  %v8256_v36 = vmul.f32 %v10765_v15, %v7839_v53  ;;  %v8261_v33 = vmul.f32 %v10767_v12, %v7845_v63  ;;  %v10769_v48 = vstv %s10746_s17  ;;  %v8279_v15 = vmul.f32 %v7831_v13, %v7831_v13  ;;  %s10937_s17 = sld [smem:[#allocation105_spill]] }
 0x439   : > { %10764 = vst [vmem:[#allocation288_spill] sm:$0xff] %v8247_v27  ;;  %v8270_v20 = vmul.f32 %v10769_v48, %v7839_v53  ;;  %v10770_v27 = vstv %s10748_s19  ;;  %v8293_v48 = vmul.f32 %v7835_v52, %v7835_v52  ;;  %v8301_v13 = vmul.f32 %v7849_v3, %v7711_v17  ;;  %s10938_s19 = sld [smem:[#allocation110_spill]] }
 0x43a   : > { %10766 = vst [vmem:[#allocation289_spill] sm:$0xff] %v8256_v36  ;;  %10768 = vst [vmem:[#allocation290_spill] sm:$0xff] %v8261_v33  ;;  %v8275_v44 = vmul.f32 %v10770_v27, %v7845_v63  ;;  %v10771_v36 = vstv %s10752_s18  ;;  %v10772_v33 = vstv %s10755_s13  ;;  %v8297_v27 = vadd.f32 %v7879_v24, %v7874_v18  ;;  %s10941_s18 = sld [smem:[#allocation115_spill]]  ;;  %s10944_s13 = sld [smem:[#allocation120_spill]] }
 0x43b   : > { %v8284_v12 = vmul.f32 %v10771_v36, %v7839_v53  ;;  %v8289_v38 = vmul.f32 %v10772_v33, %v7845_v63  ;;  %v8305_v53 = vadd.f32 %v7889_v5, %v7884_v2  ;;  %v8309_v33 = vmul.f32 %v7853_v9, %v7715_v31  ;;  %v10782_v36 = vld [vmem:[#allocation227_spill] sm:$0xff] }
 0x43c   : > { %v8313_v63 = vadd.f32 %v7899_v21, %v7894_v11  ;;  %v8317_v18 = vmul.f32 %v7857_v59, %v7719_v32  ;;  %v8321_v3 = vadd.f32 %v7909_v43, %v7904_v19  ;;  %v8325_v24 = vmul.f32 %v7861_v54, %v7723_v45  ;;  %v10773_v21 = vld [vmem:[#allocation209_spill] sm:$0xff]  ;;  %v10774_v19 = vld [vmem:[#allocation225_spill] sm:$0xff] }
 0x43d   : > { %v8329_v9 = vadd.f32 %v7919_v40, %v7914_v46  ;;  %v8333_v2 = vmul.f32 %v7865_v49, %v7727_v22  ;;  %v8337_v59 = vadd.f32 %v7929_v0, %v7924_v57  ;;  %v8341_v5 = vmul.f32 %v7869_v7, %v7731_v8  ;;  %v10775_v43 = vld [vmem:[#allocation223_spill] sm:$0xff]  ;;  %v10777_v40 = vld [vmem:[#allocation210_spill] sm:$0xff]  ;;  %v10778_v57 = vld [vmem:[#allocation226_spill] sm:$0xff] }
 0x43e   : > { %v8345_v54 = vadd.f32 %v7939_v58, %v7934_v41  ;;  %v8349_v11 = vmul.f32 %v7943_v6, %v7735_v14  ;;  %v8353_v49 = vadd.f32 %v10773_v21, %v7948_v26  ;;  %v8357_v46 = vmul.f32 %v10775_v43, %v10774_v19  ;;  %v10779_v0 = vld [vmem:[#allocation222_spill] sm:$0xff]  ;;  %v10781_v58 = vld [vmem:[#allocation221_spill] sm:$0xff]  ;;  %v10785_v21 = vld [vmem:[#allocation251_spill] sm:$0xff] }
 0x43f   : > { %v8361_v7 = vadd.f32 %v10777_v40, %v7962_v25  ;;  %v8365_v41 = vmul.f32 %v10779_v0, %v10778_v57  ;;  %v8369_v6 = vadd.f32 %v10781_v58, %v7976_v47  ;;  %v10783_v14 = vld [vmem:[#allocation250_spill] sm:$0xff]  ;;  %v8377_v43 = vadd.f32 %v10785_v21, %v7990_v23  ;;  %v10786_v19 = vld [vmem:[#allocation228_spill] sm:$0xff]  ;;  %v10789_v40 = vld [vmem:[#allocation253_spill] sm:$0xff] }
 0x440   : > { %10776 = vst [vmem:[#allocation209_spill] sm:$0xff] %v8357_v46  ;;  %v8373_v26 = vmul.f32 %v10783_v14, %v10782_v36  ;;  %v10787_v46 = vld [vmem:[#allocation252_spill] sm:$0xff]  ;;  %v8385_v0 = vadd.f32 %v10789_v40, %v8004_v42  ;;  %v10790_v57 = vld [vmem:[#allocation229_spill] sm:$0xff]  ;;  %v10793_v58 = vld [vmem:[#allocation255_spill] sm:$0xff] }
 0x441   : > { %10780 = vst [vmem:[#allocation223_spill] sm:$0xff] %v8365_v41  ;;  %v8381_v25 = vmul.f32 %v10787_v46, %v10786_v19  ;;  %v10791_v41 = vld [vmem:[#allocation254_spill] sm:$0xff]  ;;  %v8393_v14 = vadd.f32 %v10793_v58, %v8018_v1  ;;  %v10797_v21 = vld [vmem:[#allocation257_spill] sm:$0xff]  ;;  %v10798_v19 = vld [vmem:[#allocation231_spill] sm:$0xff] }
 0x442   : > { %10784 = vst [vmem:[#allocation210_spill] sm:$0xff] %v8373_v26  ;;  %v8389_v47 = vmul.f32 %v10791_v41, %v10790_v57  ;;  %v10794_v36 = vld [vmem:[#allocation230_spill] sm:$0xff]  ;;  %v10795_v26 = vld [vmem:[#allocation256_spill] sm:$0xff]  ;;  %v8401_v46 = vadd.f32 %v10797_v21, %v8032_v60  ;;  %v10801_v40 = vld [vmem:[#allocation259_spill] sm:$0xff] }
 0x443   : > { %10788 = vst [vmem:[#allocation222_spill] sm:$0xff] %v8381_v25  ;;  %v8397_v23 = vmul.f32 %v10795_v26, %v10794_v36  ;;  %v10799_v25 = vld [vmem:[#allocation258_spill] sm:$0xff]  ;;  %v8409_v41 = vadd.f32 %v10801_v40, %v8046_v55  ;;  %v10802_v57 = vld [vmem:[#allocation232_spill] sm:$0xff]  ;;  %v10805_v58 = vld [vmem:[#allocation261_spill] sm:$0xff] }
 0x444   : > { %10792 = vst [vmem:[#allocation221_spill] sm:$0xff] %v8389_v47  ;;  %v8405_v42 = vmul.f32 %v10799_v25, %v10798_v19  ;;  %v10803_v47 = vld [vmem:[#allocation260_spill] sm:$0xff]  ;;  %v8417_v26 = vadd.f32 %v10805_v58, %v8060_v61  ;;  %v10806_v36 = vld [vmem:[#allocation233_spill] sm:$0xff]  ;;  %v10809_v21 = vld [vmem:[#allocation263_spill] sm:$0xff] }
 0x445   : > { %10796 = vst [vmem:[#allocation250_spill] sm:$0xff] %v8397_v23  ;;  %v8413_v1 = vmul.f32 %v10803_v47, %v10802_v57  ;;  %v10807_v23 = vld [vmem:[#allocation262_spill] sm:$0xff]  ;;  %v8425_v25 = vadd.f32 %v10809_v21, %v8074_v35  ;;  %v10813_v40 = vld [vmem:[#allocation265_spill] sm:$0xff]  ;;  %v10814_v57 = vld [vmem:[#allocation235_spill] sm:$0xff] }
 0x446   : > { %10800 = vst [vmem:[#allocation251_spill] sm:$0xff] %v8405_v42  ;;  %v8421_v60 = vmul.f32 %v10807_v23, %v10806_v36  ;;  %v10810_v19 = vld [vmem:[#allocation234_spill] sm:$0xff]  ;;  %v10811_v42 = vld [vmem:[#allocation264_spill] sm:$0xff]  ;;  %v8433_v47 = vadd.f32 %v10813_v40, %v8088_v56  ;;  %v10817_v58 = vld [vmem:[#allocation267_spill] sm:$0xff] }
 0x447   : > { %10804 = vst [vmem:[#allocation252_spill] sm:$0xff] %v8413_v1  ;;  %v8429_v55 = vmul.f32 %v10811_v42, %v10810_v19  ;;  %v10815_v1 = vld [vmem:[#allocation266_spill] sm:$0xff]  ;;  %v8441_v23 = vadd.f32 %v10817_v58, %v8102_v51  ;;  %v10818_v36 = vld [vmem:[#allocation236_spill] sm:$0xff]  ;;  %v10821_v21 = vld [vmem:[#allocation269_spill] sm:$0xff] }
 0x448   : > { %10808 = vst [vmem:[#allocation253_spill] sm:$0xff] %v8421_v60  ;;  %v8437_v61 = vmul.f32 %v10815_v1, %v10814_v57  ;;  %v10819_v60 = vld [vmem:[#allocation268_spill] sm:$0xff]  ;;  %v8449_v42 = vadd.f32 %v10821_v21, %v8116_v29  ;;  %v10822_v19 = vld [vmem:[#allocation237_spill] sm:$0xff]  ;;  %v10825_v40 = vld [vmem:[#allocation271_spill] sm:$0xff] }
 0x449   : > { %10812 = vst [vmem:[#allocation254_spill] sm:$0xff] %v8429_v55  ;;  %v8445_v35 = vmul.f32 %v10819_v60, %v10818_v36  ;;  %v10823_v55 = vld [vmem:[#allocation270_spill] sm:$0xff]  ;;  %v8457_v1 = vadd.f32 %v10825_v40, %v8130_v37  ;;  %v10829_v58 = vld [vmem:[#allocation273_spill] sm:$0xff]  ;;  %v10830_v36 = vld [vmem:[#allocation239_spill] sm:$0xff] }
 0x44a   : > { %10816 = vst [vmem:[#allocation255_spill] sm:$0xff] %v8437_v61  ;;  %v8453_v56 = vmul.f32 %v10823_v55, %v10822_v19  ;;  %v10826_v57 = vld [vmem:[#allocation238_spill] sm:$0xff]  ;;  %v10827_v61 = vld [vmem:[#allocation272_spill] sm:$0xff]  ;;  %v8465_v60 = vadd.f32 %v10829_v58, %v8144_v30  ;;  %v10833_v21 = vld [vmem:[#allocation275_spill] sm:$0xff] }
 0x44b   : > { %10820 = vst [vmem:[#allocation256_spill] sm:$0xff] %v8445_v35  ;;  %v8461_v51 = vmul.f32 %v10827_v61, %v10826_v57  ;;  %v10831_v35 = vld [vmem:[#allocation274_spill] sm:$0xff]  ;;  %v8473_v55 = vadd.f32 %v10833_v21, %v8158_v39  ;;  %v10834_v19 = vld [vmem:[#allocation240_spill] sm:$0xff]  ;;  %v10836_v40 = vld [vmem:[#allocation277_spill] sm:$0xff] }
 0x44c   : > { %10824 = vst [vmem:[#allocation257_spill] sm:$0xff] %v8453_v56  ;;  %v8469_v29 = vmul.f32 %v10831_v35, %v10830_v36  ;;  %v10835_v56 = vld [vmem:[#allocation276_spill] sm:$0xff]  ;;  %v8481_v61 = vadd.f32 %v10836_v40, %v8172_v4  ;;  %v10837_v57 = vld [vmem:[#allocation241_spill] sm:$0xff]  ;;  %v10840_v58 = vld [vmem:[#allocation279_spill] sm:$0xff] }
 0x44d   : > { %10828 = vst [vmem:[#allocation258_spill] sm:$0xff] %v8461_v51  ;;  %v8477_v37 = vmul.f32 %v10835_v56, %v10834_v19  ;;  %v10838_v51 = vld [vmem:[#allocation278_spill] sm:$0xff]  ;;  %v8489_v35 = vadd.f32 %v10840_v58, %v8186_v62  ;;  %v10845_v56 = vld [vmem:[#allocation281_spill] sm:$0xff]  ;;  %v10847_v19 = vld [vmem:[#allocation243_spill] sm:$0xff] }
 0x44e   : > { %10832 = vst [vmem:[#allocation259_spill] sm:$0xff] %v8469_v29  ;;  %v8485_v30 = vmul.f32 %v10838_v51, %v10837_v57  ;;  %v10841_v36 = vld [vmem:[#allocation242_spill] sm:$0xff]  ;;  %v10842_v29 = vld [vmem:[#allocation280_spill] sm:$0xff]  ;;  %v8497_v21 = vadd.f32 %v10845_v56, %v8200_v34  ;;  %v10851_v51 = vld [vmem:[#allocation283_spill] sm:$0xff] }
 0x44f   : > { %v8493_v39 = vmul.f32 %v10842_v29, %v10841_v36  ;;  %v10848_v4 = vld [vmem:[#allocation282_spill] sm:$0xff]  ;;  %v10852_v57 = vld [vmem:[#allocation284_spill] sm:$0xff]  ;;  %v10857_v29 = vld [vmem:[#allocation285_spill] sm:$0xff] }
 0x450   : > { %10839 = vst [vmem:[#allocation260_spill] sm:$0xff] %v8485_v30  ;;  %10846 = vst [vmem:[#allocation262_spill] sm:$0xff] %v8497_v21  ;;  %v8501_v40 = vmul.f32 %v10848_v4, %v10847_v19  ;;  %v8505_v30 = vadd.f32 %v10852_v57, %v10851_v51  ;;  %v10854_v62 = vld [vmem:[#allocation244_spill] sm:$0xff]  ;;  %v10858_v36 = vld [vmem:[#allocation286_spill] sm:$0xff] }
 0x451   : > { %10844 = vst [vmem:[#allocation261_spill] sm:$0xff] %v8493_v39  ;;  %v8509_v58 = vmul.f32 %v8223_v50, %v10854_v62  ;;  %v8513_v39 = vadd.f32 %v10858_v36, %v10857_v29  ;;  %v10860_v34 = vld [vmem:[#allocation245_spill] sm:$0xff]  ;;  %v10862_v21 = vld [vmem:[#allocation287_spill] sm:$0xff]  ;;  %v10863_v4 = vld [vmem:[#allocation288_spill] sm:$0xff] }
 0x452   : > { %10850 = vst [vmem:[#allocation263_spill] sm:$0xff] %v8501_v40  ;;  %10853 = vst [vmem:[#allocation264_spill] sm:$0xff] %v8505_v30  ;;  %v8517_v56 = vmul.f32 %v8237_v28, %v10860_v34  ;;  %v8521_v19 = vadd.f32 %v10863_v4, %v10862_v21  ;;  %v10865_v40 = vld [vmem:[#allocation246_spill] sm:$0xff]  ;;  %v10868_v51 = vld [vmem:[#allocation289_spill] sm:$0xff]  ;;  %v8537_v28 = vadd.f32 %v8275_v44, %v8270_v20  ;;  %v10879_v44 = vstv %s10849_s20  ;;  %s10959_s20 = sld [smem:[#allocation102_spill]] }
 0x453   : > { %10856 = vst [vmem:[#allocation265_spill] sm:$0xff] %v8509_v58  ;;  %10859 = vst [vmem:[#allocation266_spill] sm:$0xff] %v8513_v39  ;;  %v8525_v57 = vmul.f32 %v8251_v16, %v10865_v40  ;;  %v10869_v50 = vld [vmem:[#allocation290_spill] sm:$0xff]  ;;  %v10871_v58 = vld [vmem:[#allocation247_spill] sm:$0xff]  ;;  %v8545_v16 = vadd.f32 %v8289_v38, %v8284_v12  ;;  %v8549_v4 = vmul.f32 %v8293_v48, %v7835_v52  ;;  %v2079_v12 = vmul.f32 0.044715, %v8317_v18 }
 0x454   : > { %10861 = vst [vmem:[#allocation267_spill] sm:$0xff] %v8517_v56  ;;  %10864 = vst [vmem:[#allocation268_spill] sm:$0xff] %v8521_v19  ;;  %v8529_v62 = vadd.f32 %v10869_v50, %v10868_v51  ;;  %v8533_v36 = vmul.f32 %v8265_v10, %v10871_v58  ;;  %v10874_v29 = vld [vmem:[#allocation248_spill] sm:$0xff]  ;;  %v10878_v51 = vstv %s10843_s3  ;;  %v1991_v50 = vmul.f32 0.044715, %v8301_v13  ;;  %s10958_s3 = sld [smem:[#allocation101_spill]] }
 0x455   : > { %10867 = vst [vmem:[#allocation269_spill] sm:$0xff] %v8525_v57  ;;  %10873 = vst [vmem:[#allocation272_spill] sm:$0xff] %v8537_v28  ;;  %v8541_v21 = vmul.f32 %v8279_v15, %v10874_v29  ;;  %v8554_v10 = vadd.f32 %v10878_v51, %v8297_v27  ;;  %v8560_v20 = vadd.f32 %v10879_v44, %v8305_v53  ;;  %v2035_v15 = vmul.f32 0.044715, %v8309_v33 }
 0x456   : > { %10870 = vst [vmem:[#allocation270_spill] sm:$0xff] %v8529_v62  ;;  %10872 = vst [vmem:[#allocation271_spill] sm:$0xff] %v8533_v36  ;;  %v10880_v29 = vstv %s10855_s7  ;;  %v1993_v27 = vadd.f32 %v1991_v50, %v7711_v17  ;;  %v10881_v51 = vstv %s10866_s25  ;;  %v2123_v53 = vmul.f32 0.044715, %v8325_v24  ;;  %s10970_s7 = sld [smem:[#allocation111_spill]]  ;;  %s10971_s25 = sld [smem:[#allocation112_spill]] }
 0x457   : > { %10875 = vst [vmem:[#allocation273_spill] sm:$0xff] %v8541_v21  ;;  %10876 = vst [vmem:[#allocation274_spill] sm:$0xff] %v8545_v16  ;;  %v8566_v38 = vadd.f32 %v10880_v29, %v8313_v63  ;;  %v1988_v48 = vmul.f32 %v8554_v10, %v8554_v10  ;;  %v8575_v13 = vadd.f32 %v10881_v51, %v8321_v3  ;;  %v10904_v36 = vstv %s10896_s10 }
 0x458   : > { %10877 = vst [vmem:[#allocation275_spill] sm:$0xff] %v8549_v4  ;;  %v2032_v33 = vmul.f32 %v8560_v20, %v8560_v20  ;;  %v2037_v44 = vadd.f32 %v2035_v15, %v7715_v31  ;;  %v2081_v18 = vadd.f32 %v2079_v12, %v7719_v32  ;;  %v1995_v50 = vmul.f32 0.7978846, %v1993_v27 }
 0x459   : > { %v2076_v63 = vmul.f32 %v8566_v38, %v8566_v38  ;;  %v1990_v29 = vmul.f32 %v1988_v48, %v8554_v10  ;;  %v2120_v3 = vmul.f32 %v8575_v13, %v8575_v13  ;;  %v2125_v51 = vadd.f32 %v2123_v53, %v7723_v45 }
 0x45a   : > { %v2034_v24 = vmul.f32 %v2032_v33, %v8560_v20  ;;  %v2039_v52 = vmul.f32 0.7978846, %v2037_v44  ;;  %v2083_v15 = vmul.f32 0.7978846, %v2081_v18  ;;  %5453 = vtanh.f32 %v1995_v50 }
 0x45b   : > { %v2078_v4 = vmul.f32 %v2076_v63, %v8566_v38  ;;  %v1992_v16 = vmul.f32 0.044715, %v1990_v29  ;;  %v2122_v21 = vmul.f32 %v2120_v3, %v8575_v13  ;;  %v2127_v12 = vmul.f32 0.7978846, %v2125_v51 }
 0x45c   : > { %v2036_v28 = vmul.f32 0.044715, %v2034_v24  ;;  %5455 = vtanh.f32 %v2039_v52  ;;  %v10884_v27 = vstv %s10882_s16  ;;  %v2167_v44 = vmul.f32 0.044715, %v8333_v2  ;;  %s10976_s16 = sld [smem:[#allocation116_spill]] }
 0x45d   : > { %v2080_v48 = vmul.f32 0.044715, %v2078_v4  ;;  %v8594_v58 = vadd.f32 %v10884_v27, %v8329_v9  ;;  %v1994_v53 = vadd.f32 %v1992_v16, %v8554_v10  ;;  %5457 = vtanh.f32 %v2083_v15 }
 0x45e   : > { %v2124_v33 = vmul.f32 0.044715, %v2122_v21  ;;  %v2038_v63 = vadd.f32 %v2036_v28, %v8560_v20  ;;  %5459 = vtanh.f32 %v2127_v12  ;;  %v2169_v9 = vadd.f32 %v2167_v44, %v7727_v22 }
 0x45f   : > { %v2082_v18 = vadd.f32 %v2080_v48, %v8566_v38  ;;  %v2164_v29 = vmul.f32 %v8594_v58, %v8594_v58  ;;  %v1996_v52 = vmul.f32 0.7978846, %v1994_v53  ;;  %v10886_v16 = vstv %s10883_s22  ;;  %s10977_s22 = sld [smem:[#allocation117_spill]] }
 0x460   : > { %v2126_v4 = vadd.f32 %v2124_v33, %v8575_v13  ;;  %v8607_v50 = vadd.f32 %v10886_v16, %v8337_v59  ;;  %v2040_v2 = vmul.f32 0.7978846, %v2038_v63  ;;  %v2211_v3 = vmul.f32 0.044715, %v8341_v5 }
 0x461   : > { %v2084_v21 = vmul.f32 0.7978846, %v2082_v18  ;;  %v2166_v28 = vmul.f32 %v2164_v29, %v8594_v58  ;;  %5461 = vtanh.f32 %v1996_v52  ;;  %v2171_v24 = vmul.f32 0.7978846, %v2169_v9 }
 0x462   : > { %v2128_v51 = vmul.f32 0.7978846, %v2126_v4  ;;  %v2208_v15 = vmul.f32 %v8607_v50, %v8607_v50  ;;  %5463 = vtanh.f32 %v2040_v2  ;;  %v2213_v48 = vadd.f32 %v2211_v3, %v7731_v8  ;;  %v10890_v4 = vld [vmem:[#allocation224_spill] sm:$0xff] }
 0x463   : > { %v2168_v12 = vmul.f32 0.044715, %v2166_v28  ;;  %v10888_v59 = vstv %s10885_s26  ;;  %5465 = vtanh.f32 %v2084_v21  ;;  %v2255_v33 = vmul.f32 0.044715, %v8349_v11  ;;  %s10987_s26 = sld [smem:[#allocation122_spill]] }
 0x464   : > { %v8617_v27 = vadd.f32 %v10888_v59, %v8345_v54  ;;  %v2210_v53 = vmul.f32 %v2208_v15, %v8607_v50  ;;  %v10889_v5 = vstv %s10887_s4  ;;  %5467 = vtanh.f32 %v2128_v51  ;;  %v5454_v52 = vpop.eup %5453  ;;  %s10992_s4 = sld [smem:[#allocation140_spill]] }
 0x465   : > { %v8624_v44 = vadd.f32 %v10889_v5, %v8353_v49  ;;  %v2170_v63 = vadd.f32 %v2168_v12, %v8594_v58  ;;  %v2215_v18 = vmul.f32 0.7978846, %v2213_v48  ;;  %5469 = vtanh.f32 %v2171_v24 }
 0x466   : > { %v2252_v29 = vmul.f32 %v8617_v27, %v8617_v27  ;;  %v2212_v54 = vmul.f32 0.044715, %v2210_v53  ;;  %v2257_v9 = vadd.f32 %v2255_v33, %v10890_v4  ;;  %v5456_v11 = vpop.eup %5455  ;;  %v1999_v2 = vadd.f32 1.0, %v5454_v52 }
 0x467   : > { %v2296_v16 = vmul.f32 %v8624_v44, %v8624_v44  ;;  %v2172_v21 = vmul.f32 0.7978846, %v2170_v63  ;;  %5471 = vtanh.f32 %v2215_v18  ;;  %v5458_v28 = vpop.eup %5457  ;;  %v2043_v3 = vadd.f32 1.0, %v5456_v11 }
 0x468   : > { %v2254_v49 = vmul.f32 %v2252_v29, %v8617_v27  ;;  %v2214_v51 = vadd.f32 %v2212_v54, %v8607_v50  ;;  %v2259_v15 = vmul.f32 0.7978846, %v2257_v9  ;;  %v5460_v24 = vpop.eup %5459  ;;  %v2001_v48 = vmul.f32 0.5, %v1999_v2  ;;  %v10895_v54 = vld [vmem:[#allocation209_spill] sm:$0xff] }
 0x469   : > { %v2298_v12 = vmul.f32 %v2296_v16, %v8624_v44  ;;  %v2087_v59 = vadd.f32 1.0, %v5458_v28  ;;  %5473 = vtanh.f32 %v2172_v21  ;;  %v2045_v33 = vmul.f32 0.5, %v2043_v3 }
 0x46a   : > { %v2256_v53 = vmul.f32 0.044715, %v2254_v49  ;;  %v2131_v5 = vadd.f32 1.0, %v5460_v24  ;;  %v2216_v63 = vmul.f32 0.7978846, %v2214_v51  ;;  %5475 = vtanh.f32 %v2259_v15 }
 0x46b   : > { %v2003_v18 = vmul.f32 %v2001_v48, %v7711_v17  ;;  %v2089_v29 = vmul.f32 0.5, %v2087_v59  ;;  %v8638_v9 = vmul.f32 0.044715, %v10895_v54  ;;  %v5462_v16 = vpop.eup %5461  ;;  %v2047_v11 = vmul.f32 %v2045_v33, %v7715_v31 }
 0x46c   : > { %v2258_v52 = vadd.f32 %v2256_v53, %v8617_v27  ;;  %v2133_v2 = vmul.f32 0.5, %v2131_v5  ;;  %5477 = vtanh.f32 %v2216_v63  ;;  %v8641_v21 = vmul.f32 0.044715, %v2298_v12  ;;  %v5464_v49 = vpop.eup %5463 }
 0x46d   : > { %v2000_v28 = vadd.f32 1.0, %v5462_v16  ;;  %v10898_v17 = vstv %s10891_s29  ;;  %v10900_v51 = vstv %s10892_s5  ;;  %v2091_v24 = vmul.f32 %v2089_v29, %v7719_v32  ;;  %v5466_v48 = vpop.eup %5465 }
 0x46e   : > { %v2007_v3 = vmul.f32 %v10898_v17, %v2003_v18  ;;  %v2013_v15 = vmul.f32 %v10900_v51, %v2003_v18  ;;  %v2044_v59 = vadd.f32 1.0, %v5464_v49  ;;  %v10902_v53 = vstv %s10893_s2  ;;  %v5468_v12 = vpop.eup %5467 }
 0x46f   : > { %v2051_v31 = vmul.f32 %v10902_v53, %v2047_v11  ;;  %v10903_v33 = vstv %s10894_s9  ;;  %v2135_v63 = vmul.f32 %v2133_v2, %v7723_v45  ;;  %v2002_v54 = vmul.f32 0.5, %v2000_v28  ;;  %v5470_v18 = vpop.eup %5469 }
 0x470   : > { %v2057_v5 = vmul.f32 %v10903_v33, %v2047_v11  ;;  %v2009_v16 = vadd.f32 %v2007_v3, %v10904_v36  ;;  %v10906_v62 = vstv %s10897_s0  ;;  %v2088_v40 = vadd.f32 1.0, %v5466_v48 }
 0x471   : > { %v2015_v17 = vadd.f32 %v2013_v15, %v10906_v62  ;;  %v2046_v32 = vmul.f32 0.5, %v2044_v59  ;;  %v10908_v29 = vstv %s10899_s24  ;;  %v10909_v51 = vstv %s10901_s21  ;;  %v5472_v45 = vpop.eup %5471 }
 0x472   : > { %v2095_v49 = vmul.f32 %v10908_v29, %v2091_v24  ;;  %v2101_v53 = vmul.f32 %v10909_v51, %v2091_v24  ;;  %v2132_v11 = vadd.f32 1.0, %v5468_v12  ;;  %v2004_v2 = vmul.f32 %v2002_v54, %v8554_v10 }
 0x473   : > { %v2053_v28 = vadd.f32 %v2051_v31, %v2009_v16  ;;  %v2059_v36 = vadd.f32 %v2057_v5, %v2015_v17  ;;  %v2090_v3 = vmul.f32 0.5, %v2088_v40  ;;  %v2048_v62 = vmul.f32 %v2046_v32, %v8560_v20  ;;  %v5474_v12 = vpop.eup %5473 }
 0x474   : > { %v2134_v15 = vmul.f32 0.5, %v2132_v11  ;;  %v10910_v48 = vstv %s10905_s30  ;;  %v10911_v33 = vstv %s10907_s6  ;;  %v10912_v29 = vstv %s10891_s29  ;;  %v5476_v5 = vpop.eup %5475  ;;  %s10993_s29 = sld [smem:[#allocation126_spill]] }
 0x475   : > { %v2139_v59 = vmul.f32 %v10910_v48, %v2135_v63  ;;  %v2145_v24 = vmul.f32 %v10911_v33, %v2135_v63  ;;  %v2008_v51 = vmul.f32 %v10912_v29, %v2004_v2  ;;  %v10913_v34 = vstv %s10892_s5  ;;  %s10994_s5 = sld [smem:[#allocation127_spill]] }
 0x476   : > { %v2014_v10 = vmul.f32 %v10913_v34, %v2004_v2  ;;  %v2092_v31 = vmul.f32 %v2090_v3, %v8566_v38  ;;  %v2097_v40 = vadd.f32 %v2095_v49, %v2053_v28  ;;  %v10914_v54 = vstv %s10893_s2  ;;  %v5478_v34 = vpop.eup %5477  ;;  %s10997_s2 = sld [smem:[#allocation145_spill]] }
 0x477   : > { %v2052_v20 = vmul.f32 %v10914_v54, %v2048_v62  ;;  %v10915_v16 = vstv %s10894_s9  ;;  %v2103_v32 = vadd.f32 %v2101_v53, %v2059_v36  ;;  %v2136_v11 = vmul.f32 %v2134_v15, %v8575_v13  ;;  %s11004_s9 = sld [smem:[#allocation150_spill]] }
 0x478   : > { %v2058_v17 = vmul.f32 %v10915_v16, %v2048_v62  ;;  %v10916_v48 = vstv %s10896_s10  ;;  %v10917_v33 = vstv %s10897_s0  ;;  %v10918_v19 = vstv %s10899_s24  ;;  %s11012_s10 = sld [smem:[#allocation155_spill]]  ;;  %s11014_s24 = sld [smem:[#allocation132_spill]] }
 0x479   : > { %v2010_v63 = vadd.f32 %v2008_v51, %v10916_v48  ;;  %v2016_v57 = vadd.f32 %v2014_v10, %v10917_v33  ;;  %v2096_v29 = vmul.f32 %v10918_v19, %v2092_v31  ;;  %v10919_v56 = vstv %s10901_s21  ;;  %s11013_s0 = sld [smem:[#allocation131_spill]]  ;;  %s11020_s21 = sld [smem:[#allocation160_spill]] }
 0x47a   : > { %v2102_v39 = vmul.f32 %v10919_v56, %v2092_v31  ;;  %v10920_v2 = vstv %s10905_s30  ;;  %v2141_v49 = vadd.f32 %v2139_v59, %v2097_v40  ;;  %v10921_v28 = vstv %s10907_s6  ;;  %s11026_s30 = sld [smem:[#allocation136_spill]]  ;;  %s11027_s6 = sld [smem:[#allocation137_spill]] }
 0x47b   : > { %v2140_v38 = vmul.f32 %v10920_v2, %v2136_v11  ;;  %v2146_v3 = vmul.f32 %v10921_v28, %v2136_v11  ;;  %v2147_v54 = vadd.f32 %v2145_v24, %v2103_v32  ;;  %v2054_v30 = vadd.f32 %v2052_v20, %v2010_v63 }
 0x47c   : > { %v2060_v62 = vadd.f32 %v2058_v17, %v2016_v57  ;;  %v2175_v53 = vadd.f32 1.0, %v5470_v18  ;;  %v2176_v36 = vadd.f32 1.0, %v5474_v12  ;;  %v2219_v13 = vadd.f32 1.0, %v5472_v45 }
 0x47d   : > { %v2220_v15 = vadd.f32 1.0, %v5478_v34  ;;  %v2260_v51 = vmul.f32 0.7978846, %v2258_v52  ;;  %v2263_v16 = vadd.f32 1.0, %v5476_v5  ;;  %v2098_v10 = vadd.f32 %v2096_v29, %v2054_v30  ;;  %v10928_v5 = vld [vmem:[#allocation225_spill] sm:$0xff] }
 0x47e   : > { %v2104_v19 = vadd.f32 %v2102_v39, %v2060_v62  ;;  %v2177_v56 = vmul.f32 0.5, %v2175_v53  ;;  %v2178_v31 = vmul.f32 0.5, %v2176_v36  ;;  %v2221_v59 = vmul.f32 0.5, %v2219_v13 }
 0x47f   : > { %v2222_v40 = vmul.f32 0.5, %v2220_v15  ;;  %5479 = vtanh.f32 %v2260_v51  ;;  %v2265_v57 = vmul.f32 0.5, %v2263_v16  ;;  %v2142_v18 = vadd.f32 %v2140_v38, %v2098_v10 }
 0x480   : > { %v2148_v45 = vadd.f32 %v2146_v3, %v2104_v19  ;;  %v2179_v52 = vmul.f32 %v2177_v56, %v7727_v22  ;;  %v2180_v30 = vmul.f32 %v2178_v31, %v8594_v58  ;;  %v2223_v39 = vmul.f32 %v2221_v59, %v7731_v8 }
 0x481   : > { %v2224_v24 = vmul.f32 %v2222_v40, %v8607_v50  ;;  %v2267_v12 = vmul.f32 %v2265_v57, %v10890_v4  ;;  %v2301_v20 = vadd.f32 %v8638_v9, %v10928_v5  ;;  %v10929_v17 = vstv %s10922_s28  ;;  %v10943_v57 = vld [vmem:[#allocation223_spill] sm:$0xff]  ;;  %s11029_s28 = sld [smem:[#allocation141_spill]] }
 0x482   : > { %v2183_v32 = vmul.f32 %v10929_v17, %v2179_v52  ;;  %v10930_v11 = vmov %v10929_v17  ;;  %v10931_v63 = vstv %s10923_s8  ;;  %v10933_v58 = vstv %s10924_s1  ;;  %s11030_s8 = sld [smem:[#allocation142_spill]]  ;;  %s11034_s1 = sld [smem:[#allocation146_spill]] }
 0x483   : > { %v2184_v48 = vmul.f32 %v10930_v11, %v2180_v30  ;;  %v2189_v33 = vmul.f32 %v10931_v63, %v2179_v52  ;;  %v10932_v22 = vmov %v10931_v63  ;;  %v2227_v34 = vmul.f32 %v10933_v58, %v2223_v39 }
 0x484   : > { %v2190_v29 = vmul.f32 %v10932_v22, %v2180_v30  ;;  %v10934_v8 = vmov %v10933_v58  ;;  %v10935_v38 = vstv %s10925_s14  ;;  %v2185_v3 = vadd.f32 %v2183_v32, %v2141_v49  ;;  %v10950_v22 = vld [vmem:[#allocation222_spill] sm:$0xff]  ;;  %s11035_s14 = sld [smem:[#allocation147_spill]] }
 0x485   : > { %v2228_v2 = vmul.f32 %v10934_v8, %v2224_v24  ;;  %v2233_v50 = vmul.f32 %v10935_v38, %v2223_v39  ;;  %v10936_v28 = vmov %v10935_v38  ;;  %v2186_v62 = vadd.f32 %v2184_v48, %v2142_v18  ;;  %v10946_v39 = vld [vmem:[#allocation210_spill] sm:$0xff] }
 0x486   : > { %v2234_v4 = vmul.f32 %v10936_v28, %v2224_v24  ;;  %v2191_v9 = vadd.f32 %v2189_v33, %v2147_v54  ;;  %v2192_v53 = vadd.f32 %v2190_v29, %v2148_v45  ;;  %v10939_v36 = vstv %s10926_s12  ;;  %v10949_v33 = vld [vmem:[#allocation227_spill] sm:$0xff] }
 0x487   : > { %v2271_v13 = vmul.f32 %v10939_v36, %v2267_v12  ;;  %v10940_v15 = vstv %s10927_s15  ;;  %v2302_v16 = vadd.f32 %v8641_v21, %v8624_v44  ;;  %v2303_v10 = vmul.f32 0.7978846, %v2301_v20 }
 0x488   : > { %v2277_v51 = vmul.f32 %v10940_v15, %v2267_v12  ;;  %v2229_v19 = vadd.f32 %v2227_v34, %v2185_v3  ;;  %v2230_v56 = vadd.f32 %v2228_v2, %v2186_v62  ;;  %v2235_v31 = vadd.f32 %v2233_v50, %v2191_v9 }
 0x489   : > { %v2236_v59 = vadd.f32 %v2234_v4, %v2192_v53  ;;  %v2304_v40 = vmul.f32 0.7978846, %v2302_v16  ;;  %5481 = vtanh.f32 %v2303_v10  ;;  %v10942_v49 = vstv %s10937_s17  ;;  %v5480_v12 = vpop.eup %5479  ;;  %v10952_v4 = vld [vmem:[#allocation228_spill] sm:$0xff]  ;;  %v10953_v10 = vld [vmem:[#allocation221_spill] sm:$0xff]  ;;  %s11048_s17 = sld [smem:[#allocation165_spill]] }
 0x48a   : > { %v8721_v54 = vadd.f32 %v10942_v49, %v8361_v7  ;;  %v2343_v18 = vmul.f32 0.044715, %v10943_v57  ;;  %v8724_v45 = vadd.f32 %v2271_v13, %v2229_v19  ;;  %v8726_v52 = vadd.f32 %v2277_v51, %v2235_v31  ;;  %v10947_v7 = vld [vmem:[#allocation226_spill] sm:$0xff] }
 0x48b   : > { %v10945_v21 = vstv %s10938_s19  ;;  %v2387_v24 = vmul.f32 0.044715, %v10946_v39  ;;  %5483 = vtanh.f32 %v2304_v40  ;;  %v10948_v32 = vstv %s10941_s18  ;;  %s11051_s19 = sld [smem:[#allocation170_spill]]  ;;  %s11056_s18 = sld [smem:[#allocation175_spill]] }
 0x48c   : > { %v8731_v30 = vadd.f32 %v10945_v21, %v8369_v6  ;;  %v2340_v20 = vmul.f32 %v8721_v54, %v8721_v54  ;;  %v2345_v17 = vadd.f32 %v2343_v18, %v10947_v7  ;;  %v8740_v11 = vadd.f32 %v10948_v32, %v8377_v43 }
 0x48d   : > { %v2264_v48 = vadd.f32 1.0, %v5480_v12  ;;  %v2389_v6 = vadd.f32 %v2387_v24, %v10949_v33  ;;  %v2431_v29 = vmul.f32 0.044715, %v10950_v22  ;;  %v10951_v2 = vstv %s10944_s13  ;;  %v10956_v12 = vld [vmem:[#allocation229_spill] sm:$0xff]  ;;  %s11060_s13 = sld [smem:[#allocation180_spill]] }
 0x48e   : > { %v2384_v63 = vmul.f32 %v8731_v30, %v8731_v30  ;;  %v2342_v58 = vmul.f32 %v2340_v20, %v8721_v54  ;;  %v2347_v34 = vmul.f32 0.7978846, %v2345_v17  ;;  %v2428_v8 = vmul.f32 %v8740_v11, %v8740_v11 }
 0x48f   : > { %v8752_v38 = vadd.f32 %v10951_v2, %v8385_v0  ;;  %v2266_v43 = vmul.f32 0.5, %v2264_v48  ;;  %v2391_v28 = vmul.f32 0.7978846, %v2389_v6  ;;  %v2433_v3 = vadd.f32 %v2431_v29, %v10952_v4 }
 0x490   : > { %v2386_v50 = vmul.f32 %v2384_v63, %v8731_v30  ;;  %v2344_v62 = vmul.f32 0.044715, %v2342_v58  ;;  %5485 = vtanh.f32 %v2347_v34  ;;  %v2430_v9 = vmul.f32 %v2428_v8, %v8740_v11 }
 0x491   : > { %v2472_v53 = vmul.f32 %v8752_v38, %v8752_v38  ;;  %v2268_v36 = vmul.f32 %v2266_v43, %v8617_v27  ;;  %5487 = vtanh.f32 %v2391_v28  ;;  %v2435_v0 = vmul.f32 0.7978846, %v2433_v3 }
 0x492   : > { %v2388_v13 = vmul.f32 0.044715, %v2386_v50  ;;  %v2346_v15 = vadd.f32 %v2344_v62, %v8721_v54  ;;  %v2432_v51 = vmul.f32 0.044715, %v2430_v9  ;;  %v2475_v19 = vmul.f32 0.044715, %v10953_v10 }
 0x493   : > { %v2474_v16 = vmul.f32 %v2472_v53, %v8752_v38  ;;  %v10954_v31 = vstv %s10926_s12  ;;  %v10955_v49 = vstv %s10927_s15  ;;  %5489 = vtanh.f32 %v2435_v0  ;;  %v5482_v21 = vpop.eup %5481  ;;  %s11042_s12 = sld [smem:[#allocation151_spill]]  ;;  %s11043_s15 = sld [smem:[#allocation152_spill]] }
 0x494   : > { %v2272_v40 = vmul.f32 %v10954_v31, %v2268_v36  ;;  %v2278_v57 = vmul.f32 %v10955_v49, %v2268_v36  ;;  %v2390_v18 = vadd.f32 %v2388_v13, %v8731_v30  ;;  %v2348_v39 = vmul.f32 0.7978846, %v2346_v15  ;;  %v10962_v36 = vld [vmem:[#allocation230_spill] sm:$0xff]  ;;  %v10963_v15 = vld [vmem:[#allocation251_spill] sm:$0xff] }
 0x495   : > { %v2434_v27 = vadd.f32 %v2432_v51, %v8740_v11  ;;  %v2476_v24 = vmul.f32 0.044715, %v2474_v16  ;;  %v2477_v20 = vadd.f32 %v2475_v19, %v10956_v12  ;;  %v2307_v48 = vadd.f32 1.0, %v5482_v21  ;;  %v5484_v6 = vpop.eup %5483 }
 0x496   : > { %v2274_v17 = vadd.f32 %v2272_v40, %v2230_v56  ;;  %v2280_v32 = vadd.f32 %v2278_v57, %v2236_v59  ;;  %v2392_v63 = vmul.f32 0.7978846, %v2390_v18  ;;  %5491 = vtanh.f32 %v2348_v39  ;;  %v10960_v59 = vld [vmem:[#allocation250_spill] sm:$0xff] }
 0x497   : > { %v2436_v22 = vmul.f32 0.7978846, %v2434_v27  ;;  %v2478_v29 = vadd.f32 %v2476_v24, %v8752_v38  ;;  %v2479_v58 = vmul.f32 0.7978846, %v2477_v20  ;;  %v2308_v34 = vadd.f32 1.0, %v5484_v6 }
 0x498   : > { %v2309_v8 = vmul.f32 0.5, %v2307_v48  ;;  %5493 = vtanh.f32 %v2392_v63  ;;  %v10957_v2 = vstv %s10526_s27  ;;  %v2519_v50 = vmul.f32 0.044715, %v10960_v59  ;;  %s10968_s27 = sld [smem:[#allocation106_spill]] }
 0x499   : > { %v8774_v43 = vadd.f32 %v10957_v2, %v8393_v14  ;;  %5495 = vtanh.f32 %v2436_v22  ;;  %v2480_v56 = vmul.f32 0.7978846, %v2478_v29  ;;  %v10961_v28 = vstv %s10527_s23  ;;  %s10969_s23 = sld [smem:[#allocation107_spill]] }
 0x49a   : > { %v8780_v3 = vadd.f32 %v10961_v28, %v8401_v46  ;;  %v2310_v62 = vmul.f32 0.5, %v2308_v34  ;;  %v2311_v9 = vmul.f32 %v2309_v8, %v10928_v5  ;;  %5497 = vtanh.f32 %v2479_v58  ;;  %v5486_v14 = vpop.eup %5485 }
 0x49b   : > { %v2516_v53 = vmul.f32 %v8774_v43, %v8774_v43  ;;  %5499 = vtanh.f32 %v2480_v56  ;;  %v2521_v13 = vadd.f32 %v2519_v50, %v10962_v36  ;;  %v2563_v51 = vmul.f32 0.044715, %v10963_v15  ;;  %v5488_v46 = vpop.eup %5487 }
 0x49c   : > { %v2560_v0 = vmul.f32 %v8780_v3, %v8780_v3  ;;  %v2312_v16 = vmul.f32 %v2310_v62, %v8624_v44  ;;  %v10964_v10 = vstv %s10958_s3  ;;  %v10965_v19 = vstv %s10959_s20  ;;  %s11063_s3 = sld [smem:[#allocation185_spill]]  ;;  %s11070_s20 = sld [smem:[#allocation156_spill]] }
 0x49d   : > { %v2315_v5 = vmul.f32 %v10964_v10, %v2311_v9  ;;  %v2321_v31 = vmul.f32 %v10965_v19, %v2311_v9  ;;  %v2351_v40 = vadd.f32 1.0, %v5486_v14  ;;  %v2395_v49 = vadd.f32 1.0, %v5488_v46  ;;  %v5490_v39 = vpop.eup %5489  ;;  %v10972_v9 = vld [vmem:[#allocation231_spill] sm:$0xff] }
 0x49e   : > { %v2518_v57 = vmul.f32 %v2516_v53, %v8774_v43  ;;  %v2523_v18 = vmul.f32 0.7978846, %v2521_v13  ;;  %v2562_v21 = vmul.f32 %v2560_v0, %v8780_v3  ;;  %v10966_v27 = vmov %v10964_v10 }
 0x49f   : > { %v2316_v24 = vmul.f32 %v10966_v27, %v2312_v16  ;;  %v2317_v20 = vadd.f32 %v2315_v5, %v8724_v45  ;;  %v10967_v48 = vmov %v10965_v19  ;;  %v2323_v44 = vadd.f32 %v2321_v31, %v8726_v52 }
 0x4a0   : > { %v2322_v63 = vmul.f32 %v10967_v48, %v2312_v16  ;;  %v2353_v6 = vmul.f32 0.5, %v2351_v40  ;;  %v2397_v22 = vmul.f32 0.5, %v2395_v49  ;;  %v2439_v29 = vadd.f32 1.0, %v5490_v39  ;;  %v5492_v56 = vpop.eup %5491 }
 0x4a1   : > { %v2520_v58 = vmul.f32 0.044715, %v2518_v57  ;;  %v2318_v34 = vadd.f32 %v2316_v24, %v2274_v17  ;;  %5501 = vtanh.f32 %v2523_v18  ;;  %v2564_v2 = vmul.f32 0.044715, %v2562_v21 }
 0x4a2   : > { %v2324_v8 = vadd.f32 %v2322_v63, %v2280_v32  ;;  %v2355_v59 = vmul.f32 %v2353_v6, %v10947_v7  ;;  %v2399_v45 = vmul.f32 %v2397_v22, %v10949_v33  ;;  %v2441_v50 = vmul.f32 0.5, %v2439_v29  ;;  %v5494_v28 = vpop.eup %5493 }
 0x4a3   : > { %v2522_v52 = vadd.f32 %v2520_v58, %v8774_v43  ;;  %v2352_v62 = vadd.f32 1.0, %v5492_v56  ;;  %v2565_v53 = vadd.f32 %v2563_v51, %v10972_v9  ;;  %v2566_v17 = vadd.f32 %v2564_v2, %v8780_v3  ;;  %v5496_v13 = vpop.eup %5495 }
 0x4a4   : > { %v10973_v32 = vstv %s10528_s11  ;;  %v10974_v0 = vstv %s10968_s27  ;;  %v10975_v7 = vstv %s10969_s23  ;;  %v2396_v33 = vadd.f32 1.0, %v5494_v28  ;;  %v5498_v5 = vpop.eup %5497  ;;  %s10986_s11 = sld [smem:[#allocation121_spill]]  ;;  %s11071_s27 = sld [smem:[#allocation157_spill]] }
 0x4a5   : > { %v8810_v14 = vadd.f32 %v10973_v32, %v8409_v41  ;;  %v2359_v15 = vmul.f32 %v10974_v0, %v2355_v59  ;;  %v2365_v46 = vmul.f32 %v10975_v7, %v2355_v59  ;;  %v10978_v16 = vstv %s10970_s7  ;;  %v5500_v49 = vpop.eup %5499  ;;  %s11077_s23 = sld [smem:[#allocation190_spill]]  ;;  %s11078_s7 = sld [smem:[#allocation161_spill]] }
 0x4a6   : > { %v2403_v10 = vmul.f32 %v10978_v16, %v2399_v45  ;;  %v2354_v19 = vmul.f32 0.5, %v2352_v62  ;;  %v10979_v31 = vstv %s10971_s25  ;;  %v2440_v40 = vadd.f32 1.0, %v5496_v13  ;;  %s11079_s25 = sld [smem:[#allocation162_spill]] }
 0x4a7   : > { %v2409_v51 = vmul.f32 %v10979_v31, %v2399_v45  ;;  %v2443_v41 = vmul.f32 %v2441_v50, %v10952_v4  ;;  %v2361_v57 = vadd.f32 %v2359_v15, %v2317_v20  ;;  %v2367_v18 = vadd.f32 %v2365_v46, %v2323_v44 }
 0x4a8   : > { %v2398_v21 = vmul.f32 0.5, %v2396_v33  ;;  %v2483_v39 = vadd.f32 1.0, %v5498_v5  ;;  %v2356_v27 = vmul.f32 %v2354_v19, %v8721_v54  ;;  %v2442_v24 = vmul.f32 0.5, %v2440_v40 }
 0x4a9   : > { %v10980_v48 = vstv %s10976_s16  ;;  %v10981_v6 = vstv %s10977_s22  ;;  %v2405_v58 = vadd.f32 %v2403_v10, %v2361_v57  ;;  %v2411_v4 = vadd.f32 %v2409_v51, %v2367_v18  ;;  %s11085_s16 = sld [smem:[#allocation166_spill]]  ;;  %s11086_s22 = sld [smem:[#allocation167_spill]] }
 0x4aa   : > { %v2447_v63 = vmul.f32 %v10980_v48, %v2443_v41  ;;  %v2453_v22 = vmul.f32 %v10981_v6, %v2443_v41  ;;  %v2400_v29 = vmul.f32 %v2398_v21, %v8731_v30  ;;  %v2484_v2 = vadd.f32 1.0, %v5500_v49 }
 0x4ab   : > { %v10982_v20 = vmov %v10974_v0  ;;  %v10983_v44 = vmov %v10975_v7  ;;  %v2444_v45 = vmul.f32 %v2442_v24, %v8740_v11  ;;  %v2485_v50 = vmul.f32 0.5, %v2483_v39  ;;  %v5502_v30 = vpop.eup %5501 }
 0x4ac   : > { %v2360_v56 = vmul.f32 %v10982_v20, %v2356_v27  ;;  %v2366_v59 = vmul.f32 %v10983_v44, %v2356_v27  ;;  %v10984_v54 = vmov %v10978_v16  ;;  %v10985_v62 = vmov %v10979_v31 }
 0x4ad   : > { %v2404_v28 = vmul.f32 %v10984_v54, %v2400_v29  ;;  %v2410_v32 = vmul.f32 %v10985_v62, %v2400_v29  ;;  %v2449_v13 = vadd.f32 %v2447_v63, %v2405_v58  ;;  %v2455_v0 = vadd.f32 %v2453_v22, %v2411_v4  ;;  %v10998_v22 = vld [vmem:[#allocation252_spill] sm:$0xff] }
 0x4ae   : > { %v2362_v15 = vadd.f32 %v2360_v56, %v2318_v34  ;;  %v2368_v7 = vadd.f32 %v2366_v59, %v2324_v8  ;;  %v10988_v46 = vmov %v10980_v48  ;;  %v10989_v16 = vmov %v10981_v6  ;;  %v11000_v56 = vld [vmem:[#allocation253_spill] sm:$0xff] }
 0x4af   : > { %v2448_v33 = vmul.f32 %v10988_v46, %v2444_v45  ;;  %v2454_v10 = vmul.f32 %v10989_v16, %v2444_v45  ;;  %v2486_v5 = vmul.f32 0.5, %v2484_v2  ;;  %v2487_v11 = vmul.f32 %v2485_v50, %v10956_v12 }
 0x4b0   : > { %v2524_v19 = vmul.f32 0.7978846, %v2522_v52  ;;  %v2527_v31 = vadd.f32 1.0, %v5502_v30  ;;  %v2406_v51 = vadd.f32 %v2404_v28, %v2362_v15  ;;  %v2412_v40 = vadd.f32 %v2410_v32, %v2368_v7  ;;  %v11003_v28 = vld [vmem:[#allocation232_spill] sm:$0xff]  ;;  %v11007_v15 = vld [vmem:[#allocation254_spill] sm:$0xff] }
 0x4b1   : > { %v2567_v41 = vmul.f32 0.7978846, %v2565_v53  ;;  %v2568_v49 = vmul.f32 0.7978846, %v2566_v17  ;;  %v2488_v57 = vmul.f32 %v2486_v5, %v8752_v38  ;;  %v10990_v18 = vstv %s10986_s11  ;;  %s11089_s11 = sld [smem:[#allocation171_spill]] }
 0x4b2   : > { %v2491_v34 = vmul.f32 %v10990_v18, %v2487_v11  ;;  %v10991_v8 = vstv %s10987_s26  ;;  %5503 = vtanh.f32 %v2524_v19  ;;  %v2450_v39 = vadd.f32 %v2448_v33, %v2406_v51  ;;  %s11090_s26 = sld [smem:[#allocation172_spill]] }
 0x4b3   : > { %v2497_v21 = vmul.f32 %v10991_v8, %v2487_v11  ;;  %v2456_v27 = vadd.f32 %v2454_v10, %v2412_v40  ;;  %v2529_v12 = vmul.f32 0.5, %v2527_v31  ;;  %5505 = vtanh.f32 %v2567_v41  ;;  %v11008_v31 = vld [vmem:[#allocation234_spill] sm:$0xff] }
 0x4b4   : > { %v10995_v52 = vmov %v10990_v18  ;;  %v2493_v48 = vadd.f32 %v2491_v34, %v2449_v13  ;;  %v10996_v63 = vmov %v10991_v8  ;;  %5507 = vtanh.f32 %v2568_v49  ;;  %v11005_v13 = vld [vmem:[#allocation233_spill] sm:$0xff]  ;;  %v11010_v49 = vld [vmem:[#allocation255_spill] sm:$0xff] }
 0x4b5   : > { %v2492_v24 = vmul.f32 %v10995_v52, %v2488_v57  ;;  %v2498_v53 = vmul.f32 %v10996_v63, %v2488_v57  ;;  %v2499_v17 = vadd.f32 %v2497_v21, %v2455_v0  ;;  %v2531_v38 = vmul.f32 %v2529_v12, %v10962_v36 }
 0x4b6   : > { %v2604_v6 = vmul.f32 %v8810_v14, %v8810_v14  ;;  %v2607_v29 = vmul.f32 0.044715, %v10998_v22  ;;  %v10999_v2 = vstv %s10992_s4  ;;  %v2651_v44 = vmul.f32 0.044715, %v11000_v56  ;;  %s11095_s4 = sld [smem:[#allocation176_spill]] }
 0x4b7   : > { %v8854_v58 = vadd.f32 %v2492_v24, %v2450_v39  ;;  %v8856_v4 = vadd.f32 %v2498_v53, %v2456_v27  ;;  %v8861_v20 = vadd.f32 %v10999_v2, %v8417_v26  ;;  %v11001_v59 = vstv %s10993_s29  ;;  %v11011_v24 = vld [vmem:[#allocation235_spill] sm:$0xff] }
 0x4b8   : > { %v2535_v45 = vmul.f32 %v11001_v59, %v2531_v38  ;;  %v11002_v50 = vstv %s10994_s5  ;;  %v2606_v54 = vmul.f32 %v2604_v6, %v8810_v14  ;;  %v2609_v62 = vadd.f32 %v2607_v29, %v11003_v28 }
 0x4b9   : > { %v2541_v36 = vmul.f32 %v11002_v50, %v2531_v38  ;;  %v2648_v32 = vmul.f32 %v8861_v20, %v8861_v20  ;;  %v2653_v0 = vadd.f32 %v2651_v44, %v11005_v13  ;;  %v11006_v30 = vstv %s10997_s2  ;;  %s11101_s2 = sld [smem:[#allocation182_spill]] }
 0x4ba   : > { %v8876_v26 = vadd.f32 %v11006_v30, %v8425_v25  ;;  %v2695_v7 = vmul.f32 0.044715, %v11007_v15  ;;  %v2537_v46 = vadd.f32 %v2535_v45, %v2493_v48  ;;  %v2608_v16 = vmul.f32 0.044715, %v2606_v54 }
 0x4bb   : > { %v2543_v33 = vadd.f32 %v2541_v36, %v2499_v17  ;;  %v2611_v10 = vmul.f32 0.7978846, %v2609_v62  ;;  %v2650_v5 = vmul.f32 %v2648_v32, %v8861_v20  ;;  %v2655_v11 = vmul.f32 0.7978846, %v2653_v0 }
 0x4bc   : > { %v2692_v19 = vmul.f32 %v8876_v26, %v8876_v26  ;;  %v2697_v51 = vadd.f32 %v2695_v7, %v11008_v31  ;;  %v2610_v40 = vadd.f32 %v2608_v16, %v8810_v14  ;;  %v11009_v25 = vstv %s11004_s9  ;;  %v5504_v18 = vpop.eup %5503  ;;  %s11108_s9 = sld [smem:[#allocation195_spill]] }
 0x4bd   : > { %5509 = vtanh.f32 %v2611_v10  ;;  %v8887_v41 = vadd.f32 %v11009_v25, %v8433_v47  ;;  %v2739_v57 = vmul.f32 0.044715, %v11010_v49  ;;  %v2652_v34 = vmul.f32 0.044715, %v2650_v5  ;;  %v5506_v39 = vpop.eup %5505 }
 0x4be   : > { %5511 = vtanh.f32 %v2655_v11  ;;  %v2694_v8 = vmul.f32 %v2692_v19, %v8876_v26  ;;  %v2699_v21 = vmul.f32 0.7978846, %v2697_v51  ;;  %v2528_v27 = vadd.f32 1.0, %v5504_v18  ;;  %v5508_v17 = vpop.eup %5507 }
 0x4bf   : > { %v2612_v12 = vmul.f32 0.7978846, %v2610_v40  ;;  %v2736_v52 = vmul.f32 %v8887_v41, %v8887_v41  ;;  %v2741_v48 = vadd.f32 %v2739_v57, %v11011_v24  ;;  %v2571_v63 = vadd.f32 1.0, %v5506_v39 }
 0x4c0   : > { %v2654_v47 = vadd.f32 %v2652_v34, %v8861_v20  ;;  %v2696_v53 = vmul.f32 0.044715, %v2694_v8  ;;  %5513 = vtanh.f32 %v2699_v21  ;;  %v2530_v38 = vmul.f32 0.5, %v2528_v27 }
 0x4c1   : > { %5515 = vtanh.f32 %v2612_v12  ;;  %v2738_v6 = vmul.f32 %v2736_v52, %v8887_v41  ;;  %v2743_v22 = vmul.f32 0.7978846, %v2741_v48  ;;  %v2572_v29 = vadd.f32 1.0, %v5508_v17  ;;  %v11023_v52 = vld [vmem:[#allocation256_spill] sm:$0xff] }
 0x4c2   : > { %v2573_v2 = vmul.f32 0.5, %v2571_v63  ;;  %v2656_v56 = vmul.f32 0.7978846, %v2654_v47  ;;  %v2698_v44 = vadd.f32 %v2696_v53, %v8876_v26  ;;  %v2532_v59 = vmul.f32 %v2530_v38, %v8774_v43 }
 0x4c3   : > { %v2740_v45 = vmul.f32 0.044715, %v2738_v6  ;;  %5517 = vtanh.f32 %v2743_v22  ;;  %v11015_v50 = vstv %s11012_s10  ;;  %v2574_v54 = vmul.f32 0.5, %v2572_v29  ;;  %v11025_v29 = vld [vmem:[#allocation236_spill] sm:$0xff]  ;;  %s11110_s10 = sld [smem:[#allocation200_spill]] }
 0x4c4   : > { %v8901_v36 = vadd.f32 %v11015_v50, %v8441_v23  ;;  %v2575_v62 = vmul.f32 %v2573_v2, %v10972_v9  ;;  %5519 = vtanh.f32 %v2656_v56  ;;  %v2700_v32 = vmul.f32 0.7978846, %v2698_v44 }
 0x4c5   : > { %v11016_v0 = vstv %s10993_s29  ;;  %v11017_v15 = vstv %s10994_s5  ;;  %v2742_v16 = vadd.f32 %v2740_v45, %v8887_v41  ;;  %v2576_v10 = vmul.f32 %v2574_v54, %v8780_v3  ;;  %s11096_s29 = sld [smem:[#allocation177_spill]]  ;;  %s11099_s5 = sld [smem:[#allocation181_spill]] }
 0x4c6   : > { %v2536_v30 = vmul.f32 %v11016_v0, %v2532_v59  ;;  %v2542_v7 = vmul.f32 %v11017_v15, %v2532_v59  ;;  %v2780_v43 = vmul.f32 %v8901_v36, %v8901_v36  ;;  %v11018_v23 = vstv %s11013_s0  ;;  %v11028_v59 = vld [vmem:[#allocation257_spill] sm:$0xff]  ;;  %v5447_v0 = vld [vmem:[#allocation18 + $0x8] sm:$0xff]   ;;  %s11113_s0 = sld [smem:[#allocation205_spill]] }
 0x4c7   : > { %v2579_v5 = vmul.f32 %v11018_v23, %v2575_v62  ;;  %v11019_v11 = vstv %s11014_s24  ;;  %5521 = vtanh.f32 %v2700_v32  ;;  %v5510_v9 = vpop.eup %5509  ;;  %v2744_v25 = vmul.f32 0.7978846, %v2742_v16  ;;  %5179 = vmatprep.subr.bf16.mxu1 %v5447_v0  ;;  %s11127_s24 = sld [smem:[#allocation212_spill]] }
 0x4c8   : > { %v2585_v19 = vmul.f32 %v11019_v11, %v2575_v62  ;;  %v2538_v51 = vadd.f32 %v2536_v30, %v8854_v58  ;;  %v2544_v40 = vadd.f32 %v2542_v7, %v8856_v4  ;;  %v2782_v49 = vmul.f32 %v2780_v43, %v8901_v36  ;;  %v5512_v57 = vpop.eup %5511  ;;  %5180 = vmatpush3.bf16.msra.mxu1 %v5447_v0 }
 0x4c9   : > { %v11021_v18 = vmov %v11018_v23  ;;  %v2581_v8 = vadd.f32 %v2579_v5, %v2537_v46  ;;  %v11022_v21 = vmov %v11019_v11  ;;  %v2615_v27 = vadd.f32 1.0, %v5510_v9 }
 0x4ca   : > { %v2580_v34 = vmul.f32 %v11021_v18, %v2576_v10  ;;  %v2586_v3 = vmul.f32 %v11022_v21, %v2576_v10  ;;  %v2587_v39 = vadd.f32 %v2585_v19, %v2543_v33  ;;  %v2659_v12 = vadd.f32 1.0, %v5512_v57  ;;  %v5514_v63 = vpop.eup %5513 }
 0x4cb   : > { %5523 = vtanh.f32 %v2744_v25  ;;  %v2783_v48 = vmul.f32 0.044715, %v11023_v52  ;;  %v2784_v4 = vmul.f32 0.044715, %v2782_v49  ;;  %v11024_v53 = vstv %s11020_s21  ;;  %v5516_v38 = vpop.eup %5515  ;;  %s11132_s21 = sld [smem:[#allocation217_spill]] }
 0x4cc   : > { %v2582_v58 = vadd.f32 %v2580_v34, %v2538_v51  ;;  %v2588_v47 = vadd.f32 %v2586_v3, %v2544_v40  ;;  %v8927_v17 = vadd.f32 %v11024_v53, %v8449_v42  ;;  %v2617_v6 = vmul.f32 0.5, %v2615_v27 }
 0x4cd   : > { %v2661_v22 = vmul.f32 0.5, %v2659_v12  ;;  %v2703_v46 = vadd.f32 1.0, %v5514_v63  ;;  %v2785_v2 = vadd.f32 %v2783_v48, %v11025_v29  ;;  %v2616_v33 = vadd.f32 1.0, %v5516_v38  ;;  %v5518_v42 = vpop.eup %5517 }
 0x4ce   : > { %v2786_v56 = vadd.f32 %v2784_v4, %v8901_v36  ;;  %v2824_v44 = vmul.f32 %v8927_v17, %v8927_v17  ;;  %v8934_v45 = vmul.f32 0.044715, %v11028_v59  ;;  %v2619_v50 = vmul.f32 %v2617_v6, %v11003_v28  ;;  %v5520_v30 = vpop.eup %5519 }
 0x4cf   : > { %v2663_v54 = vmul.f32 %v2661_v22, %v11005_v13  ;;  %v2705_v62 = vmul.f32 0.5, %v2703_v46  ;;  %v2787_v32 = vmul.f32 0.7978846, %v2785_v2  ;;  %v2618_v15 = vmul.f32 0.5, %v2616_v33 }
 0x4d0   : > { %v2747_v7 = vadd.f32 1.0, %v5518_v42  ;;  %v2788_v16 = vmul.f32 0.7978846, %v2786_v56  ;;  %v2826_v43 = vmul.f32 %v2824_v44, %v8927_v17  ;;  %v11031_v10 = vstv %s11026_s30  ;;  %s11134_s30 = sld [smem:[#allocation186_spill]] }
 0x4d1   : > { %v2623_v23 = vmul.f32 %v11031_v10, %v2619_v50  ;;  %v11032_v5 = vstv %s11027_s6  ;;  %v2660_v19 = vadd.f32 1.0, %v5520_v30  ;;  %v11033_v28 = vstv %s11029_s28  ;;  %v5522_v9 = vpop.eup %5521  ;;  %s11135_s6 = sld [smem:[#allocation187_spill]]  ;;  %s11138_s28 = sld [smem:[#allocation220_spill]] }
 0x4d2   : > { %v2629_v11 = vmul.f32 %v11032_v5, %v2619_v50  ;;  %v2667_v13 = vmul.f32 %v11033_v28, %v2663_v54  ;;  %v2620_v51 = vmul.f32 %v2618_v15, %v8810_v14  ;;  %v11036_v40 = vstv %s11030_s8  ;;  %s11147_s8 = sld [smem:[#allocation191_spill]] }
 0x4d3   : > { %v2673_v25 = vmul.f32 %v11036_v40, %v2663_v54  ;;  %v2707_v49 = vmul.f32 %v2705_v62, %v11008_v31  ;;  %v2749_v57 = vmul.f32 0.5, %v2747_v7  ;;  %v2625_v18 = vadd.f32 %v2623_v23, %v2581_v8 }
 0x4d4   : > { %v2631_v34 = vadd.f32 %v2629_v11, %v2587_v39  ;;  %v2662_v21 = vmul.f32 0.5, %v2660_v19  ;;  %v2704_v3 = vadd.f32 1.0, %v5522_v9  ;;  %v11037_v27 = vmov 0.0  }
 0x4d5   : > { %5199 = vmatprep.subr.bf16.mxu1 %v11037_v27  ;;  %v11038_v12 = vmov %v11031_v10  ;;  %v11039_v48 = vmov %v11032_v5  ;;  %v11040_v4 = vstv %s11034_s1  ;;  %v11041_v53 = vstv %s11035_s14  ;;  %v5524_v31 = vpop.eup %5523  ;;  %s11148_s1 = sld [smem:[#allocation192_spill]]  ;;  %s11149_s14 = sld [smem:[#allocation196_spill]] }
 0x4d6   : > { %v2624_v52 = vmul.f32 %v11038_v12, %v2620_v51  ;;  %v2630_v63 = vmul.f32 %v11039_v48, %v2620_v51  ;;  %v2711_v14 = vmul.f32 %v11040_v4, %v2707_v49  ;;  %v2717_v38 = vmul.f32 %v11041_v53, %v2707_v49  ;;  %v11057_v12 = vld [vmem:[#allocation258_spill] sm:$0xff] }
 0x4d7   : > { %v2664_v8 = vmul.f32 %v2662_v21, %v8861_v20  ;;  %v2669_v39 = vadd.f32 %v2667_v13, %v2625_v18  ;;  %v2675_v6 = vadd.f32 %v2673_v25, %v2631_v34  ;;  %v2706_v22 = vmul.f32 0.5, %v2704_v3  ;;  %v11054_v18 = vld [vmem:[#allocation237_spill] sm:$0xff] }
 0x4d8   : > { %v2626_v46 = vadd.f32 %v2624_v52, %v2582_v58  ;;  %v2632_v2 = vadd.f32 %v2630_v63, %v2588_v47  ;;  %v2748_v33 = vadd.f32 1.0, %v5524_v31  ;;  %v2751_v56 = vmul.f32 %v2749_v57, %v11011_v24 }
 0x4d9   : > { %v11044_v44 = vmov %v11033_v28  ;;  %v11045_v42 = vmov %v11036_v40  ;;  %v2708_v54 = vmul.f32 %v2706_v22, %v8876_v26  ;;  %v2713_v62 = vadd.f32 %v2711_v14, %v2669_v39 }
 0x4da   : > { %v2668_v59 = vmul.f32 %v11044_v44, %v2664_v8  ;;  %v2674_v50 = vmul.f32 %v11045_v42, %v2664_v8  ;;  %v2719_v0 = vadd.f32 %v2717_v38, %v2675_v6  ;;  %v2750_v20 = vmul.f32 0.5, %v2748_v33  ;;  %v11062_v8 = vld [vmem:[#allocation239_spill] sm:$0xff]  ;;  %v11065_v42 = vld [vmem:[#allocation240_spill] sm:$0xff] }
 0x4db   : > { %v11046_v30 = vstv %s11042_s12  ;;  %v11047_v7 = vstv %s11043_s15  ;;  %v11049_v23 = vmov %v11040_v4  ;;  %v11050_v5 = vmov %v11041_v53  ;;  %v11061_v53 = vld [vmem:[#allocation238_spill] sm:$0xff]  ;;  %s11150_s12 = sld [smem:[#allocation197_spill]]  ;;  %s11155_s15 = sld [smem:[#allocation201_spill]] }
 0x4dc   : > { %v2755_v15 = vmul.f32 %v11046_v30, %v2751_v56  ;;  %v2761_v10 = vmul.f32 %v11047_v7, %v2751_v56  ;;  %v2670_v58 = vadd.f32 %v2668_v59, %v2626_v46  ;;  %v2676_v47 = vadd.f32 %v2674_v50, %v2632_v2 }
 0x4dd   : > { %v2712_v24 = vmul.f32 %v11049_v23, %v2708_v54  ;;  %v2718_v11 = vmul.f32 %v11050_v5, %v2708_v54  ;;  %v2752_v19 = vmul.f32 %v2750_v20, %v8887_v41  ;;  %5525 = vtanh.f32 %v2787_v32  ;;  %v11069_v5 = vld [vmem:[#allocation241_spill] sm:$0xff] }
 0x4de   : > { %v8974_v26 = vadd.f32 %v2755_v15, %v2713_v62  ;;  %v8976_v28 = vadd.f32 %v2761_v10, %v2719_v0  ;;  %5527 = vtanh.f32 %v2788_v16  ;;  %v2828_v51 = vmul.f32 0.044715, %v2826_v43  ;;  %v11059_v43 = vld [vmem:[#allocation259_spill] sm:$0xff]  ;;  %v11067_v0 = vld [vmem:[#allocation260_spill] sm:$0xff] }
 0x4df   : > { %v2714_v13 = vadd.f32 %v2712_v24, %v2670_v58  ;;  %v2720_v9 = vadd.f32 %v2718_v11, %v2676_v47  ;;  %v11052_v40 = vmov %v11046_v30  ;;  %v11053_v49 = vmov %v11047_v7 }
 0x4e0   : > { %v2756_v25 = vmul.f32 %v11052_v40, %v2752_v19  ;;  %v2762_v57 = vmul.f32 %v11053_v49, %v2752_v19  ;;  %v2829_v34 = vadd.f32 %v8934_v45, %v11054_v18  ;;  %v11055_v21 = vstv %s11048_s17  ;;  %s11157_s17 = sld [smem:[#allocation202_spill]] }
 0x4e1   : > { %v8987_v41 = vadd.f32 %v11055_v21, %v8457_v1  ;;  %v2830_v3 = vadd.f32 %v2828_v51, %v8927_v17  ;;  %v2871_v32 = vmul.f32 0.044715, %v11057_v12  ;;  %v11058_v52 = vstv %s11051_s19  ;;  %v11072_v12 = vld [vmem:[#allocation261_spill] sm:$0xff]  ;;  %s11163_s19 = sld [smem:[#allocation206_spill]] }
 0x4e2   : > { %v8994_v16 = vadd.f32 %v11058_v52, %v8465_v60  ;;  %v2915_v48 = vmul.f32 0.044715, %v11059_v43  ;;  %v8997_v63 = vadd.f32 %v2756_v25, %v2714_v13  ;;  %v8999_v4 = vadd.f32 %v2762_v57, %v2720_v9 }
 0x4e3   : > { %v2831_v45 = vmul.f32 0.7978846, %v2829_v34  ;;  %v2868_v14 = vmul.f32 %v8987_v41, %v8987_v41  ;;  %v2832_v1 = vmul.f32 0.7978846, %v2830_v3  ;;  %v2873_v38 = vadd.f32 %v2871_v32, %v11061_v53 }
 0x4e4   : > { %v2912_v31 = vmul.f32 %v8994_v16, %v8994_v16  ;;  %v2917_v60 = vadd.f32 %v2915_v48, %v11062_v8  ;;  %v11064_v6 = vstv %s11056_s18  ;;  %v2959_v46 = vmul.f32 0.044715, %v8477_v37  ;;  %s11164_s18 = sld [smem:[#allocation207_spill]] }
 0x4e5   : > { %5529 = vtanh.f32 %v2831_v45  ;;  %v2870_v39 = vmul.f32 %v2868_v14, %v8987_v41  ;;  %v9011_v22 = vadd.f32 %v11064_v6, %v8473_v55  ;;  %v2875_v2 = vmul.f32 0.7978846, %v2873_v38 }
 0x4e6   : > { %5531 = vtanh.f32 %v2832_v1  ;;  %v2914_v33 = vmul.f32 %v2912_v31, %v8994_v16  ;;  %v2919_v56 = vmul.f32 0.7978846, %v2917_v60  ;;  %v2961_v50 = vadd.f32 %v2959_v46, %v11065_v42 }
 0x4e7   : > { %v2872_v44 = vmul.f32 0.044715, %v2870_v39  ;;  %v2956_v59 = vmul.f32 %v9011_v22, %v9011_v22  ;;  %v11066_v54 = vstv %s11060_s13  ;;  %5533 = vtanh.f32 %v2875_v2  ;;  %v5526_v15 = vpop.eup %5525  ;;  %s9229_s13 = sld [smem:[#allocation25 + $0xf00]] }
 0x4e8   : > { %v9021_v62 = vadd.f32 %v11066_v54, %v8481_v61  ;;  %v2916_v55 = vmul.f32 0.044715, %v2914_v33  ;;  %v3003_v20 = vmul.f32 0.044715, %v11067_v0  ;;  %v11068_v37 = vstv %s11063_s3  ;;  %v5528_v47 = vpop.eup %5527  ;;  %s9231_s3 = sld [smem:[#allocation25 + $0xf01]] }
 0x4e9   : > { %v9027_v30 = vadd.f32 %v11068_v37, %v8489_v35  ;;  %v2874_v7 = vadd.f32 %v2872_v44, %v8987_v41  ;;  %5535 = vtanh.f32 %v2919_v56  ;;  %v2958_v10 = vmul.f32 %v2956_v59, %v9011_v22 }
 0x4ea   : > { %v2963_v58 = vmul.f32 0.7978846, %v2961_v50  ;;  %v2791_v23 = vadd.f32 1.0, %v5526_v15  ;;  %v2918_v61 = vadd.f32 %v2916_v55, %v8994_v16  ;;  %v3000_v24 = vmul.f32 %v9021_v62, %v9021_v62 }
 0x4eb   : > { %v3005_v11 = vadd.f32 %v3003_v20, %v11069_v5  ;;  %v2792_v19 = vadd.f32 1.0, %v5528_v47  ;;  %v2876_v13 = vmul.f32 0.7978846, %v2874_v7  ;;  %v2960_v35 = vmul.f32 0.044715, %v2958_v10 }
 0x4ec   : > { %5537 = vtanh.f32 %v2963_v58  ;;  %v2793_v9 = vmul.f32 0.5, %v2791_v23  ;;  %v2920_v51 = vmul.f32 0.7978846, %v2918_v61  ;;  %v3002_v40 = vmul.f32 %v3000_v24, %v9021_v62  ;;  %v11080_v23 = vld [vmem:[#allocation242_spill] sm:$0xff] }
 0x4ed   : > { %v3007_v25 = vmul.f32 0.7978846, %v3005_v11  ;;  %v2794_v49 = vmul.f32 0.5, %v2792_v19  ;;  %5539 = vtanh.f32 %v2876_v13  ;;  %v2962_v57 = vadd.f32 %v2960_v35, %v9011_v22  ;;  %v11081_v24 = vld [vmem:[#allocation262_spill] sm:$0xff] }
 0x4ee   : > { %v3044_v34 = vmul.f32 %v9027_v30, %v9027_v30  ;;  %v2795_v21 = vmul.f32 %v2793_v9, %v11025_v29  ;;  %5541 = vtanh.f32 %v2920_v51  ;;  %v3004_v3 = vmul.f32 0.044715, %v3002_v40 }
 0x4ef   : > { %v3047_v32 = vmul.f32 0.044715, %v11072_v12  ;;  %v5530_v52 = vpop.eup %5529  ;;  %v2796_v43 = vmul.f32 %v2794_v49, %v8901_v36  ;;  %v2964_v48 = vmul.f32 0.7978846, %v2962_v57  ;;  %5543 = vtanh.f32 %v3007_v25 }
 0x4f0   : > { %v3046_v45 = vmul.f32 %v3044_v34, %v9027_v30  ;;  %v5532_v14 = vpop.eup %5531  ;;  %v11073_v1 = vstv %s11070_s20  ;;  %v11074_v31 = vstv %s11071_s27  ;;  %v2835_v39 = vadd.f32 1.0, %v5530_v52  ;;  %s11169_s20 = sld [smem:[#allocation213_spill]]  ;;  %s11170_s27 = sld [smem:[#allocation214_spill]] }
 0x4f1   : > { %v2799_v38 = vmul.f32 %v11073_v1, %v2795_v21  ;;  %v2805_v60 = vmul.f32 %v11074_v31, %v2795_v21  ;;  %v3006_v6 = vadd.f32 %v3004_v3, %v9021_v62  ;;  %v11075_v29 = vmov %v11073_v1  ;;  %v5534_v44 = vpop.eup %5533 }
 0x4f2   : > { %v2800_v46 = vmul.f32 %v11075_v29, %v2796_v43  ;;  %v11076_v2 = vmov %v11074_v31  ;;  %v2836_v56 = vadd.f32 1.0, %v5532_v14  ;;  %5545 = vtanh.f32 %v2964_v48 }
 0x4f3   : > { %v2806_v33 = vmul.f32 %v11076_v2, %v2796_v43  ;;  %v2801_v36 = vadd.f32 %v2799_v38, %v8974_v26  ;;  %v2807_v59 = vadd.f32 %v2805_v60, %v8976_v28  ;;  %v2837_v50 = vmul.f32 0.5, %v2835_v39  ;;  %v5536_v55 = vpop.eup %5535 }
 0x4f4   : > { %v3008_v54 = vmul.f32 0.7978846, %v3006_v6  ;;  %v2802_v0 = vadd.f32 %v2800_v46, %v8997_v63  ;;  %v2838_v37 = vmul.f32 0.5, %v2836_v56  ;;  %v2879_v15 = vadd.f32 1.0, %v5534_v44 }
 0x4f5   : > { %v2808_v20 = vadd.f32 %v2806_v33, %v8999_v4  ;;  %v2839_v7 = vmul.f32 %v2837_v50, %v11054_v18  ;;  %v2923_v10 = vadd.f32 1.0, %v5536_v55  ;;  %v3048_v26 = vmul.f32 0.044715, %v3046_v45 }
 0x4f6   : > { %5547 = vtanh.f32 %v3008_v54  ;;  %v5538_v28 = vpop.eup %5537  ;;  %v2840_v58 = vmul.f32 %v2838_v37, %v8927_v17  ;;  %v2881_v47 = vmul.f32 0.5, %v2879_v15  ;;  %v3049_v61 = vadd.f32 %v3047_v32, %v11080_v23 }
 0x4f7   : > { %v11082_v11 = vstv %s11077_s23  ;;  %v11083_v4 = vstv %s11078_s7  ;;  %v11084_v13 = vstv %s11079_s25  ;;  %v2925_v9 = vmul.f32 0.5, %v2923_v10  ;;  %v5540_v51 = vpop.eup %5539  ;;  %s4941_s23 = sld [smem:[#allocation25 + $0xf80]]  ;;  %s4942_s7 = sld [smem:[#allocation25 + $0xf81]] }
 0x4f8   : > { %v9062_v63 = vadd.f32 %v11082_v11, %v11081_v24  ;;  %v2843_v19 = vmul.f32 %v11083_v4, %v2839_v7  ;;  %v2849_v35 = vmul.f32 %v11084_v13, %v2839_v7  ;;  %v2967_v18 = vadd.f32 1.0, %v5538_v28  ;;  %v5542_v21 = vpop.eup %5541  ;;  %s11179_s25 = sld [smem:[#allocation59_spill]] }
 0x4f9   : > { %v11087_v40 = vmov %v11083_v4  ;;  %v11088_v49 = vmov %v11084_v13  ;;  %v2883_v57 = vmul.f32 %v2881_v47, %v11061_v53  ;;  %v3050_v34 = vadd.f32 %v3048_v26, %v9027_v30  ;;  %v5544_v43 = vpop.eup %5543 }
 0x4fa   : > { %v2844_v25 = vmul.f32 %v11087_v40, %v2840_v58  ;;  %v2850_v17 = vmul.f32 %v11088_v49, %v2840_v58  ;;  %v2845_v3 = vadd.f32 %v2843_v19, %v2801_v36  ;;  %v2851_v12 = vadd.f32 %v2849_v35, %v2807_v59 }
 0x4fb   : > { %v2880_v32 = vadd.f32 1.0, %v5540_v51  ;;  %v2927_v52 = vmul.f32 %v2925_v9, %v11062_v8  ;;  %v11091_v14 = vstv %s11085_s16  ;;  %v11092_v38 = vstv %s11086_s22  ;;  %s11180_s16 = sld [smem:[#allocation60_spill]]  ;;  %s11181_s22 = sld [smem:[#allocation54_spill]] }
 0x4fc   : > { %v2846_v48 = vadd.f32 %v2844_v25, %v2802_v0  ;;  %v2852_v45 = vadd.f32 %v2850_v17, %v2808_v20  ;;  %v2887_v1 = vmul.f32 %v11091_v14, %v2883_v57  ;;  %v2893_v31 = vmul.f32 %v11092_v38, %v2883_v57  ;;  %v5546_v2 = vpop.eup %5545 }
 0x4fd   : > { %v2882_v60 = vmul.f32 0.5, %v2880_v32  ;;  %v2924_v39 = vadd.f32 1.0, %v5542_v21  ;;  %v11093_v6 = vstv %s11089_s11  ;;  %v11094_v53 = vstv %s11090_s26 }
 0x4fe   : > { %v2931_v29 = vmul.f32 %v11093_v6, %v2927_v52  ;;  %v2937_v46 = vmul.f32 %v11094_v53, %v2927_v52  ;;  %v2889_v33 = vadd.f32 %v2887_v1, %v2845_v3  ;;  %v2895_v56 = vadd.f32 %v2893_v31, %v2851_v12 }
 0x4ff   : > { %v2969_v8 = vmul.f32 0.5, %v2967_v18  ;;  %v3011_v44 = vadd.f32 1.0, %v5544_v43  ;;  %v2884_v36 = vmul.f32 %v2882_v60, %v8987_v41  ;;  %v2926_v59 = vmul.f32 0.5, %v2924_v39 }
 0x500   : > { %v2968_v50 = vadd.f32 1.0, %v5546_v2  ;;  %v3051_v54 = vmul.f32 0.7978846, %v3049_v61  ;;  %v2933_v55 = vadd.f32 %v2931_v29, %v2889_v33  ;;  %v2939_v0 = vadd.f32 %v2937_v46, %v2895_v56  ;;  %v5548_v15 = vpop.eup %5547  ;;  %v11115_v2 = vld [vmem:[#allocation264_spill] sm:$0xff] }
 0x501   : > { %v2971_v20 = vmul.f32 %v2969_v8, %v11065_v42  ;;  %v3013_v37 = vmul.f32 0.5, %v3011_v44  ;;  %v11097_v7 = vmov %v11091_v14  ;;  %v11098_v26 = vmov %v11092_v38  ;;  %s9299_s11 = scalar_lea.vmem [#allocation28], %s11181_s22  ;;  %s9306_s26 = scalar_lea.vmem [#allocation29], %s11181_s22 }
 0x502   : > { %v2888_v10 = vmul.f32 %v11097_v7, %v2884_v36  ;;  %v2894_v28 = vmul.f32 %v11098_v26, %v2884_v36  ;;  %v2928_v58 = vmul.f32 %v2926_v59, %v8994_v16  ;;  %v2970_v47 = vmul.f32 0.5, %v2968_v50  ;;  %v11117_v36 = vld [vmem:[#allocation265_spill] sm:$0xff]  ;;  %v11118_v50 = vld [vmem:[#allocation266_spill] sm:$0xff]  ;;  %v11121_v7 = vld [vmem:[#allocation267_spill] sm:$0xff] }
 0x503   : > { %v11100_v41 = vstv %s11095_s4  ;;  %v11102_v61 = vstv %s11096_s29  ;;  %v3012_v4 = vadd.f32 1.0, %v5548_v15  ;;  %v3015_v42 = vmul.f32 %v3013_v37, %v11069_v5  ;;  %v11122_v26 = vld [vmem:[#allocation244_spill] sm:$0xff]  ;;  %s11182_s4 = sld [smem:[#allocation53_spill]]  ;;  %s11183_s29 = sld [smem:[#allocation57_spill]] }
 0x504   : > { %v2975_v24 = vmul.f32 %v11100_v41, %v2971_v20  ;;  %v2981_v11 = vmul.f32 %v11102_v61, %v2971_v20  ;;  %v2890_v19 = vadd.f32 %v2888_v10, %v2846_v48  ;;  %v2896_v13 = vadd.f32 %v2894_v28, %v2852_v45  ;;  %v11120_v20 = vld [vmem:[#allocation243_spill] sm:$0xff] }
 0x505   : > { %v11103_v35 = vmov %v11093_v6  ;;  %v11104_v18 = vmov %v11094_v53  ;;  %v2972_v16 = vmul.f32 %v2970_v47, %v9011_v22  ;;  %v3014_v49 = vmul.f32 0.5, %v3012_v4  ;;  %v11123_v47 = vld [vmem:[#allocation268_spill] sm:$0xff] }
 0x506   : > { %v2932_v9 = vmul.f32 %v11103_v35, %v2928_v58  ;;  %v2938_v51 = vmul.f32 %v11104_v18, %v2928_v58  ;;  %v2977_v40 = vadd.f32 %v2975_v24, %v2933_v55  ;;  %v2983_v25 = vadd.f32 %v2981_v11, %v2939_v0 }
 0x507   : > { %v11105_v21 = vstv %s11099_s5  ;;  %v11106_v12 = vstv %s11101_s2  ;;  %v11107_v5 = vmov %v11100_v41  ;;  %v11109_v43 = vmov %v11102_v61  ;;  %v11125_v61 = vld [vmem:[#allocation269_spill] sm:$0xff]  ;;  %s11184_s5 = sld [smem:[#allocation55_spill]]  ;;  %s11185_s2 = sld [smem:[#allocation58_spill]] }
 0x508   : > { %v2934_v17 = vadd.f32 %v2932_v9, %v2890_v19  ;;  %v2940_v57 = vadd.f32 %v2938_v51, %v2896_v13  ;;  %v3019_v3 = vmul.f32 %v11105_v21, %v3015_v42  ;;  %v3025_v32 = vmul.f32 %v11106_v12, %v3015_v42  ;;  %v11126_v13 = vld [vmem:[#allocation245_spill] sm:$0xff] }
 0x509   : > { %v2976_v52 = vmul.f32 %v11107_v5, %v2972_v16  ;;  %v2982_v48 = vmul.f32 %v11109_v43, %v2972_v16  ;;  %v3016_v45 = vmul.f32 %v3014_v49, %v9021_v62  ;;  %v3052_v14 = vmul.f32 0.7978846, %v3050_v34  ;;  %v11114_v34 = vld [vmem:[#allocation263_spill] sm:$0xff]  ;;  %v11128_v16 = vld [vmem:[#allocation246_spill] sm:$0xff] }
 0x50a   : > { %v9109_v22 = vadd.f32 %v3019_v3, %v2977_v40  ;;  %v9111_v1 = vadd.f32 %v3025_v32, %v2983_v25  ;;  %5549 = vtanh.f32 %v3051_v54  ;;  %v3088_v38 = vmul.f32 %v9062_v63, %v9062_v63  ;;  %v11129_v5 = vld [vmem:[#allocation270_spill] sm:$0xff] }
 0x50b   : > { %v2978_v31 = vadd.f32 %v2976_v52, %v2934_v17  ;;  %v2984_v60 = vadd.f32 %v2982_v48, %v2940_v57  ;;  %v11111_v39 = vmov %v11105_v21  ;;  %v11112_v29 = vmov %v11106_v12  ;;  %v11131_v48 = vld [vmem:[#allocation271_spill] sm:$0xff] }
 0x50c   : > { %v3020_v6 = vmul.f32 %v11111_v39, %v3016_v45  ;;  %v3026_v53 = vmul.f32 %v11112_v29, %v3016_v45  ;;  %5551 = vtanh.f32 %v3052_v14  ;;  %v3090_v62 = vmul.f32 %v3088_v38, %v9062_v63  ;;  %v11133_v29 = vld [vmem:[#allocation247_spill] sm:$0xff] }
 0x50d   : > { %v3091_v46 = vmul.f32 0.044715, %v11114_v34  ;;  %v11116_v33 = vstv %s11108_s9  ;;  %v3135_v59 = vmul.f32 0.044715, %v11117_v36  ;;  %v11119_v54 = vstv %s11110_s10  ;;  %s11186_s9 = scalar_lea.vmem [#allocation3], %s11182_s4  ;;  %s11187_s10 = sld [smem:[#allocation56_spill]] }
 0x50e   : > { %v9124_v56 = vadd.f32 %v11116_v33, %v11115_v2  ;;  %v9126_v8 = vadd.f32 %v3020_v6, %v2978_v31  ;;  %v9128_v44 = vadd.f32 %v3026_v53, %v2984_v60  ;;  %v9134_v55 = vadd.f32 %v11119_v54, %v11118_v50 }
 0x50f   : > { %v3092_v0 = vmul.f32 0.044715, %v3090_v62  ;;  %v3093_v37 = vadd.f32 %v3091_v46, %v11120_v20  ;;  %v3179_v10 = vmul.f32 0.044715, %v11121_v7  ;;  %v3137_v28 = vadd.f32 %v3135_v59, %v11122_v26  ;;  %v11136_v59 = vld [vmem:[#allocation272_spill] sm:$0xff] }
 0x510   : > { %v3132_v15 = vmul.f32 %v9124_v56, %v9124_v56  ;;  %v3176_v58 = vmul.f32 %v9134_v55, %v9134_v55  ;;  %v11124_v41 = vstv %s11113_s0  ;;  %v3223_v11 = vmul.f32 0.044715, %v11125_v61  ;;  %s941_s0 = sld [smem:[#allocation2]] }
 0x511   : > { %v9146_v24 = vadd.f32 %v11124_v41, %v11123_v47  ;;  %v3094_v4 = vadd.f32 %v3092_v0, %v9062_v63  ;;  %v3095_v42 = vmul.f32 0.7978846, %v3093_v37  ;;  %v3181_v35 = vadd.f32 %v3179_v10, %v11126_v13 }
 0x512   : > { %v3134_v19 = vmul.f32 %v3132_v15, %v9124_v56  ;;  %v3139_v9 = vmul.f32 0.7978846, %v3137_v28  ;;  %v3178_v18 = vmul.f32 %v3176_v58, %v9134_v55  ;;  %v3225_v40 = vadd.f32 %v3223_v11, %v11128_v16  ;;  %v11139_v28 = vld [vmem:[#allocation273_spill] sm:$0xff] }
 0x513   : > { %v3220_v51 = vmul.f32 %v9146_v24, %v9146_v24  ;;  %v3096_v25 = vmul.f32 0.7978846, %v3094_v4  ;;  %5553 = vtanh.f32 %v3095_v42  ;;  %v3183_v17 = vmul.f32 0.7978846, %v3181_v35  ;;  %v11142_v35 = vld [vmem:[#allocation248_spill] sm:$0xff] }
 0x514   : > { %v3136_v49 = vmul.f32 0.044715, %v3134_v19  ;;  %5555 = vtanh.f32 %v3139_v9  ;;  %v3180_v57 = vmul.f32 0.044715, %v3178_v18  ;;  %v3227_v3 = vmul.f32 0.7978846, %v3225_v40  ;;  %v5550_v12 = vpop.eup %5549 }
 0x515   : > { %v3222_v21 = vmul.f32 %v3220_v51, %v9146_v24  ;;  %5557 = vtanh.f32 %v3096_v25  ;;  %v11130_v52 = vstv %s11127_s24  ;;  %v3267_v45 = vmul.f32 0.044715, %v11131_v48  ;;  %v11143_v18 = vld [vmem:[#allocation274_spill] sm:$0xff]  ;;  %s11188_s24 = sld [smem:[#allocation46_spill]] }
 0x516   : > { %v3138_v32 = vadd.f32 %v3136_v49, %v9124_v56  ;;  %v9161_v43 = vadd.f32 %v11130_v52, %v11129_v5  ;;  %v3055_v14 = vadd.f32 1.0, %v5550_v12  ;;  %v3182_v38 = vadd.f32 %v3180_v57, %v9134_v55  ;;  %v5552_v60 = vpop.eup %5551 }
 0x517   : > { %5559 = vtanh.f32 %v3183_v17  ;;  %v3224_v31 = vmul.f32 0.044715, %v3222_v21  ;;  %v3269_v53 = vadd.f32 %v3267_v45, %v11133_v29  ;;  %v3056_v62 = vadd.f32 1.0, %v5552_v60 }
 0x518   : > { %v3140_v39 = vmul.f32 0.7978846, %v3138_v32  ;;  %5561 = vtanh.f32 %v3227_v3  ;;  %v3264_v6 = vmul.f32 %v9161_v43, %v9161_v43  ;;  %v3057_v34 = vmul.f32 0.5, %v3055_v14 }
 0x519   : > { %v3184_v46 = vmul.f32 0.7978846, %v3182_v38  ;;  %v3226_v2 = vadd.f32 %v3224_v31, %v9146_v24  ;;  %v3271_v36 = vmul.f32 0.7978846, %v3269_v53  ;;  %v11137_v50 = vstv %s11132_s21 }
 0x51a   : > { %5563 = vtanh.f32 %v3140_v39  ;;  %v3266_v33 = vmul.f32 %v3264_v6, %v9161_v43  ;;  %v9173_v54 = vadd.f32 %v11137_v50, %v11136_v59  ;;  %v3058_v0 = vmul.f32 0.5, %v3056_v62 }
 0x51b   : > { %v3059_v37 = vmul.f32 %v3057_v34, %v11080_v23  ;;  %5565 = vtanh.f32 %v3184_v46  ;;  %v3228_v15 = vmul.f32 0.7978846, %v3226_v2  ;;  %v3311_v58 = vmul.f32 0.044715, %v11139_v28  ;;  %s4987_s21 = sshll.u32 %s11188_s24, 10 }
 0x51c   : > { %v3268_v7 = vmul.f32 0.044715, %v3266_v33  ;;  %5567 = vtanh.f32 %v3271_v36  ;;  %v3308_v10 = vmul.f32 %v9173_v54, %v9173_v54  ;;  %v3060_v47 = vmul.f32 %v3058_v0, %v9027_v30 }
 0x51d   : > { %v11140_v41 = vstv %s11134_s30  ;;  %v11141_v11 = vstv %s11135_s6  ;;  %5569 = vtanh.f32 %v3228_v15  ;;  %v5554_v42 = vpop.eup %5553  ;;  %v3313_v9 = vadd.f32 %v3311_v58, %v11142_v35  ;;  %s4381_s30 = sshll.u32 %s9299_s11, 4  ;;  %s11189_s6 = sld [smem:[#allocation51_spill]]  ;;  %s9610_s30 = int_to_ptr.vmem [resolvable:$true] %s4381_s30 }
 0x51e   : > { %v3063_v61 = vmul.f32 %v11140_v41, %v3059_v37  ;;  %v3069_v4 = vmul.f32 %v11141_v11, %v3059_v37  ;;  %v3270_v23 = vadd.f32 %v3268_v7, %v9161_v43  ;;  %v3310_v19 = vmul.f32 %v3308_v10, %v9173_v54  ;;  %v5556_v25 = vpop.eup %5555 }
 0x51f   : > { %v11144_v51 = vstv %s11138_s28  ;;  %v11145_v49 = vmov %v11140_v41  ;;  %v11146_v57 = vmov %v11141_v11  ;;  %v5558_v12 = vpop.eup %5557  ;;  %v3099_v32 = vadd.f32 1.0, %v5554_v42 }
 0x520   : > { %v9190_v40 = vadd.f32 %v11144_v51, %v11143_v18  ;;  %v3064_v17 = vmul.f32 %v11145_v49, %v3060_v47  ;;  %v3065_v30 = vadd.f32 %v3063_v61, %v9109_v22  ;;  %v3070_v21 = vmul.f32 %v11146_v57, %v3060_v47 }
 0x521   : > { %v3071_v3 = vadd.f32 %v3069_v4, %v9111_v1  ;;  %v3143_v5 = vadd.f32 1.0, %v5556_v25  ;;  %v3272_v52 = vmul.f32 0.7978846, %v3270_v23  ;;  %v3312_v48 = vmul.f32 0.044715, %v3310_v19  ;;  %v5560_v45 = vpop.eup %5559 }
 0x522   : > { %v3066_v14 = vadd.f32 %v3064_v17, %v9126_v8  ;;  %v3072_v38 = vadd.f32 %v3070_v21, %v9128_v44  ;;  %v3100_v31 = vadd.f32 1.0, %v5558_v12  ;;  %v3315_v60 = vmul.f32 0.7978846, %v3313_v9  ;;  %v5562_v39 = vpop.eup %5561 }
 0x523   : > { %v3101_v6 = vmul.f32 0.5, %v3099_v32  ;;  %v3145_v53 = vmul.f32 0.5, %v3143_v5  ;;  %v3187_v22 = vadd.f32 1.0, %v5560_v45  ;;  %5571 = vtanh.f32 %v3272_v52  ;;  %p11191_p6 = scmp.ne.s32.totalorder %s11189_s6, 0 }
 0x524   : > { %v3102_v62 = vmul.f32 0.5, %v3100_v31  ;;  %v3231_v1 = vadd.f32 1.0, %v5562_v39  ;;  %v3314_v34 = vadd.f32 %v3312_v48, %v9173_v54  ;;  %5573 = vtanh.f32 %v3315_v60  ;;  %v5564_v46 = vpop.eup %5563 }
 0x525   : > { %v3103_v8 = vmul.f32 %v3101_v6, %v11120_v20  ;;  %v3147_v44 = vmul.f32 %v3145_v53, %v11122_v26  ;;  %v3189_v2 = vmul.f32 0.5, %v3187_v22  ;;  %v3352_v33 = vmul.f32 %v9190_v40, %v9190_v40  ;;  %v5566_v36 = vpop.eup %5565 }
 0x526   : > { %v3104_v59 = vmul.f32 %v3102_v62, %v9062_v63  ;;  %v3144_v50 = vadd.f32 1.0, %v5564_v46  ;;  %v3233_v0 = vmul.f32 0.5, %v3231_v1  ;;  %v3316_v37 = vmul.f32 0.7978846, %v3314_v34  ;;  %v5568_v15 = vpop.eup %5567 }
 0x527   : > { %v11151_v7 = vstv %s11147_s8  ;;  %v11152_v28 = vstv %s11148_s1  ;;  %v11153_v47 = vstv %s11149_s14  ;;  %v11154_v41 = vstv %s11150_s12  ;;  %v5570_v26 = vpop.eup %5569  ;;  %s11190_s1 = sld [smem:[#allocation306_spill]]  ;;  %s4363_s12 = scalar_lea.sflag [#allocation5], %s11182_s4 }
 0x528   : > { %v3107_v10 = vmul.f32 %v11151_v7, %v3103_v8  ;;  %v3113_v58 = vmul.f32 %v11152_v28, %v3103_v8  ;;  %v3151_v20 = vmul.f32 %v11153_v47, %v3147_v44  ;;  %v3157_v61 = vmul.f32 %v11154_v41, %v3147_v44 }
 0x529   : > { %v11156_v11 = vmov %v11151_v7  ;;  %v11158_v42 = vmov %v11152_v28  ;;  %v3146_v23 = vmul.f32 0.5, %v3144_v50  ;;  %v3188_v19 = vadd.f32 1.0, %v5566_v36 }
 0x52a   : > { %v3108_v4 = vmul.f32 %v11156_v11, %v3104_v59  ;;  %v3114_v63 = vmul.f32 %v11158_v42, %v3104_v59  ;;  %v3109_v9 = vadd.f32 %v3107_v10, %v3065_v30  ;;  %v3115_v18 = vadd.f32 %v3113_v58, %v3071_v3  ;;  %v1033_v10 = vld [vmem:[#allocation18] sm:$0xff]  }
 0x52b   : > { %v3191_v51 = vmul.f32 %v3189_v2, %v11126_v13  ;;  %v3232_v25 = vadd.f32 1.0, %v5570_v26  ;;  %v3148_v57 = vmul.f32 %v3146_v23, %v9124_v56  ;;  %v3190_v21 = vmul.f32 0.5, %v3188_v19  ;;  %v11173_v23 = vld [vmem:[#allocation275_spill] sm:$0xff]  ;;  %v9250_v19 = vld [vmem:[#allocation18 + $0x10] sm:$0xff]   ;;  %5169 = vmatprep.subr.bf16.mxu0 %v1033_v10 }
 0x52c   : > { %v3110_v49 = vadd.f32 %v3108_v4, %v3066_v14  ;;  %v3116_v17 = vadd.f32 %v3114_v63, %v3072_v38  ;;  %v3153_v12 = vadd.f32 %v3151_v20, %v3109_v9  ;;  %v3159_v32 = vadd.f32 %v3157_v61, %v3115_v18  ;;  %5170 = vmatpush3.bf16.msra.mxu0 %v1033_v10 }
 0x52d   : > { %v11159_v5 = vstv %s11155_s15  ;;  %v11160_v48 = vstv %s11157_s17  ;;  %v11161_v31 = vmov %v11153_v47  ;;  %v11162_v30 = vmov %v11154_v41  ;;  %v5572_v38 = vpop.eup %5571  ;;  %5189 = vmatprep.subr.bf16.mxu0 %v9250_v19  ;;  %s9608_s14 = scalar_lea.hbm %s11190_s1, %s4987_s21  ;;  %s5987_s15 = scalar_lea.vmem %s9610_s30, 1024 }
 0x52e   : > { %v3195_v52 = vmul.f32 %v11159_v5, %v3191_v51  ;;  %v3201_v45 = vmul.f32 %v11160_v48, %v3191_v51  ;;  %v3152_v60 = vmul.f32 %v11161_v31, %v3148_v57  ;;  %v3158_v3 = vmul.f32 %v11162_v30, %v3148_v57  ;;  %v5574_v22 = vpop.eup %5573  ;;  %p5988_p4 = scmp.ne.s32.totalorder %s9610_s30, %s5987_s15  ;;  %s6140_s17 = smov [#allocation28]  }
 0x52f   : > { %v3192_v13 = vmul.f32 %v3190_v21, %v9134_v55  ;;  %v3234_v14 = vmul.f32 0.5, %v3232_v25  ;;  %v3235_v6 = vmul.f32 %v3233_v0, %v11128_v16  ;;  %v3275_v53 = vadd.f32 1.0, %v5568_v15 }
 0x530   : > { %v3197_v56 = vadd.f32 %v3195_v52, %v3153_v12  ;;  %v3203_v39 = vadd.f32 %v3201_v45, %v3159_v32  ;;  %v3154_v62 = vadd.f32 %v3152_v60, %v3110_v49  ;;  %v3160_v1 = vadd.f32 %v3158_v3, %v3116_v17  ;;  %v11176_v12 = vld [vmem:[#allocation249_spill] sm:$0xff]  ;;  %p5989_p11 = pnand %p5988_p4, %p11191_p6 }
 0x531   : > { %v11165_v34 = vmov %v11159_v5  ;;  %v11166_v55 = vmov %v11160_v48  ;;  %v3236_v44 = vmul.f32 %v3234_v14, %v9146_v24  ;;  %v11167_v2 = vstv %s11163_s19  ;;  %s5991_s19 = sshll.u32 %s6140_s17, 4  ;;  %s5992_s19 = int_to_ptr.vmem [resolvable:$false] %s5991_s19 }
 0x532   : > { %v3196_v46 = vmul.f32 %v11165_v34, %v3192_v13  ;;  %v3202_v8 = vmul.f32 %v11166_v55, %v3192_v13  ;;  %v3239_v36 = vmul.f32 %v11167_v2, %v3235_v6  ;;  %v11168_v59 = vstv %s11164_s18  ;;  %p5990_p1 = pneg %p5989_p11  ;;  %s5993_s18 = scalar_lea.vmem %s5992_s19, 2048 }
 0x533   : > { %v3245_v50 = vmul.f32 %v11168_v59, %v3235_v6  ;;  %v3276_v7 = vadd.f32 1.0, %v5572_v38  ;;  %v3277_v0 = vmul.f32 0.5, %v3275_v53  ;;  %5575 = vtanh.f32 %v3316_v37  ;;  %p5994_p12 = scmp.lt.s32.totalorder %s9610_s30, %s5992_s19  ;;  %p5995_p13 = scmp.lt.s32.totalorder %s5993_s18, %s5987_s15 }
 0x534   : > { %v3198_v28 = vadd.f32 %v3196_v46, %v3154_v62  ;;  %v3204_v16 = vadd.f32 %v3202_v8, %v3160_v1  ;;  %v11171_v15 = vmov %v11167_v2  ;;  %v3241_v47 = vadd.f32 %v3239_v36, %v3197_v56 }
 0x535   : > { %v3240_v58 = vmul.f32 %v11171_v15, %v3236_v44  ;;  %v11172_v20 = vmov %v11168_v59  ;;  %v3247_v24 = vadd.f32 %v3245_v50, %v3203_v39  ;;  %v3278_v61 = vmul.f32 0.5, %v3276_v7  ;;  %p5996_p2 = por %p5995_p13, %p5994_p12 }
 0x536   : > { %v3246_v41 = vmul.f32 %v11172_v20, %v3236_v44  ;;  %v3279_v26 = vmul.f32 %v3277_v0, %v11133_v29  ;;  %v3319_v11 = vadd.f32 1.0, %v5574_v22  ;;  %v3354_v4 = vmul.f32 %v3352_v33, %v9190_v40 }
 0x537   : > { %v3242_v42 = vadd.f32 %v3240_v58, %v3198_v28  ;;  %v3355_v37 = vmul.f32 0.044715, %v11173_v23  ;;  %v3280_v9 = vmul.f32 %v3278_v61, %v9161_v43  ;;  %v11174_v18 = vstv %s11169_s20  ;;  %v5581_v61 = vld [vmem:[%s11179_s25] sm:$0xff]  ;;  %p5997_p0 = pnand %p5996_p2, %p5990_p1 }
 0x538   : > { %v3248_v63 = vadd.f32 %v3246_v41, %v3204_v16  ;;  %v3283_v51 = vmul.f32 %v11174_v18, %v3279_v26  ;;  %v11175_v25 = vstv %s11170_s27  ;;  %v3321_v17 = vmul.f32 0.5, %v3319_v11  ;;  %v5582_v11 = vld [vmem:[%s11180_s16] sm:$0xff] }
 0x539   : > { %v3289_v49 = vmul.f32 %v11175_v25, %v3279_v26  ;;  %v3326_v57 = vstv %s9229_s13  ;;  %v3332_v29 = vstv %s9231_s3  ;;  %v3356_v21 = vmul.f32 0.044715, %v3354_v4 }
 0x53a   : > { %v3357_v32 = vadd.f32 %v3355_v37, %v11176_v12  ;;  %v11177_v33 = vmov %v11174_v18  ;;  %v3285_v52 = vadd.f32 %v3283_v51, %v3241_v47  ;;  %v11178_v48 = vmov %v11175_v25  ;;  %v5584_v37 = vld [vmem:[%s11180_s16 + $0x10] sm:$0xff]  ;;  %v5585_v18 = vld [vmem:[%s11179_s25 + $0x8] sm:$0xff] }
 0x53b   : > { %v3284_v5 = vmul.f32 %v11177_v33, %v3280_v9  ;;  %v3290_v45 = vmul.f32 %v11178_v48, %v3280_v9  ;;  %v3291_v31 = vadd.f32 %v3289_v49, %v3247_v24  ;;  %v3323_v43 = vmul.f32 %v3321_v17, %v11142_v35  ;;  %v5586_v25 = vld [vmem:[%s11180_s16 + $0x8] sm:$0xff]  ;;  %v5588_v33 = vld [vmem:[%s11180_s16 + $0x18] sm:$0xff] }
 0x53c   : > { %v3358_v60 = vadd.f32 %v3356_v21, %v9190_v40  ;;  %v3359_v30 = vmul.f32 0.7978846, %v3357_v32  ;;  %v3370_v50 = vstv %s4941_s23  ;;  %v3376_v7 = vstv %s4942_s7 }
 0x53d   : > { %v3286_v3 = vadd.f32 %v3284_v5, %v3242_v42  ;;  %v3292_v13 = vadd.f32 %v3290_v45, %v3248_v63  ;;  %v3327_v14 = vmul.f32 %v3326_v57, %v3323_v43  ;;  %v3333_v38 = vmul.f32 %v3332_v29, %v3323_v43  ;;  %v5576_v39 = vpop.eup %5575  ;;  %v5583_v63 = vld [vmem:[%s11179_s25 + $0x10] sm:$0xff] }
 0x53e   : > { %v3360_v56 = vmul.f32 0.7978846, %v3358_v60  ;;  %5577 = vtanh.f32 %v3359_v30  ;;  %v3320_v6 = vadd.f32 1.0, %v5576_v39  ;;  %v5591_v39 = vld [vmem:[%s11180_s16 + $0x20] sm:$0xff] }
 0x53f   : > { %v3329_v53 = vadd.f32 %v3327_v14, %v3285_v52  ;;  %v3335_v22 = vadd.f32 %v3333_v38, %v3291_v31  ;;  %v5590_v38 = vld [vmem:[%s11179_s25 + $0x28] sm:$0xff] }
 0x540   : > { %5579 = vtanh.f32 %v3360_v56  ;;  %v3322_v62 = vmul.f32 0.5, %v3320_v6 }
 0x542   : > { %v3324_v35 = vmul.f32 %v3322_v62, %v9173_v54 }
 0x544   : > { %v3328_v1 = vmul.f32 %v3326_v57, %v3324_v35  ;;  %v3334_v34 = vmul.f32 %v3332_v29, %v3324_v35 }
 0x546   : > { %v3330_v55 = vadd.f32 %v3328_v1, %v3286_v3  ;;  %v3336_v8 = vadd.f32 %v3334_v34, %v3292_v13  ;;  %v5589_v13 = vld [vmem:[%s11179_s25 + $0x20] sm:$0xff] }
 0x548   : > { %v5578_v46 = vpop.eup %5577 }
 0x549   : > { %v3363_v44 = vadd.f32 1.0, %v5578_v46 }
 0x54a   : > { %v5580_v2 = vpop.eup %5579 }
 0x54b   : > { %v3364_v36 = vadd.f32 1.0, %v5580_v2  ;;  %v3365_v59 = vmul.f32 0.5, %v3363_v44  ;;  %v5593_v2 = vld [vmem:[%s11179_s25 + $0x30] sm:$0xff] }
 0x54d   : > { %v3366_v10 = vmul.f32 0.5, %v3364_v36  ;;  %v3367_v28 = vmul.f32 %v3365_v59, %v11176_v12  ;;  %v5587_v12 = vld [vmem:[%s11179_s25 + $0x18] sm:$0xff] }
 0x54e   : > { %v5594_v59 = vld [vmem:[%s11179_s25 + $0x38] sm:$0xff] }
 0x54f   : > { %v3368_v16 = vmul.f32 %v3366_v10, %v9190_v40  ;;  %v3371_v54 = vmul.f32 %v3370_v50, %v3367_v28  ;;  %v3377_v0 = vmul.f32 %v3376_v7, %v3367_v28  ;;  %v5596_v28 = vld [vmem:[%s11180_s16 + $0x38] sm:$0xff] }
 0x551   : > { %v3372_v15 = vmul.f32 %v3370_v50, %v3368_v16  ;;  %v9270_v58 = vadd.f32 %v3371_v54, %v3329_v53  ;;  %v3378_v47 = vmul.f32 %v3376_v7, %v3368_v16  ;;  %v9272_v20 = vadd.f32 %v3377_v0, %v3335_v22  ;;  %v5592_v53 = vld [vmem:[%s11180_s16 + $0x28] sm:$0xff]  ;;  %v5595_v7 = vld [vmem:[%s11180_s16 + $0x30] sm:$0xff] }
 0x553   : > { %v9274_v41 = vadd.f32 %v3372_v15, %v3330_v55  ;;  %v9276_v24 = vadd.f32 %v3378_v47, %v3336_v8  ;;  %v3381_v26 = vmul.f32 %v5581_v61, %v9270_v58  ;;  %v3383_v40 = vmul.f32 %v5582_v11, %v9272_v20 }
 0x554   : > { %v3389_v4 = vmul.f32 %v5582_v11, %v9270_v58  ;;  %v3391_v42 = vmul.f32 %v5581_v61, %v9272_v20  ;;  %v3397_v23 = vmul.f32 %v5583_v63, %v9270_v58  ;;  %v3399_v9 = vmul.f32 %v5584_v37, %v9272_v20 }
 0x555   : > { %v3382_v51 = vmul.f32 %v5585_v18, %v9274_v41  ;;  %v3384_v49 = vmul.f32 %v5586_v25, %v9276_v24  ;;  %v3385_v17 = vsub.f32 %v3381_v26, %v3383_v40  ;;  %v3390_v57 = vmul.f32 %v5586_v25, %v9274_v41 }
 0x556   : > { %v3392_v29 = vmul.f32 %v5585_v18, %v9276_v24  ;;  %v3393_v21 = vadd.f32 %v3391_v42, %v3389_v4  ;;  %v3398_v32 = vmul.f32 %v5587_v12, %v9274_v41  ;;  %v3400_v5 = vmul.f32 %v5588_v33, %v9276_v24 }
 0x557   : > { %v3386_v52 = vsub.f32 %v3382_v51, %v3384_v49  ;;  %3387 = vst.msk [vmem:[%s9299_s11] sm:$0xff] %vm1075_vm0, %v3385_v17  ;;  %v3401_v48 = vsub.f32 %v3397_v23, %v3399_v9  ;;  %v3405_v45 = vmul.f32 %v5584_v37, %v9270_v58  ;;  %v3406_v31 = vmul.f32 %v5588_v33, %v9274_v41 }
 0x558   : > { %v3394_v43 = vadd.f32 %v3392_v29, %v3390_v57  ;;  %3395 = vst.msk [vmem:[%s9306_s26] sm:$0xff] %vm1075_vm0, %v3393_v21  ;;  %v3402_v60 = vsub.f32 %v3398_v32, %v3400_v5  ;;  %v3407_v30 = vmul.f32 %v5583_v63, %v9272_v20  ;;  %v3408_v3 = vmul.f32 %v5587_v12, %v9276_v24 }
 0x559   : > { %3388 = vst.msk [vmem:[%s9299_s11 + $0x8] sm:$0xff] %vm1075_vm0, %v3386_v52  ;;  %3403 = vst.msk [vmem:[%s9299_s11 + $0x10] sm:$0xff] %vm1075_vm0, %v3401_v48  ;;  %v3413_v14 = vmul.f32 %v5589_v13, %v9270_v58  ;;  %v3414_v56 = vmul.f32 %v5590_v38, %v9274_v41  ;;  %v3415_v6 = vmul.f32 %v5591_v39, %v9272_v20 }
 0x55a   : > { %v3416_v22 = vmul.f32 %v5592_v53, %v9276_v24  ;;  %3396 = vst.msk [vmem:[%s9306_s26 + $0x8] sm:$0xff] %vm1075_vm0, %v3394_v43  ;;  %3404 = vst.msk [vmem:[%s9299_s11 + $0x18] sm:$0xff] %vm1075_vm0, %v3402_v60  ;;  %v3409_v62 = vadd.f32 %v3407_v30, %v3405_v45  ;;  %v3410_v35 = vadd.f32 %v3408_v3, %v3406_v31 }
 0x55b   : > { %v3421_v1 = vmul.f32 %v5591_v39, %v9270_v58  ;;  %v3422_v34 = vmul.f32 %v5592_v53, %v9274_v41  ;;  %v3417_v46 = vsub.f32 %v3413_v14, %v3415_v6  ;;  %v3423_v8 = vmul.f32 %v5589_v13, %v9272_v20 }
 0x55c   : > { %v3418_v55 = vsub.f32 %v3414_v56, %v3416_v22  ;;  %v3424_v44 = vmul.f32 %v5590_v38, %v9276_v24  ;;  %3411 = vst.msk [vmem:[%s9306_s26 + $0x10] sm:$0xff] %vm1075_vm0, %v3409_v62  ;;  %3412 = vst.msk [vmem:[%s9306_s26 + $0x18] sm:$0xff] %vm1075_vm0, %v3410_v35  ;;  %v3429_v36 = vmul.f32 %v5593_v2, %v9270_v58 }
 0x55d   : > { %v3430_v50 = vmul.f32 %v5594_v59, %v9274_v41  ;;  %v3431_v10 = vmul.f32 %v5595_v7, %v9272_v20  ;;  %v3432_v16 = vmul.f32 %v5596_v28, %v9276_v24  ;;  %3419 = vst.msk [vmem:[%s9299_s11 + $0x20] sm:$0xff] %vm1075_vm0, %v3417_v46  ;;  %v3425_v54 = vadd.f32 %v3423_v8, %v3421_v1 }
 0x55e   : > { %3420 = vst.msk [vmem:[%s9299_s11 + $0x28] sm:$0xff] %vm1075_vm0, %v3418_v55  ;;  %v3426_v0 = vadd.f32 %v3424_v44, %v3422_v34  ;;  %v3437_v15 = vmul.f32 %v5595_v7, %v9270_v58  ;;  %v3438_v47 = vmul.f32 %v5596_v28, %v9274_v41  ;;  %v3439_v11 = vmul.f32 %v5593_v2, %v9272_v20  ;;  %v3445_v4 = vld [vmem:[%s9299_s11] sm:$0xff] }
 0x55f   : > { %v3433_v61 = vsub.f32 %v3429_v36, %v3431_v10  ;;  %v3434_v26 = vsub.f32 %v3430_v50, %v3432_v16  ;;  %v3440_v40 = vmul.f32 %v5594_v59, %v9276_v24  ;;  %3427 = vst.msk [vmem:[%s9306_s26 + $0x20] sm:$0xff] %vm1075_vm0, %v3425_v54  ;;  %v3453_v63 = vld [vmem:[%s9306_s26] sm:$0xff] }
 0x560   : > { %3428 = vst.msk [vmem:[%s9306_s26 + $0x28] sm:$0xff] %vm1075_vm0, %v3426_v0  ;;  %v3441_v58 = vadd.f32 %v3439_v11, %v3437_v15  ;;  %v3446_v42 = vld [vmem:[%s9299_s11 + $0x8] sm:$0xff]  ;;  %v3447_v24 = vld [vmem:[%s9299_s11 + $0x10] sm:$0xff]  ;;  %v3469_v45 = vadd.f32 %v3453_v63, %v3445_v4 }
 0x561   : > { %3435 = vst.msk [vmem:[%s9299_s11 + $0x30] sm:$0xff] %vm1075_vm0, %v3433_v61  ;;  %3436 = vst.msk [vmem:[%s9299_s11 + $0x38] sm:$0xff] %vm1075_vm0, %v3434_v26  ;;  %v3442_v41 = vadd.f32 %v3440_v40, %v3438_v47  ;;  %v3461_v20 = vpack.c.bf16 %v3446_v42, %v3445_v4  ;;  %v3454_v23 = vld [vmem:[%s9306_s26 + $0x8] sm:$0xff]  ;;  %v3448_v37 = vld [vmem:[%s9299_s11 + $0x18] sm:$0xff] }
 0x562   : > { %3443 = vst.msk [vmem:[%s9306_s26 + $0x30] sm:$0xff] %vm1075_vm0, %v3441_v58  ;;  %v3465_v9 = vpack.c.bf16 %v3454_v23, %v3453_v63  ;;  %v3462_v18 = vpack.c.bf16 %v3448_v37, %v3447_v24  ;;  %v3470_v5 = vadd.f32 %v3454_v23, %v3446_v42  ;;  %v9404_v16 = vld [vmem:[#allocation16] sm:$0xff]  }
 0x563   : > { %3444 = vst.msk [vmem:[%s9306_s26 + $0x38] sm:$0xff] %vm1075_vm0, %v3442_v41  ;;  %5171 = vmatprep.mubr.msk.bf16.mxu0 %vm1075_vm0, %v3461_v20  ;;  %v3455_v51 = vld [vmem:[%s9306_s26 + $0x10] sm:$0xff]  ;;  %v3456_v25 = vld [vmem:[%s9306_s26 + $0x18] sm:$0xff] }
 0x564   : > { %5181 = vmatprep.mubr.msk.bf16.mxu1 %vm1075_vm0, %v3465_v9  ;;  %5172 = vmatmul.mubr.msk.bf16.vlgmr.msra.gmra.mrb[36].mxu0 %vm1075_vm0, %v3462_v18  ;;  %v3466_v49 = vpack.c.bf16 %v3456_v25, %v3455_v51  ;;  %v3449_v17 = vld [vmem:[%s9299_s11 + $0x20] sm:$0xff]  ;;  %v3477_v60 = vpack.c.bf16 %v3470_v5, %v3469_v45  ;;  %v3472_v30 = vadd.f32 %v3456_v25, %v3448_v37 }
 0x565   : > { %v3450_v57 = vld [vmem:[%s9299_s11 + $0x28] sm:$0xff]  ;;  %5190 = vmatpush3.bf16.msra.mxu0 %v9250_v19  ;;  %v3471_v13 = vadd.f32 %v3455_v51, %v3447_v24 }
 0x566   : > { %v3463_v29 = vpack.c.bf16 %v3450_v57, %v3449_v17  ;;  %5182 = vmatmul.mubr.msk.bf16.vlgmr.msra.gmra.mrb[36].mxu1 %vm1075_vm0, %v3466_v49  ;;  %v3457_v21 = vld [vmem:[%s9306_s26 + $0x20] sm:$0xff]  ;;  %5211 = vmatprep.subr.bf16.mxu0 %v11037_v27 }
 0x567   : > { %v3458_v12 = vld [vmem:[%s9306_s26 + $0x28] sm:$0xff]  ;;  %v3473_v14 = vadd.f32 %v3457_v21, %v3449_v17  ;;  %v3478_v38 = vpack.c.bf16 %v3472_v30, %v3471_v13 }
 0x568   : > { %5175 = vmatprep.mubr.msk.bf16.mxu0 %vm1075_vm0, %v3463_v29  ;;  %v3467_v32 = vpack.c.bf16 %v3458_v12, %v3457_v21  ;;  %v3452_v33 = vld [vmem:[%s9299_s11 + $0x38] sm:$0xff]  ;;  %v3451_v52 = vld [vmem:[%s9299_s11 + $0x30] sm:$0xff]  ;;  %v3474_v3 = vadd.f32 %v3458_v12, %v3450_v57 }
 0x569   : > { %v3464_v31 = vpack.c.bf16 %v3452_v33, %v3451_v52  ;;  %v3459_v43 = vld [vmem:[%s9306_s26 + $0x30] sm:$0xff] }
 0x56a   : > { %5185 = vmatprep.mubr.msk.bf16.mxu1 %vm1075_vm0, %v3467_v32  ;;  %v3460_v48 = vld [vmem:[%s9306_s26 + $0x38] sm:$0xff]  ;;  %v3479_v56 = vpack.c.bf16 %v3474_v3, %v3473_v14  ;;  %v3475_v6 = vadd.f32 %v3459_v43, %v3451_v52 }
 0x56b   : > { %v3468_v19 = vpack.c.bf16 %v3460_v48, %v3459_v43  ;;  %v3476_v39 = vadd.f32 %v3460_v48, %v3452_v33  ;;  %v5450_v43 = vld [vmem:[#allocation16 + $0x8] sm:$0xff]  }
 0x56c   : > { %5176 = vmatmul.mubr.msk.bf16.gmra.mrb[40].mxu0 %vm1075_vm0, %v3464_v31 }
 0x56d   : > { %5191 = vmatprep.mubr.msk.bf16.mxu0 %vm1075_vm0, %v3477_v60  ;;  %v3480_v53 = vpack.c.bf16 %v3476_v39, %v3475_v6 }
 0x56e   : > { %5186 = vmatmul.mubr.msk.bf16.gmra.mrb[40].mxu1 %vm1075_vm0, %v3468_v19 }
 0x56f   : > { %5201 = vmatprep.mubr.msk.bf16.mxu1 %vm6139_vm1, %v11037_v27 }
 0x574   : > { %5192 = vmatmul.mubr.msk.bf16.vlgmr.msra.gmra.mrb[44].mxu0 %vm1075_vm0, %v3478_v38  ;;  %v5451_v38 = vld [vmem:[#allocation16 + $0x10] sm:$0xff]  }
 0x575   : > { %5195 = vmatprep.mubr.msk.bf16.mxu0 %vm1075_vm0, %v3479_v56 }
 0x57c   : > { %5196 = vmatmul.mubr.msk.bf16.gmra.mrb[48].mxu0 %vm1075_vm0, %v3480_v53 }
 0x57d   : > { %5213 = vmatprep.mubr.msk.bf16.mxu0 %vm6139_vm1, %v11037_v27 }
 0x637   : > { %v5173_v22 = vpop.f32.mrb[36].mxu0 }
 0x638   : > { %v3533_v62 = vpop.f32.mrb[37].mxu0 }
 0x639   : > { %v5183_v35 = vpop.f32.mrb[36].mxu1  ;;  %v5174_v1 = vpop.f32.mrb[38].mxu0 }
 0x63a   : > { %v9398_v34 = vsub.f32 %v5173_v22, %v5183_v35  ;;  %v3616_v46 = vpop.f32.mrb[37].mxu1  ;;  %v3536_v55 = vpop.f32.mrb[39].mxu0 }
 0x63b   : > { %v3730_v8 = vsub.f32 %v3533_v62, %v3616_v46  ;;  %v5184_v44 = vpop.f32.mrb[38].mxu1 }
 0x63c   : > { %v9400_v2 = vsub.f32 %v5174_v1, %v5184_v44  ;;  %v3619_v36 = vpop.f32.mrb[39].mxu1 }
 0x63d   : > { %v3731_v59 = vsub.f32 %v3536_v55, %v3619_v36 }
 0x63e   : > { %v3755_v50 = vpack.c.bf16 %v9400_v2, %v9398_v34 }
 0x63f   : > { %v3754_v7 = vpack.c.bf16 %v3731_v59, %v3730_v8  ;;  %v5177_v10 = vpop.f32.mrb[40].mxu0 }
 0x640   : > { %v3549_v28 = vpop.f32.mrb[41].mxu0 }
 0x641   : > { %v5187_v54 = vpop.f32.mrb[40].mxu1  ;;  %5200 = vmatpush3.bf16.msra.mxu1 %v3754_v7  ;;  %v5178_v0 = vpop.f32.mrb[42].mxu0 }
 0x642   : > { %v9406_v15 = vsub.f32 %v5177_v10, %v5187_v54  ;;  %v3632_v47 = vpop.f32.mrb[41].mxu1  ;;  %v3552_v61 = vpop.f32.mrb[43].mxu0  ;;  %5205 = vmatprep.subr.bf16.mxu1 %v11037_v27 }
 0x643   : > { %v9409_v26 = vsub.f32 %v3549_v28, %v3632_v47  ;;  %v5188_v11 = vpop.f32.mrb[42].mxu1 }
 0x644   : > { %v9411_v40 = vsub.f32 %v5178_v0, %v5188_v11  ;;  %v3635_v58 = vpop.f32.mrb[43].mxu1  ;;  %5202 = vmatmul.mubr.msk.bf16.vlgmr.msra.gmra.mrb[44].mxu1 %vm1075_vm0, %v9404_v16 }
 0x645   : > { %v9415_v41 = vsub.f32 %v3552_v61, %v3635_v58  ;;  %5207 = vmatprep.mubr.msk.bf16.mxu1 %vm6139_vm1, %v11037_v27 }
 0x646   : > { %v3757_v4 = vpack.c.bf16 %v9411_v40, %v9406_v15 }
 0x647   : > { %v3756_v42 = vpack.c.bf16 %v9415_v41, %v9409_v26  ;;  %v5193_v63 = vpop.f32.mrb[44].mxu0 }
 0x648   : > { %v3740_v20 = vsub.f32 %v5193_v63, %v5173_v22  ;;  %v3699_v23 = vpop.f32.mrb[45].mxu0 }
 0x649   : > { %v3738_v24 = vsub.f32 %v3699_v23, %v3533_v62  ;;  %v5194_v37 = vpop.f32.mrb[46].mxu0 }
 0x64a   : > { %v3748_v9 = vsub.f32 %v3740_v20, %v5183_v35  ;;  %v3741_v18 = vsub.f32 %v5194_v37, %v5174_v1  ;;  %v3702_v51 = vpop.f32.mrb[47].mxu0  ;;  %v9487_v20 = vstv %s941_s0 }
 0x64b   : > { %v3746_v25 = vsub.f32 %v3738_v24, %v3616_v46  ;;  %v3739_v49 = vsub.f32 %v3702_v51, %v3536_v55  ;;  %v948_v24 = vld [vmem:[%s11183_s29 + $0x10] sm:$0xff] }
 0x64c   : > { %v3764_v17 = vadd.f32 %v3748_v9, %v9398_v34  ;;  %v3749_v57 = vsub.f32 %v3741_v18, %v5184_v44  ;;  %v963_v44 = vlaneseq  ;;  %v5601_v51 = vld [vmem:[%s11184_s5 + $0x10] sm:$0xff] }
 0x64d   : > { %v3762_v29 = vadd.f32 %v3746_v25, %v3730_v8  ;;  %v3747_v21 = vsub.f32 %v3739_v49, %v3619_v36  ;;  %v949_v49 = vld [vmem:[%s11183_s29 + $0x18] sm:$0xff] }
 0x64e   : > { %v3759_v12 = vpack.c.bf16 %v3749_v57, %v3748_v9  ;;  %v3765_v32 = vadd.f32 %v3749_v57, %v9400_v2  ;;  %v942_v2 = vld [vmem:[%s11186_s9] sm:$0x1]  ;;  %v964_v36 = vshrl.u32 %v963_v44, 7 }
 0x64f   : > { %v3758_v33 = vpack.c.bf16 %v3747_v21, %v3746_v25  ;;  %v3763_v5 = vadd.f32 %v3747_v21, %v3731_v59  ;;  %v5197_v52 = vpop.f32.mrb[48].mxu0  ;;  %vm943_vm2 = vcmp.ne.f32.partialorder %v942_v2, 0.0  ;;  %v956_v25 = vsub.f32 %v5601_v51, %v948_v24  ;;  %v9499_v21 = vld [vmem:[%s11184_s5 + $0x18] sm:$0xff] }
 0x650   : > { %v3771_v48 = vpack.c.bf16 %v3765_v32, %v3764_v17  ;;  %v3744_v45 = vsub.f32 %v5197_v52, %v5177_v10  ;;  %v3715_v31 = vpop.f32.mrb[49].mxu0  ;;  %v965_v59 = vsub.s32 0, %v964_v36  ;;  %v4754_v10 = vsel %vm943_vm2, 1.0, %v11037_v27  ;;  %v9518_v36 = vld [vmem:[%s11187_s10 + $0x18] sm:$0xff] }
 0x651   : > { %v3770_v60 = vpack.c.bf16 %v3763_v5, %v3762_v29  ;;  %v3742_v19 = vsub.f32 %v3715_v31, %v3549_v28  ;;  %v5198_v30 = vpop.f32.mrb[50].mxu0  ;;  %5206 = vmatpush3.bf16.msra.mxu1 %v3758_v33 }
 0x652   : > { %v3752_v3 = vsub.f32 %v3744_v45, %v5187_v54  ;;  %v3745_v13 = vsub.f32 %v5198_v30, %v5178_v0  ;;  %v3718_v14 = vpop.f32.mrb[51].mxu0  ;;  %5217 = vmatprep.subr.bf16.mxu1 %v11037_v27  ;;  %v5597_v0 = vld [vmem:[%s11184_s5] sm:$0xff] }
 0x653   : > { %v3750_v56 = vsub.f32 %v3742_v19, %v3632_v47  ;;  %v3743_v39 = vsub.f32 %v3718_v14, %v3552_v61  ;;  %5212 = vmatpush3.bf16.msra.mxu0 %v3770_v60  ;;  %v985_v47 = vld [vmem:[%s11185_s2] sm:$0xff]  ;;  %v987_v19 = vld [vmem:[%s11185_s2 + $0x10] sm:$0xff] }
 0x654   : > { %v3768_v6 = vadd.f32 %v3752_v3, %v9406_v15  ;;  %v3753_v53 = vsub.f32 %v3745_v13, %v5188_v11  ;;  %5208 = vmatmul.mubr.msk.bf16.vlgmr.msra.gmra.mrb[48].mxu1 %vm1075_vm0, %v5450_v43  ;;  %5223 = vmatprep.subr.bf16.mxu0 %v11037_v27  ;;  %v5598_v11 = vld [vmem:[%s11184_s5 + $0x8] sm:$0xff] }
 0x655   : > { %v3766_v22 = vadd.f32 %v3750_v56, %v9409_v26  ;;  %v3751_v62 = vsub.f32 %v3743_v39, %v3635_v58  ;;  %5218 = vmatpush3.bf16.msra.mxu1 %v3755_v50  ;;  %5219 = vmatprep.mubr.msk.bf16.mxu1 %vm6139_vm1, %v11037_v27  ;;  %v946_v50 = vld [vmem:[%s11183_s29] sm:$0xff]  ;;  %v9480_v26 = vrot.slane %v4754_v10, %v965_v59  ;;  %v986_v58 = vld [vmem:[%s11185_s2 + $0x8] sm:$0xff] }
 0x656   : > { %v3761_v35 = vpack.c.bf16 %v3753_v53, %v3752_v3  ;;  %v3769_v1 = vadd.f32 %v3753_v53, %v9411_v40  ;;  %5214 = vmatmul.mubr.msk.bf16.vlgmr.msra.gmra.mrb[52].mxu0 %vm1075_vm0, %v5451_v38  ;;  %5229 = vmatprep.subr.bf16.mxu1 %v11037_v27  ;;  %v954_v15 = vsub.f32 %v5597_v0, %v946_v50 }
 0x657   : > { %v3760_v34 = vpack.c.bf16 %v3751_v62, %v3750_v56  ;;  %v3767_v46 = vadd.f32 %v3751_v62, %v9415_v41  ;;  %5224 = vmatpush3.bf16.msra.mxu0 %v3759_v12  ;;  %5225 = vmatprep.mubr.msk.bf16.mxu0 %vm6139_vm1, %v11037_v27  ;;  %v5599_v41 = vld [vmem:[%s11187_s10] sm:$0xff]  ;;  %v957_v12 = vsub.f32 %v9499_v21, %v949_v49 }
 0x658   : > { %v3773_v55 = vpack.c.bf16 %v3769_v1, %v3768_v6  ;;  %5235 = vmatprep.subr.bf16.mxu0 %v11037_v27  ;;  %v970_v5 = vmul.f32 %v9480_v26, %v956_v25  ;;  %v990_v25 = vld [vmem:[%s11185_s2 + $0x28] sm:$0xff]  ;;  %v9539_v49 = vld [vmem:[%s11187_s10 + $0x20] sm:$0xff] }
 0x659   : > { %v3772_v8 = vpack.c.bf16 %v3767_v46, %v3766_v22  ;;  %v971_v56 = vmul.f32 %v9480_v26, %v957_v12  ;;  %v988_v22 = vld [vmem:[%s11185_s2 + $0x18] sm:$0xff]  ;;  %v9511_v46 = vld [vmem:[%s11187_s10 + $0x10] sm:$0xff] }
 0x65a   : > { %v979_v53 = vmul.f32 %v9487_v20, %v970_v5  ;;  %v996_v59 = vsub.f32 %v9518_v36, %v988_v22 }
 0x65b   : > { %v980_v2 = vmul.f32 %v9487_v20, %v971_v56 }
 0x65c   : > { %5220 = vmatmul.mubr.msk.bf16.vlgmr.msra.gmra.mrb[52].mxu1 %vm1075_vm0, %v9404_v16 }
 0x65d   : > { %5230 = vmatpush3.bf16.msra.mxu1 %v3771_v48  ;;  %5231 = vmatprep.mubr.msk.bf16.mxu1 %vm6139_vm1, %v11037_v27 }
 0x65e   : > { %5226 = vmatmul.mubr.msk.bf16.vlgmr.msra.gmra.mrb[56].mxu0 %vm1075_vm0, %v5450_v43  ;;  %5241 = vmatprep.subr.bf16.mxu1 %v11037_v27 }
 0x65f   : > { %5236 = vmatpush3.bf16.msra.mxu0 %v3756_v42  ;;  %5237 = vmatprep.mubr.msk.bf16.mxu0 %vm6139_vm1, %v11037_v27  ;;  %v5600_v42 = vld [vmem:[%s11187_s10 + $0x8] sm:$0xff] }
 0x660   : > { %5247 = vmatprep.subr.bf16.mxu0 %v11037_v27  ;;  %v994_v63 = vsub.f32 %v5600_v42, %v986_v58  ;;  %v4069_v58 = vsub.f32 %v9499_v21, %v980_v2  ;;  %v5610_v2 = vld [vmem:[%s11184_s5 + $0x38] sm:$0xff] }
 0x662   : > { %v1002_v18 = vmul.f32 %v994_v63, %v9480_v26 }
 0x664   : > { %5232 = vmatmul.mubr.msk.bf16.vlgmr.msra.gmra.mrb[56].mxu1 %vm1075_vm0, %v5451_v38  ;;  %v1010_v33 = vmul.f32 %v1002_v18, %v9487_v20  ;;  %v9534_v18 = vld [vmem:[%s11184_s5 + $0x28] sm:$0xff] }
 0x665   : > { %5242 = vmatpush3.bf16.msra.mxu1 %v3760_v34  ;;  %5243 = vmatprep.mubr.msk.bf16.mxu1 %vm6139_vm1, %v11037_v27 }
 0x666   : > { %5238 = vmatmul.mubr.msk.bf16.vlgmr.msra.gmra.mrb[60].mxu0 %vm1075_vm0, %v9404_v16  ;;  %5253 = vmatprep.subr.bf16.mxu1 %v11037_v27  ;;  %v3934_v6 = vsub.f32 %v5600_v42, %v1010_v33  ;;  %v989_v42 = vld [vmem:[%s11185_s2 + $0x20] sm:$0xff] }
 0x667   : > { %5248 = vmatpush3.bf16.msra.mxu0 %v3772_v8  ;;  %5249 = vmatprep.mubr.msk.bf16.mxu0 %vm6139_vm1, %v11037_v27 }
 0x668   : > { %5259 = vmatprep.subr.bf16.mxu0 %v11037_v27 }
 0x66c   : > { %5244 = vmatmul.mubr.msk.bf16.vlgmr.msra.gmra.mrb[60].mxu1 %vm1075_vm0, %v5450_v43 }
 0x66d   : > { %5254 = vmatpush3.bf16.msra.mxu1 %v3757_v4  ;;  %5255 = vmatprep.mubr.msk.bf16.mxu1 %vm6139_vm1, %v11037_v27  ;;  %v993_v4 = vsub.f32 %v5599_v41, %v985_v47  ;;  %v951_v47 = vld [vmem:[%s11183_s29 + $0x28] sm:$0xff] }
 0x66e   : > { %5250 = vmatmul.mubr.msk.bf16.vlgmr.msra.gmra.mrb[64].mxu0 %vm1075_vm0, %v5451_v38  ;;  %5265 = vmatprep.subr.bf16.mxu1 %v11037_v27 }
 0x66f   : > { %5260 = vmatpush3.bf16.msra.mxu0 %v3761_v35  ;;  %5261 = vmatprep.mubr.msk.bf16.mxu0 %vm6139_vm1, %v11037_v27  ;;  %v1001_v37 = vmul.f32 %v993_v4, %v9480_v26  ;;  %v5605_v4 = vld [vmem:[%s11184_s5 + $0x20] sm:$0xff] }
 0x671   : > { %v1009_v57 = vmul.f32 %v1001_v37, %v9487_v20 }
 0x673   : > { %v3933_v60 = vsub.f32 %v5599_v41, %v1009_v57  ;;  %v1004_v41 = vmul.f32 %v996_v59, %v9480_v26 }
 0x674   : > { %5256 = vmatmul.mubr.msk.bf16.vlgmr.msra.gmra.mrb[64].mxu1 %vm1075_vm0, %v9404_v16  ;;  %v947_v16 = vld [vmem:[%s11183_s29 + $0x8] sm:$0xff] }
 0x675   : > { %5266 = vmatpush3.bf16.msra.mxu1 %v3773_v55  ;;  %5267 = vmatprep.mubr.msk.bf16.mxu1 %vm6139_vm1, %v11037_v27  ;;  %v955_v40 = vsub.f32 %v5598_v11, %v947_v16  ;;  %v968_v27 = vmul.f32 %v9480_v26, %v954_v15  ;;  %v995_v55 = vsub.f32 %v9511_v46, %v987_v19 }
 0x676   : > { %5262 = vmatmul.mubr.msk.bf16.vlgmr.msra.gmra.mrb[68].mxu0 %vm1075_vm0, %v5450_v43  ;;  %v4068_v16 = vsub.f32 %v5601_v51, %v979_v53  ;;  %v959_v51 = vsub.f32 %v9534_v18, %v951_v47  ;;  %v9560_v53 = vld [vmem:[%s11184_s5 + $0x30] sm:$0xff] }
 0x677   : > { %v969_v23 = vmul.f32 %v9480_v26, %v955_v40  ;;  %v977_v9 = vmul.f32 %v9487_v20, %v968_v27  ;;  %v991_v47 = vld [vmem:[%s11185_s2 + $0x30] sm:$0xff] }
 0x679   : > { %v978_v17 = vmul.f32 %v9487_v20, %v969_v23  ;;  %v3927_v29 = vsub.f32 %v5597_v0, %v977_v9 }
 0x67b   : > { %v3928_v45 = vsub.f32 %v5598_v11, %v978_v17  ;;  %v997_v17 = vsub.f32 %v9539_v49, %v989_v42 }
 0x67c   : > { %5268 = vmatmul.mubr.msk.bf16.vlgmr.msra.gmra.mrb[68].mxu1 %vm1075_vm0, %v5451_v38 }
 0x67d   : > { %v1005_v19 = vmul.f32 %v997_v17, %v9480_v26 }
 0x717   : > { %v3816_v7 = vpop.f32.mrb[44].mxu1 }
 0x718   : > { %v5203_v28 = vpop.f32.mrb[45].mxu1 }
 0x719   : > { %v3819_v54 = vpop.f32.mrb[46].mxu1 }
 0x71a   : > { %v5204_v61 = vpop.f32.mrb[47].mxu1 }
 0x727   : > { %v3865_v32 = vpop.f32.mrb[48].mxu1 }
 0x728   : > { %v3921_v52 = vsub.f32 %v3816_v7, %v3865_v32  ;;  %v5209_v48 = vpop.f32.mrb[49].mxu1 }
 0x729   : > { %v3868_v31 = vpop.f32.mrb[50].mxu1  ;;  %v3914_v43 = vpop.f32.mrb[52].mxu0 }
 0x72a   : > { %v3929_v30 = vsub.f32 %v3927_v29, %v3921_v52  ;;  %v3922_v3 = vsub.f32 %v3819_v54, %v3868_v31  ;;  %v3923_v13 = vsub.f32 %v3914_v43, %v3816_v7  ;;  %v5215_v14 = vpop.f32.mrb[53].mxu0  ;;  %v5210_v38 = vpop.f32.mrb[51].mxu1  ;;  %v950_v7 = vld [vmem:[%s11183_s29 + $0x20] sm:$0xff]  ;;  %v1012_v29 = vmul.f32 %v1004_v41, %v9487_v20 }
 0x72b   : > { %v3917_v39 = vpop.f32.mrb[54].mxu0  ;;  %v958_v27 = vsub.f32 %v5605_v4, %v950_v7 }
 0x72c   : > { %3931 = vst.msk [vmem:[%s9299_s11] sm:$0xff] %vm1075_vm0, %v3929_v30  ;;  %v3930_v62 = vsub.f32 %v3928_v45, %v3922_v3  ;;  %v3925_v35 = vsub.f32 %v3923_v13, %v3865_v32  ;;  %v3924_v1 = vsub.f32 %v3917_v39, %v3819_v54  ;;  %v5216_v34 = vpop.f32.mrb[55].mxu0  ;;  %v1003_v54 = vmul.f32 %v995_v55, %v9480_v26  ;;  %v9547_v32 = vld [vmem:[%s11187_s10 + $0x28] sm:$0xff] }
 0x72d   : > { %v972_v21 = vmul.f32 %v9480_v26, %v958_v27  ;;  %v998_v33 = vsub.f32 %v9547_v32, %v990_v25  ;;  %v973_v45 = vmul.f32 %v9480_v26, %v959_v51  ;;  %v4075_v13 = vsub.f32 %v9518_v36, %v1012_v29  ;;  %v9583_v51 = vld [vmem:[%s11187_s10 + $0x30] sm:$0xff]  ;;  %v9590_v29 = vld [vmem:[%s11187_s10 + $0x38] sm:$0xff] }
 0x72e   : > { %3932 = vst.msk [vmem:[%s9299_s11 + $0x8] sm:$0xff] %vm1075_vm0, %v3930_v62  ;;  %v3935_v8 = vsub.f32 %v3933_v60, %v3925_v35  ;;  %v3926_v44 = vsub.f32 %v3924_v1, %v3868_v31  ;;  %v1011_v37 = vmul.f32 %v1003_v54, %v9487_v20  ;;  %v952_v31 = vld [vmem:[%s11183_s29 + $0x30] sm:$0xff]  ;;  %v953_v62 = vld [vmem:[%s11183_s29 + $0x38] sm:$0xff]  ;;  %v1013_v55 = vmul.f32 %v1005_v19, %v9487_v20 }
 0x72f   : > { %v3973_v50 = vpop.f32.mrb[52].mxu1  ;;  %v981_v56 = vmul.f32 %v9487_v20, %v972_v21  ;;  %v960_v22 = vsub.f32 %v9560_v53, %v952_v31  ;;  %v961_v36 = vsub.f32 %v5610_v2, %v953_v62  ;;  %v999_v25 = vsub.f32 %v9583_v51, %v991_v47 }
 0x730   : > { %3937 = vst.msk [vmem:[%s9306_s26] sm:$0xff] %vm1075_vm0, %v3935_v8  ;;  %v3936_v10 = vsub.f32 %v3934_v6, %v3926_v44  ;;  %v5221_v28 = vpop.f32.mrb[53].mxu1  ;;  %v4074_v52 = vsub.f32 %v9511_v46, %v1011_v37  ;;  %v1006_v6 = vmul.f32 %v998_v33, %v9480_v26  ;;  %v982_v46 = vmul.f32 %v9487_v20, %v973_v45 }
 0x731   : > { %v4014_v0 = vpop.f32.mrb[56].mxu0  ;;  %v3976_v15 = vpop.f32.mrb[54].mxu1  ;;  %v4209_v44 = vsub.f32 %v5605_v4, %v981_v56  ;;  %v974_v7 = vmul.f32 %v9480_v26, %v960_v22  ;;  %v975_v4 = vmul.f32 %v9480_v26, %v961_v36 }
 0x732   : > { %3938 = vst.msk [vmem:[%s9306_s26 + $0x8] sm:$0xff] %vm1075_vm0, %v3936_v10  ;;  %v4062_v61 = vsub.f32 %v3973_v50, %v4014_v0  ;;  %v5227_v11 = vpop.f32.mrb[57].mxu0  ;;  %v5222_v40 = vpop.f32.mrb[55].mxu1 }
 0x733   : > { %v4017_v63 = vpop.f32.mrb[58].mxu0 }
 0x734   : > { %v4070_v23 = vsub.f32 %v4068_v16, %v4062_v61  ;;  %v4063_v24 = vsub.f32 %v3976_v15, %v4017_v63  ;;  %v5228_v9 = vpop.f32.mrb[59].mxu0  ;;  %v4210_v16 = vsub.f32 %v9534_v18, %v982_v46 }
 0x736   : > { %4072 = vst.msk [vmem:[%s9299_s11 + $0x10] sm:$0xff] %vm1075_vm0, %v4070_v23  ;;  %v4071_v57 = vsub.f32 %v4069_v58, %v4063_v24  ;;  %v992_v23 = vld [vmem:[%s11185_s2 + $0x38] sm:$0xff] }
 0x737   : > { %v4055_v12 = vpop.f32.mrb[56].mxu1  ;;  %v1000_v21 = vsub.f32 %v9590_v29, %v992_v23 }
 0x738   : > { %4073 = vst.msk [vmem:[%s9299_s11 + $0x18] sm:$0xff] %vm1075_vm0, %v4071_v57  ;;  %v4064_v5 = vsub.f32 %v4055_v12, %v3973_v50  ;;  %v5233_v48 = vpop.f32.mrb[57].mxu1  ;;  %v1014_v50 = vmul.f32 %v1006_v6, %v9487_v20  ;;  %v984_v57 = vmul.f32 %v9487_v20, %v975_v4 }
 0x739   : > { %v4058_v43 = vpop.f32.mrb[58].mxu1  ;;  %v4114_v60 = vpop.f32.mrb[60].mxu0 }
 0x73a   : > { %v4066_v30 = vsub.f32 %v4064_v5, %v4014_v0  ;;  %v4065_v3 = vsub.f32 %v4058_v43, %v3976_v15  ;;  %v5234_v14 = vpop.f32.mrb[59].mxu1  ;;  %v5239_v38 = vpop.f32.mrb[61].mxu0  ;;  %v4215_v0 = vsub.f32 %v9539_v49, %v1013_v55  ;;  %v4216_v42 = vsub.f32 %v9547_v32, %v1014_v50 }
 0x73b   : > { %v4117_v39 = vpop.f32.mrb[62].mxu0  ;;  %v4351_v19 = vsub.f32 %v5610_v2, %v984_v57 }
 0x73c   : > { %v4076_v35 = vsub.f32 %v4074_v52, %v4066_v30  ;;  %v4067_v1 = vsub.f32 %v4065_v3, %v4017_v63  ;;  %v5240_v34 = vpop.f32.mrb[63].mxu0  ;;  %v983_v63 = vmul.f32 %v9487_v20, %v974_v7  ;;  %v1007_v52 = vmul.f32 %v999_v25, %v9480_v26 }
 0x73d   : > { %v1008_v30 = vmul.f32 %v1000_v21, %v9480_v26 }
 0x73e   : > { %4078 = vst.msk [vmem:[%s9306_s26 + $0x10] sm:$0xff] %vm1075_vm0, %v4076_v35  ;;  %v4077_v8 = vsub.f32 %v4075_v13, %v4067_v1  ;;  %v4350_v5 = vsub.f32 %v9560_v53, %v983_v63  ;;  %v1015_v38 = vmul.f32 %v1007_v52, %v9487_v20 }
 0x73f   : > { %v4155_v59 = vpop.f32.mrb[60].mxu1 }
 0x740   : > { %4079 = vst.msk [vmem:[%s9306_s26 + $0x18] sm:$0xff] %vm1075_vm0, %v4077_v8  ;;  %v4203_v10 = vsub.f32 %v4114_v60, %v4155_v59  ;;  %v5245_v28 = vpop.f32.mrb[61].mxu1  ;;  %v4356_v22 = vsub.f32 %v9583_v51, %v1015_v38 }
 0x741   : > { %v4196_v54 = vpop.f32.mrb[64].mxu0  ;;  %v4158_v15 = vpop.f32.mrb[62].mxu1 }
 0x742   : > { %v4211_v61 = vsub.f32 %v4209_v44, %v4203_v10  ;;  %v4205_v11 = vsub.f32 %v4196_v54, %v4114_v60  ;;  %v5251_v40 = vpop.f32.mrb[65].mxu0  ;;  %v4204_v58 = vsub.f32 %v4117_v39, %v4158_v15  ;;  %v5246_v41 = vpop.f32.mrb[63].mxu1 }
 0x743   : > { %v4199_v27 = vpop.f32.mrb[66].mxu0 }
 0x744   : > { %4213 = vst.msk [vmem:[%s9299_s11 + $0x20] sm:$0xff] %vm1075_vm0, %v4211_v61  ;;  %v4207_v24 = vsub.f32 %v4205_v11, %v4155_v59  ;;  %v4212_v37 = vsub.f32 %v4210_v16, %v4204_v58  ;;  %v4206_v9 = vsub.f32 %v4199_v27, %v4117_v39  ;;  %v5252_v18 = vpop.f32.mrb[67].mxu0  ;;  %v1016_v39 = vmul.f32 %v1008_v30, %v9487_v20 }
 0x746   : > { %v4217_v49 = vsub.f32 %v4215_v0, %v4207_v24  ;;  %4214 = vst.msk [vmem:[%s9299_s11 + $0x28] sm:$0xff] %vm1075_vm0, %v4212_v37  ;;  %v4208_v17 = vsub.f32 %v4206_v9, %v4158_v15 }
 0x747   : > { %v4255_v12 = vpop.f32.mrb[64].mxu1 }
 0x748   : > { %4219 = vst.msk [vmem:[%s9306_s26 + $0x20] sm:$0xff] %vm1075_vm0, %v4217_v49  ;;  %v4218_v32 = vsub.f32 %v4216_v42, %v4208_v17  ;;  %v5257_v33 = vpop.f32.mrb[65].mxu1 }
 0x749   : > { %v4296_v48 = vpop.f32.mrb[68].mxu0  ;;  %v4258_v45 = vpop.f32.mrb[66].mxu1 }
 0x74a   : > { %4220 = vst.msk [vmem:[%s9306_s26 + $0x28] sm:$0xff] %vm1075_vm0, %v4218_v32  ;;  %v4344_v31 = vsub.f32 %v4255_v12, %v4296_v48  ;;  %v5263_v43 = vpop.f32.mrb[69].mxu0  ;;  %v5258_v60 = vpop.f32.mrb[67].mxu1 }
 0x74b   : > { %v4299_v3 = vpop.f32.mrb[70].mxu0 }
 0x74c   : > { %v4352_v13 = vsub.f32 %v4350_v5, %v4344_v31  ;;  %v4345_v14 = vsub.f32 %v4258_v45, %v4299_v3  ;;  %v5264_v56 = vpop.f32.mrb[71].mxu0 }
 0x74e   : > { %4354 = vst.msk [vmem:[%s9299_s11 + $0x30] sm:$0xff] %vm1075_vm0, %v4352_v13  ;;  %v4353_v26 = vsub.f32 %v4351_v19, %v4345_v14 }
 0x74f   : > { %v4337_v6 = vpop.f32.mrb[68].mxu1 }
 0x750   : > { %4355 = vst.msk [vmem:[%s9299_s11 + $0x38] sm:$0xff] %vm1075_vm0, %v4353_v26  ;;  %v4346_v53 = vsub.f32 %v4337_v6, %v4255_v12  ;;  %v5269_v62 = vpop.f32.mrb[69].mxu1 }
 0x751   : > { %v4340_v35 = vpop.f32.mrb[70].mxu1 }
 0x752   : > { %6000 = shalt.err (!%p5997_p0)
}
 0x753   : > { %s6001_s13 = scalar_lea.hbm %s9608_s14, 1024  ;;  %s6005_s27 = scalar_lea.hbm %s11190_s1, 2048 }
 0x754   : > { %p6002_p8 = scmp.ne.s32.totalorder %s9608_s14, %s6001_s13  ;;  %p6006_p7 = scmp.lt.u32.totalorder %s9608_s14, %s11190_s1 }
 0x755   : > { %p6007_p10 = scmp.lt.u32.totalorder %s6005_s27, %s6001_s13  ;;  %p6009_p4 = scmp.lt.u32.totalorder %s6001_s13, %s9608_s14 }
 0x756   : > { %p6003_p3 = pnand %p6002_p8, %p11191_p6 }
 0x757   : > { %p6008_p9 = por %p6007_p10, %p6006_p7 }
 0x758   : > { %p6004_p5 = pneg %p6003_p3 }
 0x759   : > { %p6010_p11 = por %p6009_p4, %p6008_p9 }
 0x75b   : > { %p6011_p1 = pnand %p6010_p11, %p6004_p5 }
 0x75d   : > { %6014 = shalt.err (!%p6011_p1)
}
 0x75e   : > { %s6141_s25 = smov 128   ;;  %s6142_s16 = smov 8   ;;  %v4348_v20 = vsub.f32 %v4346_v53, %v4296_v48  ;;  %v4347_v1 = vsub.f32 %v4340_v35, %v4258_v45  ;;  %v4357_v34 = vsub.f32 %v9590_v29, %v1016_v39  ;;  %v5270_v46 = vpop.f32.mrb[71].mxu1 }
 0x75f   : > { %5317 = dma.vmem_to_hbm [thread:$0]  (%p11191_p6), %s9610_s30, 1024, %s9608_s14, %s4363_s12, %s6141_s25, %s6141_s25, %s6142_s16  }
 0x760   : > { %s4397_s22 = sshll.u32 %s9306_s26, 4  ;;  %v4358_v55 = vsub.f32 %v4356_v22, %v4348_v20  ;;  %v4349_v8 = vsub.f32 %v4347_v1, %v4299_v3  ;;  %s11192_s5 = sld [smem:[#allocation307_spill]]  ;;  %s9656_s22 = int_to_ptr.vmem [resolvable:$true] %s4397_s22 }
 0x761   : > { %s4368_s9 = scalar_lea.sflag [#allocation30], %s11182_s4  ;;  %s6015_s10 = scalar_lea.vmem %s9656_s22, 1024 }
 0x762   : > { %4360 = vst.msk [vmem:[%s9306_s26 + $0x30] sm:$0xff] %vm1075_vm0, %v4358_v55  ;;  %v4359_v44 = vsub.f32 %v4357_v34, %v4349_v8  ;;  %p6016_p12 = scmp.ne.s32.totalorder %s9656_s22, %s6015_s10  ;;  %s6143_s0 = smov [#allocation29]  }
 0x763   : > { %s6019_s24 = sshll.u32 %s6143_s0, 4  ;;  %s6020_s24 = int_to_ptr.vmem [resolvable:$false] %s6019_s24 }
 0x764   : > { %4361 = vst.msk [vmem:[%s9306_s26 + $0x38] sm:$0xff] %vm1075_vm0, %v4359_v44  ;;  %p6017_p13 = pnand %p6016_p12, %p11191_p6  ;;  %s6021_s30 = scalar_lea.vmem %s6020_s24, 2048 }
 0x765   : > { %p6022_p0 = scmp.lt.s32.totalorder %s9656_s22, %s6020_s24  ;;  %p6023_p8 = scmp.lt.s32.totalorder %s6021_s30, %s6015_s10 }
 0x766   : > { %s9654_s2 = scalar_lea.hbm %s11192_s5, %s4987_s21  ;;  %p6018_p2 = pneg %p6017_p13 }
 0x767   : > { %p6024_p3 = por %p6023_p8, %p6022_p0 }
 0x769   : > { %p6025_p5 = pnand %p6024_p3, %p6018_p2 }
 0x76b   : > { %6028 = shalt.err (!%p6025_p5)
}
 0x76c   : > { %s6029_s26 = scalar_lea.hbm %s9654_s2, 1024  ;;  %s6033_s8 = scalar_lea.hbm %s11192_s5, 2048 }
 0x76d   : > { %p6030_p7 = scmp.ne.s32.totalorder %s9654_s2, %s6029_s26  ;;  %p6034_p4 = scmp.lt.u32.totalorder %s9654_s2, %s11192_s5 }
 0x76e   : > { %p6035_p11 = scmp.lt.u32.totalorder %s6033_s8, %s6029_s26  ;;  %p6037_p12 = scmp.lt.u32.totalorder %s6029_s26, %s9654_s2 }
 0x76f   : > { %p6031_p10 = pnand %p6030_p7, %p11191_p6 }
 0x770   : > { %p6036_p1 = por %p6035_p11, %p6034_p4 }
 0x771   : > { %p6032_p9 = pneg %p6031_p10 }
 0x772   : > { %p6038_p13 = por %p6037_p12, %p6036_p1 }
 0x774   : > { %p6039_p2 = pnand %p6038_p13, %p6032_p9 }
 0x776   : > { %6042 = shalt.err (!%p6039_p2)
}
 0x777   : > { %5318 = dma.vmem_to_hbm [thread:$0]  (%p11191_p6), %s9656_s22, 1024, %s9654_s2, %s4368_s9, %s6141_s25, %s6141_s25, %s6142_s16  }
 0x778 PF: > { %s11193_s15 = sld [smem:[#allocation42_spill]]  ;;  %s11194_s17 = sld [smem:[#allocation52_spill]] }
 0x779   : > { %s11195_s19 = sld [smem:[#allocation45_spill]] }
 0x77e   : > { %s4412_s18 = sand.u32 1, %s11193_s15   ;;  %p11196_p0 = scmp.ne.s32.totalorder %s11194_s17, 0 }
 0x77f   : > { %p11197_p8 = scmp.ge.s32.totalorder %s11195_s19, 2  ;;  %s4413_s13 = scalar_lea.sflag [#allocation5], %s4412_s18 }
 0x781   : > { %p5369_p3 = pnand %p11197_p8, %p11196_p0 }
 0x783   : > { %6096 = dma.done.wait (!%p5369_p3), %s4413_s13, 1024  }
 0x784   : > { %6098 = vsyncadd (!%p5369_p3), %s4413_s13, 4294966272  ;;  %s4422_s6 = scalar_lea.sflag [#allocation30], %s4412_s18 }
 0x785   : > { %6100 = dma.done.wait (!%p5369_p3), %s4422_s6, 1024  }
 0x786   : > { %6102 = vsyncadd (!%p5369_p3), %s4422_s6, 4294966272  ;;  %s11198_s28 = sld [smem:[#allocation48_spill]]  ;;  %s11199_s26 = sld [smem:[#allocation43_spill]] }
 0x787   : > { %s11200_s15 = sld [smem:[#allocation44_spill]]  ;;  %s11201_s27 = sld [smem:[#allocation49_spill]] }
 0x78c   : > { %p49_p6 = scmp.ge.s32.totalorder %s11198_s28, 4  }
 0x78e   :  { %51 = sbr.rel (!%p49_p6) target bundleno = 37 (0x25), region = 259 }
 0x795   :  { %4427 = vsyncpa [#allocation4], 1 }
 0x796   :  { %4429 = vsyncpa [#allocation4 + $0x1], 1 }
 0x797   :  { %4430 = vsyncpa [#allocation8], 1 }
 0x798   :  { %4432 = vsyncpa [#allocation8 + $0x1], 1 }
 0x799   :  { %4433 = vsyncpa [#allocation11], 1 }
 0x79a   :  { %4435 = vsyncpa [#allocation11 + $0x1], 1 }
 0x79b   :  { %4436 = vsyncpa [#allocation14], 1 }
 0x79c   :  { %4438 = vsyncpa [#allocation14 + $0x1], 1 }
 0x79d   :  { %4439 = vsyncpa [#allocation17], 1 }
 0x79e   :  { %4440 = vsyncpa [#allocation20], 1 }
 0x79f   :  { %4441 = vsyncpa [#allocation5], 1 }
 0x7a0   :  { %4443 = vsyncpa [#allocation5 + $0x1], 1 }
 0x7a1   :  { %4444 = vsyncpa [#allocation30], 1 }
 0x7a2   :  { %4446 = vsyncpa [#allocation30 + $0x1], 1 }
 0x7a3   :  { %4447 = vsyncpa [#allocation6], 1 }
 0x7a4   :  { %4449 = vsyncpa [#allocation6 + $0x1], 1 }
 0x7a5   :  { %4450 = vsyncpa [#allocation24], 1 }
 0x7a6   :  { %4451 = vsyncpa [#allocation27], 1 }

</bundles_post_ra>
